<compile_context>
chip_gen: v6e
topology: v6e:2x2x1
jax: 0.10.0
libtpu: 0.0.40
codegen_flags: <defaults>
</compile_context>

<pallas_src>
import functools

import jax
import jax.numpy as jnp
import numpy as np
from jax.experimental import pallas as pl
from jax.experimental.pallas import tpu as pltpu

_BN_EPS = 1e-5
_LANES = 128
_VMEM_LIMIT = 64 * 1024 * 1024

_TAPS = tuple((dy, dx) for dy in range(3) for dx in range(3))


def _round_up(x, m):
    return (x + m - 1) // m * m


def _cparams():
    return pltpu.CompilerParams(dimension_semantics=("parallel",),
                                vmem_limit_bytes=_VMEM_LIMIT)


# ----------------------------------------------------------------------------
# Kernel A: conv1 (3x3, stride) as 9 shifted MXU dots + BN1 partial statistics,
#           with the shortcut 1x1 conv (+ its BN stats) fused in when present.
# ----------------------------------------------------------------------------
def _conv1_shortcut_kernel(x_ref, w1_ref, *rest, stride, ho, wo, has_sc):
    if has_sc:
        ws_ref, y1_ref, st1_ref, ysc_ref, stsc_ref = rest
    else:
        y1_ref, st1_ref = rest

    x_img = x_ref[0]                        # (H+2, W+2, Cin) bf16, zero-padded
    cin = x_img.shape[-1]
    m = ho * wo

    # 3x3 conv = sum over 9 taps of a (M, Cin) @ (Cin, Cp) MXU dot (f32 acc).
    acc = None
    for t, (dy, dx) in enumerate(_TAPS):
        patch = x_img[dy:dy + (ho - 1) * stride + 1:stride,
                      dx:dx + (wo - 1) * stride + 1:stride, :]
        d = jnp.dot(patch.reshape(m, cin), w1_ref[t],
                    preferred_element_type=jnp.float32)
        acc = d if acc is None else acc + d

    y1_ref[0] = acc.astype(y1_ref.dtype)          # bf16 store (halved HBM write)
    s = jnp.sum(acc, axis=0, keepdims=True)       # per-image channel sum
    q = jnp.sum(acc * acc, axis=0, keepdims=True)  # per-image channel sum-of-squares
    st1_ref[0] = jnp.concatenate([s, q], axis=0)  # packed (2, Cp) stats

    if has_sc:
        # Shortcut 1x1 conv with stride: centre pixel of each padded window.
        centre = x_img[1:1 + (ho - 1) * stride + 1:stride,
                       1:1 + (wo - 1) * stride + 1:stride, :]
        acc_sc = jnp.dot(centre.reshape(m, cin), ws_ref[...],
                         preferred_element_type=jnp.float32)
        ysc_ref[0] = acc_sc.astype(ysc_ref.dtype)
        ss = jnp.sum(acc_sc, axis=0, keepdims=True)
        qs = jnp.sum(acc_sc * acc_sc, axis=0, keepdims=True)
        stsc_ref[0] = jnp.concatenate([ss, qs], axis=0)


def conv1_with_shortcut(xp, w1, ws, *, stride, ho, wo, cp):
    n, hp, wp, cin = xp.shape
    m = ho * wo
    has_sc = ws is not None
    kern = functools.partial(_conv1_shortcut_kernel, stride=stride, ho=ho,
                             wo=wo, has_sc=has_sc)
    in_specs = [pl.BlockSpec((1, hp, wp, cin), lambda i: (i, 0, 0, 0)),
                pl.BlockSpec((9, cin, cp), lambda i: (0, 0, 0))]
    args = [xp, w1]
    out_shapes = [jax.ShapeDtypeStruct((n, m, cp), jnp.bfloat16),
                  jax.ShapeDtypeStruct((n, 2, cp), jnp.float32)]
    out_specs = [pl.BlockSpec((1, m, cp), lambda i: (i, 0, 0)),
                 pl.BlockSpec((1, 2, cp), lambda i: (i, 0, 0))]
    if has_sc:
        in_specs.append(pl.BlockSpec((cin, cp), lambda i: (0, 0)))
        args.append(ws)
        out_shapes += [jax.ShapeDtypeStruct((n, m, cp), jnp.bfloat16),
                       jax.ShapeDtypeStruct((n, 2, cp), jnp.float32)]
        out_specs += [pl.BlockSpec((1, m, cp), lambda i: (i, 0, 0)),
                      pl.BlockSpec((1, 2, cp), lambda i: (i, 0, 0))]
    return pl.pallas_call(
        kern,
        grid=(n,),
        in_specs=in_specs,
        out_specs=tuple(out_specs),
        out_shape=tuple(out_shapes),
        compiler_params=_cparams(),
    )(*args)


# ----------------------------------------------------------------------------
# Kernel B: bn1-apply + ReLU (fused prologue, o1 stays in VMEM) + conv2 (3x3,
#           stride 1) as 9 shifted MXU dots + BN2 partial statistics.
# ----------------------------------------------------------------------------
def _bn_relu_conv2_kernel(y1_ref, sc1_ref, sh1_ref, w2_ref, y2_ref, st2_ref,
                          xp_ref, *, ho, wo):
    cp = y2_ref.shape[-1]
    m = ho * wo

    # BN1 affine + ReLU in VMEM; padded channels have scale=shift=0 -> stay 0.
    o1 = jnp.maximum(
        y1_ref[0].astype(jnp.float32) * sc1_ref[...] + sh1_ref[...], 0.0)

    # Build the zero-padded (Ho+2, Wo+2, Cp) image for conv2's 3x3 taps.
    xp_ref[...] = jnp.zeros(xp_ref.shape, xp_ref.dtype)
    xp_ref[pl.ds(1, ho), pl.ds(1, wo), :] = (
        o1.astype(xp_ref.dtype).reshape(ho, wo, cp))

    acc = None
    for t, (dy, dx) in enumerate(_TAPS):
        lhs = xp_ref[pl.ds(dy, ho), pl.ds(dx, wo), :].reshape(m, cp)
        d = jnp.dot(lhs, w2_ref[t], preferred_element_type=jnp.float32)
        acc = d if acc is None else acc + d

    y2_ref[0] = acc.astype(y2_ref.dtype)
    s = jnp.sum(acc, axis=0, keepdims=True)
    q = jnp.sum(acc * acc, axis=0, keepdims=True)
    st2_ref[0] = jnp.concatenate([s, q], axis=0)


def bn1_relu_conv2(y1, sc1, sh1, w2, *, ho, wo, cp):
    n, m, _ = y1.shape
    kern = functools.partial(_bn_relu_conv2_kernel, ho=ho, wo=wo)
    return pl.pallas_call(
        kern,
        grid=(n,),
        in_specs=[pl.BlockSpec((1, m, cp), lambda i: (i, 0, 0)),
                  pl.BlockSpec((1, cp), lambda i: (0, 0)),
                  pl.BlockSpec((1, cp), lambda i: (0, 0)),
                  pl.BlockSpec((9, cp, cp), lambda i: (0, 0, 0))],
        out_specs=(pl.BlockSpec((1, m, cp), lambda i: (i, 0, 0)),
                   pl.BlockSpec((1, 2, cp), lambda i: (i, 0, 0))),
        out_shape=(jax.ShapeDtypeStruct((n, m, cp), jnp.bfloat16),
                   jax.ShapeDtypeStruct((n, 2, cp), jnp.float32)),
        scratch_shapes=[pltpu.VMEM((ho + 2, wo + 2, cp), jnp.bfloat16)],
        compiler_params=_cparams(),
    )(y1, sc1, sh1, w2)


# ----------------------------------------------------------------------------
# Kernel C: bn2-apply + shortcut-bn-apply + residual add + ReLU (elementwise).
# ----------------------------------------------------------------------------
def _bn_add_bn_relu_kernel(y2_ref, sc2_ref, sh2_ref, res_ref, scs_ref, shs_ref,
                           out_ref):
    main = y2_ref[0].astype(jnp.float32) * sc2_ref[...] + sh2_ref[...]
    res = res_ref[0].astype(jnp.float32) * scs_ref[...] + shs_ref[...]
    out_ref[0] = jnp.maximum(main + res, 0.0).astype(out_ref.dtype)


def bn2_add_bnsc_relu(y2, sc2, sh2, res, scs, shs, *, cp):
    n, m, _ = y2.shape
    return pl.pallas_call(
        _bn_add_bn_relu_kernel,
        grid=(n,),
        in_specs=[pl.BlockSpec((1, m, cp), lambda i: (i, 0, 0)),
                  pl.BlockSpec((1, cp), lambda i: (0, 0)),
                  pl.BlockSpec((1, cp), lambda i: (0, 0)),
                  pl.BlockSpec((1, m, cp), lambda i: (i, 0, 0)),
                  pl.BlockSpec((1, cp), lambda i: (0, 0)),
                  pl.BlockSpec((1, cp), lambda i: (0, 0))],
        out_specs=pl.BlockSpec((1, m, cp), lambda i: (i, 0, 0)),
        out_shape=jax.ShapeDtypeStruct((n, m, cp), jnp.bfloat16),
        compiler_params=_cparams(),
    )(y2, sc2, sh2, res, scs, shs)


# ----------------------------------------------------------------------------
# Plain-JAX glue: BN folding from packed stats, weight folding, padding.
# ----------------------------------------------------------------------------
def _bn_affine(stats, count, gamma, beta, cp):
    """stats (N, 2, Cp) [sum; sumsq] -> per-channel scale/shift (lane-padded)."""
    total = jnp.sum(stats[:, 0, :], axis=0)
    totsq = jnp.sum(stats[:, 1, :], axis=0)
    mean = total / count
    var = totsq / count - mean * mean
    # TODO(synk): one-pass E[y^2]-mean^2 is cancellation-prone for large means;
    # fine at the 5e-2 tolerance used here.
    g = jnp.zeros((cp,), jnp.float32).at[:gamma.shape[0]].set(gamma)
    b = jnp.zeros((cp,), jnp.float32).at[:beta.shape[0]].set(beta)
    scale = g * jax.lax.rsqrt(var + _BN_EPS)
    shift = b - mean * scale
    return scale.reshape(1, cp), shift.reshape(1, cp)


def _fold_conv3x3_weight(w_oihw, cin_p, cout_p):
    """torch (Cout,Cin,3,3) -> (9, Cin_p, Cout_p), tap-major, zero padded."""
    cout, cin = w_oihw.shape[0], w_oihw.shape[1]
    w = jnp.transpose(w_oihw, (2, 3, 1, 0)).reshape(9, cin, cout)
    w = jnp.pad(w, ((0, 0), (0, cin_p - cin), (0, cout_p - cout)))
    return w.astype(jnp.bfloat16)


def basic_block_forward(x_nchw, params, stride=1):
    """ResNet BasicBlock forward (training-mode BN). NCHW in, NCHW (bf16) out."""
    n, cin, h, w = x_nchw.shape
    cout = params["w1"].shape[0]
    ho = (h + 2 - 3) // stride + 1
    wo = (w + 2 - 3) // stride + 1
    m = ho * wo
    cp = _round_up(cout, _LANES)          # lane-dense (128) output channels
    count = float(n * m)

    x_nhwc = jnp.transpose(x_nchw, (0, 2, 3, 1)).astype(jnp.bfloat16)
    xp = jnp.pad(x_nhwc, ((0, 0), (1, 1), (1, 1), (0, 0)))    # pad=1 halo, 1x copy

    w1 = _fold_conv3x3_weight(params["w1"], cin, cp)            # (9, Cin, Cp)
    has_sc = "ws" in params

    # --- conv1 (+ fused shortcut 1x1 conv) + partial BN stats ----------------
    if has_sc:
        ws = jnp.pad(jnp.transpose(params["ws"][:, :, 0, 0], (1, 0)),
                     ((0, 0), (0, cp - cout))).astype(jnp.bfloat16)  # (Cin, Cp)
        y1, st1, ysc, stsc = conv1_with_shortcut(
            xp, w1, ws, stride=stride, ho=ho, wo=wo, cp=cp)
        scs, shs = _bn_affine(stsc, count, params["gs"], params["bs"], cp)
    else:
        assert stride == 1 and cin == cout, (
            "identity shortcut requires stride == 1 and in_planes == planes")
        y1, st1 = conv1_with_shortcut(
            xp, w1, None, stride=stride, ho=ho, wo=wo, cp=cp)
        # Identity residual stays bf16; kernel C upcasts on load.
        ysc = jnp.pad(x_nhwc, ((0, 0), (0, 0), (0, 0), (0, cp - cin))
                      ).reshape(n, m, cp)
        scs = jnp.ones((1, cp), jnp.float32)
        shs = jnp.zeros((1, cp), jnp.float32)

    sc1, sh1 = _bn_affine(st1, count, params["g1"], params["b1"], cp)

    # --- bn1+relu fused into conv2, + partial BN2 stats -----------------------
    w2 = _fold_conv3x3_weight(params["w2"], cp, cp)             # (9, Cp, Cp)
    y2, st2 = bn1_relu_conv2(y1, sc1, sh1, w2, ho=ho, wo=wo, cp=cp)
    sc2, sh2 = _bn_affine(st2, count, params["g2"], params["b2"], cp)

    # --- bn2-apply + shortcut-bn-apply + residual add + relu ------------------
    out = bn2_add_bnsc_relu(y2, sc2, sh2, ysc, scs, shs, cp=cp)  # (N, M, Cp) bf16
    out = out[:, :, :cout].reshape(n, ho, wo, cout)
    return jnp.transpose(out, (0, 3, 1, 2))
    # TODO(synk): when stacking blocks, keep activations NHWC/bf16 between
    # blocks to drop the per-block NCHW<->NHWC transposes.


# ----------------------------------------------------------------------------
# Pure-JAX reference (mirrors the PyTorch forward exactly, f32 HIGHEST precision)
# ----------------------------------------------------------------------------
def reference_forward(x_nchw, params, stride=1):
    def conv(x, w, s, pad):
        return jax.lax.conv_general_dilated(
            x, w, (s, s), [(pad, pad), (pad, pad)],
            dimension_numbers=("NCHW", "OIHW", "NCHW"),
            precision=jax.lax.Precision.HIGHEST)

    def bn(x, g, b):
        mean = x.mean(axis=(0, 2, 3), keepdims=True)
        var = ((x - mean) ** 2).mean(axis=(0, 2, 3), keepdims=True)
        xn = (x - mean) / jnp.sqrt(var + _BN_EPS)
        return xn * g.reshape(1, -1, 1, 1) + b.reshape(1, -1, 1, 1)

    out = jax.nn.relu(bn(conv(x_nchw, params["w1"], stride, 1),
                         params["g1"], params["b1"]))
    out = bn(conv(out, params["w2"], 1, 1), params["g2"], params["b2"])
    if "ws" in params:
        sc = bn(conv(x_nchw, params["ws"], stride, 0), params["gs"], params["bs"])
    else:
        sc = x_nchw
    return jax.nn.relu(out + sc)


# ----------------------------------------------------------------------------
if __name__ == "__main__":
    N, in_planes, planes, H, W, stride = 2, 4, 8, 16, 16, 1

    key = jax.random.PRNGKey(0)
    keys = jax.random.split(key, 10)
    params = {
        "w1": 0.1 * jax.random.normal(keys[0], (planes, in_planes, 3, 3), jnp.float32),
        "g1": 1.0 + 0.1 * jax.random.normal(keys[1], (planes,), jnp.float32),
        "b1": 0.1 * jax.random.normal(keys[2], (planes,), jnp.float32),
        "w2": 0.1 * jax.random.normal(keys[3], (planes, planes, 3, 3), jnp.float32),
        "g2": 1.0 + 0.1 * jax.random.normal(keys[4], (planes,), jnp.float32),
        "b2": 0.1 * jax.random.normal(keys[5], (planes,), jnp.float32),
        # shortcut exists because in_planes != expansion * planes
        "ws": 0.1 * jax.random.normal(keys[6], (planes, in_planes, 1, 1), jnp.float32),
        "gs": 1.0 + 0.1 * jax.random.normal(keys[7], (planes,), jnp.float32),
        "bs": 0.1 * jax.random.normal(keys[8], (planes,), jnp.float32),
    }
    x = jax.random.normal(keys[9], (N, in_planes, H, W), jnp.float32)

    fwd = jax.jit(basic_block_forward, static_argnames=("stride",))
    out = jax.block_until_ready(fwd(x, params, stride=stride))
    ref = jax.block_until_ready(reference_forward(x, params, stride=stride))

    assert out.shape == (N, planes, H // stride, W // stride)
    # Tolerance reflects bf16 MXU operands and bf16 y1/y2/out intermediates vs.
    # the f32 HIGHEST-precision reference (expected error ~1e-2, bound 5e-2).
    np.testing.assert_allclose(np.asarray(out.astype(jnp.float32)),
                               np.asarray(ref), rtol=5e-2, atol=5e-2)
    print("KERNEL_OK")
</pallas_src>

<mosaic_0001>
module attributes {stable_mosaic.version = 11 : i64} {
  func.func @_conv1_shortcut_kernel(%arg0: i32, %arg1: memref<1x18x18x4xbf16, #tpu.memory_space<vmem>>, %arg2: memref<9x4x128xbf16, #tpu.memory_space<vmem>>, %arg3: memref<4x128xbf16, #tpu.memory_space<vmem>>, %arg4: memref<1x256x128xbf16, #tpu.memory_space<vmem>>, %arg5: memref<1x2x128xf32, #tpu.memory_space<vmem>>, %arg6: memref<1x256x128xbf16, #tpu.memory_space<vmem>>, %arg7: memref<1x2x128xf32, #tpu.memory_space<vmem>>) attributes {dimension_semantics = [#tpu.dimension_semantics<parallel>], iteration_bounds = array<i64: 2>, scalar_prefetch = 0 : i64, scratch_operands = 0 : i64, tpu.core_type = #tpu.core_type<tc>, window_params = [{transform_indices = @transform_0, window_bounds = array<i64: 1, 18, 18, 4>}, {pipeline_mode = #tpu.pipeline_mode<synchronous>, transform_indices = @transform_1, window_bounds = array<i64: 9, 4, 128>}, {pipeline_mode = #tpu.pipeline_mode<synchronous>, transform_indices = @transform_2, window_bounds = array<i64: 4, 128>}, {transform_indices = @transform_3, window_bounds = array<i64: 1, 256, 128>}, {transform_indices = @transform_4, window_bounds = array<i64: 1, 2, 128>}, {transform_indices = @transform_5, window_bounds = array<i64: 1, 256, 128>}, {transform_indices = @transform_6, window_bounds = array<i64: 1, 2, 128>}]} {
    %c0 = arith.constant 0 : index
    %c0_0 = arith.constant 0 : index
    %c0_1 = arith.constant 0 : index
    %c0_2 = arith.constant 0 : index
    %0 = vector.load %arg1[%c0, %c0_0, %c0_1, %c0_2] : memref<1x18x18x4xbf16, #tpu.memory_space<vmem>>, vector<1x18x18x4xbf16>
    %1 = vector.shape_cast %0 : vector<1x18x18x4xbf16> to vector<18x18x4xbf16>
    %2 = vector.extract_strided_slice %1 {offsets = [0, 0, 0], sizes = [16, 16, 4], strides = [1, 1, 1]} : vector<18x18x4xbf16> to vector<16x16x4xbf16>
    %3 = vector.shape_cast %2 : vector<16x16x4xbf16> to vector<256x4xbf16>
    %c0_3 = arith.constant 0 : index
    %c0_4 = arith.constant 0 : index
    %c0_5 = arith.constant 0 : index
    %4 = vector.load %arg2[%c0_3, %c0_4, %c0_5] : memref<9x4x128xbf16, #tpu.memory_space<vmem>>, vector<1x4x128xbf16>
    %5 = vector.shape_cast %4 : vector<1x4x128xbf16> to vector<4x128xbf16>
    %cst = arith.constant dense<0.000000e+00> : vector<256x128xf32>
    %6 = tpu.matmul %3, %5, %cst {dimension_numbers = #tpu.dot_dimension_numbers<[1], [0], [0], [1], [0, 0, 1, 1], [], []>} : vector<256x4xbf16>, vector<4x128xbf16>, vector<256x128xf32> -> vector<256x128xf32>
    %7 = vector.extract_strided_slice %1 {offsets = [0, 1, 0], sizes = [16, 16, 4], strides = [1, 1, 1]} : vector<18x18x4xbf16> to vector<16x16x4xbf16>
    %8 = vector.shape_cast %7 : vector<16x16x4xbf16> to vector<256x4xbf16>
    %c1 = arith.constant 1 : index
    %c0_6 = arith.constant 0 : index
    %c0_7 = arith.constant 0 : index
    %9 = vector.load %arg2[%c1, %c0_6, %c0_7] : memref<9x4x128xbf16, #tpu.memory_space<vmem>>, vector<1x4x128xbf16>
    %10 = vector.shape_cast %9 : vector<1x4x128xbf16> to vector<4x128xbf16>
    %cst_8 = arith.constant dense<0.000000e+00> : vector<256x128xf32>
    %11 = tpu.matmul %8, %10, %cst_8 {dimension_numbers = #tpu.dot_dimension_numbers<[1], [0], [0], [1], [0, 0, 1, 1], [], []>} : vector<256x4xbf16>, vector<4x128xbf16>, vector<256x128xf32> -> vector<256x128xf32>
    %12 = arith.addf %6, %11 : vector<256x128xf32>
    %13 = vector.extract_strided_slice %1 {offsets = [0, 2, 0], sizes = [16, 16, 4], strides = [1, 1, 1]} : vector<18x18x4xbf16> to vector<16x16x4xbf16>
    %14 = vector.shape_cast %13 : vector<16x16x4xbf16> to vector<256x4xbf16>
    %c2 = arith.constant 2 : index
    %c0_9 = arith.constant 0 : index
    %c0_10 = arith.constant 0 : index
    %15 = vector.load %arg2[%c2, %c0_9, %c0_10] : memref<9x4x128xbf16, #tpu.memory_space<vmem>>, vector<1x4x128xbf16>
    %16 = vector.shape_cast %15 : vector<1x4x128xbf16> to vector<4x128xbf16>
    %cst_11 = arith.constant dense<0.000000e+00> : vector<256x128xf32>
    %17 = tpu.matmul %14, %16, %cst_11 {dimension_numbers = #tpu.dot_dimension_numbers<[1], [0], [0], [1], [0, 0, 1, 1], [], []>} : vector<256x4xbf16>, vector<4x128xbf16>, vector<256x128xf32> -> vector<256x128xf32>
    %18 = arith.addf %12, %17 : vector<256x128xf32>
    %19 = vector.extract_strided_slice %1 {offsets = [1, 0, 0], sizes = [16, 16, 4], strides = [1, 1, 1]} : vector<18x18x4xbf16> to vector<16x16x4xbf16>
    %20 = vector.shape_cast %19 : vector<16x16x4xbf16> to vector<256x4xbf16>
    %c3 = arith.constant 3 : index
    %c0_12 = arith.constant 0 : index
    %c0_13 = arith.constant 0 : index
    %21 = vector.load %arg2[%c3, %c0_12, %c0_13] : memref<9x4x128xbf16, #tpu.memory_space<vmem>>, vector<1x4x128xbf16>
    %22 = vector.shape_cast %21 : vector<1x4x128xbf16> to vector<4x128xbf16>
    %cst_14 = arith.constant dense<0.000000e+00> : vector<256x128xf32>
    %23 = tpu.matmul %20, %22, %cst_14 {dimension_numbers = #tpu.dot_dimension_numbers<[1], [0], [0], [1], [0, 0, 1, 1], [], []>} : vector<256x4xbf16>, vector<4x128xbf16>, vector<256x128xf32> -> vector<256x128xf32>
    %24 = arith.addf %18, %23 : vector<256x128xf32>
    %25 = vector.extract_strided_slice %1 {offsets = [1, 1, 0], sizes = [16, 16, 4], strides = [1, 1, 1]} : vector<18x18x4xbf16> to vector<16x16x4xbf16>
    %26 = vector.shape_cast %25 : vector<16x16x4xbf16> to vector<256x4xbf16>
    %c4 = arith.constant 4 : index
    %c0_15 = arith.constant 0 : index
    %c0_16 = arith.constant 0 : index
    %27 = vector.load %arg2[%c4, %c0_15, %c0_16] : memref<9x4x128xbf16, #tpu.memory_space<vmem>>, vector<1x4x128xbf16>
    %28 = vector.shape_cast %27 : vector<1x4x128xbf16> to vector<4x128xbf16>
    %cst_17 = arith.constant dense<0.000000e+00> : vector<256x128xf32>
    %29 = tpu.matmul %26, %28, %cst_17 {dimension_numbers = #tpu.dot_dimension_numbers<[1], [0], [0], [1], [0, 0, 1, 1], [], []>} : vector<256x4xbf16>, vector<4x128xbf16>, vector<256x128xf32> -> vector<256x128xf32>
    %30 = arith.addf %24, %29 : vector<256x128xf32>
    %31 = vector.extract_strided_slice %1 {offsets = [1, 2, 0], sizes = [16, 16, 4], strides = [1, 1, 1]} : vector<18x18x4xbf16> to vector<16x16x4xbf16>
    %32 = vector.shape_cast %31 : vector<16x16x4xbf16> to vector<256x4xbf16>
    %c5 = arith.constant 5 : index
    %c0_18 = arith.constant 0 : index
    %c0_19 = arith.constant 0 : index
    %33 = vector.load %arg2[%c5, %c0_18, %c0_19] : memref<9x4x128xbf16, #tpu.memory_space<vmem>>, vector<1x4x128xbf16>
    %34 = vector.shape_cast %33 : vector<1x4x128xbf16> to vector<4x128xbf16>
    %cst_20 = arith.constant dense<0.000000e+00> : vector<256x128xf32>
    %35 = tpu.matmul %32, %34, %cst_20 {dimension_numbers = #tpu.dot_dimension_numbers<[1], [0], [0], [1], [0, 0, 1, 1], [], []>} : vector<256x4xbf16>, vector<4x128xbf16>, vector<256x128xf32> -> vector<256x128xf32>
    %36 = arith.addf %30, %35 : vector<256x128xf32>
    %37 = vector.extract_strided_slice %1 {offsets = [2, 0, 0], sizes = [16, 16, 4], strides = [1, 1, 1]} : vector<18x18x4xbf16> to vector<16x16x4xbf16>
    %38 = vector.shape_cast %37 : vector<16x16x4xbf16> to vector<256x4xbf16>
    %c6 = arith.constant 6 : index
    %c0_21 = arith.constant 0 : index
    %c0_22 = arith.constant 0 : index
    %39 = vector.load %arg2[%c6, %c0_21, %c0_22] : memref<9x4x128xbf16, #tpu.memory_space<vmem>>, vector<1x4x128xbf16>
    %40 = vector.shape_cast %39 : vector<1x4x128xbf16> to vector<4x128xbf16>
    %cst_23 = arith.constant dense<0.000000e+00> : vector<256x128xf32>
    %41 = tpu.matmul %38, %40, %cst_23 {dimension_numbers = #tpu.dot_dimension_numbers<[1], [0], [0], [1], [0, 0, 1, 1], [], []>} : vector<256x4xbf16>, vector<4x128xbf16>, vector<256x128xf32> -> vector<256x128xf32>
    %42 = arith.addf %36, %41 : vector<256x128xf32>
    %43 = vector.extract_strided_slice %1 {offsets = [2, 1, 0], sizes = [16, 16, 4], strides = [1, 1, 1]} : vector<18x18x4xbf16> to vector<16x16x4xbf16>
    %44 = vector.shape_cast %43 : vector<16x16x4xbf16> to vector<256x4xbf16>
    %c7 = arith.constant 7 : index
    %c0_24 = arith.constant 0 : index
    %c0_25 = arith.constant 0 : index
    %45 = vector.load %arg2[%c7, %c0_24, %c0_25] : memref<9x4x128xbf16, #tpu.memory_space<vmem>>, vector<1x4x128xbf16>
    %46 = vector.shape_cast %45 : vector<1x4x128xbf16> to vector<4x128xbf16>
    %cst_26 = arith.constant dense<0.000000e+00> : vector<256x128xf32>
    %47 = tpu.matmul %44, %46, %cst_26 {dimension_numbers = #tpu.dot_dimension_numbers<[1], [0], [0], [1], [0, 0, 1, 1], [], []>} : vector<256x4xbf16>, vector<4x128xbf16>, vector<256x128xf32> -> vector<256x128xf32>
    %48 = arith.addf %42, %47 : vector<256x128xf32>
    %49 = vector.extract_strided_slice %1 {offsets = [2, 2, 0], sizes = [16, 16, 4], strides = [1, 1, 1]} : vector<18x18x4xbf16> to vector<16x16x4xbf16>
    %50 = vector.shape_cast %49 : vector<16x16x4xbf16> to vector<256x4xbf16>
    %c8 = arith.constant 8 : index
    %c0_27 = arith.constant 0 : index
    %c0_28 = arith.constant 0 : index
    %51 = vector.load %arg2[%c8, %c0_27, %c0_28] : memref<9x4x128xbf16, #tpu.memory_space<vmem>>, vector<1x4x128xbf16>
    %52 = vector.shape_cast %51 : vector<1x4x128xbf16> to vector<4x128xbf16>
    %cst_29 = arith.constant dense<0.000000e+00> : vector<256x128xf32>
    %53 = tpu.matmul %50, %52, %cst_29 {dimension_numbers = #tpu.dot_dimension_numbers<[1], [0], [0], [1], [0, 0, 1, 1], [], []>} : vector<256x4xbf16>, vector<4x128xbf16>, vector<256x128xf32> -> vector<256x128xf32>
    %54 = arith.addf %48, %53 : vector<256x128xf32>
    %55 = arith.truncf %54 : vector<256x128xf32> to vector<256x128xbf16>
    %c0_30 = arith.constant 0 : index
    %c0_31 = arith.constant 0 : index
    %c0_32 = arith.constant 0 : index
    %56 = vector.load %arg4[%c0_30, %c0_31, %c0_32] : memref<1x256x128xbf16, #tpu.memory_space<vmem>>, vector<1x256x128xbf16>
    %57 = vector.shape_cast %56 : vector<1x256x128xbf16> to vector<256x128xbf16>
    %58 = vector.shape_cast %55 : vector<256x128xbf16> to vector<1x256x128xbf16>
    tpu.vector_store %arg4[%c0_30, %c0_31, %c0_32], %58 {strides = array<i32>} : memref<1x256x128xbf16, #tpu.memory_space<vmem>>, vector<1x256x128xbf16>,
    %cst_33 = arith.constant dense<0.000000e+00> : vector<128xf32>
    %59 = vector.multi_reduction <add>, %54, %cst_33 [0] : vector<256x128xf32> to vector<128xf32>
    %60 = vector.shape_cast %59 : vector<128xf32> to vector<1x128xf32>
    %61 = arith.mulf %54, %54 : vector<256x128xf32>
    %cst_34 = arith.constant dense<0.000000e+00> : vector<128xf32>
    %62 = vector.multi_reduction <add>, %61, %cst_34 [0] : vector<256x128xf32> to vector<128xf32>
    %63 = vector.shape_cast %62 : vector<128xf32> to vector<1x128xf32>
    %64 = tpu.concatenate %60, %63 in 0 : vector<1x128xf32>, vector<1x128xf32> -> vector<2x128xf32>
    %c0_35 = arith.constant 0 : index
    %c0_36 = arith.constant 0 : index
    %c0_37 = arith.constant 0 : index
    %65 = vector.load %arg5[%c0_35, %c0_36, %c0_37] : memref<1x2x128xf32, #tpu.memory_space<vmem>>, vector<1x2x128xf32>
    %66 = vector.shape_cast %65 : vector<1x2x128xf32> to vector<2x128xf32>
    %67 = vector.shape_cast %64 : vector<2x128xf32> to vector<1x2x128xf32>
    tpu.vector_store %arg5[%c0_35, %c0_36, %c0_37], %67 {strides = array<i32>} : memref<1x2x128xf32, #tpu.memory_space<vmem>>, vector<1x2x128xf32>,
    %68 = vector.extract_strided_slice %1 {offsets = [1, 1, 0], sizes = [16, 16, 4], strides = [1, 1, 1]} : vector<18x18x4xbf16> to vector<16x16x4xbf16>
    %69 = vector.shape_cast %68 : vector<16x16x4xbf16> to vector<256x4xbf16>
    %c0_38 = arith.constant 0 : index
    %c0_39 = arith.constant 0 : index
    %70 = vector.load %arg3[%c0_38, %c0_39] : memref<4x128xbf16, #tpu.memory_space<vmem>>, vector<4x128xbf16>
    %cst_40 = arith.constant dense<0.000000e+00> : vector<256x128xf32>
    %71 = tpu.matmul %69, %70, %cst_40 {dimension_numbers = #tpu.dot_dimension_numbers<[1], [0], [0], [1], [0, 0, 1, 1], [], []>} : vector<256x4xbf16>, vector<4x128xbf16>, vector<256x128xf32> -> vector<256x128xf32>
    %72 = arith.truncf %71 : vector<256x128xf32> to vector<256x128xbf16>
    %c0_41 = arith.constant 0 : index
    %c0_42 = arith.constant 0 : index
    %c0_43 = arith.constant 0 : index
    %73 = vector.load %arg6[%c0_41, %c0_42, %c0_43] : memref<1x256x128xbf16, #tpu.memory_space<vmem>>, vector<1x256x128xbf16>
    %74 = vector.shape_cast %73 : vector<1x256x128xbf16> to vector<256x128xbf16>
    %75 = vector.shape_cast %72 : vector<256x128xbf16> to vector<1x256x128xbf16>
    tpu.vector_store %arg6[%c0_41, %c0_42, %c0_43], %75 {strides = array<i32>} : memref<1x256x128xbf16, #tpu.memory_space<vmem>>, vector<1x256x128xbf16>,
    %cst_44 = arith.constant dense<0.000000e+00> : vector<128xf32>
    %76 = vector.multi_reduction <add>, %71, %cst_44 [0] : vector<256x128xf32> to vector<128xf32>
    %77 = vector.shape_cast %76 : vector<128xf32> to vector<1x128xf32>
    %78 = arith.mulf %71, %71 : vector<256x128xf32>
    %cst_45 = arith.constant dense<0.000000e+00> : vector<128xf32>
    %79 = vector.multi_reduction <add>, %78, %cst_45 [0] : vector<256x128xf32> to vector<128xf32>
    %80 = vector.shape_cast %79 : vector<128xf32> to vector<1x128xf32>
    %81 = tpu.concatenate %77, %80 in 0 : vector<1x128xf32>, vector<1x128xf32> -> vector<2x128xf32>
    %c0_46 = arith.constant 0 : index
    %c0_47 = arith.constant 0 : index
    %c0_48 = arith.constant 0 : index
    %82 = vector.load %arg7[%c0_46, %c0_47, %c0_48] : memref<1x2x128xf32, #tpu.memory_space<vmem>>, vector<1x2x128xf32>
    %83 = vector.shape_cast %82 : vector<1x2x128xf32> to vector<2x128xf32>
    %84 = vector.shape_cast %81 : vector<2x128xf32> to vector<1x2x128xf32>
    tpu.vector_store %arg7[%c0_46, %c0_47, %c0_48], %84 {strides = array<i32>} : memref<1x2x128xf32, #tpu.memory_space<vmem>>, vector<1x2x128xf32>,
    return
  }
  func.func @transform_0(%arg0: i32) -> (i32, i32, i32, i32) {
    %c0_i32 = arith.constant 0 : i32
    %c0_i32_0 = arith.constant 0 : i32
    %c0_i32_1 = arith.constant 0 : i32
    %c0_i32_2 = arith.constant 0 : i32
    return %arg0, %c0_i32, %c0_i32_0, %c0_i32_1 : i32, i32, i32, i32
  }
  func.func @transform_1(%arg0: i32) -> (i32, i32, i32) {
    %c0_i32 = arith.constant 0 : i32
    %c0_i32_0 = arith.constant 0 : i32
    %c0_i32_1 = arith.constant 0 : i32
    %c0_i32_2 = arith.constant 0 : i32
    return %c0_i32, %c0_i32_0, %c0_i32_1 : i32, i32, i32
  }
  func.func @transform_2(%arg0: i32) -> (i32, i32) {
    %c0_i32 = arith.constant 0 : i32
    %c0_i32_0 = arith.constant 0 : i32
    %c0_i32_1 = arith.constant 0 : i32
    return %c0_i32, %c0_i32_0 : i32, i32
  }
  func.func @transform_3(%arg0: i32) -> (i32, i32, i32) {
    %c0_i32 = arith.constant 0 : i32
    %c0_i32_0 = arith.constant 0 : i32
    %c0_i32_1 = arith.constant 0 : i32
    return %arg0, %c0_i32, %c0_i32_0 : i32, i32, i32
  }
  func.func @transform_4(%arg0: i32) -> (i32, i32, i32) {
    %c0_i32 = arith.constant 0 : i32
    %c0_i32_0 = arith.constant 0 : i32
    %c0_i32_1 = arith.constant 0 : i32
    return %arg0, %c0_i32, %c0_i32_0 : i32, i32, i32
  }
  func.func @transform_5(%arg0: i32) -> (i32, i32, i32) {
    %c0_i32 = arith.constant 0 : i32
    %c0_i32_0 = arith.constant 0 : i32
    %c0_i32_1 = arith.constant 0 : i32
    return %arg0, %c0_i32, %c0_i32_0 : i32, i32, i32
  }
  func.func @transform_6(%arg0: i32) -> (i32, i32, i32) {
    %c0_i32 = arith.constant 0 : i32
    %c0_i32_0 = arith.constant 0 : i32
    %c0_i32_1 = arith.constant 0 : i32
    return %arg0, %c0_i32, %c0_i32_0 : i32, i32, i32
  }
}

module attributes {stable_mosaic.version = 11 : i64} {
  func.func @_bn_add_bn_relu_kernel(%arg0: i32, %arg1: memref<1x256x128xbf16, #tpu.memory_space<vmem>>, %arg2: memref<1x128xf32, #tpu.memory_space<vmem>>, %arg3: memref<1x128xf32, #tpu.memory_space<vmem>>, %arg4: memref<1x256x128xbf16, #tpu.memory_space<vmem>>, %arg5: memref<1x128xf32, #tpu.memory_space<vmem>>, %arg6: memref<1x128xf32, #tpu.memory_space<vmem>>, %arg7: memref<1x256x128xbf16, #tpu.memory_space<vmem>>) attributes {dimension_semantics = [#tpu.dimension_semantics<parallel>], iteration_bounds = array<i64: 2>, scalar_prefetch = 0 : i64, scratch_operands = 0 : i64, tpu.core_type = #tpu.core_type<tc>, window_params = [{transform_indices = @transform_0, window_bounds = array<i64: 1, 256, 128>}, {pipeline_mode = #tpu.pipeline_mode<synchronous>, transform_indices = @transform_1, window_bounds = array<i64: 1, 128>}, {pipeline_mode = #tpu.pipeline_mode<synchronous>, transform_indices = @transform_2, window_bounds = array<i64: 1, 128>}, {transform_indices = @transform_3, window_bounds = array<i64: 1, 256, 128>}, {pipeline_mode = #tpu.pipeline_mode<synchronous>, transform_indices = @transform_4, window_bounds = array<i64: 1, 128>}, {pipeline_mode = #tpu.pipeline_mode<synchronous>, transform_indices = @transform_5, window_bounds = array<i64: 1, 128>}, {transform_indices = @transform_6, window_bounds = array<i64: 1, 256, 128>}]} {
    %c0 = arith.constant 0 : index
    %c0_0 = arith.constant 0 : index
    %c0_1 = arith.constant 0 : index
    %0 = vector.load %arg1[%c0, %c0_0, %c0_1] : memref<1x256x128xbf16, #tpu.memory_space<vmem>>, vector<1x256x128xbf16>
    %1 = vector.shape_cast %0 : vector<1x256x128xbf16> to vector<256x128xbf16>
    %2 = arith.extf %1 : vector<256x128xbf16> to vector<256x128xf32>
    %c0_2 = arith.constant 0 : index
    %c0_3 = arith.constant 0 : index
    %3 = vector.load %arg2[%c0_2, %c0_3] : memref<1x128xf32, #tpu.memory_space<vmem>>, vector<1x128xf32>
    %4 = vector.broadcast %3 : vector<1x128xf32> to vector<256x128xf32>
    %5 = arith.mulf %2, %4 : vector<256x128xf32>
    %c0_4 = arith.constant 0 : index
    %c0_5 = arith.constant 0 : index
    %6 = vector.load %arg3[%c0_4, %c0_5] : memref<1x128xf32, #tpu.memory_space<vmem>>, vector<1x128xf32>
    %7 = vector.broadcast %6 : vector<1x128xf32> to vector<256x128xf32>
    %8 = arith.addf %5, %7 : vector<256x128xf32>
    %c0_6 = arith.constant 0 : index
    %c0_7 = arith.constant 0 : index
    %c0_8 = arith.constant 0 : index
    %9 = vector.load %arg4[%c0_6, %c0_7, %c0_8] : memref<1x256x128xbf16, #tpu.memory_space<vmem>>, vector<1x256x128xbf16>
    %10 = vector.shape_cast %9 : vector<1x256x128xbf16> to vector<256x128xbf16>
    %11 = arith.extf %10 : vector<256x128xbf16> to vector<256x128xf32>
    %c0_9 = arith.constant 0 : index
    %c0_10 = arith.constant 0 : index
    %12 = vector.load %arg5[%c0_9, %c0_10] : memref<1x128xf32, #tpu.memory_space<vmem>>, vector<1x128xf32>
    %13 = vector.broadcast %12 : vector<1x128xf32> to vector<256x128xf32>
    %14 = arith.mulf %11, %13 : vector<256x128xf32>
    %c0_11 = arith.constant 0 : index
    %c0_12 = arith.constant 0 : index
    %15 = vector.load %arg6[%c0_11, %c0_12] : memref<1x128xf32, #tpu.memory_space<vmem>>, vector<1x128xf32>
    %16 = vector.broadcast %15 : vector<1x128xf32> to vector<256x128xf32>
    %17 = arith.addf %14, %16 : vector<256x128xf32>
    %18 = arith.addf %8, %17 : vector<256x128xf32>
    %cst = arith.constant 0.000000e+00 : f32
    %19 = vector.broadcast %cst : f32 to vector<256x128xf32>
    %20 = arith.maximumf %18, %19 : vector<256x128xf32>
    %21 = arith.truncf %20 : vector<256x128xf32> to vector<256x128xbf16>
    %c0_13 = arith.constant 0 : index
    %c0_14 = arith.constant 0 : index
    %c0_15 = arith.constant 0 : index
    %22 = vector.load %arg7[%c0_13, %c0_14, %c0_15] : memref<1x256x128xbf16, #tpu.memory_space<vmem>>, vector<1x256x128xbf16>
    %23 = vector.shape_cast %22 : vector<1x256x128xbf16> to vector<256x128xbf16>
    %24 = vector.shape_cast %21 : vector<256x128xbf16> to vector<1x256x128xbf16>
    tpu.vector_store %arg7[%c0_13, %c0_14, %c0_15], %24 {strides = array<i32>} : memref<1x256x128xbf16, #tpu.memory_space<vmem>>, vector<1x256x128xbf16>,
    return
  }
  func.func @transform_0(%arg0: i32) -> (i32, i32, i32) {
    %c0_i32 = arith.constant 0 : i32
    %c0_i32_0 = arith.constant 0 : i32
    %c0_i32_1 = arith.constant 0 : i32
    return %arg0, %c0_i32, %c0_i32_0 : i32, i32, i32
  }
  func.func @transform_1(%arg0: i32) -> (i32, i32) {
    %c0_i32 = arith.constant 0 : i32
    %c0_i32_0 = arith.constant 0 : i32
    %c0_i32_1 = arith.constant 0 : i32
    return %c0_i32, %c0_i32_0 : i32, i32
  }
  func.func @transform_2(%arg0: i32) -> (i32, i32) {
    %c0_i32 = arith.constant 0 : i32
    %c0_i32_0 = arith.constant 0 : i32
    %c0_i32_1 = arith.constant 0 : i32
    return %c0_i32, %c0_i32_0 : i32, i32
  }
  func.func @transform_3(%arg0: i32) -> (i32, i32, i32) {
    %c0_i32 = arith.constant 0 : i32
    %c0_i32_0 = arith.constant 0 : i32
    %c0_i32_1 = arith.constant 0 : i32
    return %arg0, %c0_i32, %c0_i32_0 : i32, i32, i32
  }
  func.func @transform_4(%arg0: i32) -> (i32, i32) {
    %c0_i32 = arith.constant 0 : i32
    %c0_i32_0 = arith.constant 0 : i32
    %c0_i32_1 = arith.constant 0 : i32
    return %c0_i32, %c0_i32_0 : i32, i32
  }
  func.func @transform_5(%arg0: i32) -> (i32, i32) {
    %c0_i32 = arith.constant 0 : i32
    %c0_i32_0 = arith.constant 0 : i32
    %c0_i32_1 = arith.constant 0 : i32
    return %c0_i32, %c0_i32_0 : i32, i32
  }
  func.func @transform_6(%arg0: i32) -> (i32, i32, i32) {
    %c0_i32 = arith.constant 0 : i32
    %c0_i32_0 = arith.constant 0 : i32
    %c0_i32_1 = arith.constant 0 : i32
    return %arg0, %c0_i32, %c0_i32_0 : i32, i32, i32
  }
}

module attributes {stable_mosaic.version = 11 : i64} {
  func.func @_bn_relu_conv2_kernel(%arg0: i32, %arg1: memref<1x256x128xbf16, #tpu.memory_space<vmem>>, %arg2: memref<1x128xf32, #tpu.memory_space<vmem>>, %arg3: memref<1x128xf32, #tpu.memory_space<vmem>>, %arg4: memref<9x128x128xbf16, #tpu.memory_space<vmem>>, %arg5: memref<1x256x128xbf16, #tpu.memory_space<vmem>>, %arg6: memref<1x2x128xf32, #tpu.memory_space<vmem>>, %arg7: memref<18x18x128xbf16, #tpu.memory_space<vmem>>) attributes {dimension_semantics = [#tpu.dimension_semantics<parallel>], iteration_bounds = array<i64: 2>, scalar_prefetch = 0 : i64, scratch_operands = 1 : i64, tpu.core_type = #tpu.core_type<tc>, window_params = [{transform_indices = @transform_0, window_bounds = array<i64: 1, 256, 128>}, {pipeline_mode = #tpu.pipeline_mode<synchronous>, transform_indices = @transform_1, window_bounds = array<i64: 1, 128>}, {pipeline_mode = #tpu.pipeline_mode<synchronous>, transform_indices = @transform_2, window_bounds = array<i64: 1, 128>}, {pipeline_mode = #tpu.pipeline_mode<synchronous>, transform_indices = @transform_3, window_bounds = array<i64: 9, 128, 128>}, {transform_indices = @transform_4, window_bounds = array<i64: 1, 256, 128>}, {transform_indices = @transform_5, window_bounds = array<i64: 1, 2, 128>}]} {
    %c0 = arith.constant 0 : index
    %c0_0 = arith.constant 0 : index
    %c0_1 = arith.constant 0 : index
    %0 = vector.load %arg1[%c0, %c0_0, %c0_1] : memref<1x256x128xbf16, #tpu.memory_space<vmem>>, vector<1x256x128xbf16>
    %1 = vector.shape_cast %0 : vector<1x256x128xbf16> to vector<256x128xbf16>
    %2 = arith.extf %1 : vector<256x128xbf16> to vector<256x128xf32>
    %c0_2 = arith.constant 0 : index
    %c0_3 = arith.constant 0 : index
    %3 = vector.load %arg2[%c0_2, %c0_3] : memref<1x128xf32, #tpu.memory_space<vmem>>, vector<1x128xf32>
    %4 = vector.broadcast %3 : vector<1x128xf32> to vector<256x128xf32>
    %5 = arith.mulf %2, %4 : vector<256x128xf32>
    %c0_4 = arith.constant 0 : index
    %c0_5 = arith.constant 0 : index
    %6 = vector.load %arg3[%c0_4, %c0_5] : memref<1x128xf32, #tpu.memory_space<vmem>>, vector<1x128xf32>
    %7 = vector.broadcast %6 : vector<1x128xf32> to vector<256x128xf32>
    %8 = arith.addf %5, %7 : vector<256x128xf32>
    %cst = arith.constant 0.000000e+00 : f32
    %9 = vector.broadcast %cst : f32 to vector<256x128xf32>
    %10 = arith.maximumf %8, %9 : vector<256x128xf32>
    %cst_6 = arith.constant 0.000000e+00 : bf16
    %11 = vector.broadcast %cst_6 : bf16 to vector<18x18x128xbf16>
    %c0_7 = arith.constant 0 : index
    %c0_8 = arith.constant 0 : index
    %c0_9 = arith.constant 0 : index
    %12 = vector.load %arg7[%c0_7, %c0_8, %c0_9] : memref<18x18x128xbf16, #tpu.memory_space<vmem>>, vector<18x18x128xbf16>
    tpu.vector_store %arg7[%c0_7, %c0_8, %c0_9], %11 {strides = array<i32>} : memref<18x18x128xbf16, #tpu.memory_space<vmem>>, vector<18x18x128xbf16>,
    %13 = arith.truncf %10 : vector<256x128xf32> to vector<256x128xbf16>
    %14 = vector.shape_cast %13 : vector<256x128xbf16> to vector<16x16x128xbf16>
    %c1 = arith.constant 1 : index
    %c1_10 = arith.constant 1 : index
    %c0_11 = arith.constant 0 : index
    %15 = vector.load %arg7[%c1, %c1_10, %c0_11] : memref<18x18x128xbf16, #tpu.memory_space<vmem>>, vector<16x16x128xbf16>
    tpu.vector_store %arg7[%c1, %c1_10, %c0_11], %14 {strides = array<i32>} : memref<18x18x128xbf16, #tpu.memory_space<vmem>>, vector<16x16x128xbf16>,
    %c0_12 = arith.constant 0 : index
    %c0_13 = arith.constant 0 : index
    %c0_14 = arith.constant 0 : index
    %16 = vector.load %arg7[%c0_12, %c0_13, %c0_14] : memref<18x18x128xbf16, #tpu.memory_space<vmem>>, vector<16x16x128xbf16>
    %17 = vector.shape_cast %16 : vector<16x16x128xbf16> to vector<256x128xbf16>
    %c0_15 = arith.constant 0 : index
    %c0_16 = arith.constant 0 : index
    %c0_17 = arith.constant 0 : index
    %18 = vector.load %arg4[%c0_15, %c0_16, %c0_17] : memref<9x128x128xbf16, #tpu.memory_space<vmem>>, vector<1x128x128xbf16>
    %19 = vector.shape_cast %18 : vector<1x128x128xbf16> to vector<128x128xbf16>
    %cst_18 = arith.constant dense<0.000000e+00> : vector<256x128xf32>
    %20 = tpu.matmul %17, %19, %cst_18 {dimension_numbers = #tpu.dot_dimension_numbers<[1], [0], [0], [1], [0, 0, 1, 1], [], []>} : vector<256x128xbf16>, vector<128x128xbf16>, vector<256x128xf32> -> vector<256x128xf32>
    %c0_19 = arith.constant 0 : index
    %c1_20 = arith.constant 1 : index
    %c0_21 = arith.constant 0 : index
    %21 = vector.load %arg7[%c0_19, %c1_20, %c0_21] : memref<18x18x128xbf16, #tpu.memory_space<vmem>>, vector<16x16x128xbf16>
    %22 = vector.shape_cast %21 : vector<16x16x128xbf16> to vector<256x128xbf16>
    %c1_22 = arith.constant 1 : index
    %c0_23 = arith.constant 0 : index
    %c0_24 = arith.constant 0 : index
    %23 = vector.load %arg4[%c1_22, %c0_23, %c0_24] : memref<9x128x128xbf16, #tpu.memory_space<vmem>>, vector<1x128x128xbf16>
    %24 = vector.shape_cast %23 : vector<1x128x128xbf16> to vector<128x128xbf16>
    %cst_25 = arith.constant dense<0.000000e+00> : vector<256x128xf32>
    %25 = tpu.matmul %22, %24, %cst_25 {dimension_numbers = #tpu.dot_dimension_numbers<[1], [0], [0], [1], [0, 0, 1, 1], [], []>} : vector<256x128xbf16>, vector<128x128xbf16>, vector<256x128xf32> -> vector<256x128xf32>
    %26 = arith.addf %20, %25 : vector<256x128xf32>
    %c0_26 = arith.constant 0 : index
    %c2 = arith.constant 2 : index
    %c0_27 = arith.constant 0 : index
    %27 = vector.load %arg7[%c0_26, %c2, %c0_27] : memref<18x18x128xbf16, #tpu.memory_space<vmem>>, vector<16x16x128xbf16>
    %28 = vector.shape_cast %27 : vector<16x16x128xbf16> to vector<256x128xbf16>
    %c2_28 = arith.constant 2 : index
    %c0_29 = arith.constant 0 : index
    %c0_30 = arith.constant 0 : index
    %29 = vector.load %arg4[%c2_28, %c0_29, %c0_30] : memref<9x128x128xbf16, #tpu.memory_space<vmem>>, vector<1x128x128xbf16>
    %30 = vector.shape_cast %29 : vector<1x128x128xbf16> to vector<128x128xbf16>
    %cst_31 = arith.constant dense<0.000000e+00> : vector<256x128xf32>
    %31 = tpu.matmul %28, %30, %cst_31 {dimension_numbers = #tpu.dot_dimension_numbers<[1], [0], [0], [1], [0, 0, 1, 1], [], []>} : vector<256x128xbf16>, vector<128x128xbf16>, vector<256x128xf32> -> vector<256x128xf32>
    %32 = arith.addf %26, %31 : vector<256x128xf32>
    %c1_32 = arith.constant 1 : index
    %c0_33 = arith.constant 0 : index
    %c0_34 = arith.constant 0 : index
    %33 = vector.load %arg7[%c1_32, %c0_33, %c0_34] : memref<18x18x128xbf16, #tpu.memory_space<vmem>>, vector<16x16x128xbf16>
    %34 = vector.shape_cast %33 : vector<16x16x128xbf16> to vector<256x128xbf16>
    %c3 = arith.constant 3 : index
    %c0_35 = arith.constant 0 : index
    %c0_36 = arith.constant 0 : index
    %35 = vector.load %arg4[%c3, %c0_35, %c0_36] : memref<9x128x128xbf16, #tpu.memory_space<vmem>>, vector<1x128x128xbf16>
    %36 = vector.shape_cast %35 : vector<1x128x128xbf16> to vector<128x128xbf16>
    %cst_37 = arith.constant dense<0.000000e+00> : vector<256x128xf32>
    %37 = tpu.matmul %34, %36, %cst_37 {dimension_numbers = #tpu.dot_dimension_numbers<[1], [0], [0], [1], [0, 0, 1, 1], [], []>} : vector<256x128xbf16>, vector<128x128xbf16>, vector<256x128xf32> -> vector<256x128xf32>
    %38 = arith.addf %32, %37 : vector<256x128xf32>
    %c1_38 = arith.constant 1 : index
    %c1_39 = arith.constant 1 : index
    %c0_40 = arith.constant 0 : index
    %39 = vector.load %arg7[%c1_38, %c1_39, %c0_40] : memref<18x18x128xbf16, #tpu.memory_space<vmem>>, vector<16x16x128xbf16>
    %40 = vector.shape_cast %39 : vector<16x16x128xbf16> to vector<256x128xbf16>
    %c4 = arith.constant 4 : index
    %c0_41 = arith.constant 0 : index
    %c0_42 = arith.constant 0 : index
    %41 = vector.load %arg4[%c4, %c0_41, %c0_42] : memref<9x128x128xbf16, #tpu.memory_space<vmem>>, vector<1x128x128xbf16>
    %42 = vector.shape_cast %41 : vector<1x128x128xbf16> to vector<128x128xbf16>
    %cst_43 = arith.constant dense<0.000000e+00> : vector<256x128xf32>
    %43 = tpu.matmul %40, %42, %cst_43 {dimension_numbers = #tpu.dot_dimension_numbers<[1], [0], [0], [1], [0, 0, 1, 1], [], []>} : vector<256x128xbf16>, vector<128x128xbf16>, vector<256x128xf32> -> vector<256x128xf32>
    %44 = arith.addf %38, %43 : vector<256x128xf32>
    %c1_44 = arith.constant 1 : index
    %c2_45 = arith.constant 2 : index
    %c0_46 = arith.constant 0 : index
    %45 = vector.load %arg7[%c1_44, %c2_45, %c0_46] : memref<18x18x128xbf16, #tpu.memory_space<vmem>>, vector<16x16x128xbf16>
    %46 = vector.shape_cast %45 : vector<16x16x128xbf16> to vector<256x128xbf16>
    %c5 = arith.constant 5 : index
    %c0_47 = arith.constant 0 : index
    %c0_48 = arith.constant 0 : index
    %47 = vector.load %arg4[%c5, %c0_47, %c0_48] : memref<9x128x128xbf16, #tpu.memory_space<vmem>>, vector<1x128x128xbf16>
    %48 = vector.shape_cast %47 : vector<1x128x128xbf16> to vector<128x128xbf16>
    %cst_49 = arith.constant dense<0.000000e+00> : vector<256x128xf32>
    %49 = tpu.matmul %46, %48, %cst_49 {dimension_numbers = #tpu.dot_dimension_numbers<[1], [0], [0], [1], [0, 0, 1, 1], [], []>} : vector<256x128xbf16>, vector<128x128xbf16>, vector<256x128xf32> -> vector<256x128xf32>
    %50 = arith.addf %44, %49 : vector<256x128xf32>
    %c2_50 = arith.constant 2 : index
    %c0_51 = arith.constant 0 : index
    %c0_52 = arith.constant 0 : index
    %51 = vector.load %arg7[%c2_50, %c0_51, %c0_52] : memref<18x18x128xbf16, #tpu.memory_space<vmem>>, vector<16x16x128xbf16>
    %52 = vector.shape_cast %51 : vector<16x16x128xbf16> to vector<256x128xbf16>
    %c6 = arith.constant 6 : index
    %c0_53 = arith.constant 0 : index
    %c0_54 = arith.constant 0 : index
    %53 = vector.load %arg4[%c6, %c0_53, %c0_54] : memref<9x128x128xbf16, #tpu.memory_space<vmem>>, vector<1x128x128xbf16>
    %54 = vector.shape_cast %53 : vector<1x128x128xbf16> to vector<128x128xbf16>
    %cst_55 = arith.constant dense<0.000000e+00> : vector<256x128xf32>
    %55 = tpu.matmul %52, %54, %cst_55 {dimension_numbers = #tpu.dot_dimension_numbers<[1], [0], [0], [1], [0, 0, 1, 1], [], []>} : vector<256x128xbf16>, vector<128x128xbf16>, vector<256x128xf32> -> vector<256x128xf32>
    %56 = arith.addf %50, %55 : vector<256x128xf32>
    %c2_56 = arith.constant 2 : index
    %c1_57 = arith.constant 1 : index
    %c0_58 = arith.constant 0 : index
    %57 = vector.load %arg7[%c2_56, %c1_57, %c0_58] : memref<18x18x128xbf16, #tpu.memory_space<vmem>>, vector<16x16x128xbf16>
    %58 = vector.shape_cast %57 : vector<16x16x128xbf16> to vector<256x128xbf16>
    %c7 = arith.constant 7 : index
    %c0_59 = arith.constant 0 : index
    %c0_60 = arith.constant 0 : index
    %59 = vector.load %arg4[%c7, %c0_59, %c0_60] : memref<9x128x128xbf16, #tpu.memory_space<vmem>>, vector<1x128x128xbf16>
    %60 = vector.shape_cast %59 : vector<1x128x128xbf16> to vector<128x128xbf16>
    %cst_61 = arith.constant dense<0.000000e+00> : vector<256x128xf32>
    %61 = tpu.matmul %58, %60, %cst_61 {dimension_numbers = #tpu.dot_dimension_numbers<[1], [0], [0], [1], [0, 0, 1, 1], [], []>} : vector<256x128xbf16>, vector<128x128xbf16>, vector<256x128xf32> -> vector<256x128xf32>
    %62 = arith.addf %56, %61 : vector<256x128xf32>
    %c2_62 = arith.constant 2 : index
    %c2_63 = arith.constant 2 : index
    %c0_64 = arith.constant 0 : index
    %63 = vector.load %arg7[%c2_62, %c2_63, %c0_64] : memref<18x18x128xbf16, #tpu.memory_space<vmem>>, vector<16x16x128xbf16>
    %64 = vector.shape_cast %63 : vector<16x16x128xbf16> to vector<256x128xbf16>
    %c8 = arith.constant 8 : index
    %c0_65 = arith.constant 0 : index
    %c0_66 = arith.constant 0 : index
    %65 = vector.load %arg4[%c8, %c0_65, %c0_66] : memref<9x128x128xbf16, #tpu.memory_space<vmem>>, vector<1x128x128xbf16>
    %66 = vector.shape_cast %65 : vector<1x128x128xbf16> to vector<128x128xbf16>
    %cst_67 = arith.constant dense<0.000000e+00> : vector<256x128xf32>
    %67 = tpu.matmul %64, %66, %cst_67 {dimension_numbers = #tpu.dot_dimension_numbers<[1], [0], [0], [1], [0, 0, 1, 1], [], []>} : vector<256x128xbf16>, vector<128x128xbf16>, vector<256x128xf32> -> vector<256x128xf32>
    %68 = arith.addf %62, %67 : vector<256x128xf32>
    %69 = arith.truncf %68 : vector<256x128xf32> to vector<256x128xbf16>
    %c0_68 = arith.constant 0 : index
    %c0_69 = arith.constant 0 : index
    %c0_70 = arith.constant 0 : index
    %70 = vector.load %arg5[%c0_68, %c0_69, %c0_70] : memref<1x256x128xbf16, #tpu.memory_space<vmem>>, vector<1x256x128xbf16>
    %71 = vector.shape_cast %70 : vector<1x256x128xbf16> to vector<256x128xbf16>
    %72 = vector.shape_cast %69 : vector<256x128xbf16> to vector<1x256x128xbf16>
    tpu.vector_store %arg5[%c0_68, %c0_69, %c0_70], %72 {strides = array<i32>} : memref<1x256x128xbf16, #tpu.memory_space<vmem>>, vector<1x256x128xbf16>,
    %cst_71 = arith.constant dense<0.000000e+00> : vector<128xf32>
    %73 = vector.multi_reduction <add>, %68, %cst_71 [0] : vector<256x128xf32> to vector<128xf32>
    %74 = vector.shape_cast %73 : vector<128xf32> to vector<1x128xf32>
    %75 = arith.mulf %68, %68 : vector<256x128xf32>
    %cst_72 = arith.constant dense<0.000000e+00> : vector<128xf32>
    %76 = vector.multi_reduction <add>, %75, %cst_72 [0] : vector<256x128xf32> to vector<128xf32>
    %77 = vector.shape_cast %76 : vector<128xf32> to vector<1x128xf32>
    %78 = tpu.concatenate %74, %77 in 0 : vector<1x128xf32>, vector<1x128xf32> -> vector<2x128xf32>
    %c0_73 = arith.constant 0 : index
    %c0_74 = arith.constant 0 : index
    %c0_75 = arith.constant 0 : index
    %79 = vector.load %arg6[%c0_73, %c0_74, %c0_75] : memref<1x2x128xf32, #tpu.memory_space<vmem>>, vector<1x2x128xf32>
    %80 = vector.shape_cast %79 : vector<1x2x128xf32> to vector<2x128xf32>
    %81 = vector.shape_cast %78 : vector<2x128xf32> to vector<1x2x128xf32>
    tpu.vector_store %arg6[%c0_73, %c0_74, %c0_75], %81 {strides = array<i32>} : memref<1x2x128xf32, #tpu.memory_space<vmem>>, vector<1x2x128xf32>,
    return
  }
  func.func @transform_0(%arg0: i32) -> (i32, i32, i32) {
    %c0_i32 = arith.constant 0 : i32
    %c0_i32_0 = arith.constant 0 : i32
    %c0_i32_1 = arith.constant 0 : i32
    return %arg0, %c0_i32, %c0_i32_0 : i32, i32, i32
  }
  func.func @transform_1(%arg0: i32) -> (i32, i32) {
    %c0_i32 = arith.constant 0 : i32
    %c0_i32_0 = arith.constant 0 : i32
    %c0_i32_1 = arith.constant 0 : i32
    return %c0_i32, %c0_i32_0 : i32, i32
  }
  func.func @transform_2(%arg0: i32) -> (i32, i32) {
    %c0_i32 = arith.constant 0 : i32
    %c0_i32_0 = arith.constant 0 : i32
    %c0_i32_1 = arith.constant 0 : i32
    return %c0_i32, %c0_i32_0 : i32, i32
  }
  func.func @transform_3(%arg0: i32) -> (i32, i32, i32) {
    %c0_i32 = arith.constant 0 : i32
    %c0_i32_0 = arith.constant 0 : i32
    %c0_i32_1 = arith.constant 0 : i32
    %c0_i32_2 = arith.constant 0 : i32
    return %c0_i32, %c0_i32_0, %c0_i32_1 : i32, i32, i32
  }
  func.func @transform_4(%arg0: i32) -> (i32, i32, i32) {
    %c0_i32 = arith.constant 0 : i32
    %c0_i32_0 = arith.constant 0 : i32
    %c0_i32_1 = arith.constant 0 : i32
    return %arg0, %c0_i32, %c0_i32_0 : i32, i32, i32
  }
  func.func @transform_5(%arg0: i32) -> (i32, i32, i32) {
    %c0_i32 = arith.constant 0 : i32
    %c0_i32_0 = arith.constant 0 : i32
    %c0_i32_1 = arith.constant 0 : i32
    return %arg0, %c0_i32, %c0_i32_0 : i32, i32, i32
  }
}

</mosaic_0001>

<bundles_post_ra>
// kernel: basic_block_forward.5
= control target key start
LH: loop header
LB: loop body
LE: loop exit
PB: predicated region body
PF: predicated region fallthrough
CT: control target
= control target key end

     0   :  { %s1235_s21 = smov 0   ;;  %s1462_s0 = inlined_call_operand.vmem [shape: bf16[2,256,128], index: 0, kind: input, shape index: {}]   ;;  %s1463_s1 = inlined_call_operand.vmem [shape: f32[1,128], index: 1, kind: input, shape index: {}]   ;;  %s1464_s2 = inlined_call_operand.vmem [shape: f32[1,128], index: 2, kind: input, shape index: {}]   ;;  %s1465_s3 = inlined_call_operand.vmem [shape: bf16[2,256,128], index: 3, kind: input, shape index: {}]   ;;  %s1466_s4 = inlined_call_operand.vmem [shape: f32[1,128], index: 4, kind: input, shape index: {}]   ;;  %s1467_s5 = inlined_call_operand.vmem [shape: f32[1,128], index: 5, kind: input, shape index: {}]   ;;  %s1468_s6 = inlined_call_operand.vmem [shape: bf16[2,256,128], index: 6, kind: output, shape index: {}]  }
   0x1 LB: > { %s847_s22 = sadd.s32 4294967295, %s1198_s21   ;;  %p851_p0 = scmp.ge.s32.totalorder %s1198_s21, 1  ;;  %s1198_s21 = sphi %s1235_s21, %s16_s21  }
   0x2   : > { %p222_p1 = scmp.lt.s32.totalorder %s1198_s21, 3 }
   0x4   : > { %p223_p2 = pnand %p851_p0, %p222_p1 }
   0x5   : > { %p257_p3 = scmp.lt.s32.totalorder (!%p223_p2), %s847_s22, 1 }
   0x6   : > { %226 = sbr.rel (%p223_p2) target bundleno = 91 (0x5b), region = 44 }
   0xb   : > { %s1470_s22 = smov (!%p257_p3, %s847_s22), 1  ;;  %v1260_v0 = vld [vmem:[%s1463_s1] ss:$0 sm:$0xff] }
   0xc   : > { %s1243_s23 = sshll.u32 %s1470_s22, 7  ;;  %v1265_v1 = vld [vmem:[%s1466_s4] ss:$0 sm:$0xff] }
   0xd   : > { %s1249_s26 = scalar_lea.vmem %s1462_s0, %s1243_s23  ;;  %s1255_s29 = scalar_lea.vmem %s1465_s3, %s1243_s23  ;;  %v1274_v10 = vld [vmem:[%s1464_s2] ss:$0 sm:$0xff] }
   0xe   : > { %v932_v2 = vld [vmem:[%s1249_s26] sm:$0xff]   ;;  %v1139_v4 = vld [vmem:[%s1249_s26 + $0x8] sm:$0xff]   ;;  %v1140_v24 = vld [vmem:[%s1249_s26 + $0x10] sm:$0xff]   ;;  %s1306_s16 = scalar_lea.vmem %s1468_s6, %s1243_s23 }
   0xf   : > { %v996_v3 = vld [vmem:[%s1255_s29] sm:$0xff]   ;;  %v933_v5 = vunpack.c.l.bf16 %v932_v2  ;;  %v934_v6 = vunpack.c.h.bf16 %v932_v2  ;;  %v1154_v9 = vld [vmem:[%s1255_s29 + $0x8] sm:$0xff]   ;;  %v937_v12 = vunpack.c.l.bf16 %v1139_v4  ;;  %v938_v13 = vunpack.c.h.bf16 %v1139_v4  ;;  %v1155_v29 = vld [vmem:[%s1255_s29 + $0x10] sm:$0xff]  }
  0x10   : > { %v997_v7 = vunpack.c.l.bf16 %v996_v3  ;;  %v998_v8 = vunpack.c.h.bf16 %v996_v3  ;;  %v1279_v11 = vld [vmem:[%s1467_s5] ss:$0 sm:$0xff]  ;;  %v1001_v14 = vunpack.c.l.bf16 %v1154_v9  ;;  %v1002_v15 = vunpack.c.h.bf16 %v1154_v9  ;;  %v1141_v42 = vld [vmem:[%s1249_s26 + $0x18] sm:$0xff]  }
  0x11   : > { %v343_v16 = vmul.f32 %v933_v5, %v1260_v0  ;;  %v344_v17 = vmul.f32 %v934_v6, %v1260_v0  ;;  %v345_v20 = vmul.f32 %v937_v12, %v1260_v0  ;;  %v346_v21 = vmul.f32 %v938_v13, %v1260_v0  ;;  %v1156_v51 = vld [vmem:[%s1255_s29 + $0x18] sm:$0xff]   ;;  %v1142_v52 = vld [vmem:[%s1249_s26 + $0x20] sm:$0xff]  }
  0x12   : > { %v485_v18 = vmul.f32 %v997_v7, %v1265_v1  ;;  %v486_v19 = vmul.f32 %v998_v8, %v1265_v1  ;;  %v487_v22 = vmul.f32 %v1001_v14, %v1265_v1  ;;  %v488_v23 = vmul.f32 %v1002_v15, %v1265_v1  ;;  %v1157_v7 = vld [vmem:[%s1255_s29 + $0x20] sm:$0xff]   ;;  %v1143_v14 = vld [vmem:[%s1249_s26 + $0x28] sm:$0xff]  }
  0x13   : > { %v382_v25 = vadd.f32 %v1274_v10, %v343_v16  ;;  %v383_v26 = vadd.f32 %v1274_v10, %v344_v17  ;;  %v384_v30 = vadd.f32 %v1274_v10, %v345_v20  ;;  %v385_v31 = vadd.f32 %v1274_v10, %v346_v21 }
  0x14   : > { %v524_v27 = vadd.f32 %v1279_v11, %v485_v18  ;;  %v525_v28 = vadd.f32 %v1279_v11, %v486_v19  ;;  %v526_v32 = vadd.f32 %v1279_v11, %v487_v22  ;;  %v527_v33 = vadd.f32 %v1279_v11, %v488_v23  ;;  %v1158_v23 = vld [vmem:[%s1255_s29 + $0x28] sm:$0xff]  }
  0x15   : > { %v941_v36 = vunpack.c.l.bf16 %v1140_v24  ;;  %v942_v37 = vunpack.c.h.bf16 %v1140_v24  ;;  %v1005_v40 = vunpack.c.l.bf16 %v1155_v29  ;;  %v1006_v41 = vunpack.c.h.bf16 %v1155_v29 }
  0x16   : > { %v556_v34 = vadd.f32 %v524_v27, %v382_v25  ;;  %v557_v35 = vadd.f32 %v525_v28, %v383_v26  ;;  %v558_v38 = vadd.f32 %v526_v32, %v384_v30  ;;  %v559_v39 = vadd.f32 %v527_v33, %v385_v31 }
  0x17   : > { %v347_v45 = vmul.f32 %v941_v36, %v1260_v0  ;;  %v348_v46 = vmul.f32 %v942_v37, %v1260_v0  ;;  %v489_v49 = vmul.f32 %v1005_v40, %v1265_v1  ;;  %v490_v50 = vmul.f32 %v1006_v41, %v1265_v1  ;;  %v1144_v36 = vld [vmem:[%s1249_s26 + $0x30] sm:$0xff]  }
  0x18   : > { %v588_v43 = vmax.f32 %v556_v34, 0.0  ;;  %v589_v44 = vmax.f32 %v557_v35, 0.0  ;;  %v590_v47 = vmax.f32 %v558_v38, 0.0  ;;  %v591_v48 = vmax.f32 %v559_v39, 0.0 }
  0x19   : > { %v386_v54 = vadd.f32 %v1274_v10, %v347_v45  ;;  %v387_v55 = vadd.f32 %v1274_v10, %v348_v46  ;;  %v945_v56 = vunpack.c.l.bf16 %v1141_v42  ;;  %v528_v58 = vadd.f32 %v1279_v11, %v489_v49  ;;  %v1159_v45 = vld [vmem:[%s1255_s29 + $0x30] sm:$0xff]  }
  0x1a   : > { %v1062_v53 = vpack.c.bf16 %v589_v44, %v588_v43  ;;  %v1067_v57 = vpack.c.bf16 %v591_v48, %v590_v47  ;;  %v529_v59 = vadd.f32 %v1279_v11, %v490_v50  ;;  %v946_v60 = vunpack.c.h.bf16 %v1141_v42 }
  0x1b   : > { %v349_v61 = vmul.f32 %v945_v56, %v1260_v0  ;;  %v1009_v62 = vunpack.c.l.bf16 %v1156_v51  ;;  %v1010_v63 = vunpack.c.h.bf16 %v1156_v51  ;;  %v949_v2 = vunpack.c.l.bf16 %v1142_v52 }
  0x1c   : > { %1063 = vst [vmem:[%s1306_s16] sm:$0xff] %v1062_v53   ;;  %1169 = vst [vmem:[%s1306_s16 + $0x8] sm:$0xff] %v1067_v57   ;;  %v560_v3 = vadd.f32 %v528_v58, %v386_v54  ;;  %v561_v4 = vadd.f32 %v529_v59, %v387_v55  ;;  %v350_v5 = vmul.f32 %v946_v60, %v1260_v0  ;;  %v950_v6 = vunpack.c.h.bf16 %v1142_v52  ;;  %v1145_v54 = vld [vmem:[%s1249_s26 + $0x38] sm:$0xff]  }
  0x1d   : > { %v388_v8 = vadd.f32 %v1274_v10, %v349_v61  ;;  %v491_v9 = vmul.f32 %v1009_v62, %v1265_v1  ;;  %v492_v12 = vmul.f32 %v1010_v63, %v1265_v1  ;;  %v351_v13 = vmul.f32 %v949_v2, %v1260_v0 }
  0x1e   : > { %v592_v15 = vmax.f32 %v560_v3, 0.0  ;;  %v593_v16 = vmax.f32 %v561_v4, 0.0  ;;  %v389_v17 = vadd.f32 %v1274_v10, %v350_v5  ;;  %v352_v18 = vmul.f32 %v950_v6, %v1260_v0  ;;  %v1160_v5 = vld [vmem:[%s1255_s29 + $0x38] sm:$0xff]   ;;  %v1146_v6 = vld [vmem:[%s1249_s26 + $0x40] sm:$0xff]  }
  0x1f   : > { %v530_v19 = vadd.f32 %v1279_v11, %v491_v9  ;;  %v531_v20 = vadd.f32 %v1279_v11, %v492_v12  ;;  %v390_v21 = vadd.f32 %v1274_v10, %v351_v13  ;;  %v1013_v22 = vunpack.c.l.bf16 %v1157_v7 }
  0x20   : > { %v1072_v24 = vpack.c.bf16 %v593_v16, %v592_v15  ;;  %v391_v25 = vadd.f32 %v1274_v10, %v352_v18  ;;  %v1014_v26 = vunpack.c.h.bf16 %v1157_v7  ;;  %v953_v27 = vunpack.c.l.bf16 %v1143_v14 }
  0x21   : > { %v562_v28 = vadd.f32 %v530_v19, %v388_v8  ;;  %v563_v29 = vadd.f32 %v531_v20, %v389_v17  ;;  %v493_v30 = vmul.f32 %v1013_v22, %v1265_v1  ;;  %v954_v31 = vunpack.c.h.bf16 %v1143_v14 }
  0x22   : > { %1170 = vst [vmem:[%s1306_s16 + $0x10] sm:$0xff] %v1072_v24   ;;  %v494_v32 = vmul.f32 %v1014_v26, %v1265_v1  ;;  %v353_v33 = vmul.f32 %v953_v27, %v1260_v0  ;;  %v1017_v34 = vunpack.c.l.bf16 %v1158_v23  ;;  %v1018_v35 = vunpack.c.h.bf16 %v1158_v23 }
  0x23   : > { %v594_v37 = vmax.f32 %v562_v28, 0.0  ;;  %v595_v38 = vmax.f32 %v563_v29, 0.0  ;;  %v532_v39 = vadd.f32 %v1279_v11, %v493_v30  ;;  %v354_v40 = vmul.f32 %v954_v31, %v1260_v0  ;;  %v1147_v30 = vld [vmem:[%s1249_s26 + $0x48] sm:$0xff]  }
  0x24   : > { %v533_v41 = vadd.f32 %v1279_v11, %v494_v32  ;;  %v392_v42 = vadd.f32 %v1274_v10, %v353_v33  ;;  %v495_v43 = vmul.f32 %v1017_v34, %v1265_v1  ;;  %v496_v44 = vmul.f32 %v1018_v35, %v1265_v1 }
  0x25   : > { %v1077_v46 = vpack.c.bf16 %v595_v38, %v594_v37  ;;  %v564_v47 = vadd.f32 %v532_v39, %v390_v21  ;;  %v393_v48 = vadd.f32 %v1274_v10, %v354_v40  ;;  %v957_v49 = vunpack.c.l.bf16 %v1144_v36  ;;  %v1161_v21 = vld [vmem:[%s1255_s29 + $0x40] sm:$0xff]   ;;  %v1162_v39 = vld [vmem:[%s1255_s29 + $0x48] sm:$0xff]  }
  0x26   : > { %v565_v50 = vadd.f32 %v533_v41, %v391_v25  ;;  %v534_v51 = vadd.f32 %v1279_v11, %v495_v43  ;;  %v535_v52 = vadd.f32 %v1279_v11, %v496_v44  ;;  %v958_v53 = vunpack.c.h.bf16 %v1144_v36 }
  0x27   : > { %1171 = vst [vmem:[%s1306_s16 + $0x18] sm:$0xff] %v1077_v46   ;;  %v596_v55 = vmax.f32 %v564_v47, 0.0  ;;  %v355_v56 = vmul.f32 %v957_v49, %v1260_v0  ;;  %v1021_v57 = vunpack.c.l.bf16 %v1159_v45  ;;  %v1022_v58 = vunpack.c.h.bf16 %v1159_v45 }
  0x28   : > { %v597_v59 = vmax.f32 %v565_v50, 0.0  ;;  %v566_v60 = vadd.f32 %v534_v51, %v392_v42  ;;  %v567_v61 = vadd.f32 %v535_v52, %v393_v48  ;;  %v356_v62 = vmul.f32 %v958_v53, %v1260_v0  ;;  %v1148_v52 = vld [vmem:[%s1249_s26 + $0x50] sm:$0xff]  }
  0x29   : > { %v394_v63 = vadd.f32 %v1274_v10, %v355_v56  ;;  %v497_v2 = vmul.f32 %v1021_v57, %v1265_v1  ;;  %v498_v3 = vmul.f32 %v1022_v58, %v1265_v1  ;;  %v961_v4 = vunpack.c.l.bf16 %v1145_v54 }
  0x2a   : > { %v1082_v7 = vpack.c.bf16 %v597_v59, %v596_v55  ;;  %v598_v8 = vmax.f32 %v566_v60, 0.0  ;;  %v599_v9 = vmax.f32 %v567_v61, 0.0  ;;  %v395_v12 = vadd.f32 %v1274_v10, %v356_v62  ;;  %v1163_v61 = vld [vmem:[%s1255_s29 + $0x50] sm:$0xff]  }
  0x2b   : > { %v536_v13 = vadd.f32 %v1279_v11, %v497_v2  ;;  %v537_v14 = vadd.f32 %v1279_v11, %v498_v3  ;;  %v962_v15 = vunpack.c.h.bf16 %v1145_v54  ;;  %v357_v16 = vmul.f32 %v961_v4, %v1260_v0  ;;  %v1149_v4 = vld [vmem:[%s1249_s26 + $0x58] sm:$0xff]  }
  0x2c   : > { %1172 = vst [vmem:[%s1306_s16 + $0x20] sm:$0xff] %v1082_v7   ;;  %v1087_v17 = vpack.c.bf16 %v599_v9, %v598_v8  ;;  %v1025_v18 = vunpack.c.l.bf16 %v1160_v5  ;;  %v1026_v19 = vunpack.c.h.bf16 %v1160_v5  ;;  %v965_v20 = vunpack.c.l.bf16 %v1146_v6 }
  0x2d   : > { %v568_v22 = vadd.f32 %v536_v13, %v394_v63  ;;  %v569_v23 = vadd.f32 %v537_v14, %v395_v12  ;;  %v358_v24 = vmul.f32 %v962_v15, %v1260_v0  ;;  %v396_v25 = vadd.f32 %v1274_v10, %v357_v16 }
  0x2e   : > { %1173 = vst [vmem:[%s1306_s16 + $0x28] sm:$0xff] %v1087_v17   ;;  %v499_v26 = vmul.f32 %v1025_v18, %v1265_v1  ;;  %v500_v27 = vmul.f32 %v1026_v19, %v1265_v1  ;;  %v966_v28 = vunpack.c.h.bf16 %v1146_v6  ;;  %v359_v29 = vmul.f32 %v965_v20, %v1260_v0 }
  0x2f   : > { %v600_v31 = vmax.f32 %v568_v22, 0.0  ;;  %v601_v32 = vmax.f32 %v569_v23, 0.0  ;;  %v397_v33 = vadd.f32 %v1274_v10, %v358_v24  ;;  %v1029_v34 = vunpack.c.l.bf16 %v1161_v21  ;;  %v1164_v23 = vld [vmem:[%s1255_s29 + $0x58] sm:$0xff]   ;;  %v1150_v24 = vld [vmem:[%s1249_s26 + $0x60] sm:$0xff]  }
  0x30   : > { %v538_v35 = vadd.f32 %v1279_v11, %v499_v26  ;;  %v539_v36 = vadd.f32 %v1279_v11, %v500_v27  ;;  %v360_v37 = vmul.f32 %v966_v28, %v1260_v0  ;;  %v398_v38 = vadd.f32 %v1274_v10, %v359_v29 }
  0x31   : > { %v1092_v40 = vpack.c.bf16 %v601_v32, %v600_v31  ;;  %v1030_v41 = vunpack.c.h.bf16 %v1161_v21  ;;  %v501_v42 = vmul.f32 %v1029_v34, %v1265_v1  ;;  %v969_v43 = vunpack.c.l.bf16 %v1147_v30 }
  0x32   : > { %v570_v44 = vadd.f32 %v538_v35, %v396_v25  ;;  %v571_v45 = vadd.f32 %v539_v36, %v397_v33  ;;  %v399_v46 = vadd.f32 %v1274_v10, %v360_v37  ;;  %v970_v47 = vunpack.c.h.bf16 %v1147_v30  ;;  %v1165_v37 = vld [vmem:[%s1255_s29 + $0x60] sm:$0xff]  }
  0x33   : > { %1174 = vst [vmem:[%s1306_s16 + $0x30] sm:$0xff] %v1092_v40   ;;  %v502_v48 = vmul.f32 %v1030_v41, %v1265_v1  ;;  %v540_v49 = vadd.f32 %v1279_v11, %v501_v42  ;;  %v361_v50 = vmul.f32 %v969_v43, %v1260_v0  ;;  %v1033_v51 = vunpack.c.l.bf16 %v1162_v39 }
  0x34   : > { %v602_v53 = vmax.f32 %v570_v44, 0.0  ;;  %v603_v54 = vmax.f32 %v571_v45, 0.0  ;;  %v362_v55 = vmul.f32 %v970_v47, %v1260_v0  ;;  %v1034_v56 = vunpack.c.h.bf16 %v1162_v39 }
  0x35   : > { %v541_v57 = vadd.f32 %v1279_v11, %v502_v48  ;;  %v572_v58 = vadd.f32 %v540_v49, %v398_v38  ;;  %v400_v59 = vadd.f32 %v1274_v10, %v361_v50  ;;  %v503_v60 = vmul.f32 %v1033_v51, %v1265_v1 }
  0x36   : > { %v1097_v62 = vpack.c.bf16 %v603_v54, %v602_v53  ;;  %v401_v63 = vadd.f32 %v1274_v10, %v362_v55  ;;  %v504_v2 = vmul.f32 %v1034_v56, %v1265_v1  ;;  %v973_v3 = vunpack.c.l.bf16 %v1148_v52  ;;  %v1166_v55 = vld [vmem:[%s1255_s29 + $0x68] sm:$0xff]  }
  0x37   : > { %v573_v5 = vadd.f32 %v541_v57, %v399_v46  ;;  %v604_v6 = vmax.f32 %v572_v58, 0.0  ;;  %v542_v7 = vadd.f32 %v1279_v11, %v503_v60  ;;  %v974_v8 = vunpack.c.h.bf16 %v1148_v52  ;;  %v1151_v46 = vld [vmem:[%s1249_s26 + $0x68] sm:$0xff]  }
  0x38   : > { %1175 = vst [vmem:[%s1306_s16 + $0x38] sm:$0xff] %v1097_v62   ;;  %v543_v9 = vadd.f32 %v1279_v11, %v504_v2  ;;  %v363_v12 = vmul.f32 %v973_v3, %v1260_v0  ;;  %v1037_v13 = vunpack.c.l.bf16 %v1163_v61  ;;  %v1038_v14 = vunpack.c.h.bf16 %v1163_v61 }
  0x39   : > { %v605_v15 = vmax.f32 %v573_v5, 0.0  ;;  %v574_v16 = vadd.f32 %v542_v7, %v400_v59  ;;  %v364_v17 = vmul.f32 %v974_v8, %v1260_v0  ;;  %v977_v18 = vunpack.c.l.bf16 %v1149_v4 }
  0x3a   : > { %v575_v19 = vadd.f32 %v543_v9, %v401_v63  ;;  %v402_v20 = vadd.f32 %v1274_v10, %v363_v12  ;;  %v505_v21 = vmul.f32 %v1037_v13, %v1265_v1  ;;  %v506_v22 = vmul.f32 %v1038_v14, %v1265_v1 }
  0x3b   : > { %v1102_v25 = vpack.c.bf16 %v605_v15, %v604_v6  ;;  %v606_v26 = vmax.f32 %v574_v16, 0.0  ;;  %v403_v27 = vadd.f32 %v1274_v10, %v364_v17  ;;  %v978_v28 = vunpack.c.h.bf16 %v1149_v4  ;;  %v1152_v6 = vld [vmem:[%s1249_s26 + $0x70] sm:$0xff]  }
  0x3c   : > { %v607_v29 = vmax.f32 %v575_v19, 0.0  ;;  %v544_v30 = vadd.f32 %v1279_v11, %v505_v21  ;;  %v545_v31 = vadd.f32 %v1279_v11, %v506_v22  ;;  %v365_v32 = vmul.f32 %v977_v18, %v1260_v0  ;;  %v1167_v17 = vld [vmem:[%s1255_s29 + $0x70] sm:$0xff]   ;;  %v1153_v22 = vld [vmem:[%s1249_s26 + $0x78] sm:$0xff]  }
  0x3d   : > { %1176 = vst [vmem:[%s1306_s16 + $0x40] sm:$0xff] %v1102_v25   ;;  %v366_v33 = vmul.f32 %v978_v28, %v1260_v0  ;;  %v1041_v34 = vunpack.c.l.bf16 %v1164_v23  ;;  %v1042_v35 = vunpack.c.h.bf16 %v1164_v23  ;;  %v981_v36 = vunpack.c.l.bf16 %v1150_v24 }
  0x3e   : > { %v1107_v38 = vpack.c.bf16 %v607_v29, %v606_v26  ;;  %v576_v39 = vadd.f32 %v544_v30, %v402_v20  ;;  %v577_v40 = vadd.f32 %v545_v31, %v403_v27  ;;  %v404_v41 = vadd.f32 %v1274_v10, %v365_v32 }
  0x3f   : > { %v405_v42 = vadd.f32 %v1274_v10, %v366_v33  ;;  %v507_v43 = vmul.f32 %v1041_v34, %v1265_v1  ;;  %v508_v44 = vmul.f32 %v1042_v35, %v1265_v1  ;;  %v982_v45 = vunpack.c.h.bf16 %v1150_v24  ;;  %v1168_v35 = vld [vmem:[%s1255_s29 + $0x78] sm:$0xff]  }
  0x40   : > { %1177 = vst [vmem:[%s1306_s16 + $0x48] sm:$0xff] %v1107_v38   ;;  %v608_v47 = vmax.f32 %v576_v39, 0.0  ;;  %v609_v48 = vmax.f32 %v577_v40, 0.0  ;;  %v367_v49 = vmul.f32 %v981_v36, %v1260_v0  ;;  %v1045_v50 = vunpack.c.l.bf16 %v1165_v37 }
  0x41   : > { %v546_v51 = vadd.f32 %v1279_v11, %v507_v43  ;;  %v547_v52 = vadd.f32 %v1279_v11, %v508_v44  ;;  %v368_v53 = vmul.f32 %v982_v45, %v1260_v0  ;;  %v1046_v54 = vunpack.c.h.bf16 %v1165_v37 }
  0x42   : > { %v1112_v56 = vpack.c.bf16 %v609_v48, %v608_v47  ;;  %v406_v57 = vadd.f32 %v1274_v10, %v367_v49  ;;  %v509_v58 = vmul.f32 %v1045_v50, %v1265_v1  ;;  %v985_v59 = vunpack.c.l.bf16 %v1151_v46 }
  0x43   : > { %v578_v60 = vadd.f32 %v546_v51, %v404_v41  ;;  %v579_v61 = vadd.f32 %v547_v52, %v405_v42  ;;  %v407_v62 = vadd.f32 %v1274_v10, %v368_v53  ;;  %v510_v63 = vmul.f32 %v1046_v54, %v1265_v1 }
  0x44   : > { %1178 = vst [vmem:[%s1306_s16 + $0x50] sm:$0xff] %v1112_v56   ;;  %v548_v2 = vadd.f32 %v1279_v11, %v509_v58  ;;  %v986_v3 = vunpack.c.h.bf16 %v1151_v46  ;;  %v369_v4 = vmul.f32 %v985_v59, %v1260_v0  ;;  %v1049_v5 = vunpack.c.l.bf16 %v1166_v55 }
  0x45   : > { %v610_v7 = vmax.f32 %v578_v60, 0.0  ;;  %v611_v8 = vmax.f32 %v579_v61, 0.0  ;;  %v549_v9 = vadd.f32 %v1279_v11, %v510_v63  ;;  %v1050_v12 = vunpack.c.h.bf16 %v1166_v55 }
  0x46   : > { %v580_v13 = vadd.f32 %v548_v2, %v406_v57  ;;  %v370_v14 = vmul.f32 %v986_v3, %v1260_v0  ;;  %v408_v15 = vadd.f32 %v1274_v10, %v369_v4  ;;  %v511_v16 = vmul.f32 %v1049_v5, %v1265_v1 }
  0x47   : > { %v1117_v18 = vpack.c.bf16 %v611_v8, %v610_v7  ;;  %v581_v19 = vadd.f32 %v549_v9, %v407_v62  ;;  %v512_v20 = vmul.f32 %v1050_v12, %v1265_v1  ;;  %v989_v21 = vunpack.c.l.bf16 %v1152_v6 }
  0x48   : > { %v612_v23 = vmax.f32 %v580_v13, 0.0  ;;  %v409_v24 = vadd.f32 %v1274_v10, %v370_v14  ;;  %v550_v25 = vadd.f32 %v1279_v11, %v511_v16  ;;  %v990_v26 = vunpack.c.h.bf16 %v1152_v6 }
  0x49   : > { %1179 = vst [vmem:[%s1306_s16 + $0x58] sm:$0xff] %v1117_v18   ;;  %v613_v27 = vmax.f32 %v581_v19, 0.0  ;;  %v551_v28 = vadd.f32 %v1279_v11, %v512_v20  ;;  %v371_v29 = vmul.f32 %v989_v21, %v1260_v0  ;;  %v1053_v30 = vunpack.c.l.bf16 %v1167_v17 }
  0x4a   : > { %v582_v31 = vadd.f32 %v550_v25, %v408_v15  ;;  %v372_v32 = vmul.f32 %v990_v26, %v1260_v0  ;;  %v1054_v33 = vunpack.c.h.bf16 %v1167_v17  ;;  %v993_v34 = vunpack.c.l.bf16 %v1153_v22 }
  0x4b   : > { %v1122_v36 = vpack.c.bf16 %v613_v27, %v612_v23  ;;  %v583_v37 = vadd.f32 %v551_v28, %v409_v24  ;;  %v410_v38 = vadd.f32 %v1274_v10, %v371_v29  ;;  %v513_v39 = vmul.f32 %v1053_v30, %v1265_v1 }
  0x4c   : > { %v614_v40 = vmax.f32 %v582_v31, 0.0  ;;  %v411_v41 = vadd.f32 %v1274_v10, %v372_v32  ;;  %v514_v42 = vmul.f32 %v1054_v33, %v1265_v1  ;;  %v994_v43 = vunpack.c.h.bf16 %v1153_v22 }
  0x4d   : > { %1180 = vst [vmem:[%s1306_s16 + $0x60] sm:$0xff] %v1122_v36   ;;  %v615_v44 = vmax.f32 %v583_v37, 0.0  ;;  %v552_v45 = vadd.f32 %v1279_v11, %v513_v39  ;;  %v373_v46 = vmul.f32 %v993_v34, %v1260_v0  ;;  %v1057_v47 = vunpack.c.l.bf16 %v1168_v35 }
  0x4e   : > { %v553_v48 = vadd.f32 %v1279_v11, %v514_v42  ;;  %v374_v49 = vmul.f32 %v994_v43, %v1260_v0  ;;  %v1058_v50 = vunpack.c.h.bf16 %v1168_v35 }
  0x4f   : > { %v1127_v51 = vpack.c.bf16 %v615_v44, %v614_v40  ;;  %v584_v52 = vadd.f32 %v552_v45, %v410_v38  ;;  %v412_v53 = vadd.f32 %v1274_v10, %v373_v46  ;;  %v515_v54 = vmul.f32 %v1057_v47, %v1265_v1 }
  0x50   : > { %v585_v55 = vadd.f32 %v553_v48, %v411_v41  ;;  %v413_v56 = vadd.f32 %v1274_v10, %v374_v49  ;;  %v516_v57 = vmul.f32 %v1058_v50, %v1265_v1 }
  0x51   : > { %1181 = vst [vmem:[%s1306_s16 + $0x68] sm:$0xff] %v1127_v51   ;;  %v616_v58 = vmax.f32 %v584_v52, 0.0  ;;  %v554_v59 = vadd.f32 %v1279_v11, %v515_v54 }
  0x52   : > { %v617_v60 = vmax.f32 %v585_v55, 0.0  ;;  %v555_v0 = vadd.f32 %v1279_v11, %v516_v57 }
  0x53   : > { %v586_v61 = vadd.f32 %v554_v59, %v412_v53 }
  0x54   : > { %v1132_v62 = vpack.c.bf16 %v617_v60, %v616_v58  ;;  %v587_v63 = vadd.f32 %v555_v0, %v413_v56 }
  0x55   : > { %v618_v2 = vmax.f32 %v586_v61, 0.0 }
  0x56   : > { %1182 = vst [vmem:[%s1306_s16 + $0x70] sm:$0xff] %v1132_v62   ;;  %v619_v3 = vmax.f32 %v587_v63, 0.0 }
  0x58   : > { %v1137_v4 = vpack.c.bf16 %v619_v3, %v618_v2 }
  0x5a   : > { %1183 = vst [vmem:[%s1306_s16 + $0x78] sm:$0xff] %v1137_v4  }
  0x5b PF: > { %s16_s21 = sadd.s32 1, %s1198_s21  }
  0x5c   : > { %p13_p4 = scmp.ge.s32.totalorder %s16_s21, 4  }
  0x5e   :  { %15 = sbr.rel (!%p13_p4) target bundleno = 1 (0x1), region = 77 }

// kernel: basic_block_forward.3
= control target key start
LH: loop header
LB: loop body
LE: loop exit
PB: predicated region body
PF: predicated region fallthrough
CT: control target
= control target key end

     0   :  { %s5017_s21 = smov 0   ;;  %s6492_s0 = inlined_call_operand.vmem [shape: bf16[2,18,18,4], index: 0, kind: input, shape index: {}]   ;;  %s6493_s1 = inlined_call_operand.vmem [shape: bf16[9,4,128], index: 1, kind: input, shape index: {}]   ;;  %s6494_s2 = inlined_call_operand.vmem [shape: bf16[4,128], index: 2, kind: input, shape index: {}]   ;;  %s6495_s3 = inlined_call_operand.vmem [shape: bf16[2,256,128], index: 3, kind: output, shape index: {0}]   ;;  %s6496_s4 = inlined_call_operand.vmem [shape: f32[2,2,128], index: 4, kind: output, shape index: {1}]   ;;  %s6497_s5 = inlined_call_operand.vmem [shape: bf16[2,256,128], index: 5, kind: output, shape index: {2}]   ;;  %s6498_s6 = inlined_call_operand.vmem [shape: f32[2,2,128], index: 6, kind: output, shape index: {3}]  }
   0x1 LB: > { %s3853_s22 = sadd.s32 4294967295, %s4980_s21   ;;  %p3857_p0 = scmp.ge.s32.totalorder %s4980_s21, 1  ;;  %s4980_s21 = sphi %s5017_s21, %s17_s21  }
   0x2   : > { %p219_p1 = scmp.lt.s32.totalorder %s4980_s21, 3 }
   0x4   : > { %p220_p2 = pnand %p3857_p0, %p219_p1 }
   0x6   : > { %223 = sbr.rel (%p220_p2) target bundleno = 578 (0x242), region = 32 }
   0xb   : > { %v340_v0 = vld [vmem:[%s6493_s1] sm:$0x3]  ;;  %vm827_vm0 = vcmask 1041408   ;;  %p262_p3 = scmp.lt.s32.totalorder %s3853_s22, 1  ;;  %v3865_v2 = vld [vmem:[%s6493_s1 + $0x2] sm:$0x3] }
   0xc   : > { %4938 = vmatprep.subr.msk.bf16.mxu1 %vm827_vm0, %v340_v0  ;;  %v1121_v1 = vsel %vm827_vm0, %v340_v0, 0  ;;  %4937 = vmatprep.subr.msk.bf16.mxu0 %vm827_vm0, %v3865_v2  ;;  %v829_v3 = vsel %vm827_vm0, %v3865_v2, 0  ;;  %v3946_v4 = vld [vmem:[%s6493_s1 + $0x4] sm:$0x3]  ;;  %v3979_v5 = vld [vmem:[%s6493_s1 + $0x6] sm:$0x3] }
   0xd   : > { %4632 = vmatpush3.bf16.msra.mxu1 %v1121_v1  ;;  %s6702_s22 = smov (!%p262_p3, %s3853_s22), 1  ;;  %4598 = vmatpush3.bf16.msra.mxu0 %v829_v3  ;;  %v4016_v6 = vld [vmem:[%s6493_s1 + $0xa] sm:$0x3]  ;;  %vm778_vm1 = vcmask 31744   ;;  %vm341_vm2 = vsmask.f32 3328 }
   0xe   : > { %s4947_s7 = smul.u32 216, %s6702_s22  ;;  %4939 = vmatprep.subr.msk.bf16.mxu0 %vm827_vm0, %v3946_v4  ;;  %4940 = vmatprep.subr.msk.bf16.mxu1 %vm827_vm0, %v3979_v5  ;;  %vm342_vm3 = vsmask.f32 7440  ;;  %v5055_v7 = vsel %vm827_vm0, %v3946_v4, 0  ;;  %v1720_v8 = vsel %vm827_vm0, %v3979_v5, 0  ;;  %v5059_v9 = vsel %vm827_vm0, %v4016_v6, 0 }
   0xf   : > { %vm5136_vm4 = vmor %vm341_vm2, %vm342_vm3  ;;  %vm1300_vm5 = vcmask 1042432   ;;  %vm1301_vm6 = vcmask 1046532   ;;  %s4171_s25 = sshll.u32 %s6702_s22, 7  ;;  %s3861_s8 = sshll.u32 %s6702_s22, 1  ;;  %vm3267_vm8 = vcmask 1040384  }
  0x10   : > { %s5052_s12 = scalar_lea.vmem %s6492_s0, %s4947_s7  ;;  %vm5510_vm7 = vmor %vm1300_vm5, %vm1301_vm6  ;;  %s6376_s28 = scalar_lea.vmem %s6497_s5, %s4171_s25 }
  0x11   : > { %v5062_v10 = vld [vmem:[%s5052_s12] sm:$0xf]  ;;  %v5065_v11 = vld [vmem:[%s5052_s12 + $0x4] sm:$0xf]  ;;  %v5068_v12 = vld [vmem:[%s5052_s12 + $0xc] sm:$0xf]  ;;  %s6418_s7 = scalar_lea.vmem %s6495_s3, %s4171_s25  ;;  %s284_s11 = scalar_lea.vmem %s6498_s6, %s3861_s8 }
  0x12   : > { %v345_v13 = vshrl.u32 %v5062_v10, 16  ;;  %v348_v14 = vshll.u32 %v5062_v10, 16  ;;  %v358_v15 = vshrl.u32 %v5065_v11, 16  ;;  %v3898_v16 = vcombine.low %v5062_v10, %v5065_v11  ;;  %v5076_v17 = vld [vmem:[%s5052_s12 + $0x10] sm:$0xf]  ;;  %s275_s14 = scalar_lea.vmem %s6496_s4, %s3861_s8 }
  0x13   : > { %v6500_v19 = vrot.slane %v5065_v11, 5  ;;  %v369_v20 = vshrl.u32 %v5068_v12, 16  ;;  %v372_v21 = vshll.u32 %v5068_v12, 16  ;;  %v5083_v22 = vld [vmem:[%s5052_s12 + $0x18] sm:$0xf]  ;;  %v382_v23 = vshrl.u32 %v5076_v17, 16 }
  0x14   : > { %4633 = vmatprep.mubr.msk.bf16.mxu1 %vm778_vm1, %v3898_v16  ;;  %v5089_v24 = vcombine.low %v5068_v12, %v5076_v17  ;;  %v6499_v26 = vrot.slane %v5076_v17, 5  ;;  %v5094_v27 = vld [vmem:[%s5052_s12 + $0x1c] sm:$0xf]  ;;  %v393_v29 = vshrl.u32 %v5083_v22, 16  ;;  %v396_v30 = vshll.u32 %v5083_v22, 16 }
  0x15   : > { %v5098_v28 = vrot.slane %v6500_v19, 4  ;;  %v406_v31 = vshrl.u32 %v5094_v27, 16  ;;  %v5104_v32 = vld [vmem:[%s5052_s12 + $0x8] sm:$0x1]  ;;  %v5114_v34 = vcombine.low %v5083_v22, %v5094_v27  ;;  %v347_v35 = vrot.slane %v345_v13, 4 }
  0x16   : > { %4634 = vmatmul.mubr.msk.bf16.vlgmr.msra.gmra.mxu1 %vm778_vm1, %v5089_v24  ;;  %v5110_v33 = vrot.slane %v6499_v26, 4  ;;  %v350_v36 = vrot.slane %v348_v14, 5  ;;  %v5117_v37 = vld [vmem:[%s5052_s12 + $0x24] sm:$0xf]  ;;  %v354_v38 = vshll.u32 %v5065_v11, 16  ;;  %v360_v39 = vrot.slane %v358_v15, 4 }
  0x17   : > { %v364_v40 = vshll.u32 %v5104_v32, 16  ;;  %v5123_v42 = vld [vmem:[%s5052_s12 + $0x28] sm:$0xf]  ;;  %4700 = vmatpush3.bf16.msra.mxu1 %v1720_v8  ;;  %4637 = vmatprep.mubr.msk.bf16.mxu1 %vm778_vm1, %v5114_v34  ;;  %v417_v44 = vshrl.u32 %v5117_v37, 16  ;;  %v420_v45 = vshll.u32 %v5117_v37, 16  ;;  %v371_v52 = vrot.slane %v369_v20, 4 }
  0x18   : > { %v351_v43 = vor.u32 %v350_v36, %v347_v35  ;;  %v430_v46 = vshrl.u32 %v5123_v42, 16  ;;  %v5131_v47 = vld [vmem:[%s5052_s12 + $0x14] sm:$0x1]  ;;  %4942 = vmatprep.subr.msk.bf16.mxu1 %vm827_vm0, %v4016_v6  ;;  %v356_v49 = vrot.slane %v354_v38, 5  ;;  %v5142_v51 = vcombine.low %v5117_v37, %v5123_v42  ;;  %v5145_v53 = vld [vmem:[%s5052_s12 + $0x30] sm:$0xf] }
  0x19   : > { %v366_v50 = vrot.slane %v364_v40, 5  ;;  %v374_v55 = vrot.slane %v372_v21, 5  ;;  %v378_v56 = vshll.u32 %v5076_v17, 16  ;;  %v384_v57 = vrot.slane %v382_v23, 4  ;;  %v5149_v58 = vld [vmem:[%s5052_s12 + $0x34] sm:$0xf] }
  0x1a   : > { %v352_v54 = vrot.slane %v351_v43, 4  ;;  %v361_v59 = vor.u32 %v360_v39, %v356_v49  ;;  %v388_v60 = vshll.u32 %v5131_v47, 16  ;;  %v441_v62 = vshrl.u32 %v5145_v53, 16  ;;  %v5158_v3 = vld [vmem:[%s5052_s12 + $0x20] sm:$0x1] }
  0x1b   : > { %v375_v0 = vor.u32 %v374_v55, %v371_v52  ;;  %v380_v1 = vrot.slane %v378_v56, 5  ;;  %v444_v2 = vshll.u32 %v5145_v53, 16  ;;  %v454_v6 = vshrl.u32 %v5149_v58, 16  ;;  %v5168_v20 = vld [vmem:[%s5052_s12 + $0x3c] sm:$0xf] }
  0x1c   : > { %v357_v63 = vsel %vm5136_vm4, %v352_v54, %v356_v49  ;;  %v362_v4 = vrot.slane %v361_v59, 4  ;;  %v390_v5 = vrot.slane %v388_v60, 5  ;;  %v5163_v8 = vcombine.low %v5145_v53, %v5149_v58  ;;  %v5177_v38 = vld [vmem:[%s5052_s12 + $0x40] sm:$0xf]  ;;  %v5184_v54 = vld [vmem:[%s5052_s12 + $0x2c] sm:$0x1] }
  0x1d   : > { %v376_v13 = vrot.slane %v375_v0, 4  ;;  %v385_v14 = vor.u32 %v384_v57, %v380_v1  ;;  %v395_v15 = vrot.slane %v393_v29, 4  ;;  %v398_v16 = vrot.slane %v396_v30, 5  ;;  %v5195_v59 = vld [vmem:[%s5052_s12 + $0x48] sm:$0xf] }
  0x1e   : > { %4638 = vmatmul.mubr.msk.bf16.gmra.mxu1 %vm778_vm1, %v5142_v51  ;;  %v367_v21 = vsel %vm5136_vm4, %v362_v4, %v366_v50  ;;  %v402_v23 = vshll.u32 %v5094_v27, 16  ;;  %v408_v35 = vrot.slane %v406_v31, 4  ;;  %v412_v36 = vshll.u32 %v5158_v3, 16  ;;  %v5200_v4 = vld [vmem:[%s5052_s12 + $0x4c] sm:$0xf] }
  0x1f   : > { %4641 = vmatprep.mubr.msk.bf16.mxu1 %vm778_vm1, %v5163_v8  ;;  %v3866_v39 = vcombine.low %v357_v63, %v367_v21  ;;  %v381_v29 = vsel %vm5136_vm4, %v376_v13, %v380_v1  ;;  %v386_v30 = vrot.slane %v385_v14, 4  ;;  %v399_v40 = vor.u32 %v398_v16, %v395_v15  ;;  %v5209_v16 = vld [vmem:[%s6493_s1 + $0x8] sm:$0x3]  ;;  %v5263_v26 = vld [vmem:[%s5052_s12 + $0x64] sm:$0xf] }
  0x20   : > { %v404_v43 = vrot.slane %v402_v23, 5  ;;  %v414_v49 = vrot.slane %v412_v36, 5  ;;  %v465_v50 = vshrl.u32 %v5168_v20, 16  ;;  %v468_v52 = vshll.u32 %v5168_v20, 16  ;;  %6584 = vst [vmem:[#allocation9_spill] sm:$0xff] %v5263_v26 }
  0x21   : > { %4599 = vmatprep.mubr.msk.bf16.mxu0 %vm778_vm1, %v3866_v39  ;;  %v391_v31 = vsel %vm5136_vm4, %v386_v30, %v390_v5  ;;  %v400_v55 = vrot.slane %v399_v40, 4  ;;  %v478_v56 = vshrl.u32 %v5177_v38, 16  ;;  %v5192_v57 = vcombine.low %v5168_v20, %v5177_v38  ;;  %v5227_v30 = vld [vmem:[%s5052_s12 + $0x54] sm:$0xf]  ;;  %v5290_v19 = vld [vmem:[%s5052_s12 + $0x70] sm:$0xf] }
  0x22   : > { %v5197_v60 = vcombine.low %v381_v29, %v391_v31  ;;  %v409_v63 = vor.u32 %v408_v35, %v404_v43  ;;  %v419_v0 = vrot.slane %v417_v44, 4  ;;  %v422_v1 = vrot.slane %v420_v45, 5  ;;  %v5216_v35 = vld [vmem:[%s5052_s12 + $0x38] sm:$0x1]  ;;  %6579 = vst [vmem:[#allocation4_spill] sm:$0xff] %v5227_v30  ;;  %6588 = vst [vmem:[#allocation13_spill] sm:$0xff] %v5290_v19 }
  0x23   : > { %v405_v5 = vsel %vm5136_vm4, %v400_v55, %v404_v43  ;;  %v426_v13 = vshll.u32 %v5123_v42, 16  ;;  %v432_v14 = vrot.slane %v430_v46, 4  ;;  %v436_v15 = vshll.u32 %v5184_v54, 16 }
  0x24   : > { %6577 = vst [vmem:[#allocation2_spill] sm:$0xff] %v5197_v60  ;;  %4600 = vmatmul.mubr.msk.bf16.vlgmr.msra.gmra.mxu0 %vm778_vm1, %v5197_v60  ;;  %v410_v44 = vrot.slane %v409_v63, 4  ;;  %v423_v45 = vor.u32 %v422_v1, %v419_v0  ;;  %v489_v21 = vshrl.u32 %v5195_v59, 16  ;;  %v492_v23 = vshll.u32 %v5195_v59, 16 }
  0x25   : > { %4666 = vmatpush3.bf16.msra.mxu0 %v5055_v7  ;;  %v428_v46 = vrot.slane %v426_v13, 5  ;;  %v438_v36 = vrot.slane %v436_v15, 5  ;;  %v502_v39 = vshrl.u32 %v5200_v4, 16  ;;  %v5224_v29 = vcombine.low %v5195_v59, %v5200_v4  ;;  %v5232_v7 = vld [vmem:[%s5052_s12 + $0x58] sm:$0xf] }
  0x26   : > { %4642 = vmatmul.mubr.msk.bf16.gmra.mxu1 %vm778_vm1, %v5192_v57  ;;  %v415_v40 = vsel %vm5136_vm4, %v410_v44, %v414_v49  ;;  %v424_v43 = vrot.slane %v423_v45, 4  ;;  %v443_v31 = vrot.slane %v441_v62, 4  ;;  %v446_v55 = vrot.slane %v444_v2, 5  ;;  %6580 = vst [vmem:[#allocation5_spill] sm:$0xff] %v5232_v7  ;;  %4941 = vmatprep.subr.msk.bf16.mxu0 %vm827_vm0, %v5209_v16 }
  0x27   : > { %6578 = vst [vmem:[#allocation3_spill] sm:$0xff] %v5224_v29  ;;  %v5236_v63 = vcombine.low %v405_v5, %v415_v40  ;;  %v433_v0 = vor.u32 %v432_v14, %v428_v46  ;;  %4645 = vmatprep.mubr.msk.bf16.mxu1 %vm778_vm1, %v5224_v29  ;;  %v450_v1 = vshll.u32 %v5149_v58, 16  ;;  %v456_v13 = vrot.slane %v454_v6, 4  ;;  %v5250_v40 = vld [vmem:[%s5052_s12 + $0x44] sm:$0x1] }
  0x28   : > { %v429_v62 = vsel %vm5136_vm4, %v424_v43, %v428_v46  ;;  %v447_v2 = vor.u32 %v446_v55, %v443_v31  ;;  %v460_v49 = vshll.u32 %v5216_v35, 16  ;;  %v513_v15 = vshrl.u32 %v5227_v30, 16  ;;  %v5257_v31 = vld [vmem:[%s5052_s12 + $0x60] sm:$0xf] }
  0x29   : > { %6581 = vst [vmem:[#allocation6_spill] sm:$0xff] %v5236_v63  ;;  %4603 = vmatprep.mubr.msk.bf16.mxu0 %vm778_vm1, %v5236_v63  ;;  %v434_v5 = vrot.slane %v433_v0, 4  ;;  %v452_v14 = vrot.slane %v450_v1, 5  ;;  %v516_v44 = vshll.u32 %v5227_v30, 16  ;;  %v526_v45 = vshrl.u32 %v5232_v7, 16  ;;  %6583 = vst [vmem:[#allocation8_spill] sm:$0xff] %v5257_v31 }
  0x2a   : > { %v448_v6 = vrot.slane %v447_v2, 4  ;;  %v462_v61 = vrot.slane %v460_v49, 5  ;;  %v5254_v46 = vcombine.low %v5227_v30, %v5232_v7  ;;  %v467_v43 = vrot.slane %v465_v50, 4 }
  0x2b   : > { %v439_v55 = vsel %vm5136_vm4, %v434_v5, %v438_v36  ;;  %v457_v0 = vor.u32 %v456_v13, %v452_v14  ;;  %v470_v1 = vrot.slane %v468_v52, 5  ;;  %v474_v25 = vshll.u32 %v5177_v38, 16  ;;  %v5274_v5 = vld [vmem:[%s5052_s12 + $0x50] sm:$0x1] }
  0x2c   : > { %6582 = vst [vmem:[#allocation7_spill] sm:$0xff] %v5254_v46  ;;  %v5265_v2 = vcombine.low %v429_v62, %v439_v55  ;;  %v453_v49 = vsel %vm5136_vm4, %v448_v6, %v452_v14  ;;  %v480_v41 = vrot.slane %v478_v56, 4  ;;  %v484_v50 = vshll.u32 %v5250_v40, 16  ;;  %v5285_v55 = vld [vmem:[%s5052_s12 + $0x6c] sm:$0xf] }
  0x2d   : > { %v458_v18 = vrot.slane %v457_v0, 4  ;;  %v471_v36 = vor.u32 %v470_v1, %v467_v43  ;;  %v476_v52 = vrot.slane %v474_v25, 5  ;;  %v537_v13 = vshrl.u32 %v5257_v31, 16  ;;  %6587 = vst [vmem:[#allocation12_spill] sm:$0xff] %v5285_v55 }
  0x2e   : > { %6585 = vst [vmem:[#allocation10_spill] sm:$0xff] %v5265_v2  ;;  %4646 = vmatmul.mubr.msk.bf16.gmra.mxu1 %vm778_vm1, %v5254_v46  ;;  %4604 = vmatmul.mubr.msk.bf16.gmra.mxu0 %vm778_vm1, %v5265_v2  ;;  %v486_v62 = vrot.slane %v484_v50, 5  ;;  %v540_v14 = vshll.u32 %v5257_v31, 16  ;;  %v550_v56 = vshrl.u32 %v5263_v26, 16  ;;  %v5282_v6 = vcombine.low %v5257_v31, %v5263_v26 }
  0x2f   : > { %v463_v25 = vsel %vm5136_vm4, %v458_v18, %v462_v61  ;;  %v472_v43 = vrot.slane %v471_v36, 4  ;;  %v481_v0 = vor.u32 %v480_v41, %v476_v52  ;;  %v491_v1 = vrot.slane %v489_v21, 4 }
  0x30   : > { %6586 = vst [vmem:[#allocation11_spill] sm:$0xff] %v5282_v6  ;;  %v5292_v50 = vcombine.low %v453_v49, %v463_v25  ;;  %4649 = vmatprep.mubr.msk.bf16.mxu1 %vm778_vm1, %v5282_v6  ;;  %v494_v2 = vrot.slane %v492_v23, 5  ;;  %v498_v63 = vshll.u32 %v5200_v4, 16  ;;  %v504_v60 = vrot.slane %v502_v39, 4  ;;  %v5304_v49 = vld [vmem:[%s5052_s12 + $0x5c] sm:$0x1] }
  0x31   : > { %v477_v18 = vsel %vm5136_vm4, %v472_v43, %v476_v52  ;;  %v482_v61 = vrot.slane %v481_v0, 4  ;;  %v508_v41 = vshll.u32 %v5274_v5, 16  ;;  %v561_v21 = vshrl.u32 %v5285_v55, 16  ;;  %6590 = vst [vmem:[#allocation15_spill] sm:$0xff] %v5304_v49  ;;  %v5311_v6 = vld [vmem:[%s5052_s12 + $0x78] sm:$0xf] }
  0x32   : > { %6589 = vst [vmem:[#allocation14_spill] sm:$0xff] %v5292_v50  ;;  %4607 = vmatprep.mubr.msk.bf16.mxu0 %vm778_vm1, %v5292_v50  ;;  %v495_v36 = vor.u32 %v494_v2, %v491_v1  ;;  %v500_v25 = vrot.slane %v498_v63, 5  ;;  %v564_v23 = vshll.u32 %v5285_v55, 16  ;;  %v574_v39 = vshrl.u32 %v5290_v19, 16  ;;  %6591 = vst [vmem:[#allocation16_spill] sm:$0xff] %v5311_v6 }
  0x33   : > { %v487_v52 = vsel %vm5136_vm4, %v482_v61, %v486_v62  ;;  %v510_v43 = vrot.slane %v508_v41, 5  ;;  %v5317_v0 = vcombine.low %v5285_v55, %v5290_v19  ;;  %v515_v46 = vrot.slane %v513_v15, 4  ;;  %v5322_v50 = vld [vmem:[%s5052_s12 + $0x7c] sm:$0xf] }
  0x34   : > { %v5319_v29 = vcombine.low %v477_v18, %v487_v52  ;;  %v496_v2 = vrot.slane %v495_v36, 4  ;;  %v505_v63 = vor.u32 %v504_v60, %v500_v25  ;;  %v518_v1 = vrot.slane %v516_v44, 5  ;;  %6594 = vst [vmem:[#allocation19_spill] sm:$0xff] %v5322_v50  ;;  %v5335_v36 = vld [vmem:[%s5052_s12 + $0x68] sm:$0x1] }
  0x35   : > { %6592 = vst [vmem:[#allocation17_spill] sm:$0xff] %v5317_v0  ;;  %v522_v62 = vshll.u32 %v5232_v7, 16  ;;  %v528_v61 = vrot.slane %v526_v45, 4  ;;  %v532_v41 = vshll.u32 %v5304_v49, 16  ;;  %v585_v55 = vshrl.u32 %v5311_v6, 16  ;;  %6595 = vst [vmem:[#allocation20_spill] sm:$0xff] %v5335_v36 }
  0x36   : > { %6593 = vst [vmem:[#allocation18_spill] sm:$0xff] %v5319_v29  ;;  %4650 = vmatmul.mubr.msk.bf16.gmra.mxu1 %vm778_vm1, %v5317_v0  ;;  %4608 = vmatmul.mubr.msk.bf16.gmra.mxu0 %vm778_vm1, %v5319_v29  ;;  %v501_v60 = vsel %vm5136_vm4, %v496_v2, %v500_v25  ;;  %v506_v15 = vrot.slane %v505_v63, 4  ;;  %v519_v44 = vor.u32 %v518_v1, %v515_v46  ;;  %v588_v18 = vshll.u32 %v5311_v6, 16  ;;  %v5343_v49 = vld [vmem:[%s5052_s12 + $0x84] sm:$0xf] }
  0x37   : > { %v524_v52 = vrot.slane %v522_v62, 5  ;;  %v534_v0 = vrot.slane %v532_v41, 5  ;;  %v598_v45 = vshrl.u32 %v5322_v50, 16  ;;  %v5340_v31 = vcombine.low %v5311_v6, %v5322_v50  ;;  %6597 = vst [vmem:[#allocation22_spill] sm:$0xff] %v5343_v49  ;;  %v5348_v63 = vld [vmem:[%s5052_s12 + $0x88] sm:$0xf] }
  0x38   : > { %v511_v29 = vsel %vm5136_vm4, %v506_v15, %v510_v43  ;;  %v520_v25 = vrot.slane %v519_v44, 4  ;;  %v539_v2 = vrot.slane %v537_v13, 4  ;;  %v542_v46 = vrot.slane %v540_v14, 5  ;;  %6598 = vst [vmem:[#allocation23_spill] sm:$0xff] %v5348_v63  ;;  %v5364_v44 = vld [vmem:[%s5052_s12 + $0x74] sm:$0x1] }
  0x39   : > { %6596 = vst [vmem:[#allocation21_spill] sm:$0xff] %v5340_v31  ;;  %v5350_v1 = vcombine.low %v501_v60, %v511_v29  ;;  %v529_v62 = vor.u32 %v528_v61, %v524_v52  ;;  %4653 = vmatprep.mubr.msk.bf16.mxu1 %vm778_vm1, %v5340_v31  ;;  %v546_v41 = vshll.u32 %v5263_v26, 16  ;;  %v552_v6 = vrot.slane %v550_v56, 4  ;;  %6600 = vst [vmem:[#allocation25_spill] sm:$0xff] %v5364_v44 }
  0x3a   : > { %v525_v7 = vsel %vm5136_vm4, %v520_v25, %v524_v52  ;;  %v543_v43 = vor.u32 %v542_v46, %v539_v2  ;;  %v556_v13 = vshll.u32 %v5335_v36, 16  ;;  %v609_v14 = vshrl.u32 %v5343_v49, 16  ;;  %v5371_v2 = vld [vmem:[%s5052_s12 + $0x90] sm:$0xf]  ;;  %v5377_v36 = vld [vmem:[%s5052_s12 + $0x94] sm:$0xf] }
  0x3b   : > { %6599 = vst [vmem:[#allocation24_spill] sm:$0xff] %v5350_v1  ;;  %4611 = vmatprep.mubr.msk.bf16.mxu0 %vm778_vm1, %v5350_v1  ;;  %v530_v29 = vrot.slane %v529_v62, 4  ;;  %v548_v61 = vrot.slane %v546_v41, 5  ;;  %v612_v60 = vshll.u32 %v5343_v49, 16  ;;  %v622_v15 = vshrl.u32 %v5348_v63, 16  ;;  %6602 = vst [vmem:[#allocation27_spill] sm:$0xff] %v5371_v2 }
  0x3c   : > { %v544_v56 = vrot.slane %v543_v43, 4  ;;  %v558_v31 = vrot.slane %v556_v13, 5  ;;  %v5368_v52 = vcombine.low %v5343_v49, %v5348_v63  ;;  %v563_v25 = vrot.slane %v561_v21, 4 }
  0x3d   : > { %v535_v46 = vsel %vm5136_vm4, %v530_v29, %v534_v0  ;;  %v553_v62 = vor.u32 %v552_v6, %v548_v61  ;;  %v566_v41 = vrot.slane %v564_v23, 5  ;;  %v570_v1 = vshll.u32 %v5290_v19, 16  ;;  %v5388_v19 = vld [vmem:[%s5052_s12 + $0x80] sm:$0x1] }
  0x3e   : > { %6601 = vst [vmem:[#allocation26_spill] sm:$0xff] %v5368_v52  ;;  %v5379_v43 = vcombine.low %v525_v7, %v535_v46  ;;  %v549_v13 = vsel %vm5136_vm4, %v544_v56, %v548_v61  ;;  %4654 = vmatmul.mubr.msk.bf16.gmra.mxu1 %vm778_vm1, %v5368_v52  ;;  %v576_v21 = vrot.slane %v574_v39, 4  ;;  %v580_v49 = vshll.u32 %v5364_v44, 16  ;;  %6604 = vst [vmem:[#allocation29_spill] sm:$0xff] %v5388_v19  ;;  %v5399_v46 = vld [vmem:[%s5052_s12 + $0x9c] sm:$0xf] }
  0x3f   : > { %v554_v0 = vrot.slane %v553_v62, 4  ;;  %v567_v6 = vor.u32 %v566_v41, %v563_v25  ;;  %v572_v23 = vrot.slane %v570_v1, 5  ;;  %v633_v29 = vshrl.u32 %v5371_v2, 16  ;;  %6606 = vst [vmem:[#allocation31_spill] sm:$0xff] %v5399_v46  ;;  %v5404_v52 = vld [vmem:[%s5052_s12 + $0xa0] sm:$0xf] }
  0x40   : > { %6603 = vst [vmem:[#allocation28_spill] sm:$0xff] %v5379_v43  ;;  %4612 = vmatmul.mubr.msk.bf16.gmra.mxu0 %vm778_vm1, %v5379_v43  ;;  %v582_v7 = vrot.slane %v580_v49, 5  ;;  %v636_v61 = vshll.u32 %v5371_v2, 16  ;;  %v646_v56 = vshrl.u32 %v5377_v36, 16  ;;  %v5396_v39 = vcombine.low %v5371_v2, %v5377_v36 }
  0x41   : > { %v559_v1 = vsel %vm5136_vm4, %v554_v0, %v558_v31  ;;  %v568_v25 = vrot.slane %v567_v6, 4  ;;  %v577_v62 = vor.u32 %v576_v21, %v572_v23  ;;  %v587_v41 = vrot.slane %v585_v55, 4  ;;  %v5416_v21 = vld [vmem:[%s5052_s12 + $0x8c] sm:$0x1]  ;;  %v5423_v6 = vld [vmem:[%s5052_s12 + $0xa8] sm:$0xf] }
  0x42   : > { %6605 = vst [vmem:[#allocation30_spill] sm:$0xff] %v5396_v39  ;;  %v5406_v49 = vcombine.low %v549_v13, %v559_v1  ;;  %4657 = vmatprep.mubr.msk.bf16.mxu1 %vm778_vm1, %v5396_v39  ;;  %v590_v43 = vrot.slane %v588_v18, 5  ;;  %v594_v2 = vshll.u32 %v5322_v50, 16  ;;  %v600_v44 = vrot.slane %v598_v45, 4  ;;  %6608 = vst [vmem:[#allocation33_spill] sm:$0xff] %v5416_v21 }
  0x43   : > { %v573_v26 = vsel %vm5136_vm4, %v568_v25, %v572_v23  ;;  %v578_v30 = vrot.slane %v577_v62, 4  ;;  %v604_v31 = vshll.u32 %v5388_v19, 16  ;;  %v657_v55 = vshrl.u32 %v5399_v46, 16  ;;  %6609 = vst [vmem:[#allocation34_spill] sm:$0xff] %v5423_v6 }
  0x44   : > { %6607 = vst [vmem:[#allocation32_spill] sm:$0xff] %v5406_v49  ;;  %4615 = vmatprep.mubr.msk.bf16.mxu0 %vm778_vm1, %v5406_v49  ;;  %v591_v13 = vor.u32 %v590_v43, %v587_v41  ;;  %v596_v0 = vrot.slane %v594_v2, 5  ;;  %v660_v18 = vshll.u32 %v5399_v46, 16  ;;  %v670_v45 = vshrl.u32 %v5404_v52, 16  ;;  %v5434_v49 = vld [vmem:[%s5052_s12 + $0xac] sm:$0xf] }
  0x45   : > { %v583_v23 = vsel %vm5136_vm4, %v578_v30, %v582_v7  ;;  %v606_v1 = vrot.slane %v604_v31, 5  ;;  %v5429_v25 = vcombine.low %v5399_v46, %v5404_v52  ;;  %v611_v62 = vrot.slane %v609_v14, 4 }
  0x46   : > { %v5431_v39 = vcombine.low %v573_v26, %v583_v23  ;;  %v592_v43 = vrot.slane %v591_v13, 4  ;;  %v601_v2 = vor.u32 %v600_v44, %v596_v0  ;;  %v614_v41 = vrot.slane %v612_v60, 5  ;;  %v5447_v13 = vld [vmem:[%s5052_s12 + $0x98] sm:$0x1] }
  0x47   : > { %6610 = vst [vmem:[#allocation35_spill] sm:$0xff] %v5429_v25  ;;  %4658 = vmatmul.mubr.msk.bf16.gmra.mxu1 %vm778_vm1, %v5429_v25  ;;  %v618_v30 = vshll.u32 %v5348_v63, 16  ;;  %v624_v7 = vrot.slane %v622_v15, 4  ;;  %v628_v31 = vshll.u32 %v5416_v21, 16  ;;  %v681_v46 = vshrl.u32 %v5423_v6, 16  ;;  %6612 = vst [vmem:[#allocation37_spill] sm:$0xff] %v5447_v13 }
  0x48   : > { %6611 = vst [vmem:[#allocation36_spill] sm:$0xff] %v5431_v39  ;;  %4616 = vmatmul.mubr.msk.bf16.gmra.mxu0 %vm778_vm1, %v5431_v39  ;;  %v597_v26 = vsel %vm5136_vm4, %v592_v43, %v596_v0  ;;  %v602_v14 = vrot.slane %v601_v2, 4  ;;  %v615_v60 = vor.u32 %v614_v41, %v611_v62  ;;  %v684_v44 = vshll.u32 %v5423_v6, 16  ;;  %v5455_v63 = vld [vmem:[%s5052_s12 + $0xb4] sm:$0xf] }
  0x49   : > { %v620_v23 = vrot.slane %v618_v30, 5  ;;  %v630_v25 = vrot.slane %v628_v31, 5  ;;  %v694_v15 = vshrl.u32 %v5434_v49, 16  ;;  %v5452_v21 = vcombine.low %v5423_v6, %v5434_v49  ;;  %6614 = vst [vmem:[#allocation39_spill] sm:$0xff] %v5455_v63  ;;  %v5460_v41 = vld [vmem:[%s5052_s12 + $0xb8] sm:$0xf] }
  0x4a   : > { %v607_v0 = vsel %vm5136_vm4, %v602_v14, %v606_v1  ;;  %v616_v62 = vrot.slane %v615_v60, 4  ;;  %v635_v43 = vrot.slane %v633_v29, 4  ;;  %v638_v2 = vrot.slane %v636_v61, 5  ;;  %v5476_v60 = vld [vmem:[%s5052_s12 + $0xa4] sm:$0x1] }
  0x4b   : > { %6613 = vst [vmem:[#allocation38_spill] sm:$0xff] %v5452_v21  ;;  %v5462_v30 = vcombine.low %v597_v26, %v607_v0  ;;  %v625_v31 = vor.u32 %v624_v7, %v620_v23  ;;  %4661 = vmatprep.mubr.msk.bf16.mxu1 %vm778_vm1, %v5452_v21  ;;  %v642_v39 = vshll.u32 %v5377_v36, 16  ;;  %v648_v6 = vrot.slane %v646_v56, 4 }
  0x4c   : > { %v621_v19 = vsel %vm5136_vm4, %v616_v62, %v620_v23  ;;  %v639_v50 = vor.u32 %v638_v2, %v635_v43  ;;  %v652_v1 = vshll.u32 %v5447_v13, 16  ;;  %v705_v29 = vshrl.u32 %v5455_v63, 16 }
  0x4d   : > { %6615 = vst [vmem:[#allocation40_spill] sm:$0xff] %v5462_v30  ;;  %4619 = vmatprep.mubr.msk.bf16.mxu0 %vm778_vm1, %v5462_v30  ;;  %v626_v61 = vrot.slane %v625_v31, 4  ;;  %v644_v26 = vrot.slane %v642_v39, 5  ;;  %v708_v7 = vshll.u32 %v5455_v63, 16  ;;  %v718_v14 = vshrl.u32 %v5460_v41, 16 }
  0x4e   : > { %v640_v56 = vrot.slane %v639_v50, 4  ;;  %v654_v0 = vrot.slane %v652_v1, 5  ;;  %v5480_v23 = vcombine.low %v5455_v63, %v5460_v41  ;;  %v659_v62 = vrot.slane %v657_v55, 4  ;;  %v5493_v63 = vld [vmem:[%s5052_s12 + $0xb0] sm:$0x1] }
  0x4f   : > { %v631_v43 = vsel %vm5136_vm4, %v626_v61, %v630_v25  ;;  %v649_v2 = vor.u32 %v648_v6, %v644_v26  ;;  %v662_v31 = vrot.slane %v660_v18, 5  ;;  %v666_v39 = vshll.u32 %v5404_v52, 16 }
  0x50   : > { %v5485_v30 = vcombine.low %v621_v19, %v631_v43  ;;  %v645_v21 = vsel %vm5136_vm4, %v640_v56, %v644_v26  ;;  %4662 = vmatmul.mubr.msk.bf16.gmra.mxu1 %vm778_vm1, %v5480_v23  ;;  %v672_v50 = vrot.slane %v670_v45, 4  ;;  %v676_v1 = vshll.u32 %v5476_v60, 16 }
  0x51   : > { %v650_v55 = vrot.slane %v649_v2, 4  ;;  %v663_v13 = vor.u32 %v662_v31, %v659_v62  ;;  %v668_v6 = vrot.slane %v666_v39, 5  ;;  %4701 = vmatprep.mubr.msk.bf16.mxu1 %vm778_vm1, %v5089_v24  ;;  %v683_v19 = vrot.slane %v681_v46, 4  ;;  %v5506_v46 = vld [vmem:[%s5052_s12 + $0xbc] sm:$0x1] }
  0x52   : > { %6616 = vst [vmem:[#allocation41_spill] sm:$0xff] %v5485_v30  ;;  %4620 = vmatmul.mubr.msk.bf16.gmra.mxu0 %vm778_vm1, %v5485_v30  ;;  %v678_v18 = vrot.slane %v676_v1, 5  ;;  %v686_v25 = vrot.slane %v684_v44, 5  ;;  %v690_v61 = vshll.u32 %v5434_v49, 16  ;;  %v696_v45 = vrot.slane %v694_v15, 4 }
  0x53   : > { %v655_v26 = vsel %vm5136_vm4, %v650_v55, %v654_v0  ;;  %v664_v56 = vrot.slane %v663_v13, 4  ;;  %v673_v43 = vor.u32 %v672_v50, %v668_v6  ;;  %v700_v62 = vshll.u32 %v5493_v63, 16 }
  0x54   : > { %v5503_v2 = vcombine.low %v645_v21, %v655_v26  ;;  %v687_v31 = vor.u32 %v686_v25, %v683_v19  ;;  %v692_v24 = vrot.slane %v690_v61, 5  ;;  %v707_v39 = vrot.slane %v705_v29, 4 }
  0x55   : > { %v6618_v44 = vmov 0  ;;  %v669_v15 = vsel %vm5136_vm4, %v664_v56, %v668_v6  ;;  %v674_v13 = vrot.slane %v673_v43, 4  ;;  %v702_v0 = vrot.slane %v700_v62, 5 }
  0x56   : > { %6617 = vst [vmem:[#allocation42_spill] sm:$0xff] %v5503_v2  ;;  %v6619_v44 = vsel %vm5510_vm7, 4294967295, %v6618_v44  ;;  %v710_v50 = vrot.slane %v708_v7, 5  ;;  %4623 = vmatprep.mubr.msk.bf16.mxu0 %vm778_vm1, %v5503_v2  ;;  %v688_v21 = vrot.slane %v687_v31, 4  ;;  %v697_v1 = vor.u32 %v696_v45, %v692_v24 }
  0x57   : > { %6620 = vst [vmem:[#allocation43_spill] sm:$0xff] %v6619_v44  ;;  %v714_v55 = vshll.u32 %v5460_v41, 16  ;;  %v720_v29 = vrot.slane %v718_v14, 4  ;;  %v679_v19 = vsel %vm5136_vm4, %v674_v13, %v678_v18  ;;  %v724_v61 = vshll.u32 %v5506_v46, 16  ;;  %v5537_v18 = vld [vmem:[%s6493_s1 + $0xe] sm:$0x3] }
  0x58   : > { %v711_v25 = vor.u32 %v710_v50, %v707_v39  ;;  %v6621_v26 = vrot.slane %v5065_v11, 5  ;;  %v6622_v6 = vrot.slane %v5062_v10, 9  ;;  %v5528_v56 = vcombine.low %v669_v15, %v679_v19  ;;  %4702 = vmatmul.mubr.msk.bf16.vlgmr.msra.gmra.mxu1 %vm778_vm1, %v5114_v34 }
  0x59   : > { %v693_v45 = vsel %vm5136_vm4, %v688_v21, %v692_v24  ;;  %v698_v43 = vrot.slane %v697_v1, 4  ;;  %v716_v14 = vrot.slane %v714_v55, 5  ;;  %v726_v10 = vrot.slane %v724_v61, 5  ;;  %4705 = vmatprep.mubr.msk.bf16.mxu1 %vm778_vm1, %v5142_v51  ;;  %4768 = vmatpush3.bf16.msra.mxu1 %v5059_v9 }
  0x5a   : > { %v1306_v7 = vsel %vm5510_vm7, %v6622_v6, %v6621_v26  ;;  %v712_v11 = vrot.slane %v711_v25, 4  ;;  %v6623_v62 = vrot.slane %v5104_v32, 5  ;;  %v6624_v24 = vrot.slane %v5076_v17, 5  ;;  %4624 = vmatmul.mubr.msk.bf16.gmra.mxu0 %vm778_vm1, %v5528_v56  ;;  %4944 = vmatprep.subr.msk.bf16.mxu1 %vm827_vm0, %v5537_v18 }
  0x5b   : > { %v6625_v39 = vrot.slane %v5068_v12, 9  ;;  %v703_v13 = vsel %vm5136_vm4, %v698_v43, %v702_v0  ;;  %v721_v32 = vor.u32 %v720_v29, %v716_v14  ;;  %v6626_v21 = vrot.slane %v5131_v47, 5 }
  0x5c   : > { %v1309_v31 = vsel %vm5510_vm7, %v5098_v28, %v6623_v62  ;;  %v5562_v12 = vcombine.low %v693_v45, %v703_v13  ;;  %v717_v28 = vsel %vm5136_vm4, %v712_v11, %v716_v14  ;;  %v3932_v1 = vrot.slane %v5083_v22, 9 }
  0x5d   : > { %v1313_v15 = vsel %vm5510_vm7, %v6625_v39, %v6624_v24  ;;  %v3947_v50 = vcombine.low %v1306_v7, %v1309_v31  ;;  %v1316_v17 = vsel %vm5510_vm7, %v5110_v33, %v6626_v21  ;;  %v722_v0 = vrot.slane %v721_v32, 4  ;;  %v6628_v31 = vld [vmem:[#allocation4_spill] sm:$0xff]  ;;  %v6630_v32 = vld [vmem:[#allocation15_spill] sm:$0xff] }
  0x5e   : > { %6627 = vst [vmem:[#allocation44_spill] sm:$0xff] %v5562_v12  ;;  %v5566_v9 = vcombine.low %v1313_v15, %v1316_v17  ;;  %v1319_v55 = vrot.slane %v5094_v27, 5  ;;  %v1322_v47 = vrot.slane %v5158_v3, 5  ;;  %v3933_v29 = vrot.slane %v5117_v37, 9  ;;  %4627 = vmatprep.mubr.msk.bf16.mxu0 %vm778_vm1, %v5562_v12  ;;  %v6629_v15 = vld [vmem:[#allocation5_spill] sm:$0xff]  ;;  %v6631_v17 = vld [vmem:[#allocation8_spill] sm:$0xff] }
  0x5f   : > { %v1326_v33 = vrot.slane %v5123_v42, 5  ;;  %v1329_v19 = vrot.slane %v5184_v54, 5  ;;  %v3934_v25 = vrot.slane %v5145_v53, 9  ;;  %v1333_v22 = vrot.slane %v5149_v58, 5 }
  0x60   : > { %v727_v61 = vsel %vm5136_vm4, %v722_v0, %v726_v10  ;;  %v1948_v27 = vsel %vm827_vm0, %v5209_v16, 0  ;;  %v1320_v37 = vsel %vm5510_vm7, %v3932_v1, %v1319_v55  ;;  %v1321_v3 = vrot.slane %v1319_v55, 4  ;;  %4706 = vmatmul.mubr.msk.bf16.gmra.mxu1 %vm778_vm1, %v5163_v8 }
  0x61   : > { %v5586_v26 = vcombine.low %v717_v28, %v727_v61  ;;  %v1327_v42 = vsel %vm5510_vm7, %v3933_v29, %v1326_v33  ;;  %v1328_v54 = vrot.slane %v1326_v33, 4  ;;  %v1336_v53 = vrot.slane %v5216_v35, 5  ;;  %4709 = vmatprep.mubr.msk.bf16.mxu1 %vm778_vm1, %v5192_v57  ;;  %v6633_v29 = vld [vmem:[#allocation20_spill] sm:$0xff] }
  0x62   : > { %v1323_v58 = vsel %vm5510_vm7, %v1321_v3, %v1322_v47  ;;  %v1335_v6 = vrot.slane %v1333_v22, 4  ;;  %v3935_v16 = vrot.slane %v5168_v20, 9  ;;  %v1340_v7 = vrot.slane %v5177_v38, 5  ;;  %v6635_v3 = vld [vmem:[#allocation13_spill] sm:$0xff] }
  0x63   : > { %v1330_v45 = vsel %vm5510_vm7, %v1328_v54, %v1329_v19  ;;  %v1334_v35 = vsel %vm5510_vm7, %v3934_v25, %v1333_v22  ;;  %v1343_v43 = vrot.slane %v5250_v40, 5  ;;  %v3936_v14 = vrot.slane %v5195_v59, 9  ;;  %4628 = vmatmul.mubr.msk.bf16.gmra.mxu0 %vm778_vm1, %v5586_v26  ;;  %v6634_v19 = vld [vmem:[#allocation12_spill] sm:$0xff]  ;;  %v6636_v54 = vld [vmem:[#allocation3_spill] sm:$0xff] }
  0x64   : > { %v5607_v11 = vcombine.low %v1320_v37, %v1323_v58  ;;  %v5609_v20 = vcombine.low %v1327_v42, %v1330_v45  ;;  %v1341_v38 = vsel %vm5510_vm7, %v3935_v16, %v1340_v7  ;;  %v1342_v10 = vrot.slane %v1340_v7, 4  ;;  %4667 = vmatprep.mubr.msk.bf16.mxu0 %vm778_vm1, %v3947_v50  ;;  %v6638_v7 = vld [vmem:[#allocation16_spill] sm:$0xff] }
  0x65   : > { %v1337_v62 = vsel %vm5510_vm7, %v1335_v6, %v1336_v53  ;;  %v1347_v40 = vrot.slane %v5200_v4, 5  ;;  %v1350_v59 = vrot.slane %v5274_v5, 5  ;;  %v3937_v24 = vrot.slane %v6628_v31, 9  ;;  %v6632_v4 = vld [vmem:[#allocation9_spill] sm:$0xff] }
  0x66   : > { %v1344_v39 = vsel %vm5510_vm7, %v1342_v10, %v1343_v43  ;;  %v1354_v13 = vrot.slane %v6629_v15, 5  ;;  %v1357_v21 = vrot.slane %v6630_v32, 5  ;;  %v3938_v28 = vrot.slane %v6631_v17, 9  ;;  %v6637_v6 = vld [vmem:[#allocation25_spill] sm:$0xff]  ;;  %v6639_v43 = vld [vmem:[#allocation7_spill] sm:$0xff]  ;;  %v6644_v32 = vld [vmem:[#allocation22_spill] sm:$0xff] }
  0x67   : > { %v5624_v1 = vcombine.low %v1341_v38, %v1344_v39  ;;  %v1348_v50 = vsel %vm5510_vm7, %v3936_v14, %v1347_v40  ;;  %v1349_v0 = vrot.slane %v1347_v40, 4  ;;  %v1361_v55 = vrot.slane %v6632_v4, 5  ;;  %v6643_v15 = vld [vmem:[#allocation29_spill] sm:$0xff] }
  0x68   : > { %v1355_v5 = vsel %vm5510_vm7, %v3937_v24, %v1354_v13  ;;  %v1356_v47 = vrot.slane %v1354_v13, 4  ;;  %v1364_v33 = vrot.slane %v6633_v29, 5  ;;  %v3939_v25 = vrot.slane %v6634_v19, 9  ;;  %4710 = vmatmul.mubr.msk.bf16.gmra.mxu1 %vm778_vm1, %v6636_v54  ;;  %v6642_v24 = vld [vmem:[#allocation19_spill] sm:$0xff] }
  0x69   : > { %v1351_v22 = vsel %vm5510_vm7, %v1349_v0, %v1350_v59  ;;  %v1362_v61 = vsel %vm5510_vm7, %v3938_v28, %v1361_v55  ;;  %v1363_v37 = vrot.slane %v1361_v55, 4  ;;  %v1368_v42 = vrot.slane %v6635_v3, 5  ;;  %4713 = vmatprep.mubr.msk.bf16.mxu1 %vm778_vm1, %v6639_v43  ;;  %v5657_v59 = vld [vmem:[%s6493_s1 + $0xc] sm:$0x3]  ;;  %v6646_v0 = vld [vmem:[#allocation33_spill] sm:$0xff] }
  0x6a   : > { %v5640_v53 = vcombine.low %v1348_v50, %v1351_v22  ;;  %v1358_v58 = vsel %vm5510_vm7, %v1356_v47, %v1357_v21  ;;  %v1371_v16 = vrot.slane %v6637_v6, 5  ;;  %v3940_v45 = vrot.slane %v6638_v7, 9  ;;  %v6645_v28 = vld [vmem:[#allocation23_spill] sm:$0xff]  ;;  %v5686_v3 = vld [vmem:[%s5052_s12 + $0xc0] sm:$0xf] }
  0x6b   : > { %v5648_v14 = vcombine.low %v1355_v5, %v1358_v58  ;;  %v1365_v38 = vsel %vm5510_vm7, %v1363_v37, %v1364_v33  ;;  %v1369_v10 = vsel %vm5510_vm7, %v3939_v25, %v1368_v42  ;;  %v1370_v40 = vrot.slane %v1368_v42, 4  ;;  %4668 = vmatmul.mubr.msk.bf16.vlgmr.msra.gmra.mxu0 %vm778_vm1, %v5566_v9  ;;  %v6647_v55 = vld [vmem:[#allocation27_spill] sm:$0xff]  ;;  %v5693_v6 = vld [vmem:[%s5052_s12 + $0xc4] sm:$0xf] }
  0x6c   : > { %v5661_v31 = vcombine.low %v1362_v61, %v1365_v38  ;;  %v1375_v39 = vrot.slane %v6642_v24, 5  ;;  %v1378_v13 = vrot.slane %v6643_v15, 5  ;;  %v3941_v21 = vrot.slane %v6644_v32, 9  ;;  %4734 = vmatpush3.bf16.msra.mxu0 %v1948_v27  ;;  %4671 = vmatprep.mubr.msk.bf16.mxu0 %vm778_vm1, %v5607_v11  ;;  %v6649_v61 = vld [vmem:[#allocation37_spill] sm:$0xff]  ;;  %v6651_v38 = vld [vmem:[#allocation11_spill] sm:$0xff] }
  0x6d   : > { %6640 = vst [vmem:[#allocation4_spill] sm:$0xff] %v5648_v14  ;;  %v1372_v17 = vsel %vm5510_vm7, %v1370_v40, %v1371_v16  ;;  %v1382_v50 = vrot.slane %v6645_v28, 5  ;;  %v1385_v4 = vrot.slane %v6646_v0, 5  ;;  %v3942_v5 = vrot.slane %v6647_v55, 9  ;;  %4943 = vmatprep.subr.msk.bf16.mxu0 %vm827_vm0, %v5657_v59  ;;  %v6653_v24 = vld [vmem:[#allocation31_spill] sm:$0xff] }
  0x6e   : > { %6641 = vst [vmem:[#allocation5_spill] sm:$0xff] %v5661_v31  ;;  %v5673_v47 = vcombine.low %v1369_v10, %v1372_v17  ;;  %v1376_v29 = vsel %vm5510_vm7, %v3940_v45, %v1375_v39  ;;  %v1377_v33 = vrot.slane %v1375_v39, 4  ;;  %v1389_v27 = vrot.slane %v5377_v36, 5  ;;  %v6656_v17 = vld [vmem:[#allocation34_spill] sm:$0xff]  ;;  %v6657_v55 = vld [vmem:[#allocation39_spill] sm:$0xff] }
  0x6f   : > { %v5680_v19 = vcombine.low %v1334_v35, %v1337_v62  ;;  %v1383_v25 = vsel %vm5510_vm7, %v3941_v21, %v1382_v50  ;;  %v1384_v22 = vrot.slane %v1382_v50, 4  ;;  %v1392_v37 = vrot.slane %v6649_v61, 5 }
  0x70   : > { %6648 = vst [vmem:[#allocation15_spill] sm:$0xff] %v5673_v47  ;;  %v1379_v42 = vsel %vm5510_vm7, %v1377_v33, %v1378_v13  ;;  %v1390_v58 = vsel %vm5510_vm7, %v3942_v5, %v1389_v27  ;;  %v1391_v36 = vrot.slane %v1389_v27, 4  ;;  %v1916_v35 = vshrl.u32 %v5686_v3, 16  ;;  %4714 = vmatmul.mubr.msk.bf16.gmra.mxu1 %vm778_vm1, %v6651_v38  ;;  %v6654_v13 = vld [vmem:[#allocation17_spill] sm:$0xff] }
  0x71   : > { %v5696_v62 = vcombine.low %v1376_v29, %v1379_v42  ;;  %v1386_v16 = vsel %vm5510_vm7, %v1384_v22, %v1385_v4  ;;  %v1919_v7 = vshll.u32 %v5686_v3, 16  ;;  %v1929_v45 = vshrl.u32 %v5693_v6, 16  ;;  %4717 = vmatprep.mubr.msk.bf16.mxu1 %vm778_vm1, %v6654_v13 }
  0x72   : > { %v5704_v10 = vcombine.low %v1383_v25, %v1386_v16  ;;  %v1393_v40 = vsel %vm5510_vm7, %v1391_v36, %v1392_v37  ;;  %v3943_v39 = vrot.slane %v6653_v24, 9  ;;  %v1396_v15 = vrot.slane %v5404_v52, 5 }
  0x73   : > { %6650 = vst [vmem:[#allocation8_spill] sm:$0xff] %v5696_v62  ;;  %v5712_v32 = vcombine.low %v1390_v58, %v1393_v40  ;;  %v1399_v21 = vrot.slane %v5476_v60, 5  ;;  %v3944_v28 = vrot.slane %v6656_v17, 9  ;;  %v1403_v50 = vrot.slane %v5434_v49, 5  ;;  %4672 = vmatmul.mubr.msk.bf16.gmra.mxu0 %vm778_vm1, %v5609_v20  ;;  %v5742_v58 = vld [vmem:[%s5052_s12 + $0xc8] sm:$0x1] }
  0x74   : > { %6652 = vst [vmem:[#allocation9_spill] sm:$0xff] %v5704_v10  ;;  %v1397_v0 = vsel %vm5510_vm7, %v3943_v39, %v1396_v15  ;;  %v1398_v4 = vrot.slane %v1396_v15, 4  ;;  %v1406_v52 = vrot.slane %v5493_v63, 5  ;;  %v3945_v5 = vrot.slane %v6657_v55, 9  ;;  %4675 = vmatprep.mubr.msk.bf16.mxu0 %vm778_vm1, %v5680_v19  ;;  %v6660_v40 = vld [vmem:[#allocation21_spill] sm:$0xff]  ;;  %v6662_v15 = vld [vmem:[#allocation26_spill] sm:$0xff] }
  0x75   : > { %6655 = vst [vmem:[#allocation20_spill] sm:$0xff] %v5712_v32  ;;  %v1404_v60 = vsel %vm5510_vm7, %v3944_v28, %v1403_v50  ;;  %v1405_v29 = vrot.slane %v1403_v50, 4  ;;  %v1410_v49 = vrot.slane %v5460_v41, 5  ;;  %v1413_v33 = vrot.slane %v5506_v46, 5  ;;  %v6664_v55 = vld [vmem:[#allocation35_spill] sm:$0xff] }
  0x76   : > { %v1400_v27 = vsel %vm5510_vm7, %v1398_v4, %v1399_v21  ;;  %v1918_v42 = vrot.slane %v1916_v35, 4  ;;  %v1921_v46 = vrot.slane %v1919_v7, 5  ;;  %v1925_v36 = vshll.u32 %v5693_v6, 16  ;;  %v6663_v4 = vld [vmem:[#allocation30_spill] sm:$0xff] }
  0x77   : > { %v5731_v25 = vcombine.low %v1397_v0, %v1400_v27  ;;  %v1407_v63 = vsel %vm5510_vm7, %v1405_v29, %v1406_v52  ;;  %v1411_v22 = vsel %vm5510_vm7, %v3945_v5, %v1410_v49  ;;  %v1412_v61 = vrot.slane %v1410_v49, 4  ;;  %v6665_v5 = vld [vmem:[#allocation38_spill] sm:$0xff] }
  0x78   : > { %v5737_v37 = vcombine.low %v1404_v60, %v1407_v63  ;;  %v1931_v16 = vrot.slane %v1929_v45, 4  ;;  %4718 = vmatmul.mubr.msk.bf16.gmra.mxu1 %vm778_vm1, %v6660_v40  ;;  %v1935_v39 = vshll.u32 %v5742_v58, 16  ;;  %v1922_v35 = vor.u32 %v1921_v46, %v1918_v42  ;;  %v3270_v49 = vld [vmem:[%s6494_s2] sm:$0x3]  ;;  %v6672_v42 = vld [vmem:[#allocation28_spill] sm:$0xff] }
  0x79   : > { %6658 = vst [vmem:[#allocation12_spill] sm:$0xff] %v5731_v25  ;;  %v1414_v41 = vsel %vm5510_vm7, %v1412_v61, %v1413_v33  ;;  %4721 = vmatprep.mubr.msk.bf16.mxu1 %vm778_vm1, %v6662_v15  ;;  %v1927_v21 = vrot.slane %v1925_v36, 5  ;;  %v5780_v60 = vcombine.low %v5686_v3, %v5693_v6  ;;  %v2594_v29 = vsel %vm827_vm0, %v5537_v18, 0  ;;  %v6666_v18 = vld [vmem:[#allocation2_spill] sm:$0xff]  ;;  %v4071_v33 = vld [vmem:[%s6493_s1 + $0x10] sm:$0x3] }
  0x7a   : > { %6659 = vst [vmem:[#allocation13_spill] sm:$0xff] %v5737_v37  ;;  %v5747_v24 = vcombine.low %v1411_v22, %v1414_v41  ;;  %v1923_v7 = vrot.slane %v1922_v35, 4  ;;  %v1937_v17 = vrot.slane %v1935_v39, 5  ;;  %v6667_v27 = vld [vmem:[#allocation6_spill] sm:$0xff]  ;;  %v6671_v61 = vld [vmem:[#allocation24_spill] sm:$0xff]  ;;  %v2146_v41 = vrot.slane %v5693_v6, 5 }
  0x7b   : > { %4676 = vmatmul.mubr.msk.bf16.gmra.mxu0 %vm778_vm1, %v5624_v1  ;;  %v1932_v45 = vor.u32 %v1931_v16, %v1927_v21  ;;  %v6668_v63 = vld [vmem:[#allocation10_spill] sm:$0xff]  ;;  %v6673_v46 = vld [vmem:[#allocation32_spill] sm:$0xff]  ;;  %v4015_v16 = vrot.slane %v5686_v3, 9  ;;  %v2149_v35 = vrot.slane %v5742_v58, 5 }
  0x7c   : > { %6661 = vst [vmem:[#allocation3_spill] sm:$0xff] %v5747_v24  ;;  %4679 = vmatprep.mubr.msk.bf16.mxu0 %vm778_vm1, %v5640_v53  ;;  %v1928_v28 = vsel %vm5136_vm4, %v1923_v7, %v1927_v21  ;;  %v6670_v22 = vld [vmem:[#allocation18_spill] sm:$0xff]  ;;  %v6674_v36 = vld [vmem:[#allocation36_spill] sm:$0xff]  ;;  %v2148_v39 = vrot.slane %v2146_v41, 4 }
  0x7d   : > { %v1933_v50 = vrot.slane %v1932_v45, 4  ;;  %v2147_v6 = vsel %vm5510_vm7, %v4015_v16, %v2146_v41  ;;  %v6675_v7 = vld [vmem:[#allocation40_spill] sm:$0xff]  ;;  %v3272_v45 = vsel %vm827_vm0, %v3270_v49, 0 }
  0x7e   : > { %v2150_v21 = vsel %vm5510_vm7, %v2148_v39, %v2149_v35 }
  0x7f   : > { %v1938_v0 = vsel %vm5136_vm4, %v1933_v50, %v1937_v17  ;;  %v5865_v3 = vcombine.low %v2147_v6, %v2150_v21 }
  0x80   : > { %4722 = vmatmul.mubr.msk.bf16.gmra.mxu1 %vm778_vm1, %v6663_v4  ;;  %v5762_v52 = vcombine.low %v1928_v28, %v1938_v0 }
  0x81   : > { %4725 = vmatprep.mubr.msk.bf16.mxu1 %vm778_vm1, %v6664_v55  ;;  %6676 = vst [vmem:[#allocation25_spill] sm:$0xff] %v5865_v3 }
  0x83   : > { %4680 = vmatmul.mubr.msk.bf16.gmra.mxu0 %vm778_vm1, %v5648_v14 }
  0x84   : > { %4683 = vmatprep.mubr.msk.bf16.mxu0 %vm778_vm1, %v5661_v31 }
  0x88   : > { %4726 = vmatmul.mubr.msk.bf16.gmra.mxu1 %vm778_vm1, %v6665_v5 }
  0x89   : > { %4729 = vmatprep.mubr.msk.bf16.mxu1 %vm778_vm1, %v5480_v23 }
  0x8b   : > { %4684 = vmatmul.mubr.msk.bf16.gmra.mxu0 %vm778_vm1, %v5673_v47 }
  0x8c   : > { %4687 = vmatprep.mubr.msk.bf16.mxu0 %vm778_vm1, %v5696_v62 }
  0x90   : > { %4730 = vmatmul.mubr.msk.bf16.gmra.mxu1 %vm778_vm1, %v5780_v60 }
  0x91   : > { %4769 = vmatprep.mubr.msk.bf16.mxu1 %vm778_vm1, %v5566_v9  ;;  %v2366_v9 = vsel %vm827_vm0, %v5657_v59, 0  ;;  %v6669_v59 = vld [vmem:[#allocation14_spill] sm:$0xff] }
  0x93   : > { %4688 = vmatmul.mubr.msk.bf16.gmra.mxu0 %vm778_vm1, %v5704_v10 }
  0x94   : > { %4691 = vmatprep.mubr.msk.bf16.mxu0 %vm778_vm1, %v5712_v32 }
  0x98   : > { %4770 = vmatmul.mubr.msk.bf16.vlgmr.msra.gmra.mxu1 %vm778_vm1, %v5607_v11 }
  0x99   : > { %4773 = vmatprep.mubr.msk.bf16.mxu1 %vm778_vm1, %v5609_v20  ;;  %4836 = vmatpush3.bf16.msra.mxu1 %v2594_v29 }
  0x9a   : > { %4946 = vmatprep.subr.msk.bf16.mxu1 %vm827_vm0, %v3270_v49 }
  0x9b   : > { %4692 = vmatmul.mubr.msk.bf16.gmra.mxu0 %vm778_vm1, %v5731_v25 }
  0x9c   : > { %4695 = vmatprep.mubr.msk.bf16.mxu0 %vm778_vm1, %v5737_v37 }
  0xa0   : > { %4774 = vmatmul.mubr.msk.bf16.gmra.mxu1 %vm778_vm1, %v5680_v19 }
  0xa1   : > { %4777 = vmatprep.mubr.msk.bf16.mxu1 %vm778_vm1, %v5624_v1 }
  0xa3   : > { %4696 = vmatmul.mubr.msk.bf16.gmra.mxu0 %vm778_vm1, %v5747_v24 }
  0xa4   : > { %4735 = vmatprep.mubr.msk.bf16.mxu0 %vm778_vm1, %v6666_v18 }
  0xa8   : > { %4778 = vmatmul.mubr.msk.bf16.gmra.mxu1 %vm778_vm1, %v5640_v53 }
  0xa9   : > { %4781 = vmatprep.mubr.msk.bf16.mxu1 %vm778_vm1, %v5648_v14 }
  0xab   : > { %4736 = vmatmul.mubr.msk.bf16.vlgmr.msra.gmra.mxu0 %vm778_vm1, %v6667_v27 }
  0xac   : > { %4802 = vmatpush3.bf16.msra.mxu0 %v2366_v9  ;;  %4739 = vmatprep.mubr.msk.bf16.mxu0 %vm778_vm1, %v6668_v63 }
  0xad   : > { %4945 = vmatprep.subr.msk.bf16.mxu0 %vm827_vm0, %v4071_v33 }
  0xb0   : > { %4782 = vmatmul.mubr.msk.bf16.gmra.mxu1 %vm778_vm1, %v5661_v31 }
  0xb1   : > { %4785 = vmatprep.mubr.msk.bf16.mxu1 %vm778_vm1, %v5673_v47 }
  0xb3   : > { %4740 = vmatmul.mubr.msk.bf16.gmra.mxu0 %vm778_vm1, %v6669_v59 }
  0xb4   : > { %4743 = vmatprep.mubr.msk.bf16.mxu0 %vm778_vm1, %v6670_v22 }
  0xb8   : > { %4786 = vmatmul.mubr.msk.bf16.gmra.mxu1 %vm778_vm1, %v5696_v62 }
  0xb9   : > { %4789 = vmatprep.mubr.msk.bf16.mxu1 %vm778_vm1, %v5704_v10 }
  0xbb   : > { %4744 = vmatmul.mubr.msk.bf16.gmra.mxu0 %vm778_vm1, %v6671_v61 }
  0xbc   : > { %4747 = vmatprep.mubr.msk.bf16.mxu0 %vm778_vm1, %v6672_v42 }
  0xc0   : > { %4790 = vmatmul.mubr.msk.bf16.gmra.mxu1 %vm778_vm1, %v5712_v32 }
  0xc1   : > { %4793 = vmatprep.mubr.msk.bf16.mxu1 %vm778_vm1, %v5731_v25  ;;  %v5929_v25 = vld [vmem:[%s5052_s12 + $0xd0] sm:$0xf] }
  0xc3   : > { %4748 = vmatmul.mubr.msk.bf16.gmra.mxu0 %vm778_vm1, %v6673_v46 }
  0xc4   : > { %4751 = vmatprep.mubr.msk.bf16.mxu0 %vm778_vm1, %v6674_v36 }
  0xc8   : > { %4794 = vmatmul.mubr.msk.bf16.gmra.mxu1 %vm778_vm1, %v5737_v37 }
  0xc9   : > { %4797 = vmatprep.mubr.msk.bf16.mxu1 %vm778_vm1, %v5747_v24 }
  0xcb   : > { %4752 = vmatmul.mubr.msk.bf16.gmra.mxu0 %vm778_vm1, %v6675_v7 }
  0xcc   : > { %4755 = vmatprep.mubr.msk.bf16.mxu0 %vm778_vm1, %v5485_v30 }
  0xd0   : > { %4798 = vmatmul.mubr.msk.bf16.gmra.mxu1 %vm778_vm1, %v5865_v3 }
  0xd1   : > { %4837 = vmatprep.mubr.msk.bf16.mxu1 %vm778_vm1, %v6667_v27 }
  0xd3   : > { %4756 = vmatmul.mubr.msk.bf16.gmra.mxu0 %vm778_vm1, %v5503_v2 }
  0xd4   : > { %4759 = vmatprep.mubr.msk.bf16.mxu0 %vm778_vm1, %v5528_v56 }
  0xd6   : > { %v4635_v58 = vpop.f32.mrf.mxu1 }
  0xd8   : > { %v1157_v17 = vpop.f32.mrf.mxu1  ;;  %4838 = vmatmul.mubr.msk.bf16.vlgmr.msra.gmra.mxu1 %vm778_vm1, %v6668_v63 }
  0xd9   : > { %4841 = vmatprep.mubr.msk.bf16.mxu1 %vm778_vm1, %v6669_v59  ;;  %4904 = vmatpush3.bf16.msra.mxu1 %v3272_v45  ;;  %v2806_v45 = vsel %vm827_vm0, %v4071_v33, 0 }
  0xda   : > { %v4636_v28 = vpop.f32.mrf.mxu1 }
  0xdb   : > { %4760 = vmatmul.mubr.msk.bf16.gmra.mxu0 %vm778_vm1, %v5562_v12 }
  0xdc   : > { %4763 = vmatprep.mubr.msk.bf16.mxu0 %vm778_vm1, %v5586_v26  ;;  %v1160_v50 = vpop.f32.mrf.mxu1 }
  0xde   : > { %v4639_v0 = vpop.f32.mrf.mxu1 }
  0xe0   : > { %v1173_v29 = vpop.f32.mrf.mxu1  ;;  %4842 = vmatmul.mubr.msk.bf16.gmra.mxu1 %vm778_vm1, %v6670_v22 }
  0xe1   : > { %4845 = vmatprep.mubr.msk.bf16.mxu1 %vm778_vm1, %v6671_v61 }
  0xe2   : > { %v4640_v49 = vpop.f32.mrf.mxu1 }
  0xe3   : > { %4764 = vmatmul.mubr.msk.bf16.gmra.mxu0 %vm778_vm1, %v5762_v52 }
  0xe4   : > { %4803 = vmatprep.mubr.msk.bf16.mxu0 %vm778_vm1, %v5114_v34  ;;  %v1176_v9 = vpop.f32.mrf.mxu1  ;;  %v4601_v41 = vpop.f32.mrf.mxu0 }
  0xe5   : > { %v5892_v16 = vadd.f32 %v4635_v58, %v4601_v41 }
  0xe6   : > { %v4643_v39 = vpop.f32.mrf.mxu1  ;;  %v865_v35 = vpop.f32.mrf.mxu0 }
  0xe7   : > { %v5894_v6 = vadd.f32 %v1157_v17, %v865_v35 }
  0xe8   : > { %v1189_v21 = vpop.f32.mrf.mxu1  ;;  %v4602_v44 = vpop.f32.mrf.mxu0  ;;  %4846 = vmatmul.mubr.msk.bf16.gmra.mxu1 %vm778_vm1, %v6672_v42 }
  0xe9   : > { %v5899_v3 = vadd.f32 %v4636_v28, %v4602_v44  ;;  %4849 = vmatprep.mubr.msk.bf16.mxu1 %vm778_vm1, %v6673_v46 }
  0xea   : > { %v4644_v24 = vpop.f32.mrf.mxu1  ;;  %v868_v34 = vpop.f32.mrf.mxu0 }
  0xeb   : > { %4804 = vmatmul.mubr.msk.bf16.vlgmr.msra.gmra.mxu0 %vm778_vm1, %v5142_v51  ;;  %v5905_v58 = vadd.f32 %v1160_v50, %v868_v34 }
  0xec   : > { %4870 = vmatpush3.bf16.msra.mxu0 %v2806_v45  ;;  %4807 = vmatprep.mubr.msk.bf16.mxu0 %vm778_vm1, %v5163_v8  ;;  %v1192_v33 = vpop.f32.mrf.mxu1 }
  0xee   : > { %v4647_v17 = vpop.f32.mrf.mxu1  ;;  %v4605_v41 = vpop.f32.mrf.mxu0 }
  0xef   : > { %v5909_v44 = vadd.f32 %v4639_v0, %v4605_v41 }
  0xf0   : > { %v1205_v28 = vpop.f32.mrf.mxu1  ;;  %v881_v35 = vpop.f32.mrf.mxu0  ;;  %4850 = vmatmul.mubr.msk.bf16.gmra.mxu1 %vm778_vm1, %v6674_v36 }
  0xf1   : > { %v5913_v51 = vadd.f32 %v1173_v29, %v881_v35  ;;  %4853 = vmatprep.mubr.msk.bf16.mxu1 %vm778_vm1, %v6675_v7  ;;  %v5926_v29 = vld [vmem:[%s5052_s12 + $0xcc] sm:$0xf] }
  0xf2   : > { %v4648_v45 = vpop.f32.mrf.mxu1  ;;  %v4606_v8 = vpop.f32.mrf.mxu0 }
  0xf3   : > { %4808 = vmatmul.mubr.msk.bf16.gmra.mxu0 %vm778_vm1, %v5192_v57  ;;  %v5919_v50 = vadd.f32 %v4640_v49, %v4606_v8  ;;  %v2562_v49 = vshrl.u32 %v5926_v29, 16 }
  0xf4   : > { %4811 = vmatprep.mubr.msk.bf16.mxu0 %vm778_vm1, %v6636_v54  ;;  %v1208_v0 = vpop.f32.mrf.mxu1  ;;  %v884_v34 = vpop.f32.mrf.mxu0 }
  0xf5   : > { %v5923_v41 = vadd.f32 %v1176_v9, %v884_v34  ;;  %v2565_v9 = vshll.u32 %v5926_v29, 16  ;;  %v2571_v34 = vshll.u32 %v5929_v25, 16  ;;  %v2564_v47 = vrot.slane %v2562_v49, 4 }
  0xf6   : > { %v4651_v37 = vpop.f32.mrf.mxu1  ;;  %v4609_v35 = vpop.f32.mrf.mxu0 }
  0xf7   : > { %6677 = vst [vmem:[#allocation16_spill] sm:$0xff] %v5923_v41  ;;  %v5931_v32 = vadd.f32 %v4643_v39, %v4609_v35  ;;  %v2575_v39 = vshrl.u32 %v5929_v25, 16  ;;  %v2573_v31 = vrot.slane %v2571_v34, 5 }
  0xf8   : > { %v1221_v10 = vpop.f32.mrf.mxu1  ;;  %v897_v57 = vpop.f32.mrf.mxu0  ;;  %4854 = vmatmul.mubr.msk.bf16.gmra.mxu1 %vm778_vm1, %v5485_v30  ;;  %v5952_v30 = vld [vmem:[%s5052_s12 + $0xd4] sm:$0x1] }
  0xf9   : > { %6678 = vst [vmem:[#allocation7_spill] sm:$0xff] %v5931_v32  ;;  %v5936_v54 = vadd.f32 %v1189_v21, %v897_v57  ;;  %4857 = vmatprep.mubr.msk.bf16.mxu1 %vm778_vm1, %v5503_v2  ;;  %v2577_v32 = vrot.slane %v2575_v39, 4  ;;  %6680 = vst [vmem:[#allocation29_spill] sm:$0xff] %v5952_v30 }
  0xfa   : > { %v4652_v8 = vpop.f32.mrf.mxu1  ;;  %v4610_v35 = vpop.f32.mrf.mxu0 }
  0xfb   : > { %6679 = vst [vmem:[#allocation19_spill] sm:$0xff] %v5936_v54  ;;  %4812 = vmatmul.mubr.msk.bf16.gmra.mxu0 %vm778_vm1, %v6639_v43  ;;  %v5945_v62 = vadd.f32 %v4644_v24, %v4610_v35  ;;  %v2567_v54 = vrot.slane %v2565_v9, 5  ;;  %v2578_v49 = vor.u32 %v2577_v32, %v2573_v31 }
  0xfc   : > { %4815 = vmatprep.mubr.msk.bf16.mxu0 %vm778_vm1, %v6651_v38  ;;  %v1224_v21 = vpop.f32.mrf.mxu1  ;;  %v900_v57 = vpop.f32.mrf.mxu0 }
  0xfd   : > { %v5949_v2 = vadd.f32 %v1192_v33, %v900_v57  ;;  %v2568_v38 = vor.u32 %v2567_v54, %v2564_v47  ;;  %v2581_v33 = vshll.u32 %v5952_v30, 16 }
  0xfe   : > { %v4655_v14 = vpop.f32.mrf.mxu1 }
  0xff   : > { %v2569_v57 = vrot.slane %v2568_v38, 4  ;;  %v2583_v47 = vrot.slane %v2581_v33, 5 }
 0x100   : > { %v4613_v41 = vpop.f32.mrf.mxu0  ;;  %4858 = vmatmul.mubr.msk.bf16.gmra.mxu1 %vm778_vm1, %v5528_v56  ;;  %v1237_v43 = vpop.f32.mrf.mxu1 }
 0x101   : > { %v5956_v24 = vadd.f32 %v4647_v17, %v4613_v41  ;;  %4861 = vmatprep.mubr.msk.bf16.mxu1 %vm778_vm1, %v5562_v12  ;;  %v2579_v12 = vrot.slane %v2578_v49, 4 }
 0x102   : > { %v913_v9 = vpop.f32.mrf.mxu0  ;;  %v4656_v34 = vpop.f32.mrf.mxu1 }
 0x103   : > { %6681 = vst [vmem:[#allocation22_spill] sm:$0xff] %v5956_v24  ;;  %4816 = vmatmul.mubr.msk.bf16.gmra.mxu0 %vm778_vm1, %v6654_v13  ;;  %v5963_v39 = vadd.f32 %v1205_v28, %v913_v9 }
 0x104   : > { %4819 = vmatprep.mubr.msk.bf16.mxu0 %vm778_vm1, %v6660_v40  ;;  %v4614_v35 = vpop.f32.mrf.mxu0  ;;  %v1240_v17 = vpop.f32.mrf.mxu1  ;;  %v2574_v40 = vsel %vm5136_vm4, %v2569_v57, %v2573_v31 }
 0x105   : > { %v5967_v41 = vadd.f32 %v4648_v45, %v4614_v35  ;;  %v2584_v45 = vsel %vm5136_vm4, %v2579_v12, %v2583_v47 }
 0x106   : > { %v916_v32 = vpop.f32.mrf.mxu0  ;;  %v4053_v49 = vcombine.low %v2574_v40, %v2584_v45 }
 0x107   : > { %v5969_v54 = vadd.f32 %v1208_v0, %v916_v32  ;;  %v4659_v30 = vpop.f32.mrf.mxu1 }
 0x108   : > { %v4617_v24 = vpop.f32.mrf.mxu0  ;;  %4862 = vmatmul.mubr.msk.bf16.gmra.mxu1 %vm778_vm1, %v5586_v26 }
 0x109   : > { %v5973_v13 = vadd.f32 %v4651_v37, %v4617_v24  ;;  %v1253_v28 = vpop.f32.mrf.mxu1  ;;  %4865 = vmatprep.mubr.msk.bf16.mxu1 %vm778_vm1, %v5762_v52 }
 0x10a   : > { %v929_v0 = vpop.f32.mrf.mxu0 }
 0x10b   : > { %4820 = vmatmul.mubr.msk.bf16.gmra.mxu0 %vm778_vm1, %v6662_v15  ;;  %v5983_v38 = vadd.f32 %v1221_v10, %v929_v0  ;;  %v4660_v37 = vpop.f32.mrf.mxu1 }
 0x10c   : > { %4823 = vmatprep.mubr.msk.bf16.mxu0 %vm778_vm1, %v6663_v4  ;;  %v4618_v24 = vpop.f32.mrf.mxu0 }
 0x10d   : > { %v5987_v33 = vadd.f32 %v4652_v8, %v4618_v24  ;;  %v1256_v9 = vpop.f32.mrf.mxu1 }
 0x10e   : > { %v932_v35 = vpop.f32.mrf.mxu0 }
 0x10f   : > { %v5989_v31 = vadd.f32 %v1224_v21, %v932_v35 }
 0x110   : > { %v4663_v48 = vpop.f32.mrf.mxu1  ;;  %4866 = vmatmul.mubr.msk.bf16.gmra.mxu1 %vm778_vm1, %v4053_v49 }
 0x111   : > { %4905 = vmatprep.mubr.msk.bf16.mxu1 %vm778_vm1, %v6666_v18 }
 0x112   : > { %v4621_v12 = vpop.f32.mrf.mxu0  ;;  %v1269_v10 = vpop.f32.mrf.mxu1 }
 0x113   : > { %4824 = vmatmul.mubr.msk.bf16.gmra.mxu0 %vm778_vm1, %v6664_v55  ;;  %v5996_v15 = vadd.f32 %v4655_v14, %v4621_v12 }
 0x114   : > { %4827 = vmatprep.mubr.msk.bf16.mxu0 %vm778_vm1, %v6665_v5  ;;  %v945_v4 = vpop.f32.mrf.mxu0  ;;  %v4664_v8 = vpop.f32.mrf.mxu1 }
 0x115   : > { %v6000_v21 = vadd.f32 %v1237_v43, %v945_v4 }
 0x116   : > { %v4622_v57 = vpop.f32.mrf.mxu0  ;;  %v1272_v47 = vpop.f32.mrf.mxu1 }
 0x117   : > { %v6002_v32 = vadd.f32 %v4656_v34, %v4622_v57 }
 0x118   : > { %v948_v40 = vpop.f32.mrf.mxu0  ;;  %v4703_v18 = vpop.f32.mrf.mxu1  ;;  %4906 = vmatmul.mubr.msk.bf16.vlgmr.msra.gmra.mxu1 %vm778_vm1, %v6667_v27 }
 0x119   : > { %v6006_v55 = vadd.f32 %v1240_v17, %v948_v40  ;;  %4909 = vmatprep.mubr.msk.bf16.mxu1 %vm778_vm1, %v6668_v63  ;;  %v4035_v17 = vcombine.low %v5926_v29, %v5929_v25 }
 0x11a   : > { %v4625_v14 = vpop.f32.mrf.mxu0  ;;  %v1756_v5 = vpop.f32.mrf.mxu1 }
 0x11b   : > { %4828 = vmatmul.mubr.msk.bf16.gmra.mxu0 %vm778_vm1, %v5480_v23  ;;  %v6012_v43 = vadd.f32 %v4659_v30, %v4625_v14 }
 0x11c   : > { %4831 = vmatprep.mubr.msk.bf16.mxu0 %vm778_vm1, %v5780_v60  ;;  %v961_v34 = vpop.f32.mrf.mxu0  ;;  %v4704_v45 = vpop.f32.mrf.mxu1 }
 0x11d   : > { %v6016_v0 = vadd.f32 %v1253_v28, %v961_v34 }
 0x11e   : > { %v4626_v27 = vpop.f32.mrf.mxu0  ;;  %v1759_v24 = vpop.f32.mrf.mxu1 }
 0x11f   : > { %v6020_v63 = vadd.f32 %v4660_v37, %v4626_v27 }
 0x120   : > { %v964_v49 = vpop.f32.mrf.mxu0  ;;  %v4707_v35 = vpop.f32.mrf.mxu1  ;;  %4910 = vmatmul.mubr.msk.bf16.gmra.mxu1 %vm778_vm1, %v6669_v59 }
 0x121   : > { %v6024_v30 = vadd.f32 %v1256_v9, %v964_v49  ;;  %4913 = vmatprep.mubr.msk.bf16.mxu1 %vm778_vm1, %v6670_v22 }
 0x122   : > { %v1772_v60 = vpop.f32.mrf.mxu1 }
 0x123   : > { %v4629_v23 = vpop.f32.mrf.mxu0  ;;  %4832 = vmatmul.mubr.msk.bf16.gmra.mxu0 %vm778_vm1, %v4035_v17 }
 0x124   : > { %v6029_v28 = vadd.f32 %v4663_v48, %v4629_v23  ;;  %4871 = vmatprep.mubr.msk.bf16.mxu0 %vm778_vm1, %v5607_v11  ;;  %v4708_v12 = vpop.f32.mrf.mxu1 }
 0x125   : > { %v977_v37 = vpop.f32.mrf.mxu0 }
 0x126   : > { %v6033_v4 = vadd.f32 %v1269_v10, %v977_v37  ;;  %v1775_v59 = vpop.f32.mrf.mxu1 }
 0x127   : > { %v4630_v57 = vpop.f32.mrf.mxu0 }
 0x128   : > { %v6035_v9 = vadd.f32 %v4664_v8, %v4630_v57  ;;  %v4711_v14 = vpop.f32.mrf.mxu1  ;;  %4914 = vmatmul.mubr.msk.bf16.gmra.mxu1 %vm778_vm1, %v6671_v61 }
 0x129   : > { %v980_v40 = vpop.f32.mrf.mxu0  ;;  %4917 = vmatprep.mubr.msk.bf16.mxu1 %vm778_vm1, %v6672_v42 }
 0x12a   : > { %v6039_v22 = vadd.f32 %v1272_v47, %v980_v40  ;;  %v1788_v11 = vpop.f32.mrf.mxu1 }
 0x12b   : > { %v4669_v48 = vpop.f32.mrf.mxu0  ;;  %4872 = vmatmul.mubr.msk.bf16.vlgmr.msra.gmra.mxu0 %vm778_vm1, %v5609_v20 }
 0x12c   : > { %v1679_v10 = vadd.f32 %v4669_v48, %v5892_v16  ;;  %4875 = vmatprep.mubr.msk.bf16.mxu0 %vm778_vm1, %v5680_v19  ;;  %v4712_v34 = vpop.f32.mrf.mxu1 }
 0x12d   : > { %v1550_v8 = vpop.f32.mrf.mxu0 }
 0x12e   : > { %v1677_v27 = vadd.f32 %v1550_v8, %v5894_v6  ;;  %v6049_v61 = vadd.f32 %v4703_v18, %v1679_v10  ;;  %v1791_v17 = vpop.f32.mrf.mxu1 }
 0x12f   : > { %v4670_v47 = vpop.f32.mrf.mxu0 }
 0x130   : > { %v1680_v42 = vadd.f32 %v4670_v47, %v5899_v3  ;;  %v6052_v49 = vadd.f32 %v1756_v5, %v1677_v27  ;;  %v4715_v20 = vpop.f32.mrf.mxu1  ;;  %4918 = vmatmul.mubr.msk.bf16.gmra.mxu1 %vm778_vm1, %v6673_v46  ;;  %v6686_v47 = vld [vmem:[#allocation5_spill] sm:$0xff] }
 0x131   : > { %v1553_v23 = vpop.f32.mrf.mxu0  ;;  %4921 = vmatprep.mubr.msk.bf16.mxu1 %vm778_vm1, %v6674_v36 }
 0x132   : > { %v1678_v16 = vadd.f32 %v1553_v23, %v5905_v58  ;;  %v6059_v19 = vadd.f32 %v4704_v45, %v1680_v42  ;;  %v1804_v18 = vpop.f32.mrf.mxu1 }
 0x133   : > { %v4673_v6 = vpop.f32.mrf.mxu0  ;;  %4876 = vmatmul.mubr.msk.bf16.gmra.mxu0 %vm778_vm1, %v5624_v1 }
 0x134   : > { %v1683_v3 = vadd.f32 %v4673_v6, %v5909_v44  ;;  %4879 = vmatprep.mubr.msk.bf16.mxu0 %vm778_vm1, %v5640_v53  ;;  %v6066_v5 = vadd.f32 %v1759_v24, %v1678_v16  ;;  %v4716_v37 = vpop.f32.mrf.mxu1  ;;  %v6682_v53 = vld [vmem:[#allocation16_spill] sm:$0xff]  ;;  %v6683_v24 = vld [vmem:[#allocation41_spill] sm:$0xff]  ;;  %v6687_v16 = vld [vmem:[#allocation19_spill] sm:$0xff] }
 0x135   : > { %v1566_v46 = vpop.f32.mrf.mxu0 }
 0x136   : > { %v1681_v58 = vadd.f32 %v1566_v46, %v5913_v51  ;;  %v6069_v57 = vadd.f32 %v4707_v35, %v1683_v3  ;;  %v1807_v45 = vpop.f32.mrf.mxu1  ;;  %v6684_v35 = vld [vmem:[#allocation4_spill] sm:$0xff] }
 0x137   : > { %v4674_v36 = vpop.f32.mrf.mxu0 }
 0x138   : > { %v1684_v40 = vadd.f32 %v4674_v36, %v5919_v50  ;;  %v6072_v48 = vadd.f32 %v1772_v60, %v1681_v58  ;;  %v4719_v10 = vpop.f32.mrf.mxu1  ;;  %4922 = vmatmul.mubr.msk.bf16.gmra.mxu1 %vm778_vm1, %v6675_v7  ;;  %v6685_v50 = vld [vmem:[#allocation7_spill] sm:$0xff] }
 0x139   : > { %v1569_v1 = vpop.f32.mrf.mxu0  ;;  %4925 = vmatprep.mubr.msk.bf16.mxu1 %vm778_vm1, %v6683_v24  ;;  %v6689_v24 = vld [vmem:[#allocation15_spill] sm:$0xff] }
 0x13a   : > { %v1682_v44 = vadd.f32 %v1569_v1, %v6682_v53  ;;  %v6079_v8 = vadd.f32 %v4708_v12, %v1684_v40  ;;  %v1820_v27 = vpop.f32.mrf.mxu1  ;;  %v6688_v53 = vld [vmem:[#allocation42_spill] sm:$0xff] }
 0x13b   : > { %v4677_v51 = vpop.f32.mrf.mxu0  ;;  %4880 = vmatmul.mubr.msk.bf16.gmra.mxu0 %vm778_vm1, %v6684_v35  ;;  %v6691_v35 = vld [vmem:[#allocation8_spill] sm:$0xff] }
 0x13c   : > { %v1687_v60 = vadd.f32 %v4677_v51, %v6685_v50  ;;  %4883 = vmatprep.mubr.msk.bf16.mxu0 %vm778_vm1, %v6686_v47  ;;  %v6086_v42 = vadd.f32 %v1775_v59, %v1682_v44  ;;  %v4720_v23 = vpop.f32.mrf.mxu1 }
 0x13d   : > { %v1582_v7 = vpop.f32.mrf.mxu0 }
 0x13e   : > { %v1685_v6 = vadd.f32 %v1582_v7, %v6687_v16  ;;  %v6089_v3 = vadd.f32 %v4711_v14, %v1687_v60  ;;  %v1823_v46 = vpop.f32.mrf.mxu1 }
 0x13f   : > { %v4678_v12 = vpop.f32.mrf.mxu0 }
 0x140   : > { %v1688_v58 = vadd.f32 %v4678_v12, %v5945_v62  ;;  %v6092_v36 = vadd.f32 %v1788_v11, %v1685_v6  ;;  %v4723_v1 = vpop.f32.mrf.mxu1  ;;  %4926 = vmatmul.mubr.msk.bf16.gmra.mxu1 %vm778_vm1, %v6688_v53  ;;  %v6690_v62 = vld [vmem:[#allocation22_spill] sm:$0xff] }
 0x141   : > { %v1585_v40 = vpop.f32.mrf.mxu0  ;;  %4929 = vmatprep.mubr.msk.bf16.mxu1 %vm778_vm1, %v5528_v56 }
 0x142   : > { %v1686_v59 = vadd.f32 %v1585_v40, %v5949_v2  ;;  %v6099_v44 = vadd.f32 %v4712_v34, %v1688_v58  ;;  %v1836_v51 = vpop.f32.mrf.mxu1  ;;  %v6692_v40 = vld [vmem:[#allocation44_spill] sm:$0xff] }
 0x143   : > { %v4681_v14 = vpop.f32.mrf.mxu0  ;;  %4884 = vmatmul.mubr.msk.bf16.gmra.mxu0 %vm778_vm1, %v6689_v24 }
 0x144   : > { %v1691_v11 = vadd.f32 %v4681_v14, %v6690_v62  ;;  %4887 = vmatprep.mubr.msk.bf16.mxu0 %vm778_vm1, %v6691_v35  ;;  %v6106_v50 = vadd.f32 %v1791_v17, %v1686_v59  ;;  %v4724_v47 = vpop.f32.mrf.mxu1 }
 0x145   : > { %v1598_v60 = vpop.f32.mrf.mxu0 }
 0x146   : > { %v1689_v2 = vadd.f32 %v1598_v60, %v5963_v39  ;;  %v6109_v7 = vadd.f32 %v4715_v20, %v1691_v11  ;;  %v1839_v34 = vpop.f32.mrf.mxu1  ;;  %v6693_v20 = vld [vmem:[#allocation9_spill] sm:$0xff] }
 0x147   : > { %v4682_v56 = vpop.f32.mrf.mxu0 }
 0x148   : > { %v1692_v16 = vadd.f32 %v4682_v56, %v5967_v41  ;;  %v6112_v6 = vadd.f32 %v1804_v18, %v1689_v2  ;;  %v4727_v58 = vpop.f32.mrf.mxu1  ;;  %4930 = vmatmul.mubr.msk.bf16.gmra.mxu1 %vm778_vm1, %v6692_v40  ;;  %v6694_v18 = vld [vmem:[#allocation20_spill] sm:$0xff]  ;;  %v6696_v40 = vld [vmem:[#allocation13_spill] sm:$0xff] }
 0x149   : > { %v1601_v12 = vpop.f32.mrf.mxu0  ;;  %4933 = vmatprep.mubr.msk.bf16.mxu1 %vm778_vm1, %v5586_v26 }
 0x14a   : > { %v1690_v17 = vadd.f32 %v1601_v12, %v5969_v54  ;;  %v6119_v53 = vadd.f32 %v4716_v37, %v1692_v16  ;;  %v1852_v59 = vpop.f32.mrf.mxu1  ;;  %v6695_v12 = vld [vmem:[#allocation12_spill] sm:$0xff] }
 0x14b   : > { %v4685_v39 = vpop.f32.mrf.mxu0  ;;  %4888 = vmatmul.mubr.msk.bf16.gmra.mxu0 %vm778_vm1, %v6693_v20 }
 0x14c   : > { %v1695_v41 = vadd.f32 %v4685_v39, %v5973_v13  ;;  %4891 = vmatprep.mubr.msk.bf16.mxu0 %vm778_vm1, %v6694_v18  ;;  %v6126_v14 = vadd.f32 %v1807_v45, %v1690_v17  ;;  %v4728_v62 = vpop.f32.mrf.mxu1 }
 0x14d   : > { %v1614_v24 = vpop.f32.mrf.mxu0 }
 0x14e   : > { %v1693_v54 = vadd.f32 %v1614_v24, %v5983_v38  ;;  %v6129_v11 = vadd.f32 %v4719_v10, %v1695_v41  ;;  %v1855_v37 = vpop.f32.mrf.mxu1  ;;  %v4070_v41 = vrot.slane %v5926_v29, 9  ;;  %v6697_v24 = vld [vmem:[#allocation29_spill] sm:$0xff] }
 0x14f   : > { %v4686_v26 = vpop.f32.mrf.mxu0 }
 0x150   : > { %v1696_v35 = vadd.f32 %v4686_v26, %v5987_v33  ;;  %v6132_v60 = vadd.f32 %v1820_v27, %v1693_v54  ;;  %v4731_v56 = vpop.f32.mrf.mxu1  ;;  %4934 = vmatmul.mubr.msk.bf16.gmra.mxu1 %vm778_vm1, %v5762_v52  ;;  %v2792_v33 = vrot.slane %v5929_v25, 5  ;;  %v2795_v54 = vrot.slane %v6697_v24, 5 }
 0x151   : > { %v1617_v2 = vpop.f32.mrf.mxu0 }
 0x152   : > { %v1694_v13 = vadd.f32 %v1617_v2, %v5989_v31  ;;  %v6137_v45 = vadd.f32 %v4720_v23, %v1696_v35  ;;  %v1868_v38 = vpop.f32.mrf.mxu1 }
 0x153   : > { %v4689_v16 = vpop.f32.mrf.mxu0  ;;  %4892 = vmatmul.mubr.msk.bf16.gmra.mxu0 %vm778_vm1, %v6695_v12 }
 0x154   : > { %v1699_v10 = vadd.f32 %v4689_v16, %v5996_v15  ;;  %4895 = vmatprep.mubr.msk.bf16.mxu0 %vm778_vm1, %v6696_v40  ;;  %v6145_v27 = vadd.f32 %v1823_v46, %v1694_v13  ;;  %v4732_v52 = vpop.f32.mrf.mxu1  ;;  %v2794_v15 = vrot.slane %v2792_v33, 4  ;;  %v6699_v16 = vld [vmem:[#allocation25_spill] sm:$0xff] }
 0x155   : > { %v1630_v17 = vpop.f32.mrf.mxu0 }
 0x156   : > { %v1697_v31 = vadd.f32 %v1630_v17, %v6000_v21  ;;  %v6148_v23 = vadd.f32 %v4723_v1, %v1699_v10  ;;  %v1871_v20 = vpop.f32.mrf.mxu1  ;;  %v6698_v1 = vld [vmem:[#allocation3_spill] sm:$0xff]  ;;  %v2796_v12 = vsel %vm5510_vm7, %v2794_v15, %v2795_v54 }
 0x157   : > { %v4690_v39 = vpop.f32.mrf.mxu0 }
 0x158   : > { %v1700_v18 = vadd.f32 %v4690_v39, %v6002_v32  ;;  %v6153_v26 = vadd.f32 %v1836_v51, %v1697_v31  ;;  %v4771_v46 = vpop.f32.mrf.mxu1  ;;  %v2793_v51 = vsel %vm5510_vm7, %v4070_v41, %v2792_v33 }
 0x159   : > { %v1633_v25 = vpop.f32.mrf.mxu0  ;;  %v4072_v39 = vcombine.low %v2793_v51, %v2796_v12 }
 0x15a   : > { %v1698_v35 = vadd.f32 %v1633_v25, %v6006_v55  ;;  %v6156_v2 = vadd.f32 %v4724_v47, %v1700_v18  ;;  %v2196_v13 = vpop.f32.mrf.mxu1 }
 0x15b   : > { %v4693_v21 = vpop.f32.mrf.mxu0  ;;  %4896 = vmatmul.mubr.msk.bf16.gmra.mxu0 %vm778_vm1, %v6698_v1 }
 0x15c   : > { %v1703_v29 = vadd.f32 %v4693_v21, %v6012_v43  ;;  %4899 = vmatprep.mubr.msk.bf16.mxu0 %vm778_vm1, %v6699_v16  ;;  %v6167_v10 = vadd.f32 %v1839_v34, %v1698_v35  ;;  %v4772_v47 = vpop.f32.mrf.mxu1 }
 0x15d   : > { %v1646_v55 = vpop.f32.mrf.mxu0 }
 0x15e   : > { %v1701_v40 = vadd.f32 %v1646_v55, %v6016_v0  ;;  %v6170_v17 = vadd.f32 %v4727_v58, %v1703_v29  ;;  %v2199_v43 = vpop.f32.mrf.mxu1 }
 0x15f   : > { %v4694_v31 = vpop.f32.mrf.mxu0 }
 0x160   : > { %v1704_v18 = vadd.f32 %v4694_v31, %v6020_v63  ;;  %v6173_v24 = vadd.f32 %v1852_v59, %v1701_v40  ;;  %v4775_v33 = vpop.f32.mrf.mxu1 }
 0x161   : > { %v1649_v25 = vpop.f32.mrf.mxu0 }
 0x162   : > { %v1702_v41 = vadd.f32 %v1649_v25, %v6024_v30  ;;  %v6176_v15 = vadd.f32 %v4728_v62, %v1704_v18  ;;  %v2212_v54 = vpop.f32.mrf.mxu1 }
 0x163   : > { %v4697_v34 = vpop.f32.mrf.mxu0  ;;  %4900 = vmatmul.mubr.msk.bf16.gmra.mxu0 %vm778_vm1, %v4072_v39 }
 0x164   : > { %v1707_v0 = vadd.f32 %v4697_v34, %v6029_v28  ;;  %v6180_v58 = vadd.f32 %v1855_v37, %v1702_v41  ;;  %v4776_v21 = vpop.f32.mrf.mxu1 }
 0x165   : > { %v1662_v35 = vpop.f32.mrf.mxu0 }
 0x166   : > { %v1705_v63 = vadd.f32 %v1662_v35, %v6033_v4  ;;  %v6183_v59 = vadd.f32 %v4731_v56, %v1707_v0  ;;  %v2215_v29 = vpop.f32.mrf.mxu1 }
 0x167   : > { %v4698_v1 = vpop.f32.mrf.mxu0 }
 0x168   : > { %v1708_v30 = vadd.f32 %v4698_v1, %v6035_v9  ;;  %v6186_v62 = vadd.f32 %v1868_v38, %v1705_v63  ;;  %v4779_v32 = vpop.f32.mrf.mxu1 }
 0x169   : > { %v1665_v16 = vpop.f32.mrf.mxu0 }
 0x16a   : > { %v1706_v51 = vadd.f32 %v1665_v16, %v6039_v22  ;;  %v6189_v12 = vadd.f32 %v4732_v52, %v1708_v30  ;;  %v2228_v37 = vpop.f32.mrf.mxu1 }
 0x16b   : > { %v4737_v28 = vpop.f32.mrf.mxu0 }
 0x16c   : > { %v2113_v55 = vadd.f32 %v4737_v28, %v6049_v61  ;;  %v6192_v40 = vadd.f32 %v1871_v20, %v1706_v51  ;;  %v4780_v56 = vpop.f32.mrf.mxu1 }
 0x16d   : > { %v1984_v4 = vpop.f32.mrf.mxu0 }
 0x16e   : > { %v2111_v31 = vadd.f32 %v1984_v4, %v6052_v49  ;;  %v6195_v39 = vadd.f32 %v4771_v46, %v2113_v55  ;;  %v2231_v38 = vpop.f32.mrf.mxu1 }
 0x16f   : > { %v4738_v9 = vpop.f32.mrf.mxu0 }
 0x170   : > { %v2114_v18 = vadd.f32 %v4738_v9, %v6059_v19  ;;  %v6198_v25 = vadd.f32 %v2196_v13, %v2111_v31  ;;  %v4783_v52 = vpop.f32.mrf.mxu1 }
 0x171   : > { %v1987_v22 = vpop.f32.mrf.mxu0 }
 0x172   : > { %v2112_v41 = vadd.f32 %v1987_v22, %v6066_v5  ;;  %v6201_v34 = vadd.f32 %v4772_v47, %v2114_v18  ;;  %v2244_v20 = vpop.f32.mrf.mxu1 }
 0x173   : > { %v4741_v61 = vpop.f32.mrf.mxu0 }
 0x174   : > { %v2117_v0 = vadd.f32 %v4741_v61, %v6069_v57  ;;  %v6204_v35 = vadd.f32 %v2199_v43, %v2112_v41  ;;  %v4784_v46 = vpop.f32.mrf.mxu1 }
 0x175   : > { %v2000_v49 = vpop.f32.mrf.mxu0 }
 0x176   : > { %v2115_v63 = vadd.f32 %v2000_v49, %v6072_v48  ;;  %v6207_v1 = vadd.f32 %v4775_v33, %v2117_v0  ;;  %v2247_v13 = vpop.f32.mrf.mxu1 }
 0x177   : > { %v4742_v19 = vpop.f32.mrf.mxu0 }
 0x178   : > { %v2118_v30 = vadd.f32 %v4742_v19, %v6079_v8  ;;  %v6210_v16 = vadd.f32 %v2212_v54, %v2115_v63  ;;  %v4787_v47 = vpop.f32.mrf.mxu1 }
 0x179   : > { %v2003_v5 = vpop.f32.mrf.mxu0 }
 0x17a   : > { %v2116_v51 = vadd.f32 %v2003_v5, %v6086_v42  ;;  %v6213_v28 = vadd.f32 %v4776_v21, %v2118_v30  ;;  %v2260_v43 = vpop.f32.mrf.mxu1 }
 0x17b   : > { %v4745_v57 = vpop.f32.mrf.mxu0 }
 0x17c   : > { %v2121_v55 = vadd.f32 %v4745_v57, %v6089_v3  ;;  %v6216_v4 = vadd.f32 %v2215_v29, %v2116_v51  ;;  %v4788_v33 = vpop.f32.mrf.mxu1 }
 0x17d   : > { %v2016_v48 = vpop.f32.mrf.mxu0 }
 0x17e   : > { %v2119_v31 = vadd.f32 %v2016_v48, %v6092_v36  ;;  %v6219_v9 = vadd.f32 %v4779_v32, %v2121_v55  ;;  %v2263_v54 = vpop.f32.mrf.mxu1 }
 0x17f   : > { %v4746_v8 = vpop.f32.mrf.mxu0 }
 0x180   : > { %v2122_v18 = vadd.f32 %v4746_v8, %v6099_v44  ;;  %v6222_v22 = vadd.f32 %v2228_v37, %v2119_v31  ;;  %v4791_v21 = vpop.f32.mrf.mxu1 }
 0x181   : > { %v2019_v42 = vpop.f32.mrf.mxu0 }
 0x182   : > { %v2120_v41 = vadd.f32 %v2019_v42, %v6106_v50  ;;  %v6225_v61 = vadd.f32 %v4780_v56, %v2122_v18  ;;  %v2276_v29 = vpop.f32.mrf.mxu1 }
 0x183   : > { %v4749_v3 = vpop.f32.mrf.mxu0 }
 0x184   : > { %v2125_v0 = vadd.f32 %v4749_v3, %v6109_v7  ;;  %v6228_v49 = vadd.f32 %v2231_v38, %v2120_v41  ;;  %v4792_v32 = vpop.f32.mrf.mxu1 }
 0x185   : > { %v2032_v36 = vpop.f32.mrf.mxu0 }
 0x186   : > { %v2123_v63 = vadd.f32 %v2032_v36, %v6112_v6  ;;  %v6231_v19 = vadd.f32 %v4783_v52, %v2125_v0  ;;  %v2279_v37 = vpop.f32.mrf.mxu1 }
 0x187   : > { %v4750_v44 = vpop.f32.mrf.mxu0 }
 0x188   : > { %v2126_v30 = vadd.f32 %v4750_v44, %v6119_v53  ;;  %v6234_v5 = vadd.f32 %v2244_v20, %v2123_v63  ;;  %v4795_v56 = vpop.f32.mrf.mxu1 }
 0x189   : > { %v2035_v50 = vpop.f32.mrf.mxu0 }
 0x18a   : > { %v2124_v51 = vadd.f32 %v2035_v50, %v6126_v14  ;;  %v6237_v57 = vadd.f32 %v4784_v46, %v2126_v30  ;;  %v2292_v38 = vpop.f32.mrf.mxu1 }
 0x18b   : > { %v4753_v7 = vpop.f32.mrf.mxu0 }
 0x18c   : > { %v2129_v55 = vadd.f32 %v4753_v7, %v6129_v11  ;;  %v6240_v48 = vadd.f32 %v2247_v13, %v2124_v51  ;;  %v4796_v52 = vpop.f32.mrf.mxu1 }
 0x18d   : > { %v2048_v6 = vpop.f32.mrf.mxu0 }
 0x18e   : > { %v2127_v31 = vadd.f32 %v2048_v6, %v6132_v60  ;;  %v6243_v8 = vadd.f32 %v4787_v47, %v2129_v55  ;;  %v2295_v20 = vpop.f32.mrf.mxu1 }
 0x18f   : > { %v4754_v53 = vpop.f32.mrf.mxu0 }
 0x190   : > { %v2130_v18 = vadd.f32 %v4754_v53, %v6137_v45  ;;  %v6246_v42 = vadd.f32 %v2260_v43, %v2127_v31  ;;  %v4799_v46 = vpop.f32.mrf.mxu1 }
 0x191   : > { %v2051_v14 = vpop.f32.mrf.mxu0 }
 0x192   : > { %v2128_v41 = vadd.f32 %v2051_v14, %v6145_v27  ;;  %v6249_v3 = vadd.f32 %v4788_v33, %v2130_v18  ;;  %v2308_v13 = vpop.f32.mrf.mxu1 }
 0x193   : > { %v4757_v11 = vpop.f32.mrf.mxu0 }
 0x194   : > { %v2133_v0 = vadd.f32 %v4757_v11, %v6148_v23  ;;  %v6252_v36 = vadd.f32 %v2263_v54, %v2128_v41  ;;  %v4800_v47 = vpop.f32.mrf.mxu1 }
 0x195   : > { %v2064_v60 = vpop.f32.mrf.mxu0 }
 0x196   : > { %v2131_v63 = vadd.f32 %v2064_v60, %v6153_v26  ;;  %v6255_v44 = vadd.f32 %v4791_v21, %v2133_v0  ;;  %v2311_v43 = vpop.f32.mrf.mxu1 }
 0x197   : > { %v4758_v45 = vpop.f32.mrf.mxu0 }
 0x198   : > { %v2134_v30 = vadd.f32 %v4758_v45, %v6156_v2  ;;  %v6258_v50 = vadd.f32 %v2276_v29, %v2131_v63  ;;  %v4839_v33 = vpop.f32.mrf.mxu1 }
 0x199   : > { %v2067_v27 = vpop.f32.mrf.mxu0 }
 0x19a   : > { %v2132_v51 = vadd.f32 %v2067_v27, %v6167_v10  ;;  %v6261_v7 = vadd.f32 %v4792_v32, %v2134_v30  ;;  %v2630_v54 = vpop.f32.mrf.mxu1 }
 0x19b   : > { %v4761_v23 = vpop.f32.mrf.mxu0 }
 0x19c   : > { %v2137_v55 = vadd.f32 %v4761_v23, %v6170_v17  ;;  %v6264_v6 = vadd.f32 %v2279_v37, %v2132_v51  ;;  %v4840_v21 = vpop.f32.mrf.mxu1 }
 0x19d   : > { %v2080_v26 = vpop.f32.mrf.mxu0 }
 0x19e   : > { %v2135_v31 = vadd.f32 %v2080_v26, %v6173_v24  ;;  %v6267_v53 = vadd.f32 %v4795_v56, %v2137_v55  ;;  %v2633_v29 = vpop.f32.mrf.mxu1 }
 0x19f   : > { %v4762_v2 = vpop.f32.mrf.mxu0 }
 0x1a0   : > { %v2138_v18 = vadd.f32 %v4762_v2, %v6176_v15  ;;  %v6270_v14 = vadd.f32 %v2292_v38, %v2135_v31  ;;  %v4843_v32 = vpop.f32.mrf.mxu1 }
 0x1a1   : > { %v2083_v10 = vpop.f32.mrf.mxu0 }
 0x1a2   : > { %v2136_v41 = vadd.f32 %v2083_v10, %v6180_v58  ;;  %v6273_v11 = vadd.f32 %v4796_v52, %v2138_v18  ;;  %v2646_v37 = vpop.f32.mrf.mxu1 }
 0x1a3   : > { %v4765_v17 = vpop.f32.mrf.mxu0 }
 0x1a4   : > { %v2141_v0 = vadd.f32 %v4765_v17, %v6183_v59  ;;  %v6276_v60 = vadd.f32 %v2295_v20, %v2136_v41  ;;  %v4844_v56 = vpop.f32.mrf.mxu1 }
 0x1a5   : > { %v2096_v24 = vpop.f32.mrf.mxu0 }
 0x1a6   : > { %v2139_v63 = vadd.f32 %v2096_v24, %v6186_v62  ;;  %v6279_v45 = vadd.f32 %v4799_v46, %v2141_v0  ;;  %v2649_v38 = vpop.f32.mrf.mxu1 }
 0x1a7   : > { %v4766_v15 = vpop.f32.mrf.mxu0 }
 0x1a8   : > { %v2142_v30 = vadd.f32 %v4766_v15, %v6189_v12  ;;  %v6282_v27 = vadd.f32 %v2308_v13, %v2139_v63  ;;  %v4847_v52 = vpop.f32.mrf.mxu1 }
 0x1a9   : > { %v2099_v58 = vpop.f32.mrf.mxu0 }
 0x1aa   : > { %v2140_v51 = vadd.f32 %v2099_v58, %v6192_v40  ;;  %v6285_v23 = vadd.f32 %v4800_v47, %v2142_v30  ;;  %v2662_v20 = vpop.f32.mrf.mxu1 }
 0x1ab   : > { %v4805_v59 = vpop.f32.mrf.mxu0 }
 0x1ac   : > { %v2531_v55 = vadd.f32 %v4805_v59, %v6195_v39  ;;  %v6288_v26 = vadd.f32 %v2311_v43, %v2140_v51  ;;  %v4848_v46 = vpop.f32.mrf.mxu1 }
 0x1ad   : > { %v2402_v62 = vpop.f32.mrf.mxu0 }
 0x1ae   : > { %v2529_v31 = vadd.f32 %v2402_v62, %v6198_v25  ;;  %v6291_v2 = vadd.f32 %v4839_v33, %v2531_v55  ;;  %v2665_v13 = vpop.f32.mrf.mxu1 }
 0x1af   : > { %v4806_v12 = vpop.f32.mrf.mxu0 }
 0x1b0   : > { %v2532_v18 = vadd.f32 %v4806_v12, %v6201_v34  ;;  %v6294_v10 = vadd.f32 %v2630_v54, %v2529_v31  ;;  %v4851_v47 = vpop.f32.mrf.mxu1 }
 0x1b1   : > { %v2405_v40 = vpop.f32.mrf.mxu0 }
 0x1b2   : > { %v2530_v41 = vadd.f32 %v2405_v40, %v6204_v35  ;;  %v6297_v17 = vadd.f32 %v4840_v21, %v2532_v18  ;;  %v2678_v43 = vpop.f32.mrf.mxu1 }
 0x1b3   : > { %v4809_v39 = vpop.f32.mrf.mxu0 }
 0x1b4   : > { %v2535_v0 = vadd.f32 %v4809_v39, %v6207_v1  ;;  %v6300_v24 = vadd.f32 %v2633_v29, %v2530_v41  ;;  %v4852_v33 = vpop.f32.mrf.mxu1 }
 0x1b5   : > { %v2418_v25 = vpop.f32.mrf.mxu0 }
 0x1b6   : > { %v2533_v63 = vadd.f32 %v2418_v25, %v6210_v16  ;;  %v6303_v15 = vadd.f32 %v4843_v32, %v2535_v0  ;;  %v2681_v54 = vpop.f32.mrf.mxu1 }
 0x1b7   : > { %v4810_v34 = vpop.f32.mrf.mxu0 }
 0x1b8   : > { %v2536_v30 = vadd.f32 %v4810_v34, %v6213_v28  ;;  %v6306_v58 = vadd.f32 %v2646_v37, %v2533_v63  ;;  %v4855_v21 = vpop.f32.mrf.mxu1 }
 0x1b9   : > { %v2421_v35 = vpop.f32.mrf.mxu0 }
 0x1ba   : > { %v2534_v51 = vadd.f32 %v2421_v35, %v6216_v4  ;;  %v6309_v59 = vadd.f32 %v4844_v56, %v2536_v30  ;;  %v2694_v29 = vpop.f32.mrf.mxu1 }
 0x1bb   : > { %v4813_v1 = vpop.f32.mrf.mxu0 }
 0x1bc   : > { %v2539_v55 = vadd.f32 %v4813_v1, %v6219_v9  ;;  %v6312_v62 = vadd.f32 %v2649_v38, %v2534_v51  ;;  %v4856_v32 = vpop.f32.mrf.mxu1 }
 0x1bd   : > { %v2434_v16 = vpop.f32.mrf.mxu0 }
 0x1be   : > { %v2537_v31 = vadd.f32 %v2434_v16, %v6222_v22  ;;  %v6315_v12 = vadd.f32 %v4847_v52, %v2539_v55  ;;  %v2697_v37 = vpop.f32.mrf.mxu1 }
 0x1bf   : > { %v4814_v28 = vpop.f32.mrf.mxu0 }
 0x1c0   : > { %v2540_v18 = vadd.f32 %v4814_v28, %v6225_v61  ;;  %v6318_v40 = vadd.f32 %v2662_v20, %v2537_v31  ;;  %v4859_v56 = vpop.f32.mrf.mxu1 }
 0x1c1   : > { %v2437_v4 = vpop.f32.mrf.mxu0 }
 0x1c2   : > { %v2538_v41 = vadd.f32 %v2437_v4, %v6228_v49  ;;  %v6321_v39 = vadd.f32 %v4848_v46, %v2540_v18  ;;  %v2710_v38 = vpop.f32.mrf.mxu1 }
 0x1c3   : > { %v4817_v9 = vpop.f32.mrf.mxu0 }
 0x1c4   : > { %v2543_v0 = vadd.f32 %v4817_v9, %v6231_v19  ;;  %v6324_v25 = vadd.f32 %v2665_v13, %v2538_v41  ;;  %v4860_v52 = vpop.f32.mrf.mxu1 }
 0x1c5   : > { %v2450_v22 = vpop.f32.mrf.mxu0 }
 0x1c6   : > { %v2541_v63 = vadd.f32 %v2450_v22, %v6234_v5  ;;  %v6327_v34 = vadd.f32 %v4851_v47, %v2543_v0  ;;  %v2713_v20 = vpop.f32.mrf.mxu1 }
 0x1c7   : > { %v4818_v61 = vpop.f32.mrf.mxu0 }
 0x1c8   : > { %v2544_v30 = vadd.f32 %v4818_v61, %v6237_v57  ;;  %v6330_v35 = vadd.f32 %v2678_v43, %v2541_v63  ;;  %v4863_v46 = vpop.f32.mrf.mxu1 }
 0x1c9   : > { %v2453_v49 = vpop.f32.mrf.mxu0 }
 0x1ca   : > { %v2542_v51 = vadd.f32 %v2453_v49, %v6240_v48  ;;  %v6333_v1 = vadd.f32 %v4852_v33, %v2544_v30  ;;  %v2726_v13 = vpop.f32.mrf.mxu1 }
 0x1cb   : > { %v4821_v19 = vpop.f32.mrf.mxu0 }
 0x1cc   : > { %v2547_v55 = vadd.f32 %v4821_v19, %v6243_v8  ;;  %v6336_v16 = vadd.f32 %v2681_v54, %v2542_v51  ;;  %v4864_v47 = vpop.f32.mrf.mxu1 }
 0x1cd   : > { %v2466_v5 = vpop.f32.mrf.mxu0 }
 0x1ce   : > { %v2545_v31 = vadd.f32 %v2466_v5, %v6246_v42  ;;  %v6339_v28 = vadd.f32 %v4855_v21, %v2547_v55  ;;  %v2729_v43 = vpop.f32.mrf.mxu1 }
 0x1cf   : > { %v4822_v57 = vpop.f32.mrf.mxu0 }
 0x1d0   : > { %v2548_v18 = vadd.f32 %v4822_v57, %v6249_v3  ;;  %v6342_v4 = vadd.f32 %v2694_v29, %v2545_v31  ;;  %v6344_v33 = vpop.f32.mrf.mxu1 }
 0x1d1   : > { %v2469_v48 = vpop.f32.mrf.mxu0 }
 0x1d2   : > { %v2546_v41 = vadd.f32 %v2469_v48, %v6252_v36  ;;  %v6347_v8 = vadd.f32 %v4856_v32, %v2548_v18  ;;  %v6349_v9 = vpop.f32.mrf.mxu1 }
 0x1d3   : > { %v4825_v54 = vpop.f32.mrf.mxu0 }
 0x1d4   : > { %v2551_v42 = vadd.f32 %v4825_v54, %v6255_v44  ;;  %v6352_v21 = vadd.f32 %v2697_v37, %v2546_v41  ;;  %v6354_v22 = vpop.f32.mrf.mxu1 }
 0x1d5   : > { %v2482_v0 = vpop.f32.mrf.mxu0 }
 0x1d6   : > { %v2549_v3 = vadd.f32 %v2482_v0, %v6258_v50  ;;  %v6357_v29 = vadd.f32 %v4859_v56, %v2551_v42  ;;  %v6359_v36 = vpop.f32.mrf.mxu1 }
 0x1d7   : > { %v4826_v63 = vpop.f32.mrf.mxu0 }
 0x1d8   : > { %v2552_v32 = vadd.f32 %v4826_v63, %v6261_v7  ;;  %v6362_v61 = vadd.f32 %v2710_v38, %v2549_v3  ;;  %v4907_v49 = vpop.f32.mrf.mxu1 }
 0x1d9   : > { %v2485_v30 = vpop.f32.mrf.mxu0 }
 0x1da   : > { %v2550_v44 = vadd.f32 %v2485_v30, %v6264_v6  ;;  %v6366_v37 = vadd.f32 %v4860_v52, %v2552_v32  ;;  %v3308_v19 = vpop.f32.mrf.mxu1 }
 0x1db   : > { %v4829_v51 = vpop.f32.mrf.mxu0  ;;  %v3632_v38 = vmul.f32 %v3308_v19, %v3308_v19 }
 0x1dc   : > { %v2555_v50 = vadd.f32 %v4829_v51, %v6267_v53  ;;  %v6369_v56 = vadd.f32 %v2713_v20, %v2550_v44  ;;  %v4908_v7 = vpop.f32.mrf.mxu1  ;;  %v3634_v53 = vmul.f32 %v4907_v49, %v4907_v49 }
 0x1dd   : > { %v2498_v55 = vpop.f32.mrf.mxu0  ;;  %v4325_v52 = vpack.c.bf16 %v4908_v7, %v4907_v49  ;;  %v3635_v3 = vmul.f32 %v4908_v7, %v4908_v7 }
 0x1de   : > { %v2553_v6 = vadd.f32 %v2498_v55, %v6270_v14  ;;  %v6379_v5 = vadd.f32 %v4863_v46, %v2555_v50  ;;  %v3311_v20 = vpop.f32.mrf.mxu1 }
 0x1df   : > { %v4830_v31 = vpop.f32.mrf.mxu0  ;;  %4412 = vst [vmem:[%s6376_s28 + $0x8] sm:$0xff] %v4325_v52   ;;  %v4320_v18 = vpack.c.bf16 %v3311_v20, %v3308_v19  ;;  %v3595_v48 = vadd.f32 %v3311_v20, %v3308_v19  ;;  %v3633_v41 = vmul.f32 %v3311_v20, %v3311_v20 }
 0x1e0   : > { %v2556_v57 = vadd.f32 %v4830_v31, %v6273_v11  ;;  %v4911_v42 = vpop.f32.mrf.mxu1  ;;  %v6383_v0 = vadd.f32 %v2726_v13, %v2553_v6 }
 0x1e1   : > { %v2501_v54 = vpop.f32.mrf.mxu0  ;;  %4321 = vst [vmem:[%s6376_s28] sm:$0xff] %v4320_v18   ;;  %v3596_v63 = vadd.f32 %v4907_v49, %v3595_v48  ;;  %v3664_v46 = vadd.f32 %v3633_v41, %v3632_v38 }
 0x1e2   : > { %v2554_v14 = vadd.f32 %v2501_v54, %v6276_v60  ;;  %v3324_v30 = vpop.f32.mrf.mxu1  ;;  %v6387_v44 = vadd.f32 %v4864_v47, %v2556_v57 }
 0x1e3   : > { %v4833_v32 = vpop.f32.mrf.mxu0  ;;  %v3665_v51 = vadd.f32 %v3664_v46, %v3634_v53  ;;  %v3597_v19 = vadd.f32 %v4908_v7, %v3596_v63  ;;  %v3636_v50 = vmul.f32 %v3324_v30, %v3324_v30 }
 0x1e4   : > { %v2559_v11 = vadd.f32 %v4833_v32, %v6279_v45  ;;  %v4912_v52 = vpop.f32.mrf.mxu1  ;;  %v6390_v13 = vadd.f32 %v2729_v43, %v2554_v14  ;;  %v3638_v43 = vmul.f32 %v4911_v42, %v4911_v42 }
 0x1e5   : > { %v2514_v55 = vpop.f32.mrf.mxu0  ;;  %v3598_v6 = vadd.f32 %v3597_v19, %v3324_v30  ;;  %v3666_v31 = vadd.f32 %v3665_v51, %v3635_v3  ;;  %v4335_v49 = vpack.c.bf16 %v4912_v52, %v4911_v42 }
 0x1e6   : > { %v2557_v60 = vadd.f32 %v2514_v55, %v6282_v27  ;;  %v3327_v20 = vpop.f32.mrf.mxu1  ;;  %v6394_v47 = vadd.f32 %v6344_v33, %v2559_v11 }
 0x1e7   : > { %v4834_v38 = vpop.f32.mrf.mxu0  ;;  %v3667_v53 = vadd.f32 %v3666_v31, %v3636_v50  ;;  %4414 = vst [vmem:[%s6376_s28 + $0x18] sm:$0xff] %v4335_v49   ;;  %v4330_v7 = vpack.c.bf16 %v3327_v20, %v3324_v30  ;;  %v3599_v57 = vadd.f32 %v3598_v6, %v3327_v20  ;;  %v3637_v48 = vmul.f32 %v3327_v20, %v3327_v20 }
 0x1e8   : > { %v2560_v45 = vadd.f32 %v4834_v38, %v6285_v23  ;;  %v4915_v41 = vpop.f32.mrf.mxu1  ;;  %v6399_v27 = vadd.f32 %v6349_v9, %v2557_v60  ;;  %v3639_v23 = vmul.f32 %v4912_v52, %v4912_v52 }
 0x1e9   : > { %v2517_v18 = vpop.f32.mrf.mxu0  ;;  %4413 = vst [vmem:[%s6376_s28 + $0x10] sm:$0xff] %v4330_v7   ;;  %v3600_v14 = vadd.f32 %v4911_v42, %v3599_v57  ;;  %v3668_v63 = vadd.f32 %v3667_v53, %v3637_v48 }
 0x1ea   : > { %v2558_v54 = vadd.f32 %v2517_v18, %v6288_v26  ;;  %v6404_v33 = vadd.f32 %v6354_v22, %v2560_v45  ;;  %v3340_v46 = vpop.f32.mrf.mxu1 }
 0x1eb   : > { %v4873_v3 = vpop.f32.mrf.mxu0  ;;  %v3601_v32 = vadd.f32 %v4912_v52, %v3600_v14  ;;  %v3669_v9 = vadd.f32 %v3668_v63, %v3638_v43  ;;  %v3640_v51 = vmul.f32 %v3340_v46, %v3340_v46 }
 0x1ec   : > { %v6407_v30 = vadd.f32 %v6359_v36, %v2558_v54  ;;  %v4916_v19 = vpop.f32.mrf.mxu1  ;;  %v2971_v42 = vadd.f32 %v4873_v3, %v6291_v2  ;;  %v3642_v2 = vmul.f32 %v4915_v41, %v4915_v41 }
 0x1ed   : > { %v2842_v11 = vpop.f32.mrf.mxu0  ;;  %v3602_v26 = vadd.f32 %v3601_v32, %v3340_v46  ;;  %v4345_v50 = vpack.c.bf16 %v4916_v19, %v4915_v41  ;;  %v3670_v55 = vadd.f32 %v3669_v9, %v3639_v23  ;;  %v3643_v57 = vmul.f32 %v4916_v19, %v4916_v19 }
 0x1ee   : > { %v3343_v60 = vpop.f32.mrf.mxu1  ;;  %v2969_v6 = vadd.f32 %v2842_v11, %v6294_v10  ;;  %v3200_v23 = vmul.f32 %v2971_v42, %v2971_v42 }
 0x1ef   : > { %v4874_v22 = vpop.f32.mrf.mxu0  ;;  %4416 = vst [vmem:[%s6376_s28 + $0x28] sm:$0xff] %v4345_v50   ;;  %v4340_v36 = vpack.c.bf16 %v3343_v60, %v3340_v46  ;;  %v3603_v31 = vadd.f32 %v3602_v26, %v3343_v60  ;;  %v3671_v38 = vadd.f32 %v3670_v55, %v3640_v51  ;;  %v3641_v20 = vmul.f32 %v3343_v60, %v3343_v60 }
 0x1f0   : > { %v2972_v52 = vadd.f32 %v4874_v22, %v6297_v17  ;;  %v4919_v45 = vpop.f32.mrf.mxu1  ;;  %v3198_v48 = vmul.f32 %v2969_v6, %v2969_v6 }
 0x1f1   : > { %v2845_v49 = vpop.f32.mrf.mxu0  ;;  %4415 = vst [vmem:[%s6376_s28 + $0x20] sm:$0xff] %v4340_v36   ;;  %v3604_v17 = vadd.f32 %v4915_v41, %v3603_v31  ;;  %v3672_v18 = vadd.f32 %v3671_v38, %v3641_v20  ;;  %v3646_v22 = vmul.f32 %v4919_v45, %v4919_v45 }
 0x1f2   : > { %v4245_v53 = vpack.c.bf16 %v2972_v52, %v2971_v42  ;;  %v2970_v10 = vadd.f32 %v2845_v49, %v6300_v24  ;;  %v3356_v43 = vpop.f32.mrf.mxu1  ;;  %v3201_v51 = vmul.f32 %v2972_v52, %v2972_v52 }
 0x1f3   : > { %v4877_v7 = vpop.f32.mrf.mxu0  ;;  %v3673_v46 = vadd.f32 %v3672_v18, %v3642_v2  ;;  %v3605_v32 = vadd.f32 %v4916_v19, %v3604_v17  ;;  %v3644_v11 = vmul.f32 %v3356_v43, %v3356_v43 }
 0x1f4   : > { %4397 = vst [vmem:[%s6418_s7 + $0x8] sm:$0xff] %v4245_v53   ;;  %v4240_v54 = vpack.c.bf16 %v2970_v10, %v2969_v6  ;;  %v3161_v14 = vadd.f32 %v2970_v10, %v2969_v6  ;;  %v3199_v3 = vmul.f32 %v2970_v10, %v2970_v10  ;;  %v4920_v9 = vpop.f32.mrf.mxu1  ;;  %v2975_v49 = vadd.f32 %v4877_v7, %v6303_v15 }
 0x1f5   : > { %v2858_v63 = vpop.f32.mrf.mxu0  ;;  %v3606_v55 = vadd.f32 %v3605_v32, %v3356_v43  ;;  %v3674_v60 = vadd.f32 %v3673_v46, %v3643_v57  ;;  %v4355_v36 = vpack.c.bf16 %v4920_v9, %v4919_v45  ;;  %v3647_v15 = vmul.f32 %v4920_v9, %v4920_v9 }
 0x1f6   : > { %4241 = vst [vmem:[%s6418_s7] sm:$0xff] %v4240_v54   ;;  %v3162_v24 = vadd.f32 %v3161_v14, %v2971_v42  ;;  %v3230_v41 = vadd.f32 %v3199_v3, %v3198_v48  ;;  %v2973_v26 = vadd.f32 %v2858_v63, %v6306_v58  ;;  %v3359_v6 = vpop.f32.mrf.mxu1  ;;  %v3204_v3 = vmul.f32 %v2975_v49, %v2975_v49 }
 0x1f7   : > { %v4878_v50 = vpop.f32.mrf.mxu0  ;;  %v3675_v20 = vadd.f32 %v3674_v60, %v3644_v11  ;;  %4418 = vst [vmem:[%s6376_s28 + $0x38] sm:$0xff] %v4355_v36   ;;  %v4350_v42 = vpack.c.bf16 %v3359_v6, %v3356_v43  ;;  %v3607_v53 = vadd.f32 %v3606_v55, %v3359_v6  ;;  %v3645_v58 = vmul.f32 %v3359_v6, %v3359_v6 }
 0x1f8   : > { %v3231_v31 = vadd.f32 %v3230_v41, %v3200_v23  ;;  %v3163_v2 = vadd.f32 %v3162_v24, %v2972_v52  ;;  %v2976_v19 = vadd.f32 %v4878_v50, %v6309_v59  ;;  %v4923_v10 = vpop.f32.mrf.mxu1  ;;  %v3202_v18 = vmul.f32 %v2973_v26, %v2973_v26 }
 0x1f9   : > { %v2861_v38 = vpop.f32.mrf.mxu0  ;;  %4417 = vst [vmem:[%s6376_s28 + $0x30] sm:$0xff] %v4350_v42   ;;  %v3608_v52 = vadd.f32 %v4919_v45, %v3607_v53  ;;  %v3676_v7 = vadd.f32 %v3675_v20, %v3645_v58 }
 0x1fa   : > { %v3164_v17 = vadd.f32 %v3163_v2, %v2973_v26  ;;  %v3232_v57 = vadd.f32 %v3231_v31, %v3201_v51  ;;  %v4255_v48 = vpack.c.bf16 %v2976_v19, %v2975_v49  ;;  %v2974_v54 = vadd.f32 %v2861_v38, %v6312_v62  ;;  %v3372_v59 = vpop.f32.mrf.mxu1 }
 0x1fb   : > { %v4881_v14 = vpop.f32.mrf.mxu0  ;;  %v3648_v43 = vmul.f32 %v3372_v59, %v3372_v59  ;;  %v3677_v24 = vadd.f32 %v3676_v7, %v3646_v22  ;;  %v3205_v41 = vmul.f32 %v2976_v19, %v2976_v19  ;;  %v3650_v62 = vmul.f32 %v4923_v10, %v4923_v10 }
 0x1fc   : > { %v3233_v23 = vadd.f32 %v3232_v57, %v3202_v18  ;;  %4399 = vst [vmem:[%s6418_s7 + $0x18] sm:$0xff] %v4255_v48   ;;  %v4250_v63 = vpack.c.bf16 %v2974_v54, %v2973_v26  ;;  %v3165_v46 = vadd.f32 %v3164_v17, %v2974_v54  ;;  %v3203_v32 = vmul.f32 %v2974_v54, %v2974_v54  ;;  %v4924_v51 = vpop.f32.mrf.mxu1 }
 0x1fd   : > { %v2874_v11 = vpop.f32.mrf.mxu0  ;;  %v3609_v50 = vadd.f32 %v4920_v9, %v3608_v52  ;;  %v4365_v55 = vpack.c.bf16 %v4924_v51, %v4923_v10  ;;  %v3678_v31 = vadd.f32 %v3677_v24, %v3647_v15  ;;  %v2979_v26 = vadd.f32 %v4881_v14, %v6315_v12 }
 0x1fe   : > { %4398 = vst [vmem:[%s6418_s7 + $0x10] sm:$0xff] %v4250_v63   ;;  %v3166_v45 = vadd.f32 %v3165_v46, %v2975_v49  ;;  %v3234_v60 = vadd.f32 %v3233_v23, %v3203_v32  ;;  %v2977_v36 = vadd.f32 %v2874_v11, %v6318_v40  ;;  %v3375_v2 = vpop.f32.mrf.mxu1  ;;  %v3651_v57 = vmul.f32 %v4924_v51, %v4924_v51 }
 0x1ff   : > { %v4882_v6 = vpop.f32.mrf.mxu0  ;;  %v3610_v22 = vadd.f32 %v3609_v50, %v3372_v59  ;;  %4420 = vst [vmem:[%s6376_s28 + $0x48] sm:$0xff] %v4365_v55   ;;  %v4360_v20 = vpack.c.bf16 %v3375_v2, %v3372_v59  ;;  %v3679_v58 = vadd.f32 %v3678_v31, %v3648_v43  ;;  %v3649_v49 = vmul.f32 %v3375_v2, %v3375_v2 }
 0x200   : > { %v2980_v38 = vadd.f32 %v4882_v6, %v6321_v39  ;;  %v3235_v42 = vadd.f32 %v3234_v60, %v3204_v3  ;;  %v3167_v53 = vadd.f32 %v3166_v45, %v2976_v19  ;;  %v4927_v17 = vpop.f32.mrf.mxu1  ;;  %v3206_v12 = vmul.f32 %v2977_v36, %v2977_v36 }
 0x201   : > { %v2877_v9 = vpop.f32.mrf.mxu0  ;;  %4419 = vst [vmem:[%s6376_s28 + $0x40] sm:$0xff] %v4360_v20   ;;  %v3611_v48 = vadd.f32 %v3610_v22, %v3375_v2  ;;  %v3680_v15 = vadd.f32 %v3679_v58, %v3649_v49  ;;  %v3208_v7 = vmul.f32 %v2979_v26, %v2979_v26  ;;  %v3654_v24 = vmul.f32 %v4927_v17, %v4927_v17 }
 0x202   : > { %v4265_v18 = vpack.c.bf16 %v2980_v38, %v2979_v26  ;;  %v2978_v40 = vadd.f32 %v2877_v9, %v6324_v25  ;;  %v3168_v54 = vadd.f32 %v3167_v53, %v2977_v36  ;;  %v3236_v14 = vadd.f32 %v3235_v42, %v3205_v41  ;;  %v3388_v52 = vpop.f32.mrf.mxu1 }
 0x203   : > { %v4885_v39 = vpop.f32.mrf.mxu0  ;;  %v3612_v3 = vadd.f32 %v4923_v10, %v3611_v48  ;;  %v3681_v46 = vadd.f32 %v3680_v15, %v3650_v62  ;;  %v3652_v25 = vmul.f32 %v3388_v52, %v3388_v52  ;;  %v3209_v11 = vmul.f32 %v2980_v38, %v2980_v38 }
 0x204   : > { %4401 = vst [vmem:[%s6418_s7 + $0x28] sm:$0xff] %v4265_v18   ;;  %v4260_v19 = vpack.c.bf16 %v2978_v40, %v2977_v36  ;;  %v3207_v59 = vmul.f32 %v2978_v40, %v2978_v40  ;;  %v3237_v23 = vadd.f32 %v3236_v14, %v3206_v12  ;;  %v3169_v43 = vadd.f32 %v3168_v54, %v2978_v40  ;;  %v4928_v32 = vpop.f32.mrf.mxu1 }
 0x205   : > { %v2890_v63 = vpop.f32.mrf.mxu0  ;;  %v3613_v41 = vadd.f32 %v4924_v51, %v3612_v3  ;;  %v4375_v50 = vpack.c.bf16 %v4928_v32, %v4927_v17  ;;  %v3682_v36 = vadd.f32 %v3681_v46, %v3651_v57  ;;  %v2983_v31 = vadd.f32 %v4885_v39, %v6327_v34 }
 0x206   : > { %4400 = vst [vmem:[%s6418_s7 + $0x20] sm:$0xff] %v4260_v19   ;;  %v3170_v55 = vadd.f32 %v3169_v43, %v2979_v26  ;;  %v3238_v45 = vadd.f32 %v3237_v23, %v3207_v59  ;;  %v2981_v60 = vadd.f32 %v2890_v63, %v6330_v35  ;;  %v3391_v10 = vpop.f32.mrf.mxu1  ;;  %v3655_v49 = vmul.f32 %v4928_v32, %v4928_v32 }
 0x207   : > { %v4886_v6 = vpop.f32.mrf.mxu0  ;;  %v3614_v2 = vadd.f32 %v3613_v41, %v3388_v52  ;;  %4422 = vst [vmem:[%s6376_s28 + $0x58] sm:$0xff] %v4375_v50   ;;  %v4370_v22 = vpack.c.bf16 %v3391_v10, %v3388_v52  ;;  %v3683_v51 = vadd.f32 %v3682_v36, %v3652_v25  ;;  %v3653_v26 = vmul.f32 %v3391_v10, %v3391_v10 }
 0x208   : > { %v2984_v62 = vadd.f32 %v4886_v6, %v6333_v1  ;;  %v3239_v20 = vadd.f32 %v3238_v45, %v3208_v7  ;;  %v3171_v42 = vadd.f32 %v3170_v55, %v2980_v38  ;;  %v4931_v9 = vpop.f32.mrf.mxu1  ;;  %v3210_v34 = vmul.f32 %v2981_v60, %v2981_v60 }
 0x209   : > { %v2893_v53 = vpop.f32.mrf.mxu0  ;;  %4421 = vst [vmem:[%s6376_s28 + $0x50] sm:$0xff] %v4370_v22   ;;  %v3615_v18 = vadd.f32 %v3614_v2, %v3391_v10  ;;  %v3684_v48 = vadd.f32 %v3683_v51, %v3653_v26  ;;  %v3212_v12 = vmul.f32 %v2983_v31, %v2983_v31  ;;  %v3658_v23 = vmul.f32 %v4931_v9, %v4931_v9 }
 0x20a   : > { %v4275_v58 = vpack.c.bf16 %v2984_v62, %v2983_v31  ;;  %v2982_v35 = vadd.f32 %v2893_v53, %v6336_v16  ;;  %v3172_v40 = vadd.f32 %v3171_v42, %v2981_v60  ;;  %v3240_v57 = vadd.f32 %v3239_v20, %v3209_v11  ;;  %v3404_v54 = vpop.f32.mrf.mxu1 }
 0x20b   : > { %v4889_v1 = vpop.f32.mrf.mxu0  ;;  %v3616_v39 = vadd.f32 %v4927_v17, %v3615_v18  ;;  %v3685_v19 = vadd.f32 %v3684_v48, %v3654_v24  ;;  %v3656_v16 = vmul.f32 %v3404_v54, %v3404_v54  ;;  %v3213_v3 = vmul.f32 %v2984_v62, %v2984_v62 }
 0x20c   : > { %4403 = vst [vmem:[%s6418_s7 + $0x38] sm:$0xff] %v4275_v58   ;;  %v4270_v38 = vpack.c.bf16 %v2982_v35, %v2981_v60  ;;  %v3211_v14 = vmul.f32 %v2982_v35, %v2982_v35  ;;  %v3241_v15 = vadd.f32 %v3240_v57, %v3210_v34  ;;  %v3173_v52 = vadd.f32 %v3172_v40, %v2982_v35  ;;  %v4932_v59 = vpop.f32.mrf.mxu1 }
 0x20d   : > { %v2906_v7 = vpop.f32.mrf.mxu0  ;;  %v3617_v43 = vadd.f32 %v4928_v32, %v3616_v39  ;;  %v4385_v63 = vpack.c.bf16 %v4932_v59, %v4931_v9  ;;  %v3686_v50 = vadd.f32 %v3685_v19, %v3655_v49  ;;  %v2987_v55 = vadd.f32 %v4889_v1, %v6339_v28 }
 0x20e   : > { %4402 = vst [vmem:[%s6418_s7 + $0x30] sm:$0xff] %v4270_v38   ;;  %v3174_v46 = vadd.f32 %v3173_v52, %v2983_v31  ;;  %v3242_v25 = vadd.f32 %v3241_v15, %v3211_v14  ;;  %v2985_v11 = vadd.f32 %v2906_v7, %v6342_v4  ;;  %v3407_v17 = vpop.f32.mrf.mxu1  ;;  %v3659_v20 = vmul.f32 %v4932_v59, %v4932_v59 }
 0x20f   : > { %v4890_v41 = vpop.f32.mrf.mxu0  ;;  %v3618_v45 = vadd.f32 %v3617_v43, %v3404_v54  ;;  %4424 = vst [vmem:[%s6376_s28 + $0x68] sm:$0xff] %v4385_v63   ;;  %v4380_v60 = vpack.c.bf16 %v3407_v17, %v3404_v54  ;;  %v3687_v32 = vadd.f32 %v3686_v50, %v3656_v16  ;;  %v3657_v31 = vmul.f32 %v3407_v17, %v3407_v17 }
 0x210   : > { %v2988_v24 = vadd.f32 %v4890_v41, %v6347_v8  ;;  %v3243_v6 = vadd.f32 %v3242_v25, %v3212_v12  ;;  %v3175_v36 = vadd.f32 %v3174_v46, %v2984_v62  ;;  %v4935_v2 = vpop.f32.mrf.mxu1  ;;  %v3214_v28 = vmul.f32 %v2985_v11, %v2985_v11 }
 0x211   : > { %v2909_v10 = vpop.f32.mrf.mxu0  ;;  %4423 = vst [vmem:[%s6376_s28 + $0x60] sm:$0xff] %v4380_v60   ;;  %v3619_v42 = vadd.f32 %v3618_v45, %v3407_v17  ;;  %v3688_v26 = vadd.f32 %v3687_v32, %v3657_v31  ;;  %v3216_v35 = vmul.f32 %v2987_v55, %v2987_v55  ;;  %v3662_v12 = vmul.f32 %v4935_v2, %v4935_v2 }
 0x212   : > { %v4285_v22 = vpack.c.bf16 %v2988_v24, %v2987_v55  ;;  %v2986_v4 = vadd.f32 %v2909_v10, %v6352_v21  ;;  %v3176_v53 = vadd.f32 %v3175_v36, %v2985_v11  ;;  %v3244_v51 = vadd.f32 %v3243_v6, %v3213_v3  ;;  %v3420_v58 = vpop.f32.mrf.mxu1 }
 0x213   : > { %v4893_v8 = vpop.f32.mrf.mxu0  ;;  %v3620_v18 = vadd.f32 %v4931_v9, %v3619_v42  ;;  %v3689_v1 = vadd.f32 %v3688_v26, %v3658_v23  ;;  %v3660_v21 = vmul.f32 %v3420_v58, %v3420_v58  ;;  %v3217_v54 = vmul.f32 %v2988_v24, %v2988_v24 }
 0x214   : > { %4405 = vst [vmem:[%s6418_s7 + $0x48] sm:$0xff] %v4285_v22   ;;  %v4280_v62 = vpack.c.bf16 %v2986_v4, %v2985_v11  ;;  %v3215_v49 = vmul.f32 %v2986_v4, %v2986_v4  ;;  %v3245_v40 = vadd.f32 %v3244_v51, %v3214_v28  ;;  %v3177_v34 = vadd.f32 %v3176_v53, %v2986_v4  ;;  %v4936_v48 = vpop.f32.mrf.mxu1 }
 0x215   : > { %v2922_v57 = vpop.f32.mrf.mxu0  ;;  %v3621_v38 = vadd.f32 %v4932_v59, %v3620_v18  ;;  %v4395_v14 = vpack.c.bf16 %v4936_v48, %v4935_v2  ;;  %v3690_v19 = vadd.f32 %v3689_v1, %v3659_v20  ;;  %v2991_v16 = vadd.f32 %v4893_v8, %v6357_v29 }
 0x216   : > { %4404 = vst [vmem:[%s6418_s7 + $0x40] sm:$0xff] %v4280_v62   ;;  %v3178_v39 = vadd.f32 %v3177_v34, %v2987_v55  ;;  %v3246_v15 = vadd.f32 %v3245_v40, %v3215_v49  ;;  %v2989_v52 = vadd.f32 %v2922_v57, %v6362_v61  ;;  %v3423_v9 = vpop.f32.mrf.mxu1  ;;  %v3663_v50 = vmul.f32 %v4936_v48, %v4936_v48 }
 0x217   : > { %v4894_v7 = vpop.f32.mrf.mxu0  ;;  %v3622_v23 = vadd.f32 %v3621_v38, %v3420_v58  ;;  %4426 = vst [vmem:[%s6376_s28 + $0x78] sm:$0xff] %v4395_v14   ;;  %v4390_v43 = vpack.c.bf16 %v3423_v9, %v3420_v58  ;;  %v3691_v25 = vadd.f32 %v3690_v19, %v3660_v21  ;;  %v3661_v11 = vmul.f32 %v3423_v9, %v3423_v9 }
 0x218   : > { %v2992_v3 = vadd.f32 %v4894_v7, %v6366_v37  ;;  %v3247_v63 = vadd.f32 %v3246_v15, %v3216_v35  ;;  %v3179_v46 = vadd.f32 %v3178_v39, %v2988_v24  ;;  %v3218_v29 = vmul.f32 %v2989_v52, %v2989_v52 }
 0x219   : > { %v2925_v59 = vpop.f32.mrf.mxu0  ;;  %4425 = vst [vmem:[%s6376_s28 + $0x70] sm:$0xff] %v4390_v43   ;;  %v3623_v17 = vadd.f32 %v3622_v23, %v3423_v9  ;;  %v3692_v60 = vadd.f32 %v3691_v25, %v3661_v11  ;;  %v3220_v4 = vmul.f32 %v2991_v16, %v2991_v16 }
 0x21a   : > { %v4295_v41 = vpack.c.bf16 %v2992_v3, %v2991_v16  ;;  %v2990_v61 = vadd.f32 %v2925_v59, %v6369_v56  ;;  %v3180_v55 = vadd.f32 %v3179_v46, %v2989_v52  ;;  %v3248_v45 = vadd.f32 %v3247_v63, %v3217_v54 }
 0x21b   : > { %v4897_v37 = vpop.f32.mrf.mxu0  ;;  %v3624_v10 = vadd.f32 %v4935_v2, %v3623_v17  ;;  %v3693_v22 = vadd.f32 %v3692_v60, %v3662_v12  ;;  %v3221_v2 = vmul.f32 %v2992_v3, %v2992_v3 }
 0x21c   : > { %4407 = vst [vmem:[%s6418_s7 + $0x58] sm:$0xff] %v4295_v41   ;;  %v4290_v6 = vpack.c.bf16 %v2990_v61, %v2989_v52  ;;  %v3219_v36 = vmul.f32 %v2990_v61, %v2990_v61  ;;  %v3249_v24 = vadd.f32 %v3248_v45, %v3218_v29  ;;  %v3181_v32 = vadd.f32 %v3180_v55, %v2990_v61 }
 0x21d   : > { %v2938_v31 = vpop.f32.mrf.mxu0  ;;  %v3625_v56 = vadd.f32 %v4936_v48, %v3624_v10  ;;  %v3694_v51 = vadd.f32 %v3693_v22, %v3663_v50  ;;  %v2995_v8 = vadd.f32 %v4897_v37, %v6379_v5 }
 0x21e   : > { %4406 = vst [vmem:[%s6418_s7 + $0x50] sm:$0xff] %v4290_v6   ;;  %v3182_v20 = vadd.f32 %v3181_v32, %v2991_v16  ;;  %v3250_v42 = vadd.f32 %v3249_v24, %v3219_v36  ;;  %v2993_v53 = vadd.f32 %v2938_v31, %v6383_v0 }
 0x21f   : > { %v4898_v28 = vpop.f32.mrf.mxu0  ;;  %v3626_v58 = vrot.slane %v3625_v56, 4  ;;  %v3695_v49 = vrot.slane %v3694_v51, 4  ;;  %v3224_v19 = vmul.f32 %v2995_v8, %v2995_v8 }
 0x220   : > { %v2996_v26 = vadd.f32 %v4898_v28, %v6387_v44  ;;  %v3251_v35 = vadd.f32 %v3250_v42, %v3220_v4  ;;  %v3183_v62 = vadd.f32 %v3182_v20, %v2992_v3  ;;  %v3222_v0 = vmul.f32 %v2993_v53, %v2993_v53 }
 0x221   : > { %v2941_v18 = vpop.f32.mrf.mxu0  ;;  %v3627_v34 = vadd.f32 %v3626_v58, %v3625_v56  ;;  %v3696_v48 = vadd.f32 %v3695_v49, %v3694_v51 }
 0x222   : > { %v4305_v40 = vpack.c.bf16 %v2996_v26, %v2995_v8  ;;  %v2994_v57 = vadd.f32 %v2941_v18, %v6390_v13  ;;  %v3184_v1 = vadd.f32 %v3183_v62, %v2993_v53  ;;  %v3252_v21 = vadd.f32 %v3251_v35, %v3221_v2 }
 0x223   : > { %v4901_v54 = vpop.f32.mrf.mxu0  ;;  %v3628_v5 = vrot.slane %v3627_v34, 2  ;;  %v3697_v14 = vrot.slane %v3696_v48, 2  ;;  %v3225_v46 = vmul.f32 %v2996_v26, %v2996_v26 }
 0x224   : > { %4409 = vst [vmem:[%s6418_s7 + $0x68] sm:$0xff] %v4305_v40   ;;  %v4300_v44 = vpack.c.bf16 %v2994_v57, %v2993_v53  ;;  %v3223_v12 = vmul.f32 %v2994_v57, %v2994_v57  ;;  %v3253_v38 = vadd.f32 %v3252_v21, %v3222_v0  ;;  %v3185_v39 = vadd.f32 %v3184_v1, %v2994_v57 }
 0x225   : > { %v2954_v15 = vpop.f32.mrf.mxu0  ;;  %v3629_v52 = vadd.f32 %v3628_v5, %v3627_v34  ;;  %v3698_v13 = vadd.f32 %v3697_v14, %v3696_v48  ;;  %v2999_v43 = vadd.f32 %v4901_v54, %v6394_v47 }
 0x226   : > { %4408 = vst [vmem:[%s6418_s7 + $0x60] sm:$0xff] %v4300_v44   ;;  %v2997_v7 = vadd.f32 %v2954_v15, %v6399_v27  ;;  %v3186_v9 = vadd.f32 %v3185_v39, %v2995_v8  ;;  %v3254_v16 = vadd.f32 %v3253_v38, %v3223_v12 }
 0x227   : > { %v4902_v3 = vpop.f32.mrf.mxu0  ;;  %v3630_v23 = vrot.slane %v3629_v52, 1  ;;  %v3699_v59 = vrot.slane %v3698_v13, 1  ;;  %v3228_v36 = vmul.f32 %v2999_v43, %v2999_v43 }
 0x228   : > { %v3000_v63 = vadd.f32 %v4902_v3, %v6404_v33  ;;  %v3255_v25 = vadd.f32 %v3254_v16, %v3224_v19  ;;  %v3187_v11 = vadd.f32 %v3186_v9, %v2996_v26  ;;  %v3226_v27 = vmul.f32 %v2997_v7, %v2997_v7 }
 0x229   : > { %v2957_v41 = vpop.f32.mrf.mxu0  ;;  %v3631_v47 = vadd.f32 %v3630_v23, %v3629_v52  ;;  %v3700_v17 = vadd.f32 %v3699_v59, %v3698_v13 }
 0x22a   : > { %v4315_v61 = vpack.c.bf16 %v3000_v63, %v2999_v43  ;;  %v2998_v50 = vadd.f32 %v2957_v41, %v6407_v30  ;;  %v3188_v55 = vadd.f32 %v3187_v11, %v2997_v7  ;;  %v3256_v33 = vadd.f32 %v3255_v25, %v3225_v46 }
 0x22b   : > { %v3701_v37 = vsel %vm3267_vm8, %v3631_v47, %v3700_v17  ;;  %v3229_v24 = vmul.f32 %v3000_v63, %v3000_v63 }
 0x22c   : > { %4411 = vst [vmem:[%s6418_s7 + $0x78] sm:$0xff] %v4315_v61   ;;  %v4310_v29 = vpack.c.bf16 %v2998_v50, %v2997_v7  ;;  %v3227_v45 = vmul.f32 %v2998_v50, %v2998_v50  ;;  %v3257_v60 = vadd.f32 %v3256_v33, %v3226_v27  ;;  %v3189_v6 = vadd.f32 %v3188_v55, %v2998_v50 }
 0x22d   : > { %3702 = vst [vmem:[%s284_s11] sm:$0x3] %v3701_v37 }
 0x22e   : > { %4410 = vst [vmem:[%s6418_s7 + $0x70] sm:$0xff] %v4310_v29   ;;  %v3190_v30 = vadd.f32 %v3189_v6, %v2999_v43  ;;  %v3258_v10 = vadd.f32 %v3257_v60, %v3227_v45 }
 0x230   : > { %v3191_v32 = vadd.f32 %v3190_v30, %v3000_v63  ;;  %v3259_v31 = vadd.f32 %v3258_v10, %v3228_v36 }
 0x232   : > { %v3192_v22 = vrot.slane %v3191_v32, 4  ;;  %v3260_v4 = vadd.f32 %v3259_v31, %v3229_v24 }
 0x234   : > { %v3193_v56 = vadd.f32 %v3192_v22, %v3191_v32  ;;  %v3261_v20 = vrot.slane %v3260_v4, 4 }
 0x236   : > { %v3194_v42 = vrot.slane %v3193_v56, 2  ;;  %v3262_v53 = vadd.f32 %v3261_v20, %v3260_v4 }
 0x238   : > { %v3195_v28 = vadd.f32 %v3194_v42, %v3193_v56  ;;  %v3263_v51 = vrot.slane %v3262_v53, 2 }
 0x23a   : > { %v3196_v8 = vrot.slane %v3195_v28, 1  ;;  %v3264_v26 = vadd.f32 %v3263_v51, %v3262_v53 }
 0x23c   : > { %v3265_v58 = vrot.slane %v3264_v26, 1  ;;  %v3197_v2 = vadd.f32 %v3196_v8, %v3195_v28 }
 0x23e   : > { %v3266_v35 = vadd.f32 %v3265_v58, %v3264_v26 }
 0x240   : > { %v3268_v62 = vsel %vm3267_vm8, %v3197_v2, %v3266_v35 }
 0x241   : > { %3269 = vst [vmem:[%s275_s14] sm:$0x3] %v3268_v62 }
 0x242 PF: > { %s17_s21 = sadd.s32 1, %s4980_s21  }
 0x243   : > { %p14_p4 = scmp.ge.s32.totalorder %s17_s21, 4  }
 0x245   :  { %16 = sbr.rel (!%p14_p4) target bundleno = 1 (0x1), region = 106 }

// kernel: basic_block_forward.4
= control target key start
LH: loop header
LB: loop body
LE: loop exit
PB: predicated region body
PF: predicated region fallthrough
CT: control target
= control target key end

     0   :  { %s7736_s18 = smov 0   ;;  %s10349_s0 = inlined_call_operand.vmem [shape: bf16[2,256,128], index: 0, kind: input, shape index: {}]   ;;  %s10350_s1 = inlined_call_operand.vmem [shape: f32[1,128], index: 1, kind: input, shape index: {}]   ;;  %s10351_s2 = inlined_call_operand.vmem [shape: f32[1,128], index: 2, kind: input, shape index: {}]   ;;  %s10352_s3 = inlined_call_operand.vmem [shape: bf16[9,128,128], index: 3, kind: input, shape index: {}]   ;;  %s10353_s4 = inlined_call_operand.vmem [shape: bf16[2,256,128], index: 4, kind: output, shape index: {0}]   ;;  %s10354_s5 = inlined_call_operand.vmem [shape: f32[2,2,128], index: 5, kind: output, shape index: {1}]  }
   0x1 LB: > { %s6165_s19 = sadd.s32 4294967295, %s7703_s18   ;;  %p6169_p0 = scmp.ge.s32.totalorder %s7703_s18, 1  ;;  %s7703_s18 = sphi %s7736_s18, %s16_s18  }
   0x2   : > { %p190_p1 = scmp.lt.s32.totalorder %s7703_s18, 3 }
   0x4   : > { %p191_p2 = pnand %p6169_p0, %p190_p1 }
   0x6   : > { %194 = sbr.rel (%p191_p2) target bundleno = 688 (0x2b0), region = 36 }
   0xb   : > { %v7548_v0 = vld [vmem:[%s10352_s3 + $0x78] sm:$0xff]   ;;  %v7750_v1 = vld [vmem:[%s10352_s3 + $0x70] sm:$0xff]   ;;  %v7705_v2 = vmov 0   ;;  %p222_p3 = scmp.lt.s32.totalorder %s6165_s19, 1  ;;  %v7550_v3 = vld [vmem:[%s10352_s3 + $0x68] sm:$0xff]   ;;  %vm885_vm2 = vcmask 1043456  }
   0xc   : > { %411 = vst [vmem:[#allocation2] sm:$0xf] %v7705_v2  ;;  %412 = vst [vmem:[#allocation2 + $0x4] sm:$0xf] %v7705_v2  ;;  %7091 = vmatprep.subr.bf16.mxu0 %v7548_v0  ;;  %7523 = vmatprep.subr.bf16.mxu1 %v7548_v0  ;;  %v7551_v4 = vld [vmem:[%s10352_s3 + $0x60] sm:$0xff]   ;;  %v7552_v20 = vld [vmem:[%s10352_s3 + $0x58] sm:$0xff]  }
   0xd   : > { %413 = vst [vmem:[#allocation2 + $0x8] sm:$0x1] %v7705_v2  ;;  %414 = vst [vmem:[#allocation2 + $0xc] sm:$0xf] %v7705_v2  ;;  %7092 = vmatpush3.bf16.msra.mxu0 %v7548_v0  ;;  %7531 = vmatpush3.bf16.msra.mxu1 %v7548_v0  ;;  %s10600_s19 = smov (!%p222_p3, %s6165_s19), 1  ;;  %vm892_vm5 = vcmask 1040384  }
   0xe   : > { %415 = vst [vmem:[#allocation2 + $0x10] sm:$0xf] %v7705_v2  ;;  %416 = vst [vmem:[#allocation2 + $0x14] sm:$0x1] %v7705_v2  ;;  %7093 = vmatprep.subr.bf16.mxu0 %v7750_v1  ;;  %7524 = vmatprep.subr.bf16.mxu1 %v7750_v1  ;;  %s6635_s26 = sshll.u32 %s10600_s19, 7  ;;  %v7553_v35 = vld [vmem:[%s10352_s3 + $0x50] sm:$0xff]  }
   0xf   : > { %417 = vst [vmem:[#allocation2 + $0x18] sm:$0xf] %v7705_v2  ;;  %418 = vst [vmem:[#allocation2 + $0x1c] sm:$0xf] %v7705_v2  ;;  %s7774_s6 = scalar_lea.vmem %s10349_s0, %s6635_s26  ;;  %vm1066_vm0 = vsmask.f32 3328  ;;  %s10212_s11 = scalar_lea.vmem %s10353_s4, %s6635_s26 }
  0x10   : > { %419 = vst [vmem:[#allocation2 + $0x20] sm:$0x1] %v7705_v2  ;;  %420 = vst [vmem:[#allocation2 + $0x24] sm:$0xf] %v7705_v2  ;;  %vm1067_vm1 = vsmask.f32 7440 }
  0x11   : > { %421 = vst [vmem:[#allocation2 + $0x28] sm:$0xf] %v7705_v2  ;;  %422 = vst [vmem:[#allocation2 + $0x2c] sm:$0x1] %v7705_v2  ;;  %7094 = vmatpush3.bf16.msra.mxu0 %v7750_v1  ;;  %7532 = vmatpush3.bf16.msra.mxu1 %v7750_v1  ;;  %v6702_v13 = vld [vmem:[%s7774_s6] sm:$0xff]   ;;  %v6851_v19 = vld [vmem:[%s7774_s6 + $0x38] sm:$0xff]  }
  0x12   : > { %423 = vst [vmem:[#allocation2 + $0x30] sm:$0xf] %v7705_v2  ;;  %424 = vst [vmem:[#allocation2 + $0x34] sm:$0xf] %v7705_v2  ;;  %7095 = vmatprep.subr.bf16.mxu0 %v7550_v3  ;;  %7525 = vmatprep.subr.bf16.mxu1 %v7550_v3  ;;  %v6703_v16 = vunpack.c.l.bf16 %v6702_v13  ;;  %v6704_v17 = vunpack.c.h.bf16 %v6702_v13  ;;  %v7783_v18 = vld [vmem:[%s10350_s1] ss:$0 sm:$0xff]  ;;  %v6731_v30 = vunpack.c.l.bf16 %v6851_v19  ;;  %v6732_v31 = vunpack.c.h.bf16 %v6851_v19 }
  0x13   : > { %425 = vst [vmem:[#allocation2 + $0x38] sm:$0x1] %v7705_v2  ;;  %426 = vst [vmem:[#allocation2 + $0x3c] sm:$0xf] %v7705_v2  ;;  %v1002_v5 = vld [vmem:[#allocation2] sm:$0xf] }
  0x14   : > { %427 = vst [vmem:[#allocation2 + $0x40] sm:$0xf] %v7705_v2  ;;  %428 = vst [vmem:[#allocation2 + $0x44] sm:$0x1] %v7705_v2  ;;  %v1003_v6 = vld [vmem:[#allocation2 + $0x4] sm:$0xf]  ;;  %v308_v26 = vmul.f32 %v6703_v16, %v7783_v18  ;;  %v309_v27 = vmul.f32 %v6704_v17, %v7783_v18  ;;  %v322_v37 = vmul.f32 %v6731_v30, %v7783_v18 }
  0x15   : > { %429 = vst [vmem:[#allocation2 + $0x48] sm:$0xf] %v7705_v2  ;;  %430 = vst [vmem:[#allocation2 + $0x4c] sm:$0xf] %v7705_v2  ;;  %v7776_v7 = vld [vmem:[#allocation2 + $0x8] sm:$0x1]  ;;  %7096 = vmatpush3.bf16.msra.mxu0 %v7550_v3  ;;  %7533 = vmatpush3.bf16.msra.mxu1 %v7550_v3  ;;  %v323_v38 = vmul.f32 %v6732_v31, %v7783_v18 }
  0x16   : > { %431 = vst [vmem:[#allocation2 + $0x50] sm:$0x1] %v7705_v2  ;;  %432 = vst [vmem:[#allocation2 + $0x54] sm:$0xf] %v7705_v2  ;;  %v1070_v8 = vshrl.u32 %v1002_v5, 16  ;;  %v1073_v9 = vshll.u32 %v1002_v5, 16  ;;  %7097 = vmatprep.subr.bf16.mxu0 %v7551_v4  ;;  %7526 = vmatprep.subr.bf16.mxu1 %v7551_v4 }
  0x17   : > { %433 = vst [vmem:[#allocation2 + $0x58] sm:$0xf] %v7705_v2  ;;  %434 = vst [vmem:[#allocation2 + $0x5c] sm:$0x1] %v7705_v2  ;;  %v1079_v10 = vshll.u32 %v1003_v6, 16  ;;  %v1083_v11 = vshrl.u32 %v1003_v6, 16 }
  0x18   : > { %435 = vst [vmem:[#allocation2 + $0x60] sm:$0xf] %v7705_v2  ;;  %436 = vst [vmem:[#allocation2 + $0x64] sm:$0xf] %v7705_v2  ;;  %v1089_v12 = vshll.u32 %v7776_v7, 16  ;;  %v1072_v14 = vrot.slane %v1070_v8, 4 }
  0x19   : > { %437 = vst [vmem:[#allocation2 + $0x68] sm:$0x1] %v7705_v2  ;;  %438 = vst [vmem:[#allocation2 + $0x6c] sm:$0xf] %v7705_v2  ;;  %v1075_v15 = vrot.slane %v1073_v9, 5  ;;  %v1081_v21 = vrot.slane %v1079_v10, 5  ;;  %7098 = vmatpush3.bf16.msra.mxu0 %v7551_v4  ;;  %7534 = vmatpush3.bf16.msra.mxu1 %v7551_v4 }
  0x1a   : > { %439 = vst [vmem:[#allocation2 + $0x70] sm:$0xf] %v7705_v2  ;;  %440 = vst [vmem:[#allocation2 + $0x74] sm:$0x1] %v7705_v2  ;;  %v1085_v22 = vrot.slane %v1083_v11, 4  ;;  %v1091_v25 = vrot.slane %v1089_v12, 5  ;;  %7099 = vmatprep.subr.bf16.mxu0 %v7552_v20  ;;  %7527 = vmatprep.subr.bf16.mxu1 %v7552_v20 }
  0x1b   : > { %441 = vst [vmem:[#allocation2 + $0x78] sm:$0xf] %v7705_v2  ;;  %442 = vst [vmem:[#allocation2 + $0x7c] sm:$0xf] %v7705_v2  ;;  %v7792_v23 = vld [vmem:[%s10351_s2] ss:$0 sm:$0xff]  ;;  %v1076_v24 = vor.u32 %v1075_v15, %v1072_v14 }
  0x1c   : > { %443 = vst [vmem:[#allocation2 + $0x80] sm:$0x1] %v7705_v2  ;;  %444 = vst [vmem:[#allocation2 + $0x84] sm:$0xf] %v7705_v2  ;;  %v1086_v29 = vor.u32 %v1085_v22, %v1081_v21  ;;  %vm561_vm4 = vsmask.f32 256  ;;  %v347_v33 = vadd.f32 %v7792_v23, %v308_v26  ;;  %v348_v34 = vadd.f32 %v7792_v23, %v309_v27 }
  0x1d   : > { %445 = vst [vmem:[#allocation2 + $0x88] sm:$0xf] %v7705_v2  ;;  %446 = vst [vmem:[#allocation2 + $0x8c] sm:$0x1] %v7705_v2  ;;  %v1077_v32 = vrot.slane %v1076_v24, 4  ;;  %v6852_v42 = vld [vmem:[%s7774_s6 + $0x40] sm:$0xff]   ;;  %v361_v44 = vadd.f32 %v7792_v23, %v322_v37  ;;  %v362_v45 = vadd.f32 %v7792_v23, %v323_v38  ;;  %7100 = vmatpush3.bf16.msra.mxu0 %v7552_v20  ;;  %7535 = vmatpush3.bf16.msra.mxu1 %v7552_v20 }
  0x1e   : > { %447 = vst [vmem:[#allocation2 + $0x90] sm:$0xf] %v7705_v2  ;;  %448 = vst [vmem:[#allocation2 + $0x94] sm:$0xf] %v7705_v2  ;;  %v1087_v36 = vrot.slane %v1086_v29, 4  ;;  %v379_v40 = vmax.f32 %v347_v33, 0.0  ;;  %v6735_v46 = vunpack.c.l.bf16 %v6852_v42  ;;  %v6736_v50 = vunpack.c.h.bf16 %v6852_v42  ;;  %7101 = vmatprep.subr.bf16.mxu0 %v7553_v35  ;;  %7528 = vmatprep.subr.bf16.mxu1 %v7553_v35 }
  0x1f   : > { %449 = vst [vmem:[#allocation2 + $0x98] sm:$0x1] %v7705_v2  ;;  %450 = vst [vmem:[#allocation2 + $0x9c] sm:$0xf] %v7705_v2  ;;  %v380_v41 = vmax.f32 %v348_v34, 0.0  ;;  %v7554_v51 = vld [vmem:[%s10352_s3 + $0x48] sm:$0xff]  }
  0x20   : > { %451 = vst [vmem:[#allocation2 + $0xa0] sm:$0xf] %v7705_v2  ;;  %452 = vst [vmem:[#allocation2 + $0xa4] sm:$0x1] %v7705_v2  ;;  %vm562_vm6 = vsmask.f32 4368  ;;  %v6637_v48 = vpack.c.bf16 %v379_v40, %v379_v40  ;;  %v324_v54 = vmul.f32 %v6735_v46, %v7783_v18  ;;  %v325_v1 = vmul.f32 %v6736_v50, %v7783_v18 }
  0x21   : > { %453 = vst [vmem:[#allocation2 + $0xa8] sm:$0xf] %v7705_v2  ;;  %454 = vst [vmem:[#allocation2 + $0xac] sm:$0xf] %v7705_v2  ;;  %v6638_v49 = vpack.c.bf16 %v380_v41, %v380_v41  ;;  %vm886_vm7 = vsmask.f32 7938  ;;  %7102 = vmatpush3.bf16.msra.mxu0 %v7553_v35  ;;  %7536 = vmatpush3.bf16.msra.mxu1 %v7553_v35 }
  0x22   : > { %455 = vst [vmem:[#allocation2 + $0xb0] sm:$0x1] %v7705_v2  ;;  %456 = vst [vmem:[#allocation2 + $0xb4] sm:$0xf] %v7705_v2  ;;  %v393_v52 = vmax.f32 %v361_v44, 0.0  ;;  %v394_v53 = vmax.f32 %v362_v45, 0.0  ;;  %7103 = vmatprep.subr.bf16.mxu0 %v7554_v51  ;;  %7529 = vmatprep.subr.bf16.mxu1 %v7554_v51  ;;  %v364_v26 = vadd.f32 %v7792_v23, %v325_v1 }
  0x23   : > { %457 = vst [vmem:[#allocation2 + $0xb8] sm:$0xf] %v7705_v2  ;;  %458 = vst [vmem:[#allocation2 + $0xbc] sm:$0x1] %v7705_v2  ;;  %v6845_v55 = vld [vmem:[%s7774_s6 + $0x8] sm:$0xff]   ;;  %v565_v56 = vshrl.u32 %v6637_v48, 16 }
  0x24   : > { %459 = vst [vmem:[#allocation2 + $0xc0] sm:$0xf] %v7705_v2  ;;  %460 = vst [vmem:[#allocation2 + $0xc4] sm:$0xf] %v7705_v2  ;;  %v568_v57 = vshll.u32 %v6637_v48, 16  ;;  %v573_v58 = vshrl.u32 %v6638_v49, 16  ;;  %v6651_v63 = vpack.c.bf16 %v393_v52, %v393_v52  ;;  %v6652_v0 = vpack.c.bf16 %v394_v53, %v394_v53 }
  0x25   : > { %461 = vst [vmem:[#allocation2 + $0xc8] sm:$0x1] %v7705_v2  ;;  %462 = vst [vmem:[#allocation2 + $0xcc] sm:$0xf] %v7705_v2  ;;  %v576_v59 = vshll.u32 %v6638_v49, 16  ;;  %v7555_v60 = vld [vmem:[%s10352_s3 + $0x40] sm:$0xff]   ;;  %v6707_v8 = vunpack.c.l.bf16 %v6845_v55  ;;  %v6708_v9 = vunpack.c.h.bf16 %v6845_v55  ;;  %7104 = vmatpush3.bf16.msra.mxu0 %v7554_v51  ;;  %7537 = vmatpush3.bf16.msra.mxu1 %v7554_v51 }
  0x26   : > { %463 = vst [vmem:[#allocation2 + $0xd0] sm:$0xf] %v7705_v2  ;;  %464 = vst [vmem:[#allocation2 + $0xd4] sm:$0x1] %v7705_v2  ;;  %v888_v61 = vld [vmem:[#allocation2 + $0xc] sm:$0xf]  ;;  %v363_v2 = vadd.f32 %v7792_v23, %v324_v54  ;;  %7105 = vmatprep.subr.bf16.mxu0 %v7555_v60  ;;  %7530 = vmatprep.subr.bf16.mxu1 %v7555_v60 }
  0x27   : > { %vm7798_vm3 = vmor %vm1066_vm0, %vm1067_vm1  ;;  %v10368_v62 = vmov 0  ;;  %v10371_v3 = vmov 0  ;;  %v567_v4 = vrot.slane %v565_v56, 7  ;;  %v575_v5 = vrot.slane %v573_v58, 7  ;;  %v894_v6 = vld [vmem:[#allocation2 + $0x14] sm:$0x1] }
  0x28   : > { %v1082_v39 = vsel %vm7798_vm3, %v1077_v32, %v1081_v21  ;;  %v1092_v43 = vsel %vm7798_vm3, %v1087_v36, %v1091_v25  ;;  %vm7826_vm8 = vmand %vm892_vm5, %vm561_vm4  ;;  %v6846_v10 = vld [vmem:[%s7774_s6 + $0x10] sm:$0xff]   ;;  %v10374_v11 = vmov 0  ;;  %v684_v12 = vshrl.u32 %v6651_v63, 16  ;;  %v939_v21 = vld [vmem:[#allocation2 + $0x60] sm:$0xf]  ;;  %s6174_s26 = sshll.u32 %s10600_s19, 1 }
  0x29   : > { %v6225_v47 = vcombine.low %v1082_v39, %v1092_v43  ;;  %v10369_v62 = vsel %vm7826_vm8, 4294967295, %v10368_v62  ;;  %vm7834_vm9 = vmor %vm561_vm4, %vm562_vm6  ;;  %v687_v13 = vshll.u32 %v6651_v63, 16  ;;  %v692_v14 = vshrl.u32 %v6652_v0, 16  ;;  %v7848_v25 = vld [vmem:[%s10352_s3 + $0x38] sm:$0xff]   ;;  %v943_v32 = vld [vmem:[#allocation2 + $0x68] sm:$0x1]  ;;  %7106 = vmatpush3.bf16.msra.mxu0 %v7555_v60  ;;  %7538 = vmatpush3.bf16.msra.mxu1 %v7555_v60  ;;  %s235_s14 = scalar_lea.vmem %s10354_s5, %s6174_s26 }
  0x2a   : > { %10370 = vst [vmem:[#allocation3_spill] sm:$0xff] %v10369_v62  ;;  %v10372_v3 = vsel %vm7834_vm9, 4294967295, %v10371_v3  ;;  %vm7841_vm10 = vmand %vm885_vm2, %vm886_vm7  ;;  %v695_v15 = vshll.u32 %v6652_v0, 16  ;;  %v570_v16 = vor.u32 %v568_v57, %v567_v4  ;;  %v571_v17 = vrot.slane %v567_v4, 4  ;;  %v7860_v33 = vld [vmem:[%s10352_s3 + $0xb8] sm:$0xff]   ;;  %7139 = vmatprep.subr.bf16.mxu1 %v7848_v25 }
  0x2b   : > { %7107 = vmatprep.mubr.bf16.mxu0 %v6225_v47  ;;  %10373 = vst [vmem:[#allocation4_spill] sm:$0xff] %v10372_v3  ;;  %v10375_v11 = vsel %vm7841_vm10, 4294967295, %v10374_v11  ;;  %v578_v19 = vor.u32 %v576_v59, %v575_v5  ;;  %v580_v20 = vrot.slane %v575_v5, 4  ;;  %v686_v22 = vrot.slane %v684_v12, 7  ;;  %v7871_v47 = vld [vmem:[%s7774_s6 + $0x48] sm:$0xff]   ;;  %7187 = vmatprep.subr.bf16.mxu0 %v7860_v33 }
  0x2c   : > { %10376 = vst [vmem:[#allocation5_spill] sm:$0xff] %v10375_v11  ;;  %v694_v24 = vrot.slane %v692_v14, 7  ;;  %v395_v27 = vmax.f32 %v363_v2, 0.0  ;;  %v889_v30 = vsel %vm7841_vm10, %v570_v16, %v888_v61  ;;  %v6711_v34 = vunpack.c.l.bf16 %v6846_v10  ;;  %v946_v61 = vld [vmem:[#allocation2 + $0x6c] sm:$0xf] }
  0x2d   : > { %v579_v29 = vsel %vm7834_vm9, %v571_v17, %v578_v19  ;;  %v895_v31 = vsel %vm7826_vm8, %v580_v20, %v894_v6  ;;  %890 = vst [vmem:[#allocation2 + $0xc] sm:$0xf] %v889_v30  ;;  %v689_v35 = vor.u32 %v687_v13, %v686_v22  ;;  %v690_v36 = vrot.slane %v686_v22, 4  ;;  %v7894_v20 = vld [vmem:[%s7774_s6 + $0x50] sm:$0xff]  }
  0x2e   : > { %891 = vst [vmem:[#allocation2 + $0x10] sm:$0xf] %v579_v29  ;;  %896 = vst [vmem:[#allocation2 + $0x14] sm:$0x1] %v895_v31  ;;  %v697_v37 = vor.u32 %v695_v15, %v694_v24  ;;  %v699_v38 = vrot.slane %v694_v24, 4  ;;  %v396_v39 = vmax.f32 %v364_v26, 0.0  ;;  %v6653_v40 = vpack.c.bf16 %v395_v27, %v395_v27 }
  0x2f   : > { %v310_v41 = vmul.f32 %v6707_v8, %v7783_v18  ;;  %v311_v42 = vmul.f32 %v6708_v9, %v7783_v18  ;;  %v940_v44 = vsel %vm7841_vm10, %v689_v35, %v939_v21  ;;  %v6712_v46 = vunpack.c.h.bf16 %v6846_v10 }
  0x30   : > { %v698_v43 = vsel %vm7834_vm9, %v690_v36, %v697_v37  ;;  %v944_v45 = vsel %vm7826_vm8, %v699_v38, %v943_v32  ;;  %941 = vst [vmem:[#allocation2 + $0x60] sm:$0xf] %v940_v44  ;;  %v6654_v48 = vpack.c.bf16 %v396_v39, %v396_v39  ;;  %v701_v49 = vshrl.u32 %v6653_v40, 16 }
  0x31   : > { %942 = vst [vmem:[#allocation2 + $0x64] sm:$0xf] %v698_v43  ;;  %945 = vst [vmem:[#allocation2 + $0x68] sm:$0x1] %v944_v45  ;;  %v704_v50 = vshll.u32 %v6653_v40, 16  ;;  %v349_v51 = vadd.f32 %v7792_v23, %v310_v41  ;;  %v2104_v52 = vrot.slane %v7776_v7, 5  ;;  %v350_v53 = vadd.f32 %v7792_v23, %v311_v42 }
  0x32   : > { %v312_v54 = vmul.f32 %v6711_v34, %v7783_v18  ;;  %v313_v55 = vmul.f32 %v6712_v46, %v7783_v18  ;;  %v703_v56 = vrot.slane %v701_v49, 7  ;;  %v709_v57 = vshrl.u32 %v6654_v48, 16  ;;  %v950_v43 = vld [vmem:[#allocation2 + $0x74] sm:$0x1] }
  0x33   : > { %v381_v58 = vmax.f32 %v349_v51, 0.0  ;;  %v6739_v59 = vunpack.c.l.bf16 %v7871_v47  ;;  %v712_v60 = vshll.u32 %v6654_v48, 16  ;;  %v382_v63 = vmax.f32 %v350_v53, 0.0 }
  0x34   : > { %v7882_v0 = vadd.f32 %v7792_v23, %v312_v54  ;;  %v1004_v1 = vld [vmem:[#allocation2 + $0xc] sm:$0xf]  ;;  %v706_v5 = vor.u32 %v704_v50, %v703_v56  ;;  %v7887_v8 = vadd.f32 %v7792_v23, %v313_v55  ;;  %v6740_v9 = vunpack.c.h.bf16 %v7871_v47 }
  0x35   : > { %v1005_v2 = vld [vmem:[#allocation2 + $0x10] sm:$0xf]  ;;  %v1051_v4 = vld [vmem:[#allocation2 + $0x14] sm:$0x1]  ;;  %v7884_v6 = vpack.c.bf16 %v381_v58, %v381_v58  ;;  %v1094_v10 = vshrl.u32 %v1004_v1, 16  ;;  %v1097_v12 = vshll.u32 %v1004_v1, 16  ;;  %v7891_v19 = vmul.f32 %v6739_v59, %v7783_v18 }
  0x36   : > { %v1103_v13 = vshll.u32 %v1005_v2, 16  ;;  %v1107_v14 = vshrl.u32 %v1005_v2, 16  ;;  %v1113_v15 = vshll.u32 %v1051_v4, 16  ;;  %v707_v16 = vrot.slane %v703_v56, 4  ;;  %v7559_v1 = vld [vmem:[%s10352_s3 + $0xb0] sm:$0xff]  }
  0x37   : > { %v711_v17 = vrot.slane %v709_v57, 7  ;;  %v1096_v21 = vrot.slane %v1094_v10, 4  ;;  %v1099_v22 = vrot.slane %v1097_v12, 5  ;;  %v1018_v27 = vld [vmem:[#allocation2 + $0x60] sm:$0xf]  ;;  %v947_v35 = vsel %vm7841_vm10, %v706_v5, %v946_v61 }
  0x38   : > { %v1105_v24 = vrot.slane %v1103_v13, 5  ;;  %v1109_v26 = vrot.slane %v1107_v14, 4  ;;  %v1115_v29 = vrot.slane %v1113_v15, 5  ;;  %v1019_v30 = vld [vmem:[#allocation2 + $0x64] sm:$0xf]  ;;  %v1262_v32 = vshrl.u32 %v1018_v27, 16 }
  0x39   : > { %v1058_v31 = vld [vmem:[#allocation2 + $0x68] sm:$0x1]  ;;  %v714_v34 = vor.u32 %v712_v60, %v711_v17  ;;  %v1100_v36 = vor.u32 %v1099_v22, %v1096_v21  ;;  %v1265_v38 = vshll.u32 %v1018_v27, 16  ;;  %v1271_v39 = vshll.u32 %v1019_v30, 16  ;;  %948 = vst [vmem:[#allocation2 + $0x6c] sm:$0xf] %v947_v35 }
  0x3a   : > { %v1110_v37 = vor.u32 %v1109_v26, %v1105_v24  ;;  %v1264_v40 = vrot.slane %v1262_v32, 4  ;;  %v1275_v41 = vshrl.u32 %v1019_v30, 16  ;;  %v1281_v42 = vshll.u32 %v1058_v31, 16  ;;  %v897_v26 = vld [vmem:[#allocation2 + $0x18] sm:$0xf] }
  0x3b   : > { %v6743_v44 = vunpack.c.l.bf16 %v7894_v20  ;;  %v1101_v45 = vrot.slane %v1100_v36, 4  ;;  %v1267_v48 = vrot.slane %v1265_v38, 5  ;;  %v1273_v49 = vrot.slane %v1271_v39, 5  ;;  %v901_v35 = vld [vmem:[#allocation2 + $0x20] sm:$0x1] }
  0x3c   : > { %v1111_v46 = vrot.slane %v1110_v37, 4  ;;  %v1277_v50 = vrot.slane %v1275_v41, 4  ;;  %v1283_v51 = vrot.slane %v1281_v42, 5  ;;  %v715_v53 = vsel %vm7834_vm9, %v707_v16, %v714_v34 }
  0x3d   : > { %v716_v54 = vrot.slane %v711_v17, 4  ;;  %v1106_v55 = vsel %vm7798_vm3, %v1101_v45, %v1105_v24  ;;  %v1268_v57 = vor.u32 %v1267_v48, %v1264_v40  ;;  %949 = vst [vmem:[#allocation2 + $0x70] sm:$0xf] %v715_v53  ;;  %v6640_v58 = vpack.c.bf16 %v382_v63, %v382_v63 }
  0x3e   : > { %v1116_v56 = vsel %vm7798_vm3, %v1111_v46, %v1115_v29  ;;  %v1278_v60 = vor.u32 %v1277_v50, %v1273_v49  ;;  %v582_v2 = vshrl.u32 %v7884_v6, 16  ;;  %v585_v5 = vshll.u32 %v7884_v6, 16 }
  0x3f   : > { %v6226_v59 = vcombine.low %v1106_v55, %v1116_v56  ;;  %v951_v61 = vsel %vm7826_vm8, %v716_v54, %v950_v43  ;;  %v1269_v4 = vrot.slane %v1268_v57, 4  ;;  %v590_v10 = vshrl.u32 %v6640_v58, 16  ;;  %v904_v57 = vld [vmem:[#allocation2 + $0x24] sm:$0xf] }
  0x40   : > { %952 = vst [vmem:[#allocation2 + $0x74] sm:$0x1] %v951_v61  ;;  %v593_v12 = vshll.u32 %v6640_v58, 16  ;;  %v1279_v13 = vrot.slane %v1278_v60, 4  ;;  %v1020_v63 = vld [vmem:[#allocation2 + $0x6c] sm:$0xf] }
  0x41   : > { %7108 = vmatmul.mubr.bf16.vlgmr.msra.gmra.mxu0 %v6226_v59  ;;  %v584_v14 = vrot.slane %v582_v2, 7  ;;  %v383_v15 = vmax.f32 %v7882_v0, 0.0  ;;  %v384_v16 = vmax.f32 %v7887_v8, 0.0  ;;  %v1274_v17 = vsel %vm7798_vm3, %v1269_v4, %v1273_v49  ;;  %v7561_v0 = vld [vmem:[%s10352_s3 + $0xa8] sm:$0xff]  }
  0x42   : > { %v1286_v21 = vshrl.u32 %v1020_v63, 16  ;;  %v1289_v22 = vshll.u32 %v1020_v63, 16  ;;  %7188 = vmatpush3.bf16.msra.mxu0 %v7860_v33  ;;  %v592_v24 = vrot.slane %v590_v10, 7  ;;  %v1284_v6 = vsel %vm7798_vm3, %v1279_v13, %v1283_v51  ;;  %v7563_v51 = vld [vmem:[%s10352_s3 + $0xa0] sm:$0xff]  }
  0x43   : > { %7189 = vmatprep.subr.bf16.mxu0 %v7559_v1  ;;  %v587_v27 = vor.u32 %v585_v5, %v584_v14  ;;  %v588_v29 = vrot.slane %v584_v14, 4  ;;  %v6641_v30 = vpack.c.bf16 %v383_v15, %v383_v15  ;;  %v6233_v8 = vcombine.low %v1274_v17, %v1284_v6 }
  0x44   : > { %v1288_v31 = vrot.slane %v1286_v21, 4  ;;  %v1291_v32 = vrot.slane %v1289_v22, 5  ;;  %v595_v34 = vor.u32 %v593_v12, %v592_v24  ;;  %v1021_v36 = vld [vmem:[#allocation2 + $0x70] sm:$0xf]  ;;  %v597_v33 = vrot.slane %v592_v24, 4  ;;  %v7937_v12 = vld [vmem:[%s7774_s6 + $0x18] sm:$0xff]  }
  0x45   : > { %v898_v37 = vsel %vm7841_vm10, %v587_v27, %v897_v26  ;;  %v6642_v38 = vpack.c.bf16 %v384_v16, %v384_v16  ;;  %v599_v39 = vshrl.u32 %v6641_v30, 16  ;;  %7123 = vmatprep.mubr.bf16.mxu1 %v6233_v8  ;;  %v1295_v41 = vshll.u32 %v1021_v36, 16  ;;  %v7565_v16 = vld [vmem:[%s10352_s3 + $0x98] sm:$0xff]   ;;  %v7558_v22 = vld [vmem:[%s10352_s3 + $0x30] sm:$0xff]  }
  0x46   : > { %v1292_v40 = vor.u32 %v1291_v32, %v1288_v31  ;;  %v1299_v42 = vshrl.u32 %v1021_v36, 16  ;;  %7190 = vmatpush3.bf16.msra.mxu0 %v7559_v1  ;;  %v596_v43 = vsel %vm7834_vm9, %v588_v29, %v595_v34  ;;  %899 = vst [vmem:[#allocation2 + $0x18] sm:$0xf] %v898_v37  ;;  %v902_v46 = vsel %vm7826_vm8, %v597_v33, %v901_v35  ;;  %v908_v1 = vld [vmem:[#allocation2 + $0x2c] sm:$0x1]  ;;  %v7567_v8 = vld [vmem:[%s10352_s3 + $0x90] sm:$0xff]  }
  0x47   : > { %v1059_v45 = vld [vmem:[#allocation2 + $0x74] sm:$0x1]  ;;  %900 = vst [vmem:[#allocation2 + $0x1c] sm:$0xf] %v596_v43  ;;  %v601_v48 = vrot.slane %v599_v39, 7  ;;  %v602_v49 = vshll.u32 %v6641_v30, 16  ;;  %7191 = vmatprep.subr.bf16.mxu0 %v7561_v0  ;;  %v327_v10 = vmul.f32 %v6740_v9, %v7783_v18  ;;  %v365_v15 = vadd.f32 %v7792_v23, %v7891_v19 }
  0x48   : > { %v607_v50 = vshrl.u32 %v6642_v38, 16  ;;  %v1293_v53 = vrot.slane %v1292_v40, 4  ;;  %v1297_v54 = vrot.slane %v1295_v41, 5  ;;  %v1301_v55 = vrot.slane %v1299_v42, 4  ;;  %903 = vst [vmem:[#allocation2 + $0x20] sm:$0x1] %v902_v46 }
  0x49   : > { %v1305_v56 = vshll.u32 %v1059_v45, 16  ;;  %v604_v58 = vor.u32 %v602_v49, %v601_v48  ;;  %v605_v59 = vrot.slane %v601_v48, 4  ;;  %v610_v61 = vshll.u32 %v6642_v38, 16 }
  0x4a   : > { %v609_v60 = vrot.slane %v607_v50, 7  ;;  %v1298_v2 = vsel %vm7798_vm3, %v1293_v53, %v1297_v54  ;;  %v1302_v4 = vor.u32 %v1301_v55, %v1297_v54  ;;  %7192 = vmatpush3.bf16.msra.mxu0 %v7561_v0  ;;  %v366_v47 = vadd.f32 %v7792_v23, %v327_v10  ;;  %v7560_v54 = vld [vmem:[%s10352_s3 + $0x28] sm:$0xff]  }
  0x4b   : > { %v1307_v5 = vrot.slane %v1305_v56, 5  ;;  %v905_v14 = vsel %vm7841_vm10, %v604_v58, %v904_v57  ;;  %7193 = vmatprep.subr.bf16.mxu0 %v7563_v51  ;;  %v6744_v9 = vunpack.c.h.bf16 %v7894_v20  ;;  %v328_v21 = vmul.f32 %v6743_v44, %v7783_v18 }
  0x4c   : > { %v612_v13 = vor.u32 %v610_v61, %v609_v60  ;;  %v614_v63 = vrot.slane %v609_v60, 4  ;;  %v1303_v17 = vrot.slane %v1302_v4, 4  ;;  %906 = vst [vmem:[#allocation2 + $0x24] sm:$0xf] %v905_v14  ;;  %v397_v6 = vmax.f32 %v365_v15, 0.0  ;;  %v7562_v14 = vld [vmem:[%s10352_s3 + $0x20] sm:$0xff]  }
  0x4d   : > { %v1006_v19 = vld [vmem:[#allocation2 + $0x18] sm:$0xf]  ;;  %v6715_v27 = vunpack.c.l.bf16 %v7937_v12  ;;  %v398_v0 = vmax.f32 %v366_v47, 0.0  ;;  %v329_v55 = vmul.f32 %v6744_v9, %v7783_v18  ;;  %v367_v56 = vadd.f32 %v7792_v23, %v328_v21  ;;  %v6848_v9 = vld [vmem:[%s7774_s6 + $0x20] sm:$0xff]  }
  0x4e   : > { %v613_v24 = vsel %vm7834_vm9, %v605_v59, %v612_v13  ;;  %v909_v26 = vsel %vm7826_vm8, %v614_v63, %v908_v1  ;;  %v1308_v29 = vsel %vm7798_vm3, %v1303_v17, %v1307_v5  ;;  %v1007_v30 = vld [vmem:[#allocation2 + $0x1c] sm:$0xf]  ;;  %v1118_v20 = vshrl.u32 %v1006_v19, 16  ;;  %7194 = vmatpush3.bf16.msra.mxu0 %v7563_v51  ;;  %v953_v61 = vld [vmem:[#allocation2 + $0x78] sm:$0xf]  ;;  %v7571_v21 = vld [vmem:[%s10352_s3 + $0x80] sm:$0xff]  }
  0x4f   : > { %v1121_v44 = vshll.u32 %v1006_v19, 16  ;;  %907 = vst [vmem:[#allocation2 + $0x28] sm:$0xf] %v613_v24  ;;  %910 = vst [vmem:[#allocation2 + $0x2c] sm:$0x1] %v909_v26  ;;  %v6234_v31 = vcombine.low %v1298_v2, %v1308_v29  ;;  %v1127_v34 = vshll.u32 %v1007_v30, 16  ;;  %v6655_v36 = vpack.c.bf16 %v397_v6, %v397_v6  ;;  %7195 = vmatprep.subr.bf16.mxu0 %v7565_v16 }
  0x50   : > { %v1052_v32 = vld [vmem:[#allocation2 + $0x20] sm:$0x1]  ;;  %v1131_v35 = vshrl.u32 %v1007_v30, 16  ;;  %v1120_v33 = vrot.slane %v1118_v20, 4  ;;  %v6656_v39 = vpack.c.bf16 %v398_v0, %v398_v0  ;;  %v368_v63 = vadd.f32 %v7792_v23, %v329_v55 }
  0x51   : > { %v1123_v37 = vrot.slane %v1121_v44, 5  ;;  %v1137_v38 = vshll.u32 %v1052_v32, 16  ;;  %7124 = vmatmul.mubr.bf16.vlgmr.msra.gmra.mxu1 %v6234_v31  ;;  %v1129_v40 = vrot.slane %v1127_v34, 5  ;;  %v718_v42 = vshrl.u32 %v6655_v36, 16  ;;  %v957_v13 = vld [vmem:[#allocation2 + $0x80] sm:$0x1] }
  0x52   : > { %v1133_v41 = vrot.slane %v1131_v35, 4  ;;  %v721_v43 = vshll.u32 %v6655_v36, 16  ;;  %7140 = vmatpush3.bf16.msra.mxu1 %v7848_v25  ;;  %v726_v48 = vshrl.u32 %v6656_v39, 16  ;;  %v729_v49 = vshll.u32 %v6656_v39, 16  ;;  %7196 = vmatpush3.bf16.msra.mxu0 %v7565_v16  ;;  %v7569_v25 = vld [vmem:[%s10352_s3 + $0x88] sm:$0xff]   ;;  %v7564_v32 = vld [vmem:[%s10352_s3 + $0x18] sm:$0xff]  }
  0x53   : > { %v1124_v45 = vor.u32 %v1123_v37, %v1120_v33  ;;  %v1139_v46 = vrot.slane %v1137_v38, 5  ;;  %7141 = vmatprep.subr.bf16.mxu1 %v7558_v22  ;;  %v1008_v51 = vld [vmem:[#allocation2 + $0x24] sm:$0xf]  ;;  %v720_v53 = vrot.slane %v718_v42, 7  ;;  %7197 = vmatprep.subr.bf16.mxu0 %v7567_v8  ;;  %v399_v36 = vmax.f32 %v367_v56, 0.0  ;;  %v7575_v37 = vld [vmem:[%s10352_s3 + $0x138] sm:$0xff]  }
  0x54   : > { %v1134_v50 = vor.u32 %v1133_v41, %v1129_v40  ;;  %v1142_v58 = vshrl.u32 %v1008_v51, 16  ;;  %v1145_v59 = vshll.u32 %v1008_v51, 16  ;;  %v728_v60 = vrot.slane %v726_v48, 7 }
  0x55   : > { %v1125_v57 = vrot.slane %v1124_v45, 4  ;;  %v723_v5 = vor.u32 %v721_v43, %v720_v53  ;;  %v724_v10 = vrot.slane %v720_v53, 4  ;;  %v400_v33 = vmax.f32 %v368_v63, 0.0  ;;  %v8007_v53 = vld [vmem:[%s7774_s6 + $0x58] sm:$0xff]  }
  0x56   : > { %v1135_v1 = vrot.slane %v1134_v50, 4  ;;  %v1009_v2 = vld [vmem:[#allocation2 + $0x28] sm:$0xf]  ;;  %v1053_v4 = vld [vmem:[#allocation2 + $0x2c] sm:$0x1]  ;;  %7142 = vmatpush3.bf16.msra.mxu1 %v7558_v22  ;;  %v1144_v16 = vrot.slane %v1142_v58, 4  ;;  %7198 = vmatpush3.bf16.msra.mxu0 %v7567_v8  ;;  %v731_v6 = vor.u32 %v729_v49, %v728_v60  ;;  %v6716_v39 = vunpack.c.h.bf16 %v7937_v12 }
  0x57   : > { %v1130_v15 = vsel %vm7798_vm3, %v1125_v57, %v1129_v40  ;;  %v1147_v17 = vrot.slane %v1145_v59, 5  ;;  %v1151_v47 = vshll.u32 %v1009_v2, 16  ;;  %v1155_v24 = vshrl.u32 %v1009_v2, 16  ;;  %7143 = vmatprep.subr.bf16.mxu1 %v7560_v54  ;;  %7199 = vmatprep.subr.bf16.mxu0 %v7569_v25  ;;  %v7566_v59 = vld [vmem:[%s10352_s3 + $0x10] sm:$0xff]   ;;  %v960_v2 = vld [vmem:[#allocation2 + $0x84] sm:$0xf] }
  0x58   : > { %v1140_v19 = vsel %vm7798_vm3, %v1135_v1, %v1139_v46  ;;  %v1161_v26 = vshll.u32 %v1053_v4, 16  ;;  %v733_v20 = vrot.slane %v728_v60, 4  ;;  %v732_v8 = vsel %vm7834_vm9, %v724_v10, %v731_v6 }
  0x59   : > { %v6227_v22 = vcombine.low %v1130_v15, %v1140_v19  ;;  %v1148_v29 = vor.u32 %v1147_v17, %v1144_v16  ;;  %v1153_v30 = vrot.slane %v1151_v47, 5  ;;  %v1157_v44 = vrot.slane %v1155_v24, 4  ;;  %956 = vst [vmem:[#allocation2 + $0x7c] sm:$0xf] %v732_v8 }
  0x5a   : > { %v1163_v0 = vrot.slane %v1161_v26, 5  ;;  %v954_v31 = vsel %vm7841_vm10, %v723_v5, %v953_v61  ;;  %v958_v35 = vsel %vm7826_vm8, %v733_v20, %v957_v13  ;;  %7144 = vmatpush3.bf16.msra.mxu1 %v7560_v54  ;;  %v314_v40 = vmul.f32 %v6715_v27, %v7783_v18  ;;  %7200 = vmatpush3.bf16.msra.mxu0 %v7569_v25 }
  0x5b   : > { %7111 = vmatprep.mubr.bf16.mxu0 %v6227_v22  ;;  %v1149_v34 = vrot.slane %v1148_v29, 4  ;;  %955 = vst [vmem:[#allocation2 + $0x78] sm:$0xf] %v954_v31  ;;  %v1158_v38 = vor.u32 %v1157_v44, %v1153_v30  ;;  %959 = vst [vmem:[#allocation2 + $0x80] sm:$0x1] %v958_v35  ;;  %7145 = vmatprep.subr.bf16.mxu1 %v7562_v14  ;;  %v6719_v41 = vunpack.c.l.bf16 %v6848_v9  ;;  %v6720_v46 = vunpack.c.h.bf16 %v6848_v9  ;;  %v7568_v22 = vld [vmem:[%s10352_s3 + $0x8] sm:$0xff]  }
  0x5c   : > { %v6657_v43 = vpack.c.bf16 %v399_v36, %v399_v36  ;;  %v6658_v45 = vpack.c.bf16 %v400_v33, %v400_v33  ;;  %7201 = vmatprep.subr.bf16.mxu0 %v7571_v21  ;;  %v315_v49 = vmul.f32 %v6716_v39, %v7783_v18  ;;  %v353_v50 = vadd.f32 %v7792_v23, %v314_v40  ;;  %v7570_v40 = vld [vmem:[%s10352_s3] sm:$0xff]  }
  0x5d   : > { %v1154_v42 = vsel %vm7798_vm3, %v1149_v34, %v1153_v30  ;;  %v1159_v48 = vrot.slane %v1158_v38, 4  ;;  %v316_v51 = vmul.f32 %v6719_v41, %v7783_v18  ;;  %v317_v58 = vmul.f32 %v6720_v46, %v7783_v18 }
  0x5e   : > { %v735_v12 = vshrl.u32 %v6657_v43, 16  ;;  %v738_v27 = vshll.u32 %v6657_v43, 16  ;;  %v743_v54 = vshrl.u32 %v6658_v45, 16  ;;  %v746_v55 = vshll.u32 %v6658_v45, 16  ;;  %7146 = vmatpush3.bf16.msra.mxu1 %v7562_v14  ;;  %7202 = vmatpush3.bf16.msra.mxu0 %v7571_v21  ;;  %v964_v21 = vld [vmem:[#allocation2 + $0x8c] sm:$0x1] }
  0x5f   : > { %v1164_v56 = vsel %vm7798_vm3, %v1159_v48, %v1163_v0  ;;  %v354_v25 = vadd.f32 %v7792_v23, %v315_v49  ;;  %v385_v57 = vmax.f32 %v353_v50, 0.0  ;;  %7147 = vmatprep.subr.bf16.mxu1 %v7564_v32  ;;  %v355_v4 = vadd.f32 %v7792_v23, %v316_v51  ;;  %7283 = vmatprep.subr.bf16.mxu0 %v7575_v37  ;;  %v911_v48 = vld [vmem:[#allocation2 + $0x30] sm:$0xf] }
  0x60   : > { %v6228_v60 = vcombine.low %v1154_v42, %v1164_v56  ;;  %v737_v61 = vrot.slane %v735_v12, 7  ;;  %v745_v1 = vrot.slane %v743_v54, 7  ;;  %v1023_v10 = vld [vmem:[#allocation2 + $0x7c] sm:$0xf]  ;;  %v356_v14 = vadd.f32 %v7792_v23, %v317_v58  ;;  %v915_v56 = vld [vmem:[#allocation2 + $0x38] sm:$0x1] }
  0x61   : > { %v386_v13 = vmax.f32 %v354_v25, 0.0  ;;  %v6643_v63 = vpack.c.bf16 %v385_v57, %v385_v57  ;;  %v6747_v18 = vunpack.c.l.bf16 %v8007_v53  ;;  %v1319_v47 = vshll.u32 %v1023_v10, 16 }
  0x62   : > { %v1022_v5 = vld [vmem:[#allocation2 + $0x78] sm:$0xf]  ;;  %7112 = vmatmul.mubr.bf16.gmra.mxu0 %v6228_v60  ;;  %v1060_v15 = vld [vmem:[#allocation2 + $0x80] sm:$0x1]  ;;  %v1323_v9 = vshrl.u32 %v1023_v10, 16  ;;  %7148 = vmatpush3.bf16.msra.mxu1 %v7564_v32  ;;  %v740_v24 = vor.u32 %v738_v27, %v737_v61  ;;  %v741_v26 = vrot.slane %v737_v61, 4  ;;  %v748_v6 = vor.u32 %v746_v55, %v745_v1 }
  0x63   : > { %v1310_v16 = vshrl.u32 %v1022_v5, 16  ;;  %v1313_v17 = vshll.u32 %v1022_v5, 16  ;;  %v1329_v19 = vshll.u32 %v1060_v15, 16  ;;  %7149 = vmatprep.subr.bf16.mxu1 %v7566_v59  ;;  %v1321_v30 = vrot.slane %v1319_v47, 5  ;;  %v7573_v60 = vld [vmem:[%s10352_s3 + $0xf8] sm:$0xff]  }
  0x64   : > { %v1325_v20 = vrot.slane %v1323_v9, 4  ;;  %v749_v0 = vsel %vm7834_vm9, %v741_v26, %v748_v6  ;;  %v750_v8 = vrot.slane %v745_v1, 4  ;;  %v961_v31 = vsel %vm7841_vm10, %v740_v24, %v960_v2  ;;  %v8044_v5 = vld [vmem:[%s10350_s1] ss:$0 sm:$0xff] }
  0x65   : > { %v1312_v23 = vrot.slane %v1310_v16, 4  ;;  %v1315_v29 = vrot.slane %v1313_v17, 5  ;;  %v1331_v44 = vrot.slane %v1329_v19, 5  ;;  %962 = vst [vmem:[#allocation2 + $0x84] sm:$0xf] %v961_v31  ;;  %v6644_v35 = vpack.c.bf16 %v386_v13, %v386_v13 }
  0x66   : > { %v1326_v34 = vor.u32 %v1325_v20, %v1321_v30  ;;  %963 = vst [vmem:[#allocation2 + $0x88] sm:$0xf] %v749_v0  ;;  %v616_v36 = vshrl.u32 %v6643_v63, 16  ;;  %7150 = vmatpush3.bf16.msra.mxu1 %v7566_v59  ;;  %v965_v33 = vsel %vm7826_vm8, %v750_v8, %v964_v21  ;;  %v619_v37 = vshll.u32 %v6643_v63, 16  ;;  %v8062_v31 = vld [vmem:[%s10351_s2] ss:$0 sm:$0xff] }
  0x67   : > { %v1316_v32 = vor.u32 %v1315_v29, %v1312_v23  ;;  %v387_v38 = vmax.f32 %v355_v4, 0.0  ;;  %v388_v39 = vmax.f32 %v356_v14, 0.0  ;;  %7151 = vmatprep.subr.bf16.mxu1 %v7568_v22  ;;  %966 = vst [vmem:[#allocation2 + $0x8c] sm:$0x1] %v965_v33  ;;  %v624_v45 = vshrl.u32 %v6644_v35, 16 }
  0x68   : > { %v1327_v42 = vrot.slane %v1326_v34, 4  ;;  %v618_v43 = vrot.slane %v616_v36, 7  ;;  %v627_v46 = vshll.u32 %v6644_v35, 16  ;;  %v6748_v51 = vunpack.c.h.bf16 %v8007_v53  ;;  %v918_v4 = vld [vmem:[#allocation2 + $0x3c] sm:$0xf] }
  0x69   : > { %v1317_v41 = vrot.slane %v1316_v32, 4  ;;  %v6645_v49 = vpack.c.bf16 %v387_v38, %v387_v38  ;;  %v6646_v50 = vpack.c.bf16 %v388_v39, %v388_v39  ;;  %v626_v57 = vrot.slane %v624_v45, 7  ;;  %v922_v36 = vld [vmem:[#allocation2 + $0x44] sm:$0x1] }
  0x6a   : > { %v1332_v27 = vsel %vm7798_vm3, %v1327_v42, %v1331_v44  ;;  %v621_v54 = vor.u32 %v619_v37, %v618_v43  ;;  %v622_v55 = vrot.slane %v618_v43, 4  ;;  %7152 = vmatpush3.bf16.msra.mxu1 %v7568_v22  ;;  %v330_v10 = vmul.f32 %v8044_v5, %v6747_v18  ;;  %v8055_v22 = vld [vmem:[%s7774_s6 + $0x60] sm:$0xff]  }
  0x6b   : > { %v1322_v12 = vsel %vm7798_vm3, %v1317_v41, %v1321_v30  ;;  %v633_v58 = vshrl.u32 %v6645_v49, 16  ;;  %v636_v59 = vshll.u32 %v6645_v49, 16  ;;  %7153 = vmatprep.subr.bf16.mxu1 %v7570_v40  ;;  %v641_v1 = vshrl.u32 %v6646_v50, 16 }
  0x6c   : > { %v6235_v25 = vcombine.low %v1322_v12, %v1332_v27  ;;  %v912_v61 = vsel %vm7841_vm10, %v621_v54, %v911_v48  ;;  %v644_v2 = vshll.u32 %v6646_v50, 16  ;;  %v1024_v13 = vld [vmem:[#allocation2 + $0x84] sm:$0xf]  ;;  %v629_v14 = vor.u32 %v627_v46, %v626_v57 }
  0x6d   : > { %v1025_v63 = vld [vmem:[#allocation2 + $0x88] sm:$0xf]  ;;  %v631_v15 = vrot.slane %v626_v57, 4  ;;  %913 = vst [vmem:[#allocation2 + $0x30] sm:$0xf] %v912_v61  ;;  %v635_v16 = vrot.slane %v633_v58, 7  ;;  %v331_v17 = vmul.f32 %v8044_v5, %v6748_v51  ;;  %v369_v32 = vadd.f32 %v8062_v31, %v330_v10 }
  0x6e   : > { %7127 = vmatprep.mubr.bf16.mxu1 %v6235_v25  ;;  %v1334_v47 = vshrl.u32 %v1024_v13, 16  ;;  %v1337_v9 = vshll.u32 %v1024_v13, 16  ;;  %v1343_v21 = vshll.u32 %v1025_v63, 16  ;;  %v1347_v19 = vshrl.u32 %v1025_v63, 16  ;;  %7154 = vmatpush3.bf16.msra.mxu1 %v7570_v40  ;;  %v1061_v24 = vld [vmem:[#allocation2 + $0x8c] sm:$0x1] }
  0x6f   : > { %v630_v53 = vsel %vm7834_vm9, %v622_v55, %v629_v14  ;;  %v916_v18 = vsel %vm7826_vm8, %v631_v15, %v915_v56  ;;  %v638_v26 = vor.u32 %v636_v59, %v635_v16  ;;  %v639_v6 = vrot.slane %v635_v16, 4  ;;  %7235 = vmatprep.subr.bf16.mxu1 %v7573_v60 }
  0x70   : > { %v1336_v23 = vrot.slane %v1334_v47, 4  ;;  %v1339_v29 = vrot.slane %v1337_v9, 5  ;;  %v1345_v30 = vrot.slane %v1343_v21, 5  ;;  %v1349_v20 = vrot.slane %v1347_v19, 4  ;;  %914 = vst [vmem:[#allocation2 + $0x34] sm:$0xf] %v630_v53 }
  0x71   : > { %917 = vst [vmem:[#allocation2 + $0x38] sm:$0x1] %v916_v18  ;;  %v1353_v44 = vshll.u32 %v1061_v24, 16  ;;  %v643_v0 = vrot.slane %v641_v1, 7  ;;  %v919_v8 = vsel %vm7841_vm10, %v638_v26, %v918_v4  ;;  %v370_v33 = vadd.f32 %v8062_v31, %v331_v17  ;;  %v967_v26 = vld [vmem:[#allocation2 + $0x90] sm:$0xf] }
  0x72   : > { %v1340_v34 = vor.u32 %v1339_v29, %v1336_v23  ;;  %v1350_v35 = vor.u32 %v1349_v20, %v1345_v30  ;;  %920 = vst [vmem:[#allocation2 + $0x3c] sm:$0xf] %v919_v8  ;;  %v6751_v37 = vunpack.c.l.bf16 %v8055_v22  ;;  %v401_v41 = vmax.f32 %v369_v32, 0.0  ;;  %v971_v23 = vld [vmem:[#allocation2 + $0x98] sm:$0x1] }
  0x73   : > { %v1355_v38 = vrot.slane %v1353_v44, 5  ;;  %v646_v39 = vor.u32 %v644_v2, %v643_v0  ;;  %v648_v40 = vrot.slane %v643_v0, 4  ;;  %v402_v46 = vmax.f32 %v370_v33, 0.0 }
  0x74   : > { %v1341_v42 = vrot.slane %v1340_v34, 4  ;;  %v1351_v43 = vrot.slane %v1350_v35, 4  ;;  %v8067_v45 = vld [vmem:[#allocation2 + $0x30] sm:$0xf]  ;;  %v6752_v48 = vunpack.c.h.bf16 %v8055_v22  ;;  %v6659_v55 = vpack.c.bf16 %v401_v41, %v401_v41 }
  0x75   : > { %v1166_v49 = vshrl.u32 %v8067_v45, 16  ;;  %v1169_v50 = vshll.u32 %v8067_v45, 16  ;;  %v647_v51 = vsel %vm7834_vm9, %v639_v6, %v646_v39  ;;  %v923_v12 = vsel %vm7826_vm8, %v648_v40, %v922_v36 }
  0x76   : > { %v1346_v27 = vsel %vm7798_vm3, %v1341_v42, %v1345_v30  ;;  %v1356_v54 = vsel %vm7798_vm3, %v1351_v43, %v1355_v38  ;;  %921 = vst [vmem:[#allocation2 + $0x40] sm:$0xf] %v647_v51  ;;  %924 = vst [vmem:[#allocation2 + $0x44] sm:$0x1] %v923_v12  ;;  %v6660_v56 = vpack.c.bf16 %v402_v46, %v402_v46  ;;  %v752_v10 = vshrl.u32 %v6659_v55, 16  ;;  %v6849_v42 = vld [vmem:[%s7774_s6 + $0x28] sm:$0xff]  }
  0x77   : > { %v6236_v25 = vcombine.low %v1346_v27, %v1356_v54  ;;  %v8080_v57 = vld [vmem:[#allocation2 + $0x34] sm:$0xf]  ;;  %v1168_v59 = vrot.slane %v1166_v49, 4  ;;  %v1171_v60 = vrot.slane %v1169_v50, 5  ;;  %v332_v61 = vmul.f32 %v8044_v5, %v6751_v37 }
  0x78   : > { %v8082_v58 = vld [vmem:[#allocation2 + $0x38] sm:$0x1]  ;;  %v1175_v1 = vshll.u32 %v8080_v57, 16  ;;  %v1179_v2 = vshrl.u32 %v8080_v57, 16  ;;  %v755_v14 = vshll.u32 %v6659_v55, 16  ;;  %v760_v15 = vshrl.u32 %v6660_v56, 16 }
  0x79   : > { %v1185_v4 = vshll.u32 %v8082_v58, 16  ;;  %7128 = vmatmul.mubr.bf16.gmra.mxu1 %v6236_v25  ;;  %v1172_v13 = vor.u32 %v1171_v60, %v1168_v59  ;;  %v8088_v63 = vld [vmem:[#allocation2 + $0x3c] sm:$0xf]  ;;  %v763_v16 = vshll.u32 %v6660_v56, 16  ;;  %v754_v53 = vrot.slane %v752_v10, 7  ;;  %v6850_v50 = vld [vmem:[%s7774_s6 + $0x30] sm:$0xff]  }
  0x7a   : > { %v1177_v17 = vrot.slane %v1175_v1, 5  ;;  %v1181_v47 = vrot.slane %v1179_v2, 4  ;;  %v1190_v21 = vshrl.u32 %v8088_v63, 16  ;;  %v1193_v24 = vshll.u32 %v8088_v63, 16  ;;  %v8115_v60 = vld [vmem:[%s7774_s6 + $0x68] sm:$0xff]  }
  0x7b   : > { %v1187_v9 = vrot.slane %v1185_v4, 5  ;;  %v1173_v19 = vrot.slane %v1172_v13, 4  ;;  %v762_v18 = vrot.slane %v760_v15, 7  ;;  %v333_v29 = vmul.f32 %v8044_v5, %v6752_v48 }
  0x7c   : > { %v1182_v6 = vor.u32 %v1181_v47, %v1177_v17  ;;  %v1192_v22 = vrot.slane %v1190_v21, 4  ;;  %v371_v30 = vadd.f32 %v8062_v31, %v332_v61  ;;  %v1195_v8 = vrot.slane %v1193_v24, 5 }
  0x7d   : > { %v1178_v20 = vsel %vm7798_vm3, %v1173_v19, %v1177_v17  ;;  %v8096_v44 = vld [vmem:[#allocation2 + $0x40] sm:$0xf]  ;;  %v8098_v0 = vld [vmem:[#allocation2 + $0x44] sm:$0x1]  ;;  %v757_v32 = vor.u32 %v755_v14, %v754_v53  ;;  %v758_v34 = vrot.slane %v754_v53, 4  ;;  %v765_v39 = vor.u32 %v763_v16, %v762_v18 }
  0x7e   : > { %v1183_v35 = vrot.slane %v1182_v6, 4  ;;  %v1199_v36 = vshll.u32 %v8096_v44, 16  ;;  %v1203_v33 = vshrl.u32 %v8096_v44, 16  ;;  %v1209_v37 = vshll.u32 %v8098_v0, 16 }
  0x7f   : > { %v1196_v38 = vor.u32 %v1195_v8, %v1192_v22  ;;  %v767_v40 = vrot.slane %v762_v18, 4  ;;  %v968_v41 = vsel %vm7841_vm10, %v757_v32, %v967_v26  ;;  %v766_v27 = vsel %vm7834_vm9, %v758_v34, %v765_v39 }
  0x80   : > { %v1188_v43 = vsel %vm7798_vm3, %v1183_v35, %v1187_v9  ;;  %v1201_v46 = vrot.slane %v1199_v36, 5  ;;  %v1205_v48 = vrot.slane %v1203_v33, 4  ;;  %v1211_v49 = vrot.slane %v1209_v37, 5  ;;  %969 = vst [vmem:[#allocation2 + $0x90] sm:$0xf] %v968_v41 }
  0x81   : > { %v6229_v51 = vcombine.low %v1178_v20, %v1188_v43  ;;  %v1197_v12 = vrot.slane %v1196_v38, 4  ;;  %v972_v54 = vsel %vm7826_vm8, %v767_v40, %v971_v23  ;;  %970 = vst [vmem:[#allocation2 + $0x94] sm:$0xf] %v766_v27  ;;  %v372_v56 = vadd.f32 %v8062_v31, %v333_v29  ;;  %v978_v27 = vld [vmem:[#allocation2 + $0xa4] sm:$0x1] }
  0x82   : > { %v1206_v55 = vor.u32 %v1205_v48, %v1201_v46  ;;  %973 = vst [vmem:[#allocation2 + $0x98] sm:$0x1] %v972_v54  ;;  %v403_v25 = vmax.f32 %v371_v30, 0.0  ;;  %v6723_v59 = vunpack.c.l.bf16 %v6849_v42  ;;  %v6724_v1 = vunpack.c.h.bf16 %v6849_v42  ;;  %v974_v42 = vld [vmem:[#allocation2 + $0x9c] sm:$0xf] }
  0x83   : > { %7115 = vmatprep.mubr.bf16.mxu0 %v6229_v51  ;;  %v1202_v61 = vsel %vm7798_vm3, %v1197_v12, %v1201_v46  ;;  %v6727_v2 = vunpack.c.l.bf16 %v6850_v50  ;;  %v6728_v4 = vunpack.c.h.bf16 %v6850_v50  ;;  %v404_v13 = vmax.f32 %v372_v56, 0.0 }
  0x84   : > { %v1207_v10 = vrot.slane %v1206_v55, 4  ;;  %v6661_v14 = vpack.c.bf16 %v403_v25, %v403_v25  ;;  %v318_v15 = vmul.f32 %v8044_v5, %v6723_v59  ;;  %v319_v16 = vmul.f32 %v8044_v5, %v6724_v1 }
  0x85   : > { %v320_v17 = vmul.f32 %v8044_v5, %v6727_v2  ;;  %v321_v47 = vmul.f32 %v8044_v5, %v6728_v4  ;;  %v6755_v9 = vunpack.c.l.bf16 %v8115_v60  ;;  %v6662_v19 = vpack.c.bf16 %v404_v13, %v404_v13 }
  0x86   : > { %v1212_v21 = vsel %vm7798_vm3, %v1207_v10, %v1211_v49  ;;  %v769_v24 = vshrl.u32 %v6661_v14, 16  ;;  %v772_v53 = vshll.u32 %v6661_v14, 16  ;;  %v357_v6 = vadd.f32 %v8062_v31, %v318_v15 }
  0x87   : > { %v6230_v18 = vcombine.low %v1202_v61, %v1212_v21  ;;  %v8126_v26 = vld [vmem:[#allocation2 + $0x90] sm:$0xf]  ;;  %v358_v22 = vadd.f32 %v8062_v31, %v319_v16  ;;  %v359_v23 = vadd.f32 %v8062_v31, %v320_v17  ;;  %v777_v8 = vshrl.u32 %v6662_v19, 16 }
  0x88   : > { %v1358_v29 = vshrl.u32 %v8126_v26, 16  ;;  %v1361_v30 = vshll.u32 %v8126_v26, 16  ;;  %v771_v20 = vrot.slane %v769_v24, 7  ;;  %v8133_v32 = vld [vmem:[#allocation2 + $0x94] sm:$0xf]  ;;  %v780_v35 = vshll.u32 %v6662_v19, 16 }
  0x89   : > { %7116 = vmatmul.mubr.bf16.gmra.mxu0 %v6230_v18  ;;  %v8135_v34 = vld [vmem:[#allocation2 + $0x98] sm:$0x1]  ;;  %v389_v36 = vmax.f32 %v357_v6, 0.0  ;;  %v360_v33 = vadd.f32 %v8062_v31, %v321_v47  ;;  %v6756_v37 = vunpack.c.h.bf16 %v8115_v60  ;;  %v1367_v40 = vshll.u32 %v8133_v32, 16 }
  0x8a   : > { %v1360_v38 = vrot.slane %v1358_v29, 4  ;;  %v1363_v39 = vrot.slane %v1361_v30, 5  ;;  %v1371_v41 = vshrl.u32 %v8133_v32, 16  ;;  %v1377_v43 = vshll.u32 %v8135_v34, 16 }
  0x8b   : > { %v774_v46 = vor.u32 %v772_v53, %v771_v20  ;;  %v775_v48 = vrot.slane %v771_v20, 4  ;;  %v779_v49 = vrot.slane %v777_v8, 7  ;;  %v1369_v51 = vrot.slane %v1367_v40, 5  ;;  %v925_v20 = vld [vmem:[#allocation2 + $0x48] sm:$0xf] }
  0x8c   : > { %v1364_v50 = vor.u32 %v1363_v39, %v1360_v38  ;;  %v1373_v12 = vrot.slane %v1371_v41, 4  ;;  %v390_v54 = vmax.f32 %v358_v22, 0.0  ;;  %v1379_v55 = vrot.slane %v1377_v43, 5  ;;  %v929_v38 = vld [vmem:[#allocation2 + $0x50] sm:$0x1] }
  0x8d   : > { %v782_v56 = vor.u32 %v780_v35, %v779_v49  ;;  %v784_v25 = vrot.slane %v779_v49, 4  ;;  %v975_v59 = vsel %vm7841_vm10, %v774_v46, %v974_v42  ;;  %v6647_v1 = vpack.c.bf16 %v389_v36, %v389_v36 }
  0x8e   : > { %v1365_v60 = vrot.slane %v1364_v50, 4  ;;  %v1374_v61 = vor.u32 %v1373_v12, %v1369_v51  ;;  %976 = vst [vmem:[#allocation2 + $0x9c] sm:$0xf] %v975_v59  ;;  %v6648_v2 = vpack.c.bf16 %v390_v54, %v390_v54  ;;  %v391_v13 = vmax.f32 %v359_v23, 0.0 }
  0x8f   : > { %v783_v4 = vsel %vm7834_vm9, %v775_v48, %v782_v56  ;;  %v979_v10 = vsel %vm7826_vm8, %v784_v25, %v978_v27  ;;  %v392_v14 = vmax.f32 %v360_v33, 0.0  ;;  %v650_v17 = vshrl.u32 %v6647_v1, 16  ;;  %v932_v48 = vld [vmem:[#allocation2 + $0x54] sm:$0xf] }
  0x90   : > { %v1370_v15 = vsel %vm7798_vm3, %v1365_v60, %v1369_v51  ;;  %v1375_v16 = vrot.slane %v1374_v61, 4  ;;  %977 = vst [vmem:[#allocation2 + $0xa0] sm:$0xf] %v783_v4  ;;  %980 = vst [vmem:[#allocation2 + $0xa4] sm:$0x1] %v979_v10  ;;  %v653_v47 = vshll.u32 %v6647_v1, 16  ;;  %v6649_v24 = vpack.c.bf16 %v391_v13, %v391_v13 }
  0x91   : > { %v658_v21 = vshrl.u32 %v6648_v2, 16  ;;  %v661_v19 = vshll.u32 %v6648_v2, 16  ;;  %v6650_v53 = vpack.c.bf16 %v392_v14, %v392_v14  ;;  %v652_v6 = vrot.slane %v650_v17, 7  ;;  %v936_v2 = vld [vmem:[#allocation2 + $0x5c] sm:$0x1] }
  0x92   : > { %v1380_v18 = vsel %vm7798_vm3, %v1375_v16, %v1379_v55  ;;  %v334_v22 = vmul.f32 %v8044_v5, %v6755_v9  ;;  %v335_v23 = vmul.f32 %v8044_v5, %v6756_v37  ;;  %v667_v8 = vshrl.u32 %v6649_v24, 16 }
  0x93   : > { %v6237_v29 = vcombine.low %v1370_v15, %v1380_v18  ;;  %v660_v30 = vrot.slane %v658_v21, 7  ;;  %v670_v35 = vshll.u32 %v6649_v24, 16  ;;  %v655_v36 = vor.u32 %v653_v47, %v652_v6  ;;  %v6858_v15 = vld [vmem:[%s7774_s6 + $0x70] sm:$0xff]  }
  0x94   : > { %v656_v33 = vrot.slane %v652_v6, 4  ;;  %v675_v39 = vshrl.u32 %v6650_v53, 16  ;;  %v678_v40 = vshll.u32 %v6650_v53, 16  ;;  %v669_v46 = vrot.slane %v667_v8, 7 }
  0x95   : > { %7131 = vmatprep.mubr.bf16.mxu1 %v6237_v29  ;;  %v8154_v41 = vld [vmem:[#allocation2 + $0x9c] sm:$0xf]  ;;  %v663_v42 = vor.u32 %v661_v19, %v660_v30  ;;  %v665_v43 = vrot.slane %v660_v30, 4  ;;  %v373_v9 = vadd.f32 %v8062_v31, %v334_v22  ;;  %v926_v50 = vsel %vm7841_vm10, %v655_v36, %v925_v20  ;;  %v8180_v20 = vld [vmem:[#allocation2 + $0x14] sm:$0x1] }
  0x96   : > { %v1382_v37 = vshrl.u32 %v8154_v41, 16  ;;  %v1385_v49 = vshll.u32 %v8154_v41, 16  ;;  %v677_v51 = vrot.slane %v675_v39, 7  ;;  %927 = vst [vmem:[#allocation2 + $0x48] sm:$0xf] %v926_v50  ;;  %v672_v56 = vor.u32 %v670_v35, %v669_v46 }
  0x97   : > { %v8161_v12 = vld [vmem:[#allocation2 + $0xa0] sm:$0xf]  ;;  %v8163_v27 = vld [vmem:[#allocation2 + $0xa4] sm:$0x1]  ;;  %v664_v54 = vsel %vm7834_vm9, %v656_v33, %v663_v42  ;;  %v930_v55 = vsel %vm7826_vm8, %v665_v43, %v929_v38  ;;  %v673_v25 = vrot.slane %v669_v46, 4  ;;  %v374_v21 = vadd.f32 %v8062_v31, %v335_v23  ;;  %v7591_v23 = vld [vmem:[%s10352_s3 + $0x118] sm:$0xff]  }
  0x98   : > { %v1384_v59 = vrot.slane %v1382_v37, 4  ;;  %v1387_v60 = vrot.slane %v1385_v49, 5  ;;  %v1391_v61 = vshll.u32 %v8161_v12, 16  ;;  %v1395_v1 = vshrl.u32 %v8161_v12, 16  ;;  %928 = vst [vmem:[#allocation2 + $0x4c] sm:$0xf] %v664_v54 }
  0x99   : > { %931 = vst [vmem:[#allocation2 + $0x50] sm:$0x1] %v930_v55  ;;  %v1401_v4 = vshll.u32 %v8163_v27, 16  ;;  %v680_v10 = vor.u32 %v678_v40, %v677_v51  ;;  %v682_v13 = vrot.slane %v677_v51, 4  ;;  %v933_v14 = vsel %vm7841_vm10, %v672_v56, %v932_v48  ;;  %v8183_v35 = vld [vmem:[#allocation2 + $0x68] sm:$0x1] }
  0x9a   : > { %v1388_v16 = vor.u32 %v1387_v60, %v1384_v59  ;;  %v1393_v17 = vrot.slane %v1391_v61, 5  ;;  %v1397_v47 = vrot.slane %v1395_v1, 4  ;;  %934 = vst [vmem:[#allocation2 + $0x54] sm:$0xf] %v933_v14  ;;  %v405_v18 = vmax.f32 %v373_v9, 0.0 }
  0x9b   : > { %v1403_v19 = vrot.slane %v1401_v4, 5  ;;  %v681_v24 = vsel %vm7834_vm9, %v673_v25, %v680_v10  ;;  %v937_v53 = vsel %vm7826_vm8, %v682_v13, %v936_v2  ;;  %v406_v29 = vmax.f32 %v374_v21, 0.0  ;;  %v8200_v50 = vld [vmem:[#allocation2] sm:$0xf]  ;;  %v8202_v51 = vld [vmem:[#allocation2 + $0x4] sm:$0xf] }
  0x9c   : > { %v1389_v6 = vrot.slane %v1388_v16, 4  ;;  %v1398_v22 = vor.u32 %v1397_v47, %v1393_v17  ;;  %935 = vst [vmem:[#allocation2 + $0x58] sm:$0xf] %v681_v24  ;;  %938 = vst [vmem:[#allocation2 + $0x5c] sm:$0x1] %v937_v53  ;;  %v6759_v30 = vunpack.c.l.bf16 %v6858_v15  ;;  %v2111_v8 = vrot.slane %v8180_v20, 5 }
  0x9d   : > { %v6663_v36 = vpack.c.bf16 %v405_v18, %v405_v18  ;;  %v6760_v33 = vunpack.c.h.bf16 %v6858_v15  ;;  %v8188_v40 = vld [vmem:[#allocation2 + $0x48] sm:$0xf]  ;;  %v8190_v42 = vpack.c.bf16 %v406_v29, %v406_v29  ;;  %vm2096_vm11 = vcmask 1042432  }
  0x9e   : > { %v1394_v38 = vsel %vm7798_vm3, %v1389_v6, %v1393_v17  ;;  %v1399_v39 = vrot.slane %v1398_v22, 4  ;;  %v336_v43 = vmul.f32 %v8044_v5, %v6759_v30  ;;  %v1214_v9 = vshrl.u32 %v8188_v40, 16 }
  0x9f   : > { %v8193_v46 = vld [vmem:[#allocation2 + $0x4c] sm:$0xf]  ;;  %v1217_v37 = vshll.u32 %v8188_v40, 16  ;;  %v337_v49 = vmul.f32 %v8044_v5, %v6760_v33  ;;  %vm2097_vm12 = vcmask 1046532   ;;  %v786_v2 = vshrl.u32 %v6663_v36, 16 }
  0xa0   : > { %v8195_v48 = vld [vmem:[#allocation2 + $0x50] sm:$0x1]  ;;  %v1404_v55 = vsel %vm7798_vm3, %v1399_v39, %v1403_v19  ;;  %v1223_v56 = vshll.u32 %v8193_v46, 16  ;;  %v1227_v25 = vshrl.u32 %v8193_v46, 16  ;;  %v1216_v5 = vrot.slane %v1214_v9, 4  ;;  %vm8234_vm13 = vmor %vm2096_vm11, %vm2097_vm12 }
  0xa1   : > { %v1233_v59 = vshll.u32 %v8195_v48, 16  ;;  %v6238_v60 = vcombine.low %v1394_v38, %v1404_v55  ;;  %v1219_v61 = vrot.slane %v1217_v37, 5  ;;  %v8211_v1 = vld [vmem:[#allocation2 + $0x54] sm:$0xf]  ;;  %v788_v21 = vrot.slane %v786_v2, 7 }
  0xa2   : > { %v1225_v4 = vrot.slane %v1223_v56, 5  ;;  %v1229_v10 = vrot.slane %v1227_v25, 4  ;;  %v1238_v14 = vshrl.u32 %v8211_v1, 16  ;;  %v1241_v47 = vshll.u32 %v8211_v1, 16  ;;  %v981_v38 = vld [vmem:[#allocation2 + $0xa8] sm:$0xf] }
  0xa3   : > { %v1235_v13 = vrot.slane %v1233_v59, 5  ;;  %7132 = vmatmul.mubr.bf16.gmra.mxu1 %v6238_v60  ;;  %v1220_v15 = vor.u32 %v1219_v61, %v1216_v5  ;;  %v8214_v16 = vld [vmem:[#allocation2 + $0x58] sm:$0xf]  ;;  %v8216_v17 = vld [vmem:[#allocation2 + $0x5c] sm:$0x1]  ;;  %v375_v19 = vadd.f32 %v8062_v31, %v336_v43  ;;  %v789_v33 = vshll.u32 %v6663_v36, 16 }
  0xa4   : > { %v1230_v24 = vor.u32 %v1229_v10, %v1225_v4  ;;  %v1240_v53 = vrot.slane %v1238_v14, 4  ;;  %v1247_v18 = vshll.u32 %v8214_v16, 16  ;;  %v1251_v6 = vshrl.u32 %v8214_v16, 16  ;;  %v2048_v60 = vld [vmem:[#allocation2] sm:$0xe] }
  0xa5   : > { %v1221_v22 = vrot.slane %v1220_v15, 4  ;;  %v1243_v29 = vrot.slane %v1241_v47, 5  ;;  %v1257_v30 = vshll.u32 %v8216_v17, 16  ;;  %v792_v55 = vrot.slane %v788_v21, 4  ;;  %v2049_v10 = vld [vmem:[#allocation2 + $0xc] sm:$0xe] }
  0xa6   : > { %v1231_v39 = vrot.slane %v1230_v24, 4  ;;  %v1249_v9 = vrot.slane %v1247_v18, 5  ;;  %v1253_v37 = vrot.slane %v1251_v6, 4  ;;  %v791_v59 = vor.u32 %v789_v33, %v788_v21  ;;  %v985_v6 = vld [vmem:[#allocation2 + $0xb0] sm:$0x1] }
  0xa7   : > { %v1226_v56 = vsel %vm7798_vm3, %v1221_v22, %v1225_v4  ;;  %v1244_v43 = vor.u32 %v1243_v29, %v1240_v53  ;;  %v1259_v25 = vrot.slane %v1257_v30, 5  ;;  %v794_v2 = vshrl.u32 %v8190_v42, 16 }
  0xa8   : > { %v1236_v5 = vsel %vm7798_vm3, %v1231_v39, %v1235_v13  ;;  %v1254_v61 = vor.u32 %v1253_v37, %v1249_v9  ;;  %v797_v36 = vshll.u32 %v8190_v42, 16  ;;  %v982_v47 = vsel %vm7841_vm10, %v791_v59, %v981_v38 }
  0xa9   : > { %v6231_v14 = vcombine.low %v1226_v56, %v1236_v5  ;;  %v1245_v15 = vrot.slane %v1244_v43, 4  ;;  %v376_v4 = vadd.f32 %v8062_v31, %v337_v49  ;;  %v796_v53 = vrot.slane %v794_v2, 7  ;;  %983 = vst [vmem:[#allocation2 + $0xa8] sm:$0xf] %v982_v47  ;;  %v2050_v43 = vld [vmem:[#allocation2 + $0x18] sm:$0xe] }
  0xaa   : > { %v1255_v24 = vrot.slane %v1254_v61, 4  ;;  %v407_v21 = vmax.f32 %v375_v19, 0.0  ;;  %v10377_v13 = vmov 0  ;;  %v6273_v18 = vrot.slane %v2048_v60, 9  ;;  %v8256_v47 = vld [vmem:[#allocation2 + $0xc] sm:$0xf] }
  0xab   : > { %v10378_v13 = vsel %vm8234_vm13, 4294967295, %v10377_v13  ;;  %7119 = vmatprep.mubr.bf16.mxu0 %v6231_v14  ;;  %v1250_v42 = vsel %vm7798_vm3, %v1245_v15, %v1249_v9  ;;  %v408_v22 = vmax.f32 %v376_v4, 0.0  ;;  %v2101_v29 = vrot.slane %v8202_v51, 5  ;;  %v988_v14 = vld [vmem:[#allocation2 + $0xb4] sm:$0xf] }
  0xac   : > { %10379 = vst [vmem:[#allocation6_spill] sm:$0xff] %v10378_v13  ;;  %v6274_v31 = vrot.slane %v2049_v10, 9  ;;  %v1260_v49 = vsel %vm7798_vm3, %v1255_v24, %v1259_v25  ;;  %v799_v19 = vor.u32 %v797_v36, %v796_v53  ;;  %v801_v30 = vrot.slane %v796_v53, 4  ;;  %v8253_v36 = vld [vmem:[#allocation2 + $0x10] sm:$0xf] }
  0xad   : > { %v6665_v33 = vpack.c.bf16 %v407_v21, %v407_v21  ;;  %v6232_v38 = vcombine.low %v1250_v42, %v1260_v49  ;;  %v6666_v39 = vpack.c.bf16 %v408_v22, %v408_v22  ;;  %v2102_v37 = vsel %vm8234_vm13, %v6273_v18, %v2101_v29  ;;  %v8264_v18 = vld [vmem:[#allocation2 + $0x1c] sm:$0xf] }
  0xae   : > { %v2103_v56 = vrot.slane %v2101_v29, 4  ;;  %v800_v9 = vsel %vm7834_vm9, %v792_v55, %v799_v19  ;;  %v986_v59 = vsel %vm7826_vm8, %v801_v30, %v985_v6  ;;  %v2108_v10 = vrot.slane %v8253_v36, 5  ;;  %v992_v19 = vld [vmem:[#allocation2 + $0xbc] sm:$0x1] }
  0xaf   : > { %v803_v60 = vshrl.u32 %v6665_v33, 16  ;;  %v806_v5 = vshll.u32 %v6665_v33, 16  ;;  %7120 = vmatmul.mubr.bf16.gmra.mxu0 %v6232_v38  ;;  %984 = vst [vmem:[#allocation2 + $0xac] sm:$0xf] %v800_v9  ;;  %987 = vst [vmem:[#allocation2 + $0xb0] sm:$0x1] %v986_v59 }
  0xb0   : > { %v811_v25 = vshrl.u32 %v6666_v39, 16  ;;  %v814_v61 = vshll.u32 %v6666_v39, 16  ;;  %v2105_v2 = vsel %vm8234_vm13, %v2103_v56, %v2104_v52  ;;  %v6275_v24 = vrot.slane %v2050_v43, 9  ;;  %v8260_v53 = vld [vmem:[#allocation2 + $0xa8] sm:$0xf] }
  0xb1   : > { %v805_v55 = vrot.slane %v803_v60, 7  ;;  %v6305_v15 = vcombine.low %v2102_v37, %v2105_v2  ;;  %v2109_v7 = vsel %vm8234_vm13, %v6274_v31, %v2108_v10  ;;  %v2110_v52 = vrot.slane %v2108_v10, 4  ;;  %v2051_v39 = vld [vmem:[#allocation2 + $0x24] sm:$0xe] }
  0xb2   : > { %v813_v21 = vrot.slane %v811_v25, 7  ;;  %v2115_v42 = vrot.slane %v8264_v18, 5  ;;  %v1406_v6 = vshrl.u32 %v8260_v53, 16  ;;  %v1409_v22 = vshll.u32 %v8260_v53, 16  ;;  %v7579_v25 = vld [vmem:[%s10352_s3 + $0x130] sm:$0xff]  }
  0xb3   : > { %v808_v29 = vor.u32 %v806_v5, %v805_v55  ;;  %v809_v49 = vrot.slane %v805_v55, 4  ;;  %7203 = vmatprep.mubr.bf16.mxu0 %v6305_v15  ;;  %v2112_v31 = vsel %vm8234_vm13, %v2110_v52, %v2111_v8  ;;  %v7677_v5 = vld [vmem:[#allocation2 + $0x20] sm:$0x1]  ;;  %v8288_v55 = vld [vmem:[#allocation2 + $0x18] sm:$0xf]  ;;  %v6276_v15 = vrot.slane %v2051_v39, 9 }
  0xb4   : > { %v816_v30 = vor.u32 %v814_v61, %v813_v21  ;;  %v818_v33 = vrot.slane %v813_v21, 4  ;;  %v2116_v38 = vsel %vm8234_vm13, %v6275_v24, %v2115_v42  ;;  %v1408_v37 = vrot.slane %v1406_v6, 4  ;;  %v8292_v24 = vld [vmem:[#allocation2 + $0x28] sm:$0xf] }
  0xb5   : > { %v1411_v56 = vrot.slane %v1409_v22, 5  ;;  %v989_v43 = vsel %vm7841_vm10, %v808_v29, %v988_v14  ;;  %v6306_v9 = vcombine.low %v2109_v7, %v2112_v31  ;;  %v2117_v60 = vrot.slane %v2115_v42, 4  ;;  %v2052_v22 = vld [vmem:[#allocation2 + $0x30] sm:$0xe]  ;;  %v7583_v31 = vld [vmem:[%s10352_s3 + $0x128] sm:$0xff]  }
  0xb6   : > { %v817_v59 = vsel %vm7834_vm9, %v809_v49, %v816_v30  ;;  %990 = vst [vmem:[#allocation2 + $0xb4] sm:$0xf] %v989_v43  ;;  %v993_v20 = vsel %vm7826_vm8, %v818_v33, %v992_v19  ;;  %v2118_v8 = vrot.slane %v7677_v5, 5  ;;  %v8284_v61 = vld [vmem:[#allocation2 + $0xac] sm:$0xf]  ;;  %v2122_v21 = vrot.slane %v8292_v24, 5 }
  0xb7   : > { %v8286_v2 = vld [vmem:[#allocation2 + $0xb0] sm:$0x1]  ;;  %v1412_v10 = vor.u32 %v1411_v56, %v1408_v37  ;;  %991 = vst [vmem:[#allocation2 + $0xb8] sm:$0xf] %v817_v59  ;;  %994 = vst [vmem:[#allocation2 + $0xbc] sm:$0x1] %v993_v20  ;;  %7204 = vmatmul.mubr.bf16.vlgmr.msra.gmra.mxu0 %v6306_v9 }
  0xb8   : > { %v1415_v7 = vshll.u32 %v8284_v61, 16  ;;  %v1419_v52 = vshrl.u32 %v8284_v61, 16  ;;  %v1425_v42 = vshll.u32 %v8286_v2, 16  ;;  %v2119_v6 = vsel %vm8234_vm13, %v2117_v60, %v2118_v8  ;;  %v7680_v49 = vld [vmem:[%s10352_s3 + $0x138] sm:$0xff]   ;;  %v7681_v43 = vld [vmem:[#allocation2 + $0x2c] sm:$0x1] }
  0xb9   : > { %v1413_v29 = vrot.slane %v1412_v10, 4  ;;  %7284 = vmatpush3.bf16.msra.mxu0 %v7680_v49  ;;  %v6307_v19 = vcombine.low %v2116_v38, %v2119_v6  ;;  %v2123_v30 = vsel %vm8234_vm13, %v6276_v15, %v2122_v21  ;;  %v2124_v33 = vrot.slane %v2122_v21, 4  ;;  %v2053_v59 = vld [vmem:[#allocation2 + $0x3c] sm:$0xe]  ;;  %v8308_v20 = vld [vmem:[#allocation2 + $0x24] sm:$0xf] }
  0xba   : > { %v1417_v39 = vrot.slane %v1415_v7, 5  ;;  %v1421_v37 = vrot.slane %v1419_v52, 4  ;;  %v1427_v56 = vrot.slane %v1425_v42, 5  ;;  %v2125_v9 = vrot.slane %v7681_v43, 5  ;;  %7285 = vmatprep.subr.bf16.mxu0 %v7579_v25 }
  0xbb   : > { %7207 = vmatprep.mubr.bf16.mxu0 %v6307_v19  ;;  %v6277_v60 = vrot.slane %v2052_v22, 9  ;;  %v2129_v5 = vrot.slane %v8080_v57, 5  ;;  %v2132_v8 = vrot.slane %v8082_v58, 5  ;;  %v6278_v49 = vrot.slane %v2053_v59, 9  ;;  %v7587_v58 = vld [vmem:[%s10352_s3 + $0x120] sm:$0xff]  }
  0xbc   : > { %v1418_v10 = vsel %vm7798_vm3, %v1413_v29, %v1417_v39  ;;  %v1422_v15 = vor.u32 %v1421_v37, %v1417_v39  ;;  %v2126_v21 = vsel %vm8234_vm13, %v2124_v33, %v2125_v9  ;;  %v2136_v7 = vrot.slane %v8096_v44, 5 }
  0xbd   : > { %v8320_v52 = vld [vmem:[#allocation2 + $0xb4] sm:$0xf]  ;;  %v6308_v42 = vcombine.low %v2123_v30, %v2126_v21  ;;  %7286 = vmatpush3.bf16.msra.mxu0 %v7579_v25  ;;  %v2130_v6 = vsel %vm8234_vm13, %v6277_v60, %v2129_v5  ;;  %v2131_v22 = vrot.slane %v2129_v5, 4  ;;  %v2054_v25 = vld [vmem:[#allocation2 + $0x48] sm:$0xe] }
  0xbe   : > { %v1423_v29 = vrot.slane %v1422_v15, 4  ;;  %v8327_v19 = vld [vmem:[#allocation2 + $0xb8] sm:$0xf]  ;;  %v8329_v33 = vld [vmem:[#allocation2 + $0xbc] sm:$0x1]  ;;  %v1430_v39 = vshrl.u32 %v8320_v52, 16  ;;  %7287 = vmatprep.subr.bf16.mxu0 %v7583_v31 }
  0xbf   : > { %v1433_v43 = vshll.u32 %v8320_v52, 16  ;;  %v1439_v9 = vshll.u32 %v8327_v19, 16  ;;  %v1443_v59 = vshrl.u32 %v8327_v19, 16  ;;  %v1449_v60 = vshll.u32 %v8329_v33, 16  ;;  %v2055_v5 = vld [vmem:[#allocation2 + $0x54] sm:$0xe]  ;;  %7208 = vmatmul.mubr.bf16.gmra.mxu0 %v6308_v42 }
  0xc0   : > { %v1428_v15 = vsel %vm7798_vm3, %v1423_v29, %v1427_v56  ;;  %v1432_v21 = vrot.slane %v1430_v39, 4  ;;  %v2133_v30 = vsel %vm8234_vm13, %v2131_v22, %v2132_v8  ;;  %v2137_v56 = vsel %vm8234_vm13, %v6278_v49, %v2136_v7 }
  0xc1   : > { %v6239_v37 = vcombine.low %v1418_v10, %v1428_v15  ;;  %v1435_v38 = vrot.slane %v1433_v43, 5  ;;  %v1441_v14 = vrot.slane %v1439_v9, 5  ;;  %v1445_v4 = vrot.slane %v1443_v59, 4  ;;  %7288 = vmatpush3.bf16.msra.mxu0 %v7583_v31 }
  0xc2   : > { %v1451_v54 = vrot.slane %v1449_v60, 5  ;;  %v6309_v62 = vcombine.low %v2130_v6, %v2133_v30  ;;  %v2138_v42 = vrot.slane %v2136_v7, 4  ;;  %7289 = vmatprep.subr.bf16.mxu0 %v7587_v58  ;;  %v2139_v10 = vrot.slane %v8098_v0, 5  ;;  %v2056_v6 = vld [vmem:[#allocation2 + $0x60] sm:$0xe] }
  0xc3   : > { %7135 = vmatprep.mubr.bf16.mxu1 %v6239_v37  ;;  %v1436_v8 = vor.u32 %v1435_v38, %v1432_v21  ;;  %v1446_v22 = vor.u32 %v1445_v4, %v1441_v14  ;;  %v6279_v29 = vrot.slane %v2054_v25, 9  ;;  %v2143_v31 = vrot.slane %v8193_v46, 5  ;;  %v2057_v4 = vld [vmem:[#allocation2 + $0x6c] sm:$0xe]  ;;  %v7595_v25 = vld [vmem:[%s10352_s3 + $0x110] sm:$0xff]  }
  0xc4   : > { %7211 = vmatprep.mubr.bf16.mxu0 %v6309_v62  ;;  %v2146_v39 = vrot.slane %v8195_v48, 5  ;;  %v6280_v43 = vrot.slane %v2055_v5, 9  ;;  %v2150_v9 = vrot.slane %v8214_v16, 5  ;;  %v2140_v7 = vsel %vm8234_vm13, %v2138_v42, %v2139_v10  ;;  %v2058_v5 = vld [vmem:[#allocation2 + $0x78] sm:$0xe] }
  0xc5   : > { %v1437_v30 = vrot.slane %v1436_v8, 4  ;;  %v1447_v59 = vrot.slane %v1446_v22, 4  ;;  %v2153_v38 = vrot.slane %v8216_v17, 5  ;;  %7290 = vmatpush3.bf16.msra.mxu0 %v7587_v58  ;;  %v6310_v0 = vcombine.low %v2137_v56, %v2140_v7  ;;  %v8374_v42 = vld [vmem:[#allocation2 + $0x64] sm:$0xf] }
  0xc6   : > { %v2144_v62 = vsel %vm8234_vm13, %v6279_v29, %v2143_v31  ;;  %v2145_v49 = vrot.slane %v2143_v31, 4  ;;  %v8361_v48 = vsel %vm8234_vm13, %v6280_v43, %v2150_v9  ;;  %7291 = vmatprep.subr.bf16.mxu0 %v7591_v23  ;;  %v2152_v58 = vrot.slane %v2150_v9, 4  ;;  %v2059_v31 = vld [vmem:[#allocation2 + $0x84] sm:$0xe]  ;;  %v2060_v7 = vld [vmem:[#allocation2 + $0x90] sm:$0xe] }
  0xc7   : > { %v1442_v37 = vsel %vm7798_vm3, %v1437_v30, %v1441_v14  ;;  %v1452_v17 = vsel %vm7798_vm3, %v1447_v59, %v1451_v54  ;;  %7212 = vmatmul.mubr.bf16.gmra.mxu0 %v6310_v0  ;;  %v6281_v56 = vrot.slane %v2056_v6, 9  ;;  %v2157_v8 = vrot.slane %v8374_v42, 5  ;;  %v8379_v54 = vld [vmem:[#allocation2 + $0x60] sm:$0xf]  ;;  %v8389_v30 = vld [vmem:[#allocation2 + $0x70] sm:$0xf] }
  0xc8   : > { %v6240_v15 = vcombine.low %v1442_v37, %v1452_v17  ;;  %v2147_v21 = vsel %vm8234_vm13, %v2145_v49, %v2146_v39  ;;  %v2154_v14 = vsel %vm8234_vm13, %v2152_v58, %v2153_v38  ;;  %v6282_v29 = vrot.slane %v2057_v4, 9  ;;  %v7599_v39 = vld [vmem:[%s10352_s3 + $0x108] sm:$0xff]   ;;  %v7686_v38 = vld [vmem:[#allocation2 + $0x74] sm:$0x1] }
  0xc9   : > { %v6311_v22 = vcombine.low %v2144_v62, %v2147_v21  ;;  %7292 = vmatpush3.bf16.msra.mxu0 %v7591_v23  ;;  %v6312_v43 = vcombine.low %v8361_v48, %v2154_v14  ;;  %v2158_v9 = vsel %vm8234_vm13, %v6281_v56, %v2157_v8  ;;  %v2159_v6 = vrot.slane %v2157_v8, 4  ;;  %v8395_v0 = vld [vmem:[#allocation2 + $0x6c] sm:$0xf]  ;;  %v8399_v48 = vld [vmem:[#allocation2 + $0x7c] sm:$0xf] }
  0xca   : > { %7136 = vmatmul.mubr.bf16.gmra.mxu1 %v6240_v15  ;;  %v2164_v59 = vrot.slane %v8389_v30, 5  ;;  %7293 = vmatprep.subr.bf16.mxu0 %v7595_v25  ;;  %v10380_v23 = vcombine.low %v8200_v50, %v8202_v51  ;;  %v2167_v4 = vrot.slane %v7686_v38, 5  ;;  %v6283_v49 = vrot.slane %v2058_v5, 9  ;;  %v7689_v15 = vld [vmem:[#allocation2 + $0x80] sm:$0x1] }
  0xcb   : > { %7215 = vmatprep.mubr.bf16.mxu0 %v6311_v22  ;;  %v2171_v37 = vrot.slane %v8399_v48, 5  ;;  %v10381_v17 = vrot.slane %v8183_v35, 5  ;;  %v2174_v21 = vrot.slane %v7689_v15, 5  ;;  %v2061_v56 = vld [vmem:[#allocation2 + $0x9c] sm:$0xe]  ;;  %v2206_v35 = vrot.slane %v8327_v19, 5 }
  0xcc   : > { %7155 = vmatprep.mubr.bf16.mxu1 %v10380_v23  ;;  %v8408_v50 = vsel %vm8234_vm13, %v6282_v29, %v2164_v59  ;;  %v2166_v51 = vrot.slane %v2164_v59, 4  ;;  %v8414_v14 = vld [vmem:[#allocation2 + $0x78] sm:$0xf]  ;;  %v8422_v59 = vld [vmem:[#allocation2 + $0x88] sm:$0xf] }
  0xcd   : > { %v2161_v58 = vsel %vm8234_vm13, %v2159_v6, %v10381_v17  ;;  %v8412_v5 = vsel %vm8234_vm13, %v6283_v49, %v2171_v37  ;;  %v2173_v22 = vrot.slane %v2171_v37, 4  ;;  %7294 = vmatpush3.bf16.msra.mxu0 %v7595_v25  ;;  %v6284_v6 = vrot.slane %v2059_v31, 9  ;;  %v7692_v23 = vld [vmem:[#allocation2 + $0x8c] sm:$0x1]  ;;  %v7603_v49 = vld [vmem:[%s10352_s3 + $0x100] sm:$0xff]   ;;  %v7577_v25 = vld [vmem:[%s10352_s3 + $0xf0] sm:$0xff]  }
  0xce   : > { %v6313_v8 = vcombine.low %v2158_v9, %v2161_v58  ;;  %v8420_v29 = vsel %vm8234_vm13, %v2166_v51, %v2167_v4  ;;  %v2178_v9 = vrot.slane %v8422_v59, 5  ;;  %v2181_v38 = vrot.slane %v7692_v23, 5  ;;  %7295 = vmatprep.subr.bf16.mxu0 %v7599_v39  ;;  %v8437_v37 = vld [vmem:[#allocation2 + $0x84] sm:$0xf]  ;;  %v2062_v51 = vld [vmem:[#allocation2 + $0xa8] sm:$0xe] }
  0xcf   : > { %v6314_v4 = vcombine.low %v8408_v50, %v8420_v29  ;;  %v8435_v31 = vsel %vm8234_vm13, %v2173_v22, %v2174_v21  ;;  %v6285_v58 = vrot.slane %v2060_v7, 9  ;;  %7216 = vmatmul.mubr.bf16.gmra.mxu0 %v6312_v43  ;;  %v2185_v29 = vrot.slane %v8133_v32, 5  ;;  %v2063_v21 = vld [vmem:[#allocation2 + $0xb4] sm:$0xe]  ;;  %v8502_v17 = vld [vmem:[#allocation2 + $0x14] sm:$0x1] }
  0xd0   : > { %v6315_v15 = vcombine.low %v8412_v5, %v8435_v31  ;;  %v8445_v23 = vsel %vm8234_vm13, %v6284_v6, %v2178_v9  ;;  %v2180_v50 = vrot.slane %v2178_v9, 4  ;;  %7219 = vmatprep.mubr.bf16.mxu0 %v6313_v8  ;;  %v2188_v22 = vrot.slane %v8135_v34, 5  ;;  %v8455_v5 = vld [vmem:[%s10352_s3 + $0x1b8] sm:$0xff]  }
  0xd1   : > { %v6286_v7 = vrot.slane %v2061_v56, 9  ;;  %v2192_v43 = vrot.slane %v8161_v12, 5  ;;  %7296 = vmatpush3.bf16.msra.mxu0 %v7599_v39  ;;  %v10382_v6 = vcombine.low %v8256_v47, %v8253_v36  ;;  %v8466_v34 = vsel %vm8234_vm13, %v6285_v58, %v2185_v29  ;;  %v7694_v9 = vld [vmem:[%s10352_s3 + $0xf8] sm:$0xff]   ;;  %v2919_v58 = vld [vmem:[#allocation2 + $0xc] sm:$0xf] }
  0xd2   : > { %v8462_v8 = vsel %vm8234_vm13, %v2180_v50, %v2181_v38  ;;  %v2187_v56 = vrot.slane %v2185_v29, 4  ;;  %v2195_v39 = vrot.slane %v8163_v27, 5  ;;  %7297 = vmatprep.subr.bf16.mxu0 %v7603_v49  ;;  %v10383_v36 = vcombine.low %v8288_v55, %v8264_v18  ;;  %v8483_v50 = vld [vmem:[#allocation2 + $0x10] sm:$0xf]  ;;  %v7581_v18 = vld [vmem:[%s10352_s3 + $0xe8] sm:$0xff]  }
  0xd3   : > { %7156 = vmatmul.mubr.bf16.vlgmr.msra.gmra.mxu1 %v10382_v6  ;;  %v8479_v38 = vsel %vm8234_vm13, %v6286_v7, %v2192_v43  ;;  %v2194_v31 = vrot.slane %v2192_v43, 4  ;;  %v6287_v29 = vrot.slane %v2062_v51, 9  ;;  %v2199_v7 = vrot.slane %v8284_v61, 5  ;;  %v8518_v62 = vld [vmem:[#allocation2 + $0x1c] sm:$0xf] }
  0xd4   : > { %7236 = vmatpush3.bf16.msra.mxu1 %v7694_v9  ;;  %7159 = vmatprep.mubr.bf16.mxu1 %v10383_v36  ;;  %v8490_v55 = vsel %vm8234_vm13, %v2187_v56, %v2188_v22  ;;  %v2202_v43 = vrot.slane %v8286_v2, 5  ;;  %v6288_v27 = vrot.slane %v2063_v21, 9  ;;  %v2922_v22 = vld [vmem:[#allocation2 + $0x18] sm:$0xf]  ;;  %v2209_v21 = vrot.slane %v8329_v33, 5  ;;  %10384 = vst [vmem:[#allocation7_spill] sm:$0xff] %v8518_v62 }
  0xd5   : > { %7237 = vmatprep.subr.bf16.mxu1 %v7577_v25  ;;  %v8498_v9 = vsel %vm8234_vm13, %v2194_v31, %v2195_v39  ;;  %7298 = vmatpush3.bf16.msra.mxu0 %v7603_v49  ;;  %v8508_v2 = vsel %vm8234_vm13, %v6287_v29, %v2199_v7  ;;  %v2201_v56 = vrot.slane %v2199_v7, 4  ;;  %v7585_v49 = vld [vmem:[%s10352_s3 + $0xe0] sm:$0xff]   ;;  %v2968_v31 = vshrl.u32 %v2919_v58, 16 }
  0xd6   : > { %7379 = vmatprep.subr.bf16.mxu0 %v8455_v5  ;;  %v2971_v36 = vshll.u32 %v2919_v58, 16  ;;  %v2208_v7 = vrot.slane %v2206_v35, 4  ;;  %v2977_v33 = vshll.u32 %v8483_v50, 16  ;;  %v2981_v60 = vshrl.u32 %v8483_v50, 16  ;;  %v2925_v51 = vld [vmem:[#allocation2 + $0x24] sm:$0xf] }
  0xd7   : > { %7220 = vmatmul.mubr.bf16.gmra.mxu0 %v6314_v4  ;;  %v8522_v29 = vsel %vm8234_vm13, %v2201_v56, %v2202_v43  ;;  %v2970_v58 = vrot.slane %v2968_v31, 4  ;;  %v10385_v4 = vcombine.low %v8308_v20, %v8292_v24  ;;  %v2987_v43 = vshll.u32 %v8502_v17, 16  ;;  %v8543_v56 = vld [vmem:[#allocation2 + $0x20] sm:$0x1] }
  0xd8   : > { %7238 = vmatpush3.bf16.msra.mxu1 %v7577_v25  ;;  %v8526_v25 = vsel %vm8234_vm13, %v6288_v27, %v2206_v35  ;;  %7223 = vmatprep.mubr.bf16.mxu0 %v6315_v15  ;;  %v2973_v10 = vrot.slane %v2971_v36, 5  ;;  %v7589_v27 = vld [vmem:[%s10352_s3 + $0xd8] sm:$0xff]   ;;  %v8540_v35 = vsel %vm8234_vm13, %v2208_v7, %v2209_v21  ;;  %v2979_v15 = vrot.slane %v2977_v33, 5  ;;  %v8550_v21 = vld [vmem:[#allocation2 + $0x28] sm:$0xf] }
  0xd9   : > { %7239 = vmatprep.subr.bf16.mxu1 %v7581_v18  ;;  %v2992_v36 = vshrl.u32 %v2922_v22, 16  ;;  %v10386_v31 = vcombine.low %v8067_v45, %v8080_v57  ;;  %v2995_v39 = vshll.u32 %v2922_v22, 16  ;;  %v2989_v7 = vrot.slane %v2987_v43, 5 }
  0xda   : > { %v2974_v20 = vor.u32 %v2973_v10, %v2970_v58  ;;  %v3001_v6 = vshll.u32 %v8518_v62, 16  ;;  %v3005_v47 = vshrl.u32 %v8518_v62, 16  ;;  %v8555_v10 = vld [vmem:[#allocation2 + $0x2c] sm:$0x1]  ;;  %v3019_v22 = vshll.u32 %v2925_v51, 16 }
  0xdb   : > { %7160 = vmatmul.mubr.bf16.gmra.mxu1 %v10385_v4  ;;  %v2983_v4 = vrot.slane %v2981_v60, 4  ;;  %v2994_v33 = vrot.slane %v2992_v36, 4  ;;  %v2997_v57 = vrot.slane %v2995_v39, 5  ;;  %v3016_v60 = vshrl.u32 %v2925_v51, 16  ;;  %v2928_v58 = vld [vmem:[#allocation2 + $0x30] sm:$0xf] }
  0xdc   : > { %7163 = vmatprep.mubr.bf16.mxu1 %v10386_v31  ;;  %7240 = vmatpush3.bf16.msra.mxu1 %v7581_v18  ;;  %v2975_v3 = vrot.slane %v2974_v20, 4  ;;  %v3011_v18 = vshll.u32 %v8543_v56, 16  ;;  %v3003_v31 = vrot.slane %v3001_v6, 5  ;;  %v3007_v24 = vrot.slane %v3005_v47, 4  ;;  %v8559_v62 = vld [vmem:[#allocation2 + $0x34] sm:$0xf] }
  0xdd   : > { %7241 = vmatprep.subr.bf16.mxu1 %v7585_v49  ;;  %v2984_v45 = vor.u32 %v2983_v4, %v2979_v15  ;;  %v2998_v11 = vor.u32 %v2997_v57, %v2994_v33  ;;  %v10387_v39 = vcombine.low %v8445_v23, %v8462_v8  ;;  %v7593_v47 = vld [vmem:[%s10352_s3 + $0xd0] sm:$0xff]   ;;  %v3018_v51 = vrot.slane %v3016_v60, 4  ;;  %v8580_v60 = vld [vmem:[#allocation2 + $0x38] sm:$0x1] }
  0xde   : > { %v2980_v43 = vsel %vm7798_vm3, %v2975_v3, %v2979_v15  ;;  %v3013_v13 = vrot.slane %v3011_v18, 5  ;;  %v3008_v6 = vor.u32 %v3007_v24, %v3003_v31  ;;  %v3025_v20 = vshll.u32 %v8550_v21, 16 }
  0xdf   : > { %v2985_v36 = vrot.slane %v2984_v45, 4  ;;  %7224 = vmatmul.mubr.bf16.gmra.mxu0 %v10387_v39  ;;  %v10388_v3 = vcombine.low %v8466_v34, %v8490_v55  ;;  %v2999_v4 = vrot.slane %v2998_v11, 4  ;;  %v3029_v23 = vshrl.u32 %v8550_v21, 16  ;;  %v2931_v34 = vld [vmem:[#allocation2 + $0x3c] sm:$0xf] }
  0xe0   : > { %7242 = vmatpush3.bf16.msra.mxu1 %v7585_v49  ;;  %v3021_v49 = vrot.slane %v3019_v22, 5  ;;  %v3035_v8 = vshll.u32 %v8555_v10, 16  ;;  %v10389_v33 = vcombine.low %v8088_v63, %v8096_v44  ;;  %v3009_v45 = vrot.slane %v3008_v6, 4  ;;  %v8587_v44 = vld [vmem:[#allocation2 + $0x40] sm:$0xf] }
  0xe1   : > { %7243 = vmatprep.subr.bf16.mxu1 %v7589_v27  ;;  %7227 = vmatprep.mubr.bf16.mxu0 %v10388_v3  ;;  %v2990_v15 = vsel %vm7798_vm3, %v2985_v36, %v2989_v7  ;;  %v3027_v18 = vrot.slane %v3025_v20, 5  ;;  %v10390_v55 = vcombine.low %v8188_v40, %v8193_v46  ;;  %v3004_v11 = vsel %vm7798_vm3, %v2999_v4, %v3003_v31  ;;  %v8601_v4 = vld [vmem:[#allocation2 + $0x44] sm:$0x1] }
  0xe2   : > { %v8578_v24 = vcombine.low %v2980_v43, %v2990_v15  ;;  %v3022_v57 = vor.u32 %v3021_v49, %v3018_v51  ;;  %v3031_v7 = vrot.slane %v3029_v23, 4  ;;  %v3037_v22 = vrot.slane %v3035_v8, 5  ;;  %v7597_v43 = vld [vmem:[%s10352_s3 + $0xc8] sm:$0xff]  }
  0xe3   : > { %7164 = vmatmul.mubr.bf16.gmra.mxu1 %v10389_v33  ;;  %v3040_v63 = vshrl.u32 %v2928_v58, 16  ;;  %v3014_v36 = vsel %vm7798_vm3, %v3009_v45, %v3013_v13  ;;  %v3043_v40 = vshll.u32 %v2928_v58, 16  ;;  %v3049_v46 = vshll.u32 %v8559_v62, 16  ;;  %v2934_v13 = vld [vmem:[#allocation2 + $0x48] sm:$0xf] }
  0xe4   : > { %7167 = vmatprep.mubr.bf16.mxu1 %v10390_v55  ;;  %7244 = vmatpush3.bf16.msra.mxu1 %v7589_v27  ;;  %v3023_v39 = vrot.slane %v3022_v57, 4  ;;  %v8595_v27 = vcombine.low %v3004_v11, %v3014_v36  ;;  %v3032_v31 = vor.u32 %v3031_v7, %v3027_v18  ;;  %v3053_v51 = vshrl.u32 %v8559_v62, 16  ;;  %v8603_v45 = vld [vmem:[#allocation2 + $0x4c] sm:$0xf] }
  0xe5   : > { %7245 = vmatprep.subr.bf16.mxu1 %v7593_v47  ;;  %v3042_v6 = vrot.slane %v3040_v63, 4  ;;  %v3045_v20 = vrot.slane %v3043_v40, 5  ;;  %v3051_v3 = vrot.slane %v3049_v46, 5  ;;  %v3059_v15 = vshll.u32 %v8580_v60, 16 }
  0xe6   : > { %v3028_v49 = vsel %vm7798_vm3, %v3023_v39, %v3027_v18  ;;  %v3033_v58 = vrot.slane %v3032_v31, 4  ;;  %v3055_v23 = vrot.slane %v3053_v51, 4  ;;  %v3064_v8 = vshrl.u32 %v2931_v34, 16  ;;  %v7601_v18 = vld [vmem:[%s10352_s3 + $0xc0] sm:$0xff]   ;;  %v8623_v51 = vld [vmem:[#allocation2 + $0x50] sm:$0x1] }
  0xe7   : > { %v3067_v33 = vshll.u32 %v2931_v34, 16  ;;  %v10391_v57 = vcombine.low %v8479_v38, %v8498_v9  ;;  %v3046_v55 = vor.u32 %v3045_v20, %v3042_v6  ;;  %v3061_v11 = vrot.slane %v3059_v15, 5  ;;  %v2937_v20 = vld [vmem:[#allocation2 + $0x54] sm:$0xf]  ;;  %v8634_v15 = vld [vmem:[#allocation2 + $0x58] sm:$0xf] }
  0xe8   : > { %7246 = vmatpush3.bf16.msra.mxu1 %v7593_v47  ;;  %v3073_v7 = vshll.u32 %v8587_v44, 16  ;;  %v3077_v47 = vshrl.u32 %v8587_v44, 16  ;;  %v10392_v34 = vcombine.low %v8508_v2, %v8522_v29  ;;  %v3038_v63 = vsel %vm7798_vm3, %v3033_v58, %v3037_v22  ;;  %v8631_v29 = vld [vmem:[%s10352_s3 + $0x178] sm:$0xff]  }
  0xe9   : > { %7228 = vmatmul.mubr.bf16.gmra.mxu0 %v10391_v57  ;;  %7247 = vmatprep.subr.bf16.mxu1 %v7597_v43  ;;  %v3056_v38 = vor.u32 %v3055_v23, %v3051_v3  ;;  %v3066_v9 = vrot.slane %v3064_v8, 4  ;;  %v3069_v36 = vrot.slane %v3067_v33, 5  ;;  %v10393_v39 = vcombine.low %v8211_v1, %v8214_v16 }
  0xea   : > { %7231 = vmatprep.mubr.bf16.mxu0 %v10392_v34  ;;  %v8621_v40 = vcombine.low %v3028_v49, %v3038_v63  ;;  %v3047_v46 = vrot.slane %v3046_v55, 4  ;;  %v3075_v31 = vrot.slane %v3073_v7, 5  ;;  %v3079_v6 = vrot.slane %v3077_v47, 4  ;;  %v2940_v63 = vld [vmem:[#allocation2 + $0x60] sm:$0xf] }
  0xeb   : > { %7168 = vmatmul.mubr.bf16.gmra.mxu1 %v10393_v39  ;;  %v10394_v2 = vcombine.low %v8379_v54, %v8374_v42  ;;  %v3057_v1 = vrot.slane %v3056_v38, 4  ;;  %v3070_v16 = vor.u32 %v3069_v36, %v3066_v9  ;;  %v3083_v22 = vshll.u32 %v8601_v4, 16  ;;  %v8647_v9 = vld [vmem:[#allocation2 + $0x5c] sm:$0x1]  ;;  %v8649_v36 = vld [vmem:[#allocation2 + $0x64] sm:$0xf] }
  0xec   : > { %7248 = vmatpush3.bf16.msra.mxu1 %v7597_v43  ;;  %v3088_v49 = vshrl.u32 %v2934_v13, 16  ;;  %v3052_v58 = vsel %vm7798_vm3, %v3047_v46, %v3051_v3  ;;  %v3080_v23 = vor.u32 %v3079_v6, %v3075_v31  ;;  %v3091_v42 = vshll.u32 %v2934_v13, 16 }
  0xed   : > { %7171 = vmatprep.mubr.bf16.mxu1 %v10394_v2  ;;  %7249 = vmatprep.subr.bf16.mxu1 %v7601_v18  ;;  %v3097_v54 = vshll.u32 %v8603_v45, 16  ;;  %v3062_v43 = vsel %vm7798_vm3, %v3057_v1, %v3061_v11  ;;  %v3071_v8 = vrot.slane %v3070_v16, 4  ;;  %v3085_v33 = vrot.slane %v3083_v22, 5 }
  0xee   : > { %v3090_v57 = vrot.slane %v3088_v49, 4  ;;  %v8641_v55 = vcombine.low %v3052_v58, %v3062_v43  ;;  %v3081_v7 = vrot.slane %v3080_v23, 4  ;;  %v3093_v47 = vrot.slane %v3091_v42, 5  ;;  %v8665_v42 = vld [vmem:[#allocation2 + $0x68] sm:$0x1] }
  0xef   : > { %v3099_v34 = vrot.slane %v3097_v54, 5  ;;  %v3076_v3 = vsel %vm7798_vm3, %v3071_v8, %v3075_v31  ;;  %v3101_v13 = vshrl.u32 %v8603_v45, 16  ;;  %v3107_v38 = vshll.u32 %v8623_v51, 16 }
  0xf0   : > { %7250 = vmatpush3.bf16.msra.mxu1 %v7601_v18  ;;  %v3112_v11 = vshrl.u32 %v2937_v20, 16  ;;  %v10395_v39 = vcombine.low %v8526_v25, %v8540_v35  ;;  %v3086_v18 = vsel %vm7798_vm3, %v3081_v7, %v3085_v33  ;;  %v3094_v46 = vor.u32 %v3093_v47, %v3090_v57  ;;  %v2943_v7 = vld [vmem:[#allocation2 + $0x6c] sm:$0xf] }
  0xf1   : > { %7331 = vmatprep.subr.bf16.mxu1 %v8631_v29  ;;  %v3115_v31 = vshll.u32 %v2937_v20, 16  ;;  %v3121_v6 = vshll.u32 %v8634_v15, 16  ;;  %v8659_v2 = vcombine.low %v3076_v3, %v3086_v18  ;;  %v3103_v1 = vrot.slane %v3101_v13, 4  ;;  %v8680_v18 = vld [vmem:[#allocation2 + $0x74] sm:$0x1] }
  0xf2   : > { %7232 = vmatmul.mubr.bf16.gmra.mxu0 %v10395_v39  ;;  %v3109_v16 = vrot.slane %v3107_v38, 5  ;;  %v3114_v22 = vrot.slane %v3112_v11, 4  ;;  %v10396_v25 = vcombine.low %v8395_v0, %v8389_v30  ;;  %v3095_v35 = vrot.slane %v3094_v46, 4  ;;  %v8674_v11 = vld [vmem:[#allocation2 + $0x70] sm:$0xf] }
  0xf3   : > { %7299 = vmatprep.mubr.bf16.mxu0 %v8578_v24  ;;  %v3117_v49 = vrot.slane %v3115_v31, 5  ;;  %v3123_v58 = vrot.slane %v3121_v6, 5  ;;  %v3125_v23 = vshrl.u32 %v8634_v15, 16  ;;  %v10397_v20 = vcombine.low %v8414_v14, %v8399_v48  ;;  %v7611_v48 = vld [vmem:[%s10352_s3 + $0x1b0] sm:$0xff]  }
  0xf4   : > { %7172 = vmatmul.mubr.bf16.gmra.mxu1 %v10396_v25  ;;  %v3104_v24 = vor.u32 %v3103_v1, %v3099_v34  ;;  %v3131_v54 = vshll.u32 %v8647_v9, 16  ;;  %v3136_v43 = vshrl.u32 %v2940_v63, 16  ;;  %v3139_v8 = vshll.u32 %v2940_v63, 16 }
  0xf5   : > { %7175 = vmatprep.mubr.bf16.mxu1 %v10397_v20  ;;  %v3100_v30 = vsel %vm7798_vm3, %v3095_v35, %v3099_v34  ;;  %v3118_v0 = vor.u32 %v3117_v49, %v3114_v22  ;;  %v3127_v33 = vrot.slane %v3125_v23, 4  ;;  %v3145_v57 = vshll.u32 %v8649_v36, 16  ;;  %v2946_v22 = vld [vmem:[#allocation2 + $0x78] sm:$0xf]  ;;  %v7615_v35 = vld [vmem:[%s10352_s3 + $0x1a8] sm:$0xff]  }
  0xf6   : > { %v3105_v47 = vrot.slane %v3104_v24, 4  ;;  %v3133_v3 = vrot.slane %v3131_v54, 5  ;;  %v3138_v13 = vrot.slane %v3136_v43, 4  ;;  %v3141_v38 = vrot.slane %v3139_v8, 5 }
  0xf7   : > { %v3119_v14 = vrot.slane %v3118_v0, 4  ;;  %v3128_v63 = vor.u32 %v3127_v33, %v3123_v58  ;;  %v3147_v39 = vrot.slane %v3145_v57, 5  ;;  %v3149_v34 = vshrl.u32 %v8649_v36, 16 }
  0xf8   : > { %v3110_v46 = vsel %vm7798_vm3, %v3105_v47, %v3109_v16  ;;  %v3142_v31 = vor.u32 %v3141_v38, %v3138_v13  ;;  %v3155_v6 = vshll.u32 %v8665_v42, 16  ;;  %v3160_v1 = vshrl.u32 %v2943_v7, 16  ;;  %v2949_v47 = vld [vmem:[#allocation2 + $0x84] sm:$0xf] }
  0xf9   : > { %v8686_v25 = vcombine.low %v3100_v30, %v3110_v46  ;;  %v3124_v49 = vsel %vm7798_vm3, %v3119_v14, %v3123_v58  ;;  %v3129_v23 = vrot.slane %v3128_v63, 4  ;;  %v3151_v20 = vrot.slane %v3149_v34, 4 }
  0xfa   : > { %7300 = vmatmul.mubr.bf16.vlgmr.msra.gmra.mxu0 %v8595_v27  ;;  %v3143_v16 = vrot.slane %v3142_v31, 4  ;;  %v3157_v24 = vrot.slane %v3155_v6, 5  ;;  %v3162_v54 = vrot.slane %v3160_v1, 4  ;;  %v3163_v43 = vshll.u32 %v2943_v7, 16  ;;  %v8712_v7 = vld [vmem:[#allocation2 + $0x80] sm:$0x1] }
  0xfb   : > { %7380 = vmatpush3.bf16.msra.mxu0 %v8455_v5  ;;  %7303 = vmatprep.mubr.bf16.mxu0 %v8621_v40  ;;  %v10398_v27 = vcombine.low %v8437_v37, %v8422_v59  ;;  %v3134_v8 = vsel %vm7798_vm3, %v3129_v23, %v3133_v3  ;;  %v3152_v30 = vor.u32 %v3151_v20, %v3147_v39  ;;  %v3169_v58 = vshll.u32 %v8674_v11, 16  ;;  %v8702_v5 = vld [vmem:[#allocation2 + $0x7c] sm:$0xf] }
  0xfc   : > { %7381 = vmatprep.subr.bf16.mxu0 %v7611_v48  ;;  %v3173_v0 = vshrl.u32 %v8674_v11, 16  ;;  %v10399_v40 = vcombine.low %v8126_v26, %v8133_v32  ;;  %v8707_v33 = vcombine.low %v3124_v49, %v3134_v8  ;;  %v3148_v59 = vsel %vm7798_vm3, %v3143_v16, %v3147_v39  ;;  %v7619_v26 = vld [vmem:[%s10352_s3 + $0x1a0] sm:$0xff]   ;;  %v8721_v49 = vld [vmem:[#allocation2 + $0x88] sm:$0xf] }
  0xfd   : > { %7176 = vmatmul.mubr.bf16.gmra.mxu1 %v10398_v27  ;;  %v3165_v37 = vrot.slane %v3163_v43, 5  ;;  %v3179_v57 = vshll.u32 %v8680_v18, 16  ;;  %v3153_v3 = vrot.slane %v3152_v30, 4  ;;  %v3171_v13 = vrot.slane %v3169_v58, 5 }
  0xfe   : > { %7179 = vmatprep.mubr.bf16.mxu1 %v10399_v40  ;;  %v3175_v38 = vrot.slane %v3173_v0, 4  ;;  %v3184_v14 = vshrl.u32 %v2946_v22, 16  ;;  %v3187_v34 = vshll.u32 %v2946_v22, 16  ;;  %v3193_v39 = vshll.u32 %v8702_v5, 16  ;;  %v2952_v22 = vld [vmem:[#allocation2 + $0x90] sm:$0xf] }
  0xff   : > { %7382 = vmatpush3.bf16.msra.mxu0 %v7611_v48  ;;  %v3166_v32 = vor.u32 %v3165_v37, %v3162_v54  ;;  %v3181_v63 = vrot.slane %v3179_v57, 5  ;;  %v3158_v46 = vsel %vm7798_vm3, %v3153_v3, %v3157_v24  ;;  %v3197_v1 = vshrl.u32 %v8702_v5, 16  ;;  %v8725_v54 = vld [vmem:[#allocation2 + $0x8c] sm:$0x1]  ;;  %v8741_v3 = vld [vmem:[#allocation2 + $0x94] sm:$0xf] }
 0x100   : > { %7383 = vmatprep.subr.bf16.mxu0 %v7615_v35  ;;  %v3176_v31 = vor.u32 %v3175_v38, %v3171_v13  ;;  %v3186_v6 = vrot.slane %v3184_v14, 4  ;;  %v8723_v48 = vcombine.low %v3148_v59, %v3158_v46  ;;  %v3189_v20 = vrot.slane %v3187_v34, 5  ;;  %v8748_v14 = vld [vmem:[#allocation2 + $0x98] sm:$0x1] }
 0x101   : > { %v3167_v23 = vrot.slane %v3166_v32, 4  ;;  %v3195_v16 = vrot.slane %v3193_v39, 5  ;;  %v3199_v27 = vrot.slane %v3197_v1, 4  ;;  %v3203_v24 = vshll.u32 %v8712_v7, 16  ;;  %v2955_v32 = vld [vmem:[#allocation2 + $0x9c] sm:$0xf] }
 0x102   : > { %7304 = vmatmul.mubr.bf16.gmra.mxu0 %v8641_v55  ;;  %v3177_v43 = vrot.slane %v3176_v31, 4  ;;  %v3208_v8 = vshrl.u32 %v2949_v47, 16  ;;  %v3190_v58 = vor.u32 %v3189_v20, %v3186_v6  ;;  %v3211_v0 = vshll.u32 %v2949_v47, 16  ;;  %v8755_v1 = vld [vmem:[#allocation2 + $0xa0] sm:$0xf] }
 0x103   : > { %7307 = vmatprep.mubr.bf16.mxu0 %v8659_v2  ;;  %7384 = vmatpush3.bf16.msra.mxu0 %v7615_v35  ;;  %v3172_v30 = vsel %vm7798_vm3, %v3167_v23, %v3171_v13  ;;  %v3217_v40 = vshll.u32 %v8721_v49, 16  ;;  %v10400_v59 = vcombine.low %v8154_v41, %v8161_v12  ;;  %v3200_v37 = vor.u32 %v3199_v27, %v3195_v16  ;;  %v7623_v2 = vld [vmem:[%s10352_s3 + $0x198] sm:$0xff]  }
 0x104   : > { %7385 = vmatprep.subr.bf16.mxu0 %v7619_v26  ;;  %v3182_v55 = vsel %vm7798_vm3, %v3177_v43, %v3181_v63  ;;  %v3205_v57 = vrot.slane %v3203_v24, 5  ;;  %v3210_v35 = vrot.slane %v3208_v8, 4  ;;  %v10401_v47 = vcombine.low %v8260_v53, %v8284_v61  ;;  %v7604_v24 = vld [vmem:[#allocation2 + $0xc] sm:$0xff]  }
 0x105   : > { %7180 = vmatmul.mubr.bf16.gmra.mxu1 %v10400_v59  ;;  %v8746_v13 = vcombine.low %v3172_v30, %v3182_v55  ;;  %v3191_v41 = vrot.slane %v3190_v58, 4  ;;  %v3213_v12 = vrot.slane %v3211_v0, 5  ;;  %v3219_v38 = vrot.slane %v3217_v40, 5 }
 0x106   : > { %7183 = vmatprep.mubr.bf16.mxu1 %v10401_v47  ;;  %v3201_v63 = vrot.slane %v3200_v37, 4  ;;  %v3221_v34 = vshrl.u32 %v8721_v49, 16  ;;  %v3227_v39 = vshll.u32 %v8725_v54, 16  ;;  %v3232_v46 = vshrl.u32 %v2952_v22, 16 }
 0x107   : > { %7386 = vmatpush3.bf16.msra.mxu0 %v7619_v26  ;;  %v3196_v31 = vsel %vm7798_vm3, %v3191_v41, %v3195_v16  ;;  %v3214_v53 = vor.u32 %v3213_v12, %v3210_v35  ;;  %v3235_v61 = vshll.u32 %v2952_v22, 16  ;;  %v3241_v6 = vshll.u32 %v8741_v3, 16  ;;  %v7627_v26 = vld [vmem:[%s10352_s3 + $0x190] sm:$0xff]   ;;  %v2958_v41 = vld [vmem:[#allocation2 + $0xa8] sm:$0xf] }
 0x108   : > { %v3206_v23 = vsel %vm7798_vm3, %v3201_v63, %v3205_v57  ;;  %7387 = vmatprep.subr.bf16.mxu0 %v7623_v2  ;;  %v3223_v20 = vrot.slane %v3221_v34, 4  ;;  %v3229_v43 = vrot.slane %v3227_v39, 5  ;;  %v3234_v27 = vrot.slane %v3232_v46, 4  ;;  %v8770_v57 = vld [vmem:[#allocation2 + $0xa4] sm:$0x1] }
 0x109   : > { %v8762_v8 = vcombine.low %v3196_v31, %v3206_v23  ;;  %v3215_v16 = vrot.slane %v3214_v53, 4  ;;  %v3237_v22 = vrot.slane %v3235_v61, 5  ;;  %v3243_v30 = vrot.slane %v3241_v6, 5  ;;  %v8783_v53 = vld [vmem:[#allocation2 + $0xac] sm:$0xf] }
 0x10a   : > { %7308 = vmatmul.mubr.bf16.gmra.mxu0 %v8686_v25  ;;  %v3224_v58 = vor.u32 %v3223_v20, %v3219_v38  ;;  %v3245_v0 = vshrl.u32 %v8741_v3, 16  ;;  %v3251_v40 = vshll.u32 %v8748_v14, 16  ;;  %v3256_v59 = vshrl.u32 %v2955_v32, 16 }
 0x10b   : > { %7311 = vmatprep.mubr.bf16.mxu0 %v8707_v33  ;;  %7388 = vmatpush3.bf16.msra.mxu0 %v7623_v2  ;;  %v3220_v55 = vsel %vm7798_vm3, %v3215_v16, %v3219_v38  ;;  %v3238_v37 = vor.u32 %v3237_v22, %v3234_v27  ;;  %v3259_v35 = vshll.u32 %v2955_v32, 16  ;;  %v3265_v47 = vshll.u32 %v8755_v1, 16  ;;  %v7631_v2 = vld [vmem:[%s10352_s3 + $0x188] sm:$0xff]   ;;  %v2961_v16 = vld [vmem:[#allocation2 + $0xb4] sm:$0xf]  ;;  %v7606_v22 = vld [vmem:[#allocation2 + $0x18] sm:$0xff]  }
 0x10c   : > { %v10402_v25 = vcombine.low %v8320_v52, %v8327_v19  ;;  %v3225_v12 = vrot.slane %v3224_v58, 4  ;;  %v3247_v63 = vrot.slane %v3245_v0, 4  ;;  %v3253_v34 = vrot.slane %v3251_v40, 5  ;;  %7389 = vmatprep.subr.bf16.mxu0 %v7627_v26 }
 0x10d   : > { %v3258_v33 = vrot.slane %v3256_v59, 4  ;;  %v3239_v38 = vrot.slane %v3238_v37, 4  ;;  %v3261_v39 = vrot.slane %v3259_v35, 5  ;;  %v3267_v32 = vrot.slane %v3265_v47, 5  ;;  %v7635_v59 = vld [vmem:[%s10352_s3 + $0x180] sm:$0xff]   ;;  %v7609_v47 = vld [vmem:[%s10352_s3 + $0x170] sm:$0xff]  }
 0x10e   : > { %7184 = vmatmul.mubr.bf16.gmra.mxu1 %v10402_v25  ;;  %v3269_v46 = vshrl.u32 %v8755_v1, 16  ;;  %v3230_v31 = vsel %vm7798_vm3, %v3225_v12, %v3229_v43  ;;  %v3248_v52 = vor.u32 %v3247_v63, %v3243_v30  ;;  %v3275_v19 = vshll.u32 %v8770_v57, 16  ;;  %v8803_v63 = vld [vmem:[#allocation2 + $0xb8] sm:$0xf] }
 0x10f   : > { %7251 = vmatprep.mubr.bf16.mxu1 %v7604_v24  ;;  %v3280_v61 = vshrl.u32 %v2958_v41, 16  ;;  %v8785_v6 = vcombine.low %v3220_v55, %v3230_v31  ;;  %v3244_v23 = vsel %vm7798_vm3, %v3239_v38, %v3243_v30  ;;  %7390 = vmatpush3.bf16.msra.mxu0 %v7627_v26  ;;  %v3262_v20 = vor.u32 %v3261_v39, %v3258_v33  ;;  %v8789_v24 = vld [vmem:[#allocation2 + $0xb0] sm:$0x1]  ;;  %v7608_v55 = vld [vmem:[#allocation2 + $0x24] sm:$0xff]  }
 0x110   : > { %v3271_v27 = vrot.slane %v3269_v46, 4  ;;  %v3249_v58 = vrot.slane %v3248_v52, 4  ;;  %v3277_v43 = vrot.slane %v3275_v19, 5  ;;  %v3283_v40 = vshll.u32 %v2958_v41, 16  ;;  %7391 = vmatprep.subr.bf16.mxu0 %v7631_v2 }
 0x111   : > { %v3282_v0 = vrot.slane %v3280_v61, 4  ;;  %v3263_v37 = vrot.slane %v3262_v20, 4  ;;  %v3289_v26 = vshll.u32 %v8783_v53, 16  ;;  %v3293_v30 = vshrl.u32 %v8783_v53, 16  ;;  %v6859_v20 = vld [vmem:[%s7774_s6 + $0x78] sm:$0xff]  }
 0x112   : > { %v3272_v35 = vor.u32 %v3271_v27, %v3267_v32  ;;  %7312 = vmatmul.mubr.bf16.gmra.mxu0 %v8723_v48  ;;  %v3254_v41 = vsel %vm7798_vm3, %v3249_v58, %v3253_v34  ;;  %v3285_v25 = vrot.slane %v3283_v40, 5  ;;  %v3299_v12 = vshll.u32 %v8789_v24, 16  ;;  %v8810_v48 = vld [vmem:[#allocation2 + $0xbc] sm:$0x1] }
 0x113   : > { %v3304_v33 = vshrl.u32 %v2961_v16, 16  ;;  %7315 = vmatprep.mubr.bf16.mxu0 %v8746_v13  ;;  %v8806_v38 = vcombine.low %v3244_v23, %v3254_v41  ;;  %v3268_v39 = vsel %vm7798_vm3, %v3263_v37, %v3267_v32  ;;  %v3291_v31 = vrot.slane %v3289_v26, 5  ;;  %7392 = vmatpush3.bf16.msra.mxu0 %v7631_v2  ;;  %v8816_v13 = vld [vmem:[%s10352_s3 + $0x238] sm:$0xff]   ;;  %v7610_v26 = vld [vmem:[#allocation2 + $0x30] sm:$0xff]  }
 0x114   : > { %v3273_v46 = vrot.slane %v3272_v35, 4  ;;  %v3286_v34 = vor.u32 %v3285_v25, %v3282_v0  ;;  %v3295_v52 = vrot.slane %v3293_v30, 4  ;;  %v3301_v19 = vrot.slane %v3299_v12, 5  ;;  %7393 = vmatprep.subr.bf16.mxu0 %v7635_v59 }
 0x115   : > { %v3306_v61 = vrot.slane %v3304_v33, 4  ;;  %v3307_v32 = vshll.u32 %v2961_v16, 16  ;;  %v3313_v23 = vshll.u32 %v8803_v63, 16  ;;  %v3317_v27 = vshrl.u32 %v8803_v63, 16  ;;  %v7612_v33 = vld [vmem:[#allocation2 + $0x3c] sm:$0xff]  }
 0x116   : > { %7252 = vmatmul.mubr.bf16.vlgmr.msra.gmra.mxu1 %v7606_v22  ;;  %v3278_v2 = vsel %vm7798_vm3, %v3273_v46, %v3277_v43  ;;  %v7613_v22 = vld [vmem:[%s10352_s3 + $0x168] sm:$0xff]   ;;  %v3287_v0 = vrot.slane %v3286_v34, 4  ;;  %v3296_v40 = vor.u32 %v3295_v52, %v3291_v31  ;;  %v6763_v16 = vunpack.c.l.bf16 %v6859_v20  ;;  %v7695_v34 = vld [vmem:[%s10350_s1] ss:$0 sm:$0xff] }
 0x117   : > { %7332 = vmatpush3.bf16.msra.mxu1 %v8631_v29  ;;  %7255 = vmatprep.mubr.bf16.mxu1 %v7608_v55  ;;  %v8826_v58 = vcombine.low %v3268_v39, %v3278_v2  ;;  %v3323_v29 = vshll.u32 %v8810_v48, 16  ;;  %v3673_v55 = vld [vmem:[#allocation2 + $0xc] sm:$0xe]  ;;  %v3309_v37 = vrot.slane %v3307_v32, 5  ;;  %v3315_v35 = vrot.slane %v3313_v23, 5 }
 0x118   : > { %7333 = vmatprep.subr.bf16.mxu1 %v7609_v47  ;;  %v3319_v43 = vrot.slane %v3317_v27, 4  ;;  %7394 = vmatpush3.bf16.msra.mxu0 %v7635_v59  ;;  %v3292_v30 = vsel %vm7798_vm3, %v3287_v0, %v3291_v31  ;;  %v3297_v41 = vrot.slane %v3296_v40, 4  ;;  %v6764_v12 = vunpack.c.h.bf16 %v6859_v20  ;;  %v3674_v59 = vld [vmem:[#allocation2 + $0x18] sm:$0xe]  ;;  %v7617_v31 = vld [vmem:[%s10352_s3 + $0x160] sm:$0xff]  }
 0x119   : > { %v3325_v25 = vrot.slane %v3323_v29, 5  ;;  %7475 = vmatprep.subr.bf16.mxu0 %v8816_v13  ;;  %v3310_v39 = vor.u32 %v3309_v37, %v3306_v61  ;;  %v338_v52 = vmul.f32 %v7695_v34, %v6763_v16  ;;  %v6409_v2 = vrot.slane %v3673_v55, 9  ;;  %v7696_v40 = vld [vmem:[%s10351_s2] ss:$0 sm:$0xff]  ;;  %v10404_v16 = vld [vmem:[#allocation7_spill] sm:$0xff] }
 0x11a   : > { %v3320_v46 = vor.u32 %v3319_v43, %v3315_v35  ;;  %7316 = vmatmul.mubr.bf16.gmra.mxu0 %v8762_v8  ;;  %v339_v20 = vmul.f32 %v7695_v34, %v6764_v12  ;;  %v3739_v61 = vrot.slane %v8483_v50, 5  ;;  %v3742_v32 = vrot.slane %v8502_v17, 5 }
 0x11b   : > { %7334 = vmatpush3.bf16.msra.mxu1 %v7609_v47  ;;  %v3302_v47 = vsel %vm7798_vm3, %v3297_v41, %v3301_v19  ;;  %7319 = vmatprep.mubr.bf16.mxu0 %v8785_v6  ;;  %v3311_v27 = vrot.slane %v3310_v39, 4  ;;  %v377_v29 = vadd.f32 %v7696_v40, %v338_v52  ;;  %v6410_v37 = vrot.slane %v3674_v59, 9  ;;  %v3675_v41 = vld [vmem:[#allocation2 + $0x24] sm:$0xe] }
 0x11c   : > { %7335 = vmatprep.subr.bf16.mxu1 %v7613_v22  ;;  %v8844_v23 = vcombine.low %v3292_v30, %v3302_v47  ;;  %v3321_v0 = vrot.slane %v3320_v46, 4  ;;  %v378_v8 = vadd.f32 %v7696_v40, %v339_v20  ;;  %v8851_v19 = vsel %vm8234_vm13, %v6409_v2, %v3739_v61  ;;  %v7614_v2 = vld [vmem:[#allocation2 + $0x48] sm:$0xff]  }
 0x11d   : > { %v3741_v50 = vrot.slane %v3739_v61, 4  ;;  %v3316_v17 = vsel %vm7798_vm3, %v3311_v27, %v3315_v35  ;;  %v409_v43 = vmax.f32 %v377_v29, 0.0  ;;  %v3746_v30 = vrot.slane %v10404_v16, 5  ;;  %v3677_v29 = vld [vmem:[#allocation2 + $0x3c] sm:$0xe] }
 0x11e   : > { %7256 = vmatmul.mubr.bf16.gmra.mxu1 %v7610_v26  ;;  %v3326_v6 = vsel %vm7798_vm3, %v3321_v0, %v3325_v25  ;;  %v7621_v26 = vld [vmem:[%s10352_s3 + $0x158] sm:$0xff]   ;;  %v410_v39 = vmax.f32 %v378_v8, 0.0  ;;  %v3749_v35 = vrot.slane %v8543_v56, 5  ;;  %v6411_v47 = vrot.slane %v3675_v41, 9  ;;  %v7625_v8 = vld [vmem:[%s10352_s3 + $0x150] sm:$0xff]  }
 0x11f   : > { %7259 = vmatprep.mubr.bf16.mxu1 %v7612_v33  ;;  %7336 = vmatpush3.bf16.msra.mxu1 %v7613_v22  ;;  %v8861_v12 = vcombine.low %v3316_v17, %v3326_v6  ;;  %v8865_v22 = vsel %vm8234_vm13, %v3741_v50, %v3742_v32  ;;  %v3676_v33 = vld [vmem:[#allocation2 + $0x30] sm:$0xe]  ;;  %v6667_v25 = vpack.c.bf16 %v409_v43, %v409_v43  ;;  %v3748_v52 = vrot.slane %v3746_v30, 4  ;;  %v7616_v32 = vld [vmem:[#allocation2 + $0x54] sm:$0xff]   ;;  %v995_v17 = vld [vmem:[#allocation2 + $0xc0] sm:$0xf] }
 0x120   : > { %7337 = vmatprep.subr.bf16.mxu1 %v7617_v31  ;;  %v6441_v46 = vcombine.low %v8851_v19, %v8865_v22  ;;  %v8872_v34 = vsel %vm8234_vm13, %v6410_v37, %v3746_v30  ;;  %v6668_v59 = vpack.c.bf16 %v410_v39, %v410_v39  ;;  %v3753_v20 = vrot.slane %v8550_v21, 5  ;;  %v7642_v19 = vld [vmem:[%s10352_s3 + $0x1f0] sm:$0xff]   ;;  %v7648_v22 = vld [vmem:[#allocation2 + $0x60] sm:$0xff]  }
 0x121   : > { %v3756_v61 = vrot.slane %v8555_v10, 5  ;;  %v820_v56 = vshrl.u32 %v6667_v25, 16  ;;  %v823_v27 = vshll.u32 %v6667_v25, 16  ;;  %v8878_v0 = vsel %vm8234_vm13, %v3748_v52, %v3749_v35  ;;  %v3678_v35 = vld [vmem:[#allocation2 + $0x48] sm:$0xe] }
 0x122   : > { %v6412_v40 = vrot.slane %v3676_v33, 9  ;;  %7320 = vmatmul.mubr.bf16.gmra.mxu0 %v8806_v38  ;;  %v828_v21 = vshrl.u32 %v6668_v59, 16  ;;  %v831_v50 = vshll.u32 %v6668_v59, 16  ;;  %v6442_v10 = vcombine.low %v8872_v34, %v8878_v0  ;;  %v3679_v59 = vld [vmem:[#allocation2 + $0x54] sm:$0xe]  ;;  %v7646_v0 = vld [vmem:[%s10352_s3 + $0x1e8] sm:$0xff]  }
 0x123   : > { %7338 = vmatpush3.bf16.msra.mxu1 %v7617_v31  ;;  %v8888_v31 = vsel %vm8234_vm13, %v6411_v47, %v3753_v20  ;;  %7323 = vmatprep.mubr.bf16.mxu0 %v8826_v58  ;;  %v822_v37 = vrot.slane %v820_v56, 7  ;;  %v3755_v6 = vrot.slane %v3753_v20, 4  ;;  %v3760_v38 = vrot.slane %v8559_v62, 5  ;;  %v999_v58 = vld [vmem:[#allocation2 + $0xc8] sm:$0x1] }
 0x124   : > { %7339 = vmatprep.subr.bf16.mxu1 %v7621_v26  ;;  %v3763_v43 = vrot.slane %v8580_v60, 5  ;;  %v830_v16 = vrot.slane %v828_v21, 7  ;;  %v6413_v30 = vrot.slane %v3677_v29, 9  ;;  %v3767_v41 = vrot.slane %v8587_v44, 5  ;;  %v7629_v60 = vld [vmem:[%s10352_s3 + $0x148] sm:$0xff]  }
 0x125   : > { %v3770_v39 = vrot.slane %v8601_v4, 5  ;;  %v825_v33 = vor.u32 %v823_v27, %v822_v37  ;;  %v826_v25 = vrot.slane %v822_v37, 4  ;;  %v8897_v52 = vsel %vm8234_vm13, %v3755_v6, %v3756_v61  ;;  %v7618_v27 = vld [vmem:[#allocation2 + $0x60] sm:$0xff]   ;;  %v4564_v34 = vld [vmem:[#allocation2 + $0x30] sm:$0xf] }
 0x126   : > { %7260 = vmatmul.mubr.bf16.gmra.mxu1 %v7614_v2  ;;  %v8901_v62 = vsel %vm8234_vm13, %v6412_v40, %v3760_v38  ;;  %v833_v44 = vor.u32 %v831_v50, %v830_v16  ;;  %v835_v4 = vrot.slane %v830_v16, 4  ;;  %v3762_v2 = vrot.slane %v3760_v38, 4  ;;  %v3680_v6 = vld [vmem:[#allocation2 + $0x60] sm:$0xe]  ;;  %v7620_v38 = vld [vmem:[#allocation2 + $0x6c] sm:$0xff]   ;;  %v7622_v40 = vld [vmem:[#allocation2 + $0x78] sm:$0xff]  }
 0x127   : > { %7263 = vmatprep.mubr.bf16.mxu1 %v7616_v32  ;;  %7340 = vmatpush3.bf16.msra.mxu1 %v7621_v26  ;;  %v6443_v26 = vcombine.low %v8888_v31, %v8897_v52  ;;  %v996_v20 = vsel %vm7841_vm10, %v825_v33, %v995_v17  ;;  %v8912_v61 = vsel %vm8234_vm13, %v6413_v30, %v3767_v41  ;;  %v3769_v32 = vrot.slane %v3767_v41, 4  ;;  %v3681_v33 = vld [vmem:[#allocation2 + $0x6c] sm:$0xe] }
 0x128   : > { %7341 = vmatprep.subr.bf16.mxu1 %v7625_v8  ;;  %v6414_v56 = vrot.slane %v3678_v35, 9  ;;  %v834_v29 = vsel %vm7834_vm9, %v826_v25, %v833_v44  ;;  %997 = vst [vmem:[#allocation2 + $0xc0] sm:$0xf] %v996_v20  ;;  %v1000_v50 = vsel %vm7826_vm8, %v835_v4, %v999_v58  ;;  %v8920_v37 = vsel %vm8234_vm13, %v3762_v2, %v3763_v43  ;;  %v3682_v4 = vld [vmem:[#allocation2 + $0x78] sm:$0xe] }
 0x129   : > { %v3774_v17 = vrot.slane %v8603_v45, 5  ;;  %998 = vst [vmem:[#allocation2 + $0xc4] sm:$0xf] %v834_v29  ;;  %1001 = vst [vmem:[#allocation2 + $0xc8] sm:$0x1] %v1000_v50  ;;  %v8927_v30 = vsel %vm8234_vm13, %v3769_v32, %v3770_v39  ;;  %v3777_v41 = vrot.slane %v8623_v51, 5 }
 0x12a   : > { %v6415_v35 = vrot.slane %v3679_v59, 9  ;;  %7324 = vmatmul.mubr.bf16.gmra.mxu0 %v8844_v23  ;;  %v7633_v45 = vld [vmem:[%s10352_s3 + $0x140] sm:$0xff]   ;;  %v3781_v25 = vrot.slane %v8634_v15, 5  ;;  %v3784_v51 = vrot.slane %v8647_v9, 5  ;;  %v6416_v23 = vrot.slane %v3680_v6, 9  ;;  %v8963_v20 = vld [vmem:[%s10352_s3 + $0x1f8] sm:$0xff]  }
 0x12b   : > { %7342 = vmatpush3.bf16.msra.mxu1 %v7625_v8  ;;  %v8938_v43 = vsel %vm8234_vm13, %v6414_v56, %v3774_v17  ;;  %v3776_v39 = vrot.slane %v3774_v17, 4  ;;  %7327 = vmatprep.mubr.bf16.mxu0 %v8861_v12  ;;  %v3788_v58 = vrot.slane %v8649_v36, 5  ;;  %v3791_v44 = vrot.slane %v8665_v42, 5  ;;  %v3683_v6 = vld [vmem:[#allocation2 + $0x84] sm:$0xe] }
 0x12c   : > { %7343 = vmatprep.subr.bf16.mxu1 %v7629_v60  ;;  %v8951_v59 = vsel %vm8234_vm13, %v6415_v35, %v3781_v25  ;;  %v3783_v15 = vrot.slane %v3781_v25, 4  ;;  %v6417_v47 = vrot.slane %v3681_v33, 9  ;;  %v3795_v12 = vrot.slane %v8674_v11, 5  ;;  %v7624_v25 = vld [vmem:[#allocation2 + $0x84] sm:$0xff]  }
 0x12d   : > { %v8947_v2 = vsel %vm8234_vm13, %v3776_v39, %v3777_v41  ;;  %v8957_v36 = vsel %vm8234_vm13, %v6416_v23, %v3788_v58  ;;  %v3790_v42 = vrot.slane %v3788_v58, 4  ;;  %v6418_v56 = vrot.slane %v3682_v4, 9  ;;  %v3684_v39 = vld [vmem:[#allocation2 + $0x90] sm:$0xe] }
 0x12e   : > { %7264 = vmatmul.mubr.bf16.gmra.mxu1 %v7618_v27  ;;  %v8967_v32 = vsel %vm8234_vm13, %v3783_v15, %v3784_v51  ;;  %v3802_v27 = vrot.slane %v8702_v5, 5  ;;  %v8979_v50 = vsel %vm8234_vm13, %v6417_v47, %v3795_v12  ;;  %v3797_v17 = vrot.slane %v3795_v12, 4  ;;  %v9126_v47 = vld [vmem:[#allocation2 + $0x2c] sm:$0x1] }
 0x12f   : > { %7267 = vmatprep.mubr.bf16.mxu1 %v7620_v38  ;;  %7344 = vmatpush3.bf16.msra.mxu1 %v7629_v60  ;;  %v3798_v60 = vrot.slane %v8680_v18, 5  ;;  %v2964_v29 = vld [vmem:[#allocation2 + $0xc0] sm:$0xf]  ;;  %v8975_v21 = vsel %vm8234_vm13, %v3790_v42, %v3791_v44  ;;  %v3805_v35 = vrot.slane %v8712_v7, 5  ;;  %v3809_v9 = vrot.slane %v8721_v49, 5 }
 0x130   : > { %7345 = vmatprep.subr.bf16.mxu1 %v7633_v45  ;;  %v8981_v38 = vld [vmem:[#allocation2 + $0xc4] sm:$0xf]  ;;  %v8983_v18 = vld [vmem:[#allocation2 + $0xc8] sm:$0x1]  ;;  %v3328_v5 = vshrl.u32 %v2964_v29, 16  ;;  %v3331_v41 = vshll.u32 %v2964_v29, 16  ;;  %v8989_v33 = vsel %vm8234_vm13, %v6418_v56, %v3802_v27 }
 0x131   : > { %v3337_v51 = vshll.u32 %v8981_v38, 16  ;;  %v3341_v23 = vshrl.u32 %v8981_v38, 16  ;;  %v3347_v58 = vshll.u32 %v8983_v18, 16  ;;  %v8996_v44 = vsel %vm8234_vm13, %v3797_v17, %v3798_v60 }
 0x132   : > { %v3330_v4 = vrot.slane %v3328_v5, 4  ;;  %v3333_v15 = vrot.slane %v3331_v41, 5  ;;  %v3804_v42 = vrot.slane %v3802_v27, 4  ;;  %v3812_v60 = vrot.slane %v8725_v54, 5  ;;  %v7626_v54 = vld [vmem:[#allocation2 + $0x90] sm:$0xff]  }
 0x133   : > { %7346 = vmatpush3.bf16.msra.mxu1 %v7633_v45  ;;  %v3339_v12 = vrot.slane %v3337_v51, 5  ;;  %v3343_v56 = vrot.slane %v3341_v23, 4  ;;  %v3349_v29 = vrot.slane %v3347_v58, 5  ;;  %v6419_v45 = vrot.slane %v3683_v6, 9  ;;  %v3685_v51 = vld [vmem:[#allocation2 + $0x9c] sm:$0xe] }
 0x134   : > { %7427 = vmatprep.subr.bf16.mxu1 %v8963_v20  ;;  %v3334_v11 = vor.u32 %v3333_v15, %v3330_v4  ;;  %v9006_v5 = vsel %vm8234_vm13, %v3804_v42, %v3805_v35  ;;  %v6420_v41 = vrot.slane %v3684_v39, 9  ;;  %v3816_v27 = vrot.slane %v8741_v3, 5  ;;  %v3687_v15 = vld [vmem:[#allocation2 + $0xb4] sm:$0xe]  ;;  %v7628_v42 = vld [vmem:[#allocation2 + $0x9c] sm:$0xff]  }
 0x135   : > { %v3344_v17 = vor.u32 %v3343_v56, %v3339_v12  ;;  %v3811_v49 = vrot.slane %v3809_v9, 4  ;;  %v3819_v39 = vrot.slane %v8748_v14, 5  ;;  %v6421_v58 = vrot.slane %v3685_v51, 9 }
 0x136   : > { %7268 = vmatmul.mubr.bf16.gmra.mxu1 %v7622_v40  ;;  %v3335_v23 = vrot.slane %v3334_v11, 4  ;;  %v9013_v40 = vsel %vm8234_vm13, %v6419_v45, %v3809_v9  ;;  %v3818_v35 = vrot.slane %v3816_v27, 4  ;;  %v3823_v4 = vrot.slane %v8755_v1, 5  ;;  %v3686_v9 = vld [vmem:[#allocation2 + $0xa8] sm:$0xe]  ;;  %v7636_v45 = vld [vmem:[#allocation2 + $0x18] sm:$0xff]  }
 0x137   : > { %7271 = vmatprep.mubr.bf16.mxu1 %v7624_v25  ;;  %v3345_v6 = vrot.slane %v3344_v17, 4  ;;  %v9017_v25 = vsel %vm8234_vm13, %v6420_v41, %v3816_v27  ;;  %v9024_v11 = vsel %vm8234_vm13, %v3811_v49, %v3812_v60  ;;  %v3826_v60 = vrot.slane %v8770_v57, 5  ;;  %v3688_v17 = vld [vmem:[#allocation2 + $0xc0] sm:$0xe]  ;;  %v5313_v1 = vld [vmem:[#allocation2 + $0x24] sm:$0xe] }
 0x138   : > { %v3340_v3 = vsel %vm7798_vm3, %v3335_v23, %v3339_v12  ;;  %v9033_v12 = vsel %vm8234_vm13, %v3818_v35, %v3819_v39  ;;  %v9040_v27 = vsel %vm8234_vm13, %v6421_v58, %v3823_v4  ;;  %v6422_v51 = vrot.slane %v3686_v9, 9  ;;  %v4561_v58 = vld [vmem:[#allocation2 + $0x24] sm:$0xf] }
 0x139   : > { %v3350_v56 = vsel %vm7798_vm3, %v3345_v6, %v3349_v29  ;;  %v3825_v29 = vrot.slane %v3823_v4, 4  ;;  %v3830_v23 = vrot.slane %v8783_v53, 5  ;;  %v3833_v49 = vrot.slane %v8789_v24, 5 }
 0x13a   : > { %v6400_v41 = vcombine.low %v3340_v3, %v3350_v56  ;;  %v6423_v6 = vrot.slane %v3687_v15, 9  ;;  %v3837_v35 = vrot.slane %v8803_v63, 5  ;;  %v3840_v39 = vrot.slane %v8810_v48, 5  ;;  %v7630_v56 = vld [vmem:[#allocation2 + $0xa8] sm:$0xff]  }
 0x13b   : > { %v9046_v57 = vsel %vm8234_vm13, %v3825_v29, %v3826_v60  ;;  %v6424_v3 = vrot.slane %v3688_v17, 9  ;;  %v9054_v53 = vsel %vm8234_vm13, %v6422_v51, %v3830_v23  ;;  %v3832_v24 = vrot.slane %v3830_v23, 4  ;;  %v7632_v17 = vld [vmem:[#allocation2 + $0xb4] sm:$0xff]   ;;  %v9085_v23 = vpop.f32.mrf.mxu0 }
 0x13c   : > { %7328 = vmatmul.mubr.bf16.gmra.mxu0 %v6400_v41  ;;  %v9059_v4 = vsel %vm8234_vm13, %v6423_v6, %v3837_v35  ;;  %v3839_v63 = vrot.slane %v3837_v35, 4  ;;  %v3847_v48 = vrot.slane %v8983_v18, 5  ;;  %v7640_v29 = vld [vmem:[#allocation2 + $0x30] sm:$0xff]   ;;  %10412 = vst [vmem:[#allocation3_spill] sm:$0xff] %v9085_v23  ;;  %v7647_v6 = vld [vmem:[%s10352_s3 + $0x228] sm:$0xff]  }
 0x13d   : > { %7395 = vmatprep.mubr.bf16.mxu0 %v7636_v45  ;;  %10408 = vst [vmem:[#allocation6_spill] sm:$0xff] %v9059_v4  ;;  %v9064_v9 = vsel %vm8234_vm13, %v3832_v24, %v3833_v49  ;;  %v7637_v45 = vld [vmem:[#allocation2 + $0x24] sm:$0xff]   ;;  %v7643_v51 = vld [vmem:[%s10352_s3 + $0x230] sm:$0xff]   ;;  %v9093_v35 = vpop.f32.mrf.mxu0 }
 0x13e   : > { %7272 = vmatmul.mubr.bf16.gmra.mxu1 %v7626_v54  ;;  %v3844_v54 = vrot.slane %v8981_v38, 5  ;;  %v9074_v60 = vsel %vm8234_vm13, %v3839_v63, %v3840_v39  ;;  %10413 = vst [vmem:[#allocation8_spill] sm:$0xff] %v9093_v35  ;;  %v7634_v39 = vld [vmem:[#allocation2 + $0xc0] sm:$0xff]   ;;  %v7644_v24 = vld [vmem:[#allocation2 + $0x48] sm:$0xff]  }
 0x13f   : > { %7275 = vmatprep.mubr.bf16.mxu1 %v7628_v42  ;;  %10410 = vst [vmem:[#allocation5_spill] sm:$0xff] %v9074_v60  ;;  %v7651_v63 = vld [vmem:[%s10352_s3 + $0x220] sm:$0xff]  }
 0x140   : > { %v9068_v15 = vsel %vm8234_vm13, %v6424_v3, %v3844_v54  ;;  %v3846_v42 = vrot.slane %v3844_v54, 4  ;;  %v7641_v3 = vld [vmem:[#allocation2 + $0x3c] sm:$0xff]   ;;  %v9095_v54 = vpop.f32.mrf.mxu0 }
 0x141   : > { %10409 = vst [vmem:[#allocation7_spill] sm:$0xff] %v9068_v15  ;;  %10414 = vst [vmem:[#allocation9_spill] sm:$0xff] %v9095_v54 }
 0x142   : > { %v9080_v41 = vsel %vm8234_vm13, %v3846_v42, %v3847_v48  ;;  %v4559_v48 = vld [vmem:[#allocation2 + $0x1c] sm:$0xf]  ;;  %v4558_v42 = vld [vmem:[#allocation2 + $0x18] sm:$0xf] }
 0x143   : > { %10411 = vst [vmem:[#allocation4_spill] sm:$0xff] %v9080_v41  ;;  %v4616_v38 = vshll.u32 %v4559_v48, 16 }
 0x144   : > { %7396 = vmatmul.mubr.bf16.vlgmr.msra.gmra.mxu0 %v7637_v45  ;;  %v5378_v45 = vrot.slane %v4559_v48, 5 }
 0x145   : > { %7476 = vmatpush3.bf16.msra.mxu0 %v8816_v13  ;;  %7399 = vmatprep.mubr.bf16.mxu0 %v7640_v29  ;;  %v9103_v13 = vpop.f32.mrf.mxu0  ;;  %v9108_v29 = vld [vmem:[#allocation2 + $0x20] sm:$0x1] }
 0x146   : > { %7276 = vmatmul.mubr.bf16.gmra.mxu1 %v7630_v56  ;;  %7477 = vmatprep.subr.bf16.mxu0 %v7643_v51  ;;  %10415 = vst [vmem:[#allocation10_spill] sm:$0xff] %v9103_v13  ;;  %v7655_v56 = vld [vmem:[%s10352_s3 + $0x218] sm:$0xff]   ;;  %v5380_v49 = vrot.slane %v5378_v45, 4  ;;  %v5381_v18 = vrot.slane %v9108_v29, 5 }
 0x147   : > { %7279 = vmatprep.mubr.bf16.mxu1 %v7632_v17  ;;  %v7645_v17 = vld [vmem:[#allocation2 + $0x54] sm:$0xff]   ;;  %v4567_v13 = vld [vmem:[#allocation2 + $0x3c] sm:$0xf] }
 0x148   : > { %v9139_v52 = vsel %vm8234_vm13, %v5380_v49, %v5381_v18  ;;  %v4658_v18 = vshll.u32 %v4564_v34, 16 }
 0x149   : > { %7478 = vmatpush3.bf16.msra.mxu0 %v7643_v51  ;;  %v5312_v51 = vld [vmem:[#allocation2 + $0x18] sm:$0xe] }
 0x14a   : > { %7479 = vmatprep.subr.bf16.mxu0 %v7647_v6 }
 0x14c   : > { %7400 = vmatmul.mubr.bf16.gmra.mxu0 %v7641_v3  ;;  %v4610_v3 = vshll.u32 %v4558_v42, 16 }
 0x14d   : > { %7403 = vmatprep.mubr.bf16.mxu0 %v7644_v24  ;;  %7480 = vmatpush3.bf16.msra.mxu0 %v7647_v6  ;;  %v4562_v6 = vld [vmem:[#allocation2 + $0x28] sm:$0xf]  ;;  %v6545_v24 = vrot.slane %v5312_v51, 9 }
 0x14e   : > { %7280 = vmatmul.mubr.bf16.gmra.mxu1 %v7634_v39  ;;  %7481 = vmatprep.subr.bf16.mxu0 %v7651_v63  ;;  %v4607_v39 = vshrl.u32 %v4558_v42, 16  ;;  %v7659_v42 = vld [vmem:[%s10352_s3 + $0x210] sm:$0xff]   ;;  %v5385_v14 = vrot.slane %v4562_v6, 5  ;;  %v4612_v7 = vrot.slane %v4610_v3, 5  ;;  %v4644_v8 = vshrl.u32 %v4562_v6, 16 }
 0x14f   : > { %7347 = vmatprep.mubr.bf16.mxu1 %v6441_v46  ;;  %v9113_v46 = vpop.f32.mrf.mxu0  ;;  %v9135_v31 = vsel %vm8234_vm13, %v6545_v24, %v5378_v45  ;;  %v7649_v3 = vld [vmem:[#allocation2 + $0x6c] sm:$0xff]   ;;  %v7652_v45 = vld [vmem:[#allocation2 + $0x78] sm:$0xff]   ;;  %v9147_v24 = vld [vmem:[#allocation2 + $0x34] sm:$0xf] }
 0x150   : > { %10416 = vst [vmem:[#allocation11_spill] sm:$0xff] %v9113_v46  ;;  %v4609_v51 = vrot.slane %v4607_v39, 4  ;;  %v6546_v39 = vrot.slane %v5313_v1, 9  ;;  %v5387_v16 = vrot.slane %v5385_v14, 4  ;;  %v4646_v46 = vrot.slane %v4644_v8, 4  ;;  %v9166_v8 = vpop.f32.mrf.mxu1 }
 0x151   : > { %7482 = vmatpush3.bf16.msra.mxu0 %v7651_v63  ;;  %v4620_v63 = vshrl.u32 %v4559_v48, 16  ;;  %v4631_v48 = vshrl.u32 %v4561_v58, 16  ;;  %10420 = vst [vmem:[#allocation14_spill] sm:$0xff] %v9166_v8 }
 0x152   : > { %7483 = vmatprep.subr.bf16.mxu0 %v7655_v56 }
 0x153   : > { %v4633_v1 = vrot.slane %v4631_v48, 4  ;;  %v10419_v48 = vcombine.low %v8901_v62, %v8920_v37  ;;  %v9181_v62 = vld [vmem:[#allocation2 + $0x40] sm:$0xf]  ;;  %v10422_v37 = vcombine.low %v8912_v61, %v8927_v30  ;;  %v4650_v30 = vshll.u32 %v9126_v47, 16 }
 0x154   : > { %7404 = vmatmul.mubr.bf16.gmra.mxu0 %v7645_v17  ;;  %v4634_v17 = vshll.u32 %v4561_v58, 16  ;;  %v5388_v58 = vrot.slane %v9126_v47, 5 }
 0x155   : > { %7407 = vmatprep.mubr.bf16.mxu0 %v7648_v22  ;;  %7484 = vmatpush3.bf16.msra.mxu0 %v7655_v56  ;;  %v4622_v22 = vrot.slane %v4620_v63, 4  ;;  %v7650_v56 = vld [vmem:[%s10352_s3 + $0x1e0] sm:$0xff]  }
 0x156   : > { %7348 = vmatmul.mubr.bf16.vlgmr.msra.gmra.mxu1 %v6442_v10  ;;  %v9131_v10 = vpop.f32.mrf.mxu0  ;;  %7485 = vmatprep.subr.bf16.mxu0 %v7659_v42  ;;  %v4636_v49 = vrot.slane %v4634_v17, 5 }
 0x157   : > { %7428 = vmatpush3.bf16.msra.mxu1 %v8963_v20  ;;  %7351 = vmatprep.mubr.bf16.mxu1 %v6443_v26  ;;  %10417 = vst [vmem:[#allocation12_spill] sm:$0xff] %v9131_v10  ;;  %v4640_v20 = vshll.u32 %v4562_v6, 16  ;;  %v9141_v26 = vrot.slane %v4616_v38, 5  ;;  %v4655_v10 = vshrl.u32 %v4564_v34, 16  ;;  %v4613_v6 = vor.u32 %v4612_v7, %v4609_v51 }
 0x158   : > { %7429 = vmatprep.subr.bf16.mxu1 %v7642_v19  ;;  %v9149_v38 = vpop.f32.mrf.mxu0  ;;  %v4626_v51 = vshll.u32 %v9108_v29, 16  ;;  %v9161_v34 = vsel %vm8234_vm13, %v6546_v39, %v5385_v14  ;;  %v9176_v29 = vsel %vm8234_vm13, %v5387_v16, %v5388_v58  ;;  %v5314_v39 = vld [vmem:[#allocation2 + $0x30] sm:$0xe]  ;;  %v4682_v7 = vshll.u32 %v4567_v13, 16  ;;  %v7654_v16 = vld [vmem:[%s10352_s3 + $0x1d8] sm:$0xff]  }
 0x159   : > { %10418 = vst [vmem:[#allocation13_spill] sm:$0xff] %v9149_v38  ;;  %v9151_v63 = vrot.slane %v4640_v20, 5  ;;  %7486 = vmatpush3.bf16.msra.mxu0 %v7659_v42  ;;  %v9171_v42 = vld [vmem:[%s10352_s3 + $0x200] sm:$0xff]   ;;  %v4623_v17 = vor.u32 %v4622_v22, %v9141_v26  ;;  %10421 = vst [vmem:[#allocation15_spill] sm:$0xff] %v9176_v29  ;;  %v9178_v14 = vrot.slane %v4655_v10, 4  ;;  %v4664_v20 = vshll.u32 %v9147_v24, 16  ;;  %v9201_v38 = vpop.f32.mrf.mxu1 }
 0x15a   : > { %v4679_v22 = vshrl.u32 %v4567_v13, 16  ;;  %v9190_v10 = vpop.f32.mrf.mxu0  ;;  %v9192_v58 = vrot.slane %v4613_v6, 4  ;;  %v4637_v8 = vor.u32 %v4636_v49, %v4633_v1  ;;  %v5392_v13 = vrot.slane %v9147_v24, 5  ;;  %10424 = vst [vmem:[#allocation17_spill] sm:$0xff] %v9201_v38  ;;  %v4566_v1 = vld [vmem:[#allocation2 + $0x38] sm:$0x1] }
 0x15b   : > { %7430 = vmatpush3.bf16.msra.mxu1 %v7642_v19  ;;  %v7663_v19 = vld [vmem:[%s10352_s3 + $0x208] sm:$0xff]   ;;  %10423 = vst [vmem:[#allocation16_spill] sm:$0xff] %v9190_v10  ;;  %v4647_v61 = vor.u32 %v4646_v46, %v9151_v63  ;;  %v9203_v6 = vrot.slane %v4623_v17, 4  ;;  %v6547_v47 = vrot.slane %v5314_v39, 9  ;;  %v9207_v49 = vrot.slane %v4664_v20, 5  ;;  %v7658_v17 = vld [vmem:[%s10352_s3 + $0x1d0] sm:$0xff]   ;;  %v9231_v23 = vpop.f32.mrf.mxu1 }
 0x15c   : > { %7431 = vmatprep.subr.bf16.mxu1 %v7646_v0  ;;  %7408 = vmatmul.mubr.bf16.gmra.mxu0 %v7649_v3  ;;  %v4660_v3 = vrot.slane %v4658_v18, 5  ;;  %v4692_v18 = vshrl.u32 %v9181_v62, 16  ;;  %v5315_v10 = vld [vmem:[#allocation2 + $0x3c] sm:$0xe]  ;;  %v4681_v54 = vrot.slane %v4679_v22, 4  ;;  %v4684_v35 = vrot.slane %v4682_v7, 5  ;;  %v9214_v46 = vpop.f32.mrf.mxu0 }
 0x15d   : > { %7411 = vmatprep.mubr.bf16.mxu0 %v7652_v45  ;;  %7487 = vmatprep.subr.bf16.mxu0 %v7663_v19  ;;  %v4688_v45 = vshll.u32 %v9181_v62, 16  ;;  %10425 = vst [vmem:[#allocation18_spill] sm:$0xff] %v9214_v46  ;;  %v9220_v20 = vrot.slane %v4637_v8, 4  ;;  %v9224_v39 = vrot.slane %v4650_v30, 5  ;;  %v5394_v7 = vrot.slane %v5392_v13, 4  ;;  %10427 = vst [vmem:[#allocation19_spill] sm:$0xff] %v9231_v23 }
 0x15e   : > { %7352 = vmatmul.mubr.bf16.gmra.mxu1 %v10419_v48  ;;  %v4668_v48 = vshrl.u32 %v9147_v24, 16  ;;  %7488 = vmatpush3.bf16.msra.mxu0 %v7663_v19  ;;  %v4661_v24 = vor.u32 %v4660_v3, %v9178_v14  ;;  %v7656_v19 = vld [vmem:[#allocation2 + $0x90] sm:$0xff]   ;;  %v9222_v14 = vrot.slane %v4647_v61, 4  ;;  %v5395_v3 = vrot.slane %v4566_v1, 5  ;;  %v4570_v38 = vld [vmem:[#allocation2 + $0x48] sm:$0xf] }
 0x15f   : > { %7355 = vmatprep.mubr.bf16.mxu1 %v10422_v37  ;;  %7432 = vmatpush3.bf16.msra.mxu1 %v7646_v0  ;;  %v9196_v0 = vrot.slane %v4626_v51, 5  ;;  %v7653_v37 = vld [vmem:[#allocation2 + $0x84] sm:$0xff]   ;;  %v4694_v22 = vrot.slane %v4692_v18, 4  ;;  %v10426_v46 = vcombine.low %v8938_v43, %v8947_v2  ;;  %v4674_v61 = vshll.u32 %v4566_v1, 16 }
 0x160   : > { %7433 = vmatprep.subr.bf16.mxu1 %v7650_v56  ;;  %7489 = vmatprep.subr.bf16.mxu0 %v9171_v42  ;;  %v4670_v51 = vrot.slane %v4668_v48, 4  ;;  %v9226_v48 = vrot.slane %v4688_v45, 5  ;;  %v9237_v30 = vld [vmem:[#allocation2 + $0x44] sm:$0x1]  ;;  %v5399_v45 = vrot.slane %v9181_v62, 5  ;;  %v10428_v18 = vcombine.low %v8951_v59, %v8967_v32  ;;  %v7662_v43 = vld [vmem:[%s10352_s3 + $0x1c8] sm:$0xff]   ;;  %v9253_v62 = vpop.f32.mrf.mxu0 }
 0x161   : > { %v9248_v2 = vsel %vm8234_vm13, %v6547_v47, %v5392_v13  ;;  %10429 = vst [vmem:[#allocation20_spill] sm:$0xff] %v9253_v62  ;;  %v5316_v13 = vld [vmem:[#allocation2 + $0x48] sm:$0xe]  ;;  %v4703_v1 = vshrl.u32 %v4570_v38, 16  ;;  %v4706_v47 = vshll.u32 %v4570_v38, 16  ;;  %v7657_v59 = vld [vmem:[#allocation2 + $0x9c] sm:$0xff]  }
 0x162   : > { %7490 = vmatpush3.bf16.msra.mxu0 %v9171_v42  ;;  %v4676_v32 = vrot.slane %v4674_v61, 5  ;;  %v5401_v42 = vrot.slane %v5399_v45, 4  ;;  %v5402_v8 = vrot.slane %v9237_v30, 5  ;;  %v6549_v62 = vrot.slane %v5316_v13, 9  ;;  %v4573_v61 = vld [vmem:[#allocation2 + $0x54] sm:$0xf]  ;;  %v9285_v41 = vpop.f32.mrf.mxu0 }
 0x163   : > { %7434 = vmatpush3.bf16.msra.mxu1 %v7650_v56  ;;  %v6548_v56 = vrot.slane %v5315_v10, 9  ;;  %v4685_v10 = vor.u32 %v4684_v35, %v4681_v54  ;;  %v9266_v35 = vsel %vm8234_vm13, %v5394_v7, %v5395_v3  ;;  %v4695_v54 = vor.u32 %v4694_v22, %v9226_v48  ;;  %v9279_v7 = vld [vmem:[#allocation2 + $0x50] sm:$0x1]  ;;  %v7660_v3 = vld [vmem:[#allocation2 + $0xa8] sm:$0xff]  }
 0x164   : > { %7435 = vmatprep.subr.bf16.mxu1 %v7654_v16  ;;  %7412 = vmatmul.mubr.bf16.gmra.mxu0 %v7653_v37  ;;  %v9250_v37 = vrot.slane %v4661_v24, 4  ;;  %v4698_v24 = vshll.u32 %v9237_v30, 16  ;;  %v4727_v13 = vshrl.u32 %v4573_v61, 16 }
 0x165   : > { %7415 = vmatprep.mubr.bf16.mxu0 %v7656_v19  ;;  %v9270_v19 = vld [vmem:[#allocation2 + $0x58] sm:$0xf]  ;;  %v9276_v38 = vsel %vm8234_vm13, %v6548_v56, %v5399_v45  ;;  %v4705_v56 = vrot.slane %v4703_v1, 4  ;;  %v4708_v45 = vrot.slane %v4706_v47, 5  ;;  %v4696_v60 = vrot.slane %v4695_v54, 4 }
 0x166   : > { %7356 = vmatmul.mubr.bf16.gmra.mxu1 %v10426_v46  ;;  %v4671_v46 = vor.u32 %v4670_v51, %v9207_v49  ;;  %v4667_v22 = vsel %vm7798_vm3, %v9250_v37, %v9207_v49  ;;  %v4700_v4 = vrot.slane %v4698_v24, 5  ;;  %v5409_v49 = vrot.slane %v9279_v7, 5 }
 0x167   : > { %7359 = vmatprep.mubr.bf16.mxu1 %v10428_v18  ;;  %7436 = vmatpush3.bf16.msra.mxu1 %v7654_v16  ;;  %v4571_v16 = vld [vmem:[#allocation2 + $0x4c] sm:$0xf]  ;;  %v9272_v18 = vpop.f32.mrf.mxu1  ;;  %v10431_v37 = vcombine.low %v8957_v36, %v8975_v21  ;;  %v4730_v1 = vshll.u32 %v4573_v61, 16  ;;  %v4740_v47 = vshrl.u32 %v9270_v19, 16  ;;  %v10433_v54 = vcombine.low %v8979_v50, %v8996_v44 }
 0x168   : > { %7437 = vmatprep.subr.bf16.mxu1 %v7658_v17  ;;  %v5406_v51 = vrot.slane %v4571_v16, 5  ;;  %10430 = vst [vmem:[#allocation21_spill] sm:$0xff] %v9272_v18  ;;  %v4672_v23 = vrot.slane %v4671_v46, 4  ;;  %v4686_v18 = vrot.slane %v4685_v10, 4  ;;  %v4712_v15 = vshll.u32 %v4571_v16, 16 }
 0x169   : > { %v4716_v30 = vshrl.u32 %v4571_v16, 16  ;;  %v9294_v46 = vpop.f32.mrf.mxu1  ;;  %v5317_v10 = vld [vmem:[#allocation2 + $0x54] sm:$0xe]  ;;  %v4736_v16 = vshll.u32 %v9270_v19, 16  ;;  %v9305_v36 = vsel %vm8234_vm13, %v5401_v42, %v5402_v8  ;;  %v4709_v44 = vor.u32 %v4708_v45, %v4705_v56  ;;  %v9327_v42 = vld [vmem:[#allocation2 + $0x5c] sm:$0x1] }
 0x16a   : > { %v5408_v29 = vrot.slane %v5406_v51, 4  ;;  %10432 = vst [vmem:[#allocation22_spill] sm:$0xff] %v9294_v46  ;;  %v4677_v24 = vsel %vm7798_vm3, %v4672_v23, %v4676_v32  ;;  %v9309_v21 = vsel %vm8234_vm13, %v6549_v62, %v5406_v51  ;;  %v4691_v50 = vsel %vm7798_vm3, %v4686_v18, %v9226_v48  ;;  %v7661_v23 = vld [vmem:[#allocation2 + $0xb4] sm:$0xff]   ;;  %v7664_v45 = vld [vmem:[#allocation2 + $0xc0] sm:$0xff]  }
 0x16b   : > { %7438 = vmatpush3.bf16.msra.mxu1 %v7658_v17  ;;  %v7666_v17 = vld [vmem:[%s10352_s3 + $0x1c0] sm:$0xff]   ;;  %v4718_v61 = vrot.slane %v4716_v30, 4  ;;  %v4701_v8 = vsel %vm7798_vm3, %v4696_v60, %v4700_v4  ;;  %v6550_v32 = vrot.slane %v5317_v10, 9  ;;  %v9325_v51 = vpop.f32.mrf.mxu1  ;;  %v4729_v48 = vrot.slane %v4727_v13, 4 }
 0x16c   : > { %7439 = vmatprep.subr.bf16.mxu1 %v7662_v43  ;;  %7416 = vmatmul.mubr.bf16.gmra.mxu0 %v7657_v59  ;;  %v9311_v59 = vpop.f32.mrf.mxu0  ;;  %v9322_v62 = vsel %vm8234_vm13, %v5408_v29, %v5409_v49  ;;  %10434 = vst [vmem:[#allocation23_spill] sm:$0xff] %v9325_v51  ;;  %v9329_v18 = vrot.slane %v4736_v16, 5  ;;  %v4742_v56 = vrot.slane %v4740_v47, 4  ;;  %v10435_v4 = vsel %vm7798_vm3, %v9203_v6, %v9196_v0 }
 0x16d   : > { %7419 = vmatprep.mubr.bf16.mxu0 %v7660_v3  ;;  %v9316_v3 = vrot.slane %v4712_v15, 5  ;;  %v4732_v15 = vrot.slane %v4730_v1, 5  ;;  %v10436_v60 = vsel %vm7798_vm3, %v9192_v58, %v9141_v26  ;;  %v10438_v30 = vsel %vm7798_vm3, %v9220_v20, %v9151_v63  ;;  %v4576_v63 = vld [vmem:[#allocation2 + $0x60] sm:$0xf]  ;;  %v9377_v1 = vpop.f32.mrf.mxu1 }
 0x16e   : > { %7360 = vmatmul.mubr.bf16.gmra.mxu1 %v10431_v37  ;;  %v9341_v29 = vcombine.low %v10436_v60, %v10435_v4  ;;  %v5413_v6 = vrot.slane %v9270_v19, 5  ;;  %v9360_v58 = vcombine.low %v4667_v22, %v4677_v24  ;;  %v9367_v20 = vcombine.low %v4691_v50, %v4701_v8  ;;  %10441 = vst [vmem:[#allocation25_spill] sm:$0xff] %v9377_v1 }
 0x16f   : > { %7363 = vmatprep.mubr.bf16.mxu1 %v10433_v54  ;;  %7440 = vmatpush3.bf16.msra.mxu1 %v7662_v43  ;;  %v4722_v43 = vshll.u32 %v9279_v7, 16  ;;  %v10437_v7 = vsel %vm7798_vm3, %v9222_v14, %v9224_v39  ;;  %v9358_v26 = vpop.f32.mrf.mxu0  ;;  %v9364_v39 = vrot.slane %v4709_v44, 4  ;;  %v4719_v37 = vor.u32 %v4718_v61, %v9316_v3  ;;  %v9387_v44 = vld [vmem:[#allocation2 + $0x70] sm:$0xf]  ;;  %v4579_v61 = vld [vmem:[#allocation2 + $0x6c] sm:$0xf] }
 0x170   : > { %7441 = vmatprep.subr.bf16.mxu1 %v7666_v17  ;;  %v9353_v49 = vcombine.low %v10438_v30, %v10437_v7  ;;  %10439 = vst [vmem:[#allocation24_spill] sm:$0xff] %v9358_v26  ;;  %v5416_v19 = vrot.slane %v9327_v42, 5  ;;  %v10440_v22 = vcombine.low %v8989_v33, %v9006_v5  ;;  %v9383_v47 = vsel %vm8234_vm13, %v6550_v32, %v5413_v6  ;;  %v9400_v30 = vpop.f32.mrf.mxu1 }
 0x171   : > { %v9371_v13 = vrot.slane %v4722_v43, 5  ;;  %v9379_v16 = vpop.f32.mrf.mxu0  ;;  %v4733_v54 = vor.u32 %v4732_v15, %v4729_v48  ;;  %v4743_v24 = vor.u32 %v4742_v56, %v9329_v18  ;;  %v4746_v50 = vshll.u32 %v9327_v42, 16  ;;  %v4578_v15 = vld [vmem:[#allocation2 + $0x68] sm:$0x1]  ;;  %10445 = vst [vmem:[#allocation28_spill] sm:$0xff] %v9400_v30 }
 0x172   : > { %10442 = vst [vmem:[#allocation26_spill] sm:$0xff] %v9379_v16  ;;  %v10443_v33 = vcombine.low %v9013_v40, %v9024_v11  ;;  %v5415_v5 = vrot.slane %v5413_v6, 4  ;;  %v4751_v43 = vshrl.u32 %v4576_v63, 16  ;;  %v4754_v4 = vshll.u32 %v4576_v63, 16  ;;  %v7665_v6 = vld [vmem:[#allocation2 + $0xcc] sm:$0xff]  }
 0x173   : > { %7442 = vmatpush3.bf16.msra.mxu1 %v7666_v17  ;;  %v4577_v17 = vld [vmem:[#allocation2 + $0x64] sm:$0xf]  ;;  %v9392_v32 = vpop.f32.mrf.mxu0  ;;  %v4715_v42 = vsel %vm7798_vm3, %v9364_v39, %v9316_v3  ;;  %v4720_v48 = vrot.slane %v4719_v37, 4  ;;  %v4775_v7 = vshrl.u32 %v4579_v61, 16  ;;  %v4778_v40 = vshll.u32 %v4579_v61, 16 }
 0x174   : > { %7420 = vmatmul.mubr.bf16.gmra.mxu0 %v7661_v23  ;;  %v5318_v23 = vld [vmem:[#allocation2 + $0x60] sm:$0xe]  ;;  %v5420_v8 = vrot.slane %v4577_v17, 5  ;;  %10444 = vst [vmem:[#allocation27_spill] sm:$0xff] %v9392_v32  ;;  %v4760_v56 = vshll.u32 %v4577_v17, 16  ;;  %v4764_v60 = vshrl.u32 %v4577_v17, 16  ;;  %v9411_v30 = vsel %vm8234_vm13, %v5415_v5, %v5416_v19 }
 0x175   : > { %7423 = vmatprep.mubr.bf16.mxu0 %v7664_v45  ;;  %v4784_v11 = vshll.u32 %v9387_v44, 16  ;;  %v4788_v45 = vshrl.u32 %v9387_v44, 16  ;;  %v9402_v63 = vpop.f32.mrf.mxu0  ;;  %v4748_v10 = vrot.slane %v4746_v50, 5  ;;  %v6551_v14 = vrot.slane %v5318_v23, 9  ;;  %v9415_v50 = vld [vmem:[#allocation2 + $0x74] sm:$0x1] }
 0x176   : > { %7364 = vmatmul.mubr.bf16.gmra.mxu1 %v10440_v22  ;;  %10446 = vst [vmem:[#allocation29_spill] sm:$0xff] %v9402_v63  ;;  %v4734_v22 = vrot.slane %v4733_v54, 4  ;;  %v5422_v3 = vrot.slane %v5420_v8, 4  ;;  %v5423_v39 = vrot.slane %v4578_v15, 5  ;;  %v4753_v37 = vrot.slane %v4751_v43, 4 }
 0x177   : > { %7367 = vmatprep.mubr.bf16.mxu1 %v10443_v33  ;;  %v4744_v33 = vrot.slane %v4743_v24, 4  ;;  %v4756_v0 = vrot.slane %v4754_v4, 5  ;;  %v9404_v17 = vpop.f32.mrf.mxu0  ;;  %v4725_v61 = vsel %vm7798_vm3, %v4720_v48, %v9371_v13  ;;  %v9413_v1 = vrot.slane %v4760_v56, 5  ;;  %v5319_v24 = vld [vmem:[#allocation2 + $0x6c] sm:$0xe]  ;;  %v9422_v13 = vpop.f32.mrf.mxu1 }
 0x178   : > { %v4766_v54 = vrot.slane %v4764_v60, 4  ;;  %v4777_v23 = vrot.slane %v4775_v7, 4  ;;  %v4780_v51 = vrot.slane %v4778_v40, 5  ;;  %v9417_v43 = vrot.slane %v4784_v11, 5  ;;  %10448 = vst [vmem:[#allocation30_spill] sm:$0xff] %v9422_v13 }
 0x179   : > { %v4790_v4 = vrot.slane %v4788_v45, 4  ;;  %v10447_v46 = vcombine.low %v9017_v25, %v9033_v12  ;;  %v9424_v19 = vpop.f32.mrf.mxu0  ;;  %v4739_v5 = vsel %vm7798_vm3, %v4734_v22, %v9329_v18  ;;  %v4749_v48 = vsel %vm7798_vm3, %v4744_v33, %v4748_v10  ;;  %v4582_v10 = vld [vmem:[#allocation2 + $0x78] sm:$0xf] }
 0x17a   : > { %v9433_v56 = vsel %vm8234_vm13, %v6551_v14, %v5420_v8  ;;  %v10449_v25 = vcombine.low %v9040_v27, %v9046_v57  ;;  %v10450_v12 = vcombine.low %v9135_v31, %v9139_v52  ;;  %v4757_v18 = vor.u32 %v4756_v0, %v4753_v37  ;;  %v5320_v45 = vld [vmem:[#allocation2 + $0x78] sm:$0xe]  ;;  %v9463_v37 = vld [vmem:[#allocation2 + $0x88] sm:$0xf] }
 0x17b   : > { %v4770_v60 = vshll.u32 %v4578_v15, 16  ;;  %v6552_v7 = vrot.slane %v5319_v24, 9  ;;  %v9445_v40 = vpop.f32.mrf.mxu0  ;;  %v4767_v27 = vor.u32 %v4766_v54, %v9413_v1  ;;  %v5427_v57 = vrot.slane %v9387_v44, 5  ;;  %v4583_v15 = vld [vmem:[#allocation2 + $0x7c] sm:$0xf] }
 0x17c   : > { %7424 = vmatmul.mubr.bf16.gmra.mxu0 %v7665_v6  ;;  %v4794_v31 = vshll.u32 %v9415_v50, 16  ;;  %v9452_v52 = vcombine.low %v4715_v42, %v4725_v61  ;;  %v9454_v8 = vcombine.low %v4739_v5, %v4749_v48  ;;  %v4781_v11 = vor.u32 %v4780_v51, %v4777_v23  ;;  %v9457_v6 = vpop.f32.mrf.mxu1  ;;  %v4584_v24 = vld [vmem:[#allocation2 + $0x80] sm:$0x1] }
 0x17d   : > { %7491 = vmatprep.mubr.bf16.mxu0 %v10450_v12  ;;  %v4791_v0 = vor.u32 %v4790_v4, %v9417_v43  ;;  %10451 = vst [vmem:[#allocation31_spill] sm:$0xff] %v9457_v6  ;;  %v9459_v22 = vpop.f32.mrf.mxu0  ;;  %v4799_v44 = vshrl.u32 %v4582_v10, 16  ;;  %v4758_v42 = vrot.slane %v4757_v18, 4  ;;  %v4772_v61 = vrot.slane %v4770_v60, 5  ;;  %v4585_v12 = vld [vmem:[#allocation2 + $0x84] sm:$0xf] }
 0x17e   : > { %7368 = vmatmul.mubr.bf16.gmra.mxu1 %v10447_v46  ;;  %v9443_v46 = vsel %vm8234_vm13, %v5422_v3, %v5423_v39  ;;  %v5434_v3 = vrot.slane %v4583_v15, 5  ;;  %v4802_v39 = vshll.u32 %v4582_v10, 16  ;;  %v9467_v51 = vsel %vm8234_vm13, %v6552_v7, %v5427_v57  ;;  %v9475_v60 = vpop.f32.mrf.mxu1 }
 0x17f   : > { %7371 = vmatprep.mubr.bf16.mxu1 %v10449_v25  ;;  %v5430_v54 = vrot.slane %v9415_v50, 5  ;;  %v9470_v23 = vpop.f32.mrf.mxu0  ;;  %v4768_v4 = vrot.slane %v4767_v27, 4  ;;  %v5429_v5 = vrot.slane %v5427_v57, 4  ;;  %v4796_v48 = vrot.slane %v4794_v31, 5  ;;  %10453 = vst [vmem:[#allocation32_spill] sm:$0xff] %v9475_v60  ;;  %v10454_v50 = vld [vmem:[#allocation15_spill] sm:$0xff] }
 0x180   : > { %v6553_v25 = vrot.slane %v5320_v45, 9  ;;  %v4782_v33 = vrot.slane %v4781_v11, 4  ;;  %v4792_v10 = vrot.slane %v4791_v0, 4  ;;  %v4808_v14 = vshll.u32 %v4583_v15, 16  ;;  %v10456_v11 = vld [vmem:[#allocation6_spill] sm:$0xff]  ;;  %v10457_v0 = vld [vmem:[#allocation5_spill] sm:$0xff] }
 0x181   : > { %v4812_v6 = vshrl.u32 %v4583_v15, 16  ;;  %v10452_v18 = vcombine.low %v9054_v53, %v9064_v9  ;;  %v10455_v7 = vcombine.low %v9161_v34, %v10454_v50  ;;  %v9480_v13 = vpop.f32.mrf.mxu0  ;;  %v5436_v27 = vrot.slane %v5434_v3, 4 }
 0x182   : > { %v5437_v57 = vrot.slane %v4584_v24, 5  ;;  %v4801_v31 = vrot.slane %v4799_v44, 4  ;;  %v4804_v45 = vrot.slane %v4802_v39, 5  ;;  %v10458_v63 = vcombine.low %v10456_v11, %v10457_v0 }
 0x183   : > { %v10459_v53 = vcombine.low %v9248_v2, %v9266_v35  ;;  %v4823_v9 = vshrl.u32 %v4585_v12, 16  ;;  %v4826_v15 = vshll.u32 %v4585_v12, 16  ;;  %v4836_v34 = vshrl.u32 %v9463_v37, 16  ;;  %v9490_v50 = vpop.f32.mrf.mxu0 }
 0x184   : > { %7492 = vmatmul.mubr.bf16.vlgmr.msra.gmra.mxu0 %v10455_v7  ;;  %v4763_v44 = vsel %vm7798_vm3, %v4758_v42, %v9413_v1  ;;  %v4773_v39 = vsel %vm7798_vm3, %v4768_v4, %v4772_v61  ;;  %v9503_v2 = vsel %vm8234_vm13, %v6553_v25, %v5434_v3  ;;  %v4787_v35 = vsel %vm7798_vm3, %v4782_v33, %v9417_v43  ;;  %v4588_v42 = vld [vmem:[#allocation2 + $0x90] sm:$0xf]  ;;  %v9512_v61 = vpop.f32.mrf.mxu1  ;;  %v5321_v25 = vld [vmem:[#allocation2 + $0x84] sm:$0xe]  ;;  %v4587_v33 = vld [vmem:[#allocation2 + $0x8c] sm:$0x1] }
 0x185   : > { %7495 = vmatprep.mubr.bf16.mxu0 %v10459_v53  ;;  %v4797_v12 = vsel %vm7798_vm3, %v4792_v10, %v4796_v48  ;;  %v9510_v7 = vrot.slane %v4808_v14, 5  ;;  %v4814_v1 = vrot.slane %v4812_v6, 4  ;;  %10460 = vst [vmem:[#allocation15_spill] sm:$0xff] %v9512_v61  ;;  %v9514_v4 = vpop.f32.mrf.mxu0  ;;  %v4805_v3 = vor.u32 %v4804_v45, %v4801_v31 }
 0x186   : > { %7372 = vmatmul.mubr.bf16.gmra.mxu1 %v10452_v18  ;;  %v4832_v18 = vshll.u32 %v9463_v37, 16  ;;  %v5441_v43 = vrot.slane %v9463_v37, 5  ;;  %v4825_v11 = vrot.slane %v4823_v9, 4  ;;  %v4828_v48 = vrot.slane %v4826_v15, 5  ;;  %v9534_v9 = vld [vmem:[#allocation2 + $0x94] sm:$0xf] }
 0x187   : > { %7375 = vmatprep.mubr.bf16.mxu1 %v10458_v63  ;;  %v9499_v63 = vsel %vm8234_vm13, %v5429_v5, %v5430_v54  ;;  %v9518_v54 = vsel %vm8234_vm13, %v5436_v27, %v5437_v57  ;;  %v4818_v5 = vshll.u32 %v4584_v24, 16  ;;  %v4838_v6 = vrot.slane %v4836_v34, 4  ;;  %v9523_v10 = vpop.f32.mrf.mxu0  ;;  %v10464_v34 = vld [vmem:[#allocation4_spill] sm:$0xff]  ;;  %v4591_v37 = vld [vmem:[#allocation2 + $0x9c] sm:$0xf] }
 0x188   : > { %v9521_v14 = vrot.slane %v4832_v18, 5  ;;  %v9525_v0 = vcombine.low %v4763_v44, %v4773_v39  ;;  %v4847_v27 = vshrl.u32 %v4588_v42, 16  ;;  %v4850_v57 = vshll.u32 %v4588_v42, 16  ;;  %v10463_v18 = vld [vmem:[#allocation7_spill] sm:$0xff] }
 0x189   : > { %v9529_v31 = vcombine.low %v4787_v35, %v4797_v12  ;;  %v4815_v24 = vor.u32 %v4814_v1, %v9510_v7  ;;  %v6554_v45 = vrot.slane %v5321_v25, 9  ;;  %v10465_v44 = vcombine.low %v10463_v18, %v10464_v34  ;;  %v9544_v35 = vpop.f32.mrf.mxu0 }
 0x18a   : > { %v9536_v15 = vpop.f32.mrf.mxu1  ;;  %v10466_v39 = vcombine.low %v9276_v38, %v9305_v36  ;;  %v9546_v12 = vrot.slane %v4805_v3, 4  ;;  %v9548_v42 = vrot.slane %v4818_v5, 5  ;;  %v5443_v1 = vrot.slane %v5441_v43, 4  ;;  %v5322_v36 = vld [vmem:[#allocation2 + $0x90] sm:$0xe] }
 0x18b   : > { %10461 = vst [vmem:[#allocation6_spill] sm:$0xff] %v9529_v31  ;;  %10462 = vst [vmem:[#allocation5_spill] sm:$0xff] %v9536_v15  ;;  %v5444_v25 = vrot.slane %v4587_v33, 5  ;;  %v10467_v53 = vcombine.low %v9309_v21, %v9322_v62  ;;  %v4829_v18 = vor.u32 %v4828_v48, %v4825_v11  ;;  %v4839_v34 = vor.u32 %v4838_v6, %v9521_v14  ;;  %v9556_v3 = vld [vmem:[#allocation2 + $0xa0] sm:$0xf] }
 0x18c   : > { %7496 = vmatmul.mubr.bf16.gmra.mxu0 %v10466_v39  ;;  %v4842_v38 = vshll.u32 %v4587_v33, 16  ;;  %v9558_v5 = vpop.f32.mrf.mxu1  ;;  %v9560_v39 = vpop.f32.mrf.mxu0  ;;  %v9562_v15 = vld [vmem:[#allocation2 + $0x98] sm:$0x1]  ;;  %v4852_v61 = vrot.slane %v4850_v57, 5  ;;  %v4856_v21 = vshll.u32 %v9534_v9, 16  ;;  %v4860_v62 = vshrl.u32 %v9534_v9, 16 }
 0x18d   : > { %7499 = vmatprep.mubr.bf16.mxu0 %v10467_v53  ;;  %10468 = vst [vmem:[#allocation7_spill] sm:$0xff] %v9558_v5  ;;  %v4816_v11 = vrot.slane %v4815_v24, 4  ;;  %v9568_v33 = vsel %vm8234_vm13, %v6554_v45, %v5441_v43  ;;  %v4871_v48 = vshrl.u32 %v4591_v37, 16  ;;  %v4874_v6 = vshll.u32 %v4591_v37, 16 }
 0x18e   : > { %7376 = vmatmul.mubr.bf16.gmra.mxu1 %v10465_v44  ;;  %v5448_v44 = vrot.slane %v9534_v9, 5  ;;  %v9570_v53 = vpop.f32.mrf.mxu1  ;;  %v9572_v5 = vpop.f32.mrf.mxu0  ;;  %v9576_v60 = vsel %vm8234_vm13, %v5443_v1, %v5444_v25  ;;  %v4880_v57 = vshll.u32 %v9556_v3, 16  ;;  %v4884_v9 = vshrl.u32 %v9556_v3, 16 }
 0x18f   : > { %7443 = vmatprep.mubr.bf16.mxu1 %v9341_v29  ;;  %v4849_v29 = vrot.slane %v4847_v27, 4  ;;  %10469 = vst [vmem:[#allocation4_spill] sm:$0xff] %v9570_v53  ;;  %10470 = vst [vmem:[#allocation33_spill] sm:$0xff] %v9572_v5  ;;  %v6555_v27 = vrot.slane %v5322_v36, 9  ;;  %v4830_v24 = vrot.slane %v4829_v18, 4  ;;  %v4840_v32 = vrot.slane %v4839_v34, 4 }
 0x190   : > { %v4844_v16 = vrot.slane %v4842_v38, 5  ;;  %v5451_v43 = vrot.slane %v9562_v15, 5  ;;  %v9581_v45 = vpop.f32.mrf.mxu1  ;;  %v9583_v37 = vpop.f32.mrf.mxu0  ;;  %v5450_v53 = vrot.slane %v5448_v44, 4  ;;  %v9585_v26 = vrot.slane %v4856_v21, 5  ;;  %v5323_v36 = vld [vmem:[#allocation2 + $0x9c] sm:$0xe] }
 0x191   : > { %10471 = vst [vmem:[#allocation34_spill] sm:$0xff] %v9581_v45  ;;  %v4853_v5 = vor.u32 %v4852_v61, %v4849_v29  ;;  %v4862_v1 = vrot.slane %v4860_v62, 4  ;;  %v4811_v25 = vsel %vm7798_vm3, %v9546_v12, %v9510_v7  ;;  %v5455_v18 = vrot.slane %v9556_v3, 5  ;;  %v4593_v12 = vld [vmem:[#allocation2 + $0xa4] sm:$0x1] }
 0x192   : > { %v4873_v34 = vrot.slane %v4871_v48, 4  ;;  %v4876_v38 = vrot.slane %v4874_v6, 5  ;;  %v10472_v45 = vcombine.low %v9383_v47, %v9411_v30  ;;  %v9596_v61 = vpop.f32.mrf.mxu0  ;;  %v4821_v29 = vsel %vm7798_vm3, %v4816_v11, %v9548_v42  ;;  %v4594_v6 = vld [vmem:[#allocation2 + $0xa8] sm:$0xf] }
 0x193   : > { %v7157_v31 = vpop.f32.mrf.mxu1  ;;  %v9603_v3 = vrot.slane %v4880_v57, 5  ;;  %v4886_v21 = vrot.slane %v4884_v9, 4  ;;  %v4835_v47 = vsel %vm7798_vm3, %v4830_v24, %v9521_v14  ;;  %v4845_v30 = vsel %vm7798_vm3, %v4840_v32, %v4844_v16 }
 0x194   : > { %7500 = vmatmul.mubr.bf16.gmra.mxu0 %v10472_v45  ;;  %v9616_v42 = vsel %vm8234_vm13, %v6555_v27, %v5448_v44  ;;  %v4866_v62 = vshll.u32 %v9562_v15, 16  ;;  %v9619_v48 = vpop.f32.mrf.mxu0  ;;  %v6556_v14 = vrot.slane %v5323_v36, 9  ;;  %v5457_v16 = vrot.slane %v5455_v18, 4  ;;  %v4595_v27 = vld [vmem:[#allocation2 + $0xac] sm:$0xf] }
 0x195   : > { %v1921_v11 = vpop.f32.mrf.mxu1  ;;  %10474 = vst [vmem:[#allocation35_spill] sm:$0xff] %v9619_v48  ;;  %v5458_v32 = vrot.slane %v4593_v12, 5  ;;  %v4877_v57 = vor.u32 %v4876_v38, %v4873_v34  ;;  %v4890_v44 = vshll.u32 %v4593_v12, 16  ;;  %v9630_v24 = vcombine.low %v4811_v25, %v4821_v29  ;;  %v10477_v12 = vld [vmem:[#allocation3_spill] sm:$0xff] }
 0x196   : > { %7444 = vmatmul.mubr.bf16.vlgmr.msra.gmra.mxu1 %v9353_v49  ;;  %v10473_v49 = vcombine.low %v9433_v56, %v9443_v46  ;;  %v9625_v56 = vrot.slane %v4853_v5, 4  ;;  %v4863_v46 = vor.u32 %v4862_v1, %v9585_v26  ;;  %v9628_v15 = vpop.f32.mrf.mxu0  ;;  %v9632_v45 = vcombine.low %v4835_v47, %v4845_v30  ;;  %v5324_v5 = vld [vmem:[#allocation2 + $0xa8] sm:$0xe] }
 0x197   : > { %7447 = vmatprep.mubr.bf16.mxu1 %v9360_v58  ;;  %v9623_v58 = vsel %vm8234_vm13, %v5450_v53, %v5451_v43  ;;  %v7158_v9 = vpop.f32.mrf.mxu1  ;;  %10475 = vst [vmem:[#allocation36_spill] sm:$0xff] %v9628_v15  ;;  %v4887_v53 = vor.u32 %v4886_v21, %v9603_v3  ;;  %v5462_v43 = vrot.slane %v4595_v27, 5  ;;  %v9637_v36 = vrot.slane %v4866_v62, 5 }
 0x198   : > { %7503 = vmatprep.mubr.bf16.mxu0 %v10473_v49  ;;  %10476 = vst [vmem:[#allocation37_spill] sm:$0xff] %v9632_v45  ;;  %v9639_v49 = vld [vmem:[#allocation2 + $0xb0] sm:$0x1]  ;;  %v4895_v34 = vshrl.u32 %v4594_v6, 16  ;;  %v4898_v38 = vshll.u32 %v4594_v6, 16  ;;  %v1930_v7 = vadd.f32 %v7157_v31, %v10477_v12  ;;  %v9642_v25 = vpop.f32.mrf.mxu0  ;;  %v4859_v29 = vsel %vm7798_vm3, %v9625_v56, %v9585_v26 }
 0x199   : > { %v1924_v15 = vpop.f32.mrf.mxu1  ;;  %10478 = vst [vmem:[#allocation3_spill] sm:$0xff] %v9642_v25  ;;  %v4864_v21 = vrot.slane %v4863_v46, 4  ;;  %v9650_v47 = vsel %vm8234_vm13, %v6556_v14, %v5455_v18  ;;  %v9654_v30 = vsel %vm8234_vm13, %v5457_v16, %v5458_v32  ;;  %v4878_v62 = vrot.slane %v4877_v57, 4  ;;  %v10481_v25 = vld [vmem:[#allocation8_spill] sm:$0xff]  ;;  %v10482_v32 = vld [vmem:[#allocation9_spill] sm:$0xff] }
 0x19a   : > { %v4892_v6 = vrot.slane %v4890_v44, 5  ;;  %v6557_v31 = vrot.slane %v5324_v5, 9  ;;  %v10479_v1 = vcombine.low %v9467_v51, %v9499_v63  ;;  %v9660_v26 = vpop.f32.mrf.mxu0  ;;  %v4888_v56 = vrot.slane %v4887_v53, 4  ;;  %v10484_v63 = vld [vmem:[#allocation10_spill] sm:$0xff] }
 0x19b   : > { %v7161_v12 = vpop.f32.mrf.mxu1  ;;  %10480 = vst [vmem:[#allocation38_spill] sm:$0xff] %v9660_v26  ;;  %v5464_v46 = vrot.slane %v5462_v43, 4  ;;  %v5465_v18 = vrot.slane %v9639_v49, 5  ;;  %v4904_v14 = vshll.u32 %v4595_v27, 16  ;;  %v1922_v16 = vadd.f32 %v1921_v11, %v10481_v25 }
 0x19c   : > { %7504 = vmatmul.mubr.bf16.gmra.mxu0 %v10479_v1  ;;  %v1933_v57 = vadd.f32 %v7158_v9, %v10482_v32  ;;  %v4897_v44 = vrot.slane %v4895_v34, 4  ;;  %v4900_v51 = vrot.slane %v4898_v38, 5  ;;  %v1925_v5 = vadd.f32 %v1924_v15, %v10484_v63  ;;  %v10485_v1 = vld [vmem:[#allocation11_spill] sm:$0xff]  ;;  %v9671_v45 = vpop.f32.mrf.mxu0  ;;  %v10486_v9 = vld [vmem:[#allocation12_spill] sm:$0xff]  ;;  %v5325_v38 = vld [vmem:[#allocation2 + $0xb4] sm:$0xe] }
 0x19d   : > { %v1946_v53 = vadd.f32 %v7161_v12, %v10485_v1  ;;  %v1937_v26 = vpop.f32.mrf.mxu1  ;;  %v4908_v48 = vshrl.u32 %v4595_v27, 16  ;;  %v9674_v11 = vadd.f32 %v9404_v17, %v1930_v7  ;;  %v4893_v17 = vsel %vm7798_vm3, %v4888_v56, %v4892_v6  ;;  %v9707_v56 = vld [vmem:[#allocation2 + $0xb8] sm:$0xf] }
 0x19e   : > { %7448 = vmatmul.mubr.bf16.gmra.mxu1 %v9367_v20  ;;  %v10483_v20 = vcombine.low %v9503_v2, %v9518_v54  ;;  %v1938_v25 = vadd.f32 %v1937_v26, %v10486_v9  ;;  %v4883_v2 = vsel %vm7798_vm3, %v4878_v62, %v9603_v3  ;;  %v9685_v54 = vsel %vm8234_vm13, %v6557_v31, %v5462_v43  ;;  %v9687_v34 = vpop.f32.mrf.mxu0  ;;  %v10487_v3 = vld [vmem:[#allocation13_spill] sm:$0xff] }
 0x19f   : > { %7451 = vmatprep.mubr.bf16.mxu1 %v9452_v52  ;;  %v4869_v52 = vsel %vm7798_vm3, %v4864_v21, %v9637_v36  ;;  %v7162_v15 = vpop.f32.mrf.mxu1  ;;  %v9693_v7 = vsel %vm8234_vm13, %v5464_v46, %v5465_v18  ;;  %v9695_v27 = vrot.slane %v4904_v14, 5  ;;  %v4914_v36 = vshll.u32 %v9639_v49, 16 }
 0x1a0   : > { %7507 = vmatprep.mubr.bf16.mxu0 %v10483_v20  ;;  %v1949_v21 = vadd.f32 %v7162_v15, %v10487_v3  ;;  %v4901_v62 = vor.u32 %v4900_v51, %v4897_v44  ;;  %v9700_v43 = vadd.f32 %v9424_v19, %v1922_v16  ;;  %v9703_v31 = vadd.f32 %v9445_v40, %v1933_v57  ;;  %v9705_v6 = vpop.f32.mrf.mxu0  ;;  %v10488_v19 = vld [vmem:[#allocation16_spill] sm:$0xff]  ;;  %v9721_v16 = vld [vmem:[#allocation2 + $0xbc] sm:$0x1]  ;;  %v10490_v51 = vld [vmem:[#allocation18_spill] sm:$0xff] }
 0x1a1   : > { %v1940_v12 = vpop.f32.mrf.mxu1  ;;  %v4910_v26 = vrot.slane %v4908_v48, 4  ;;  %v9710_v46 = vadd.f32 %v9459_v22, %v1925_v5  ;;  %v9713_v49 = vadd.f32 %v9470_v23, %v1946_v53  ;;  %v9716_v18 = vadd.f32 %v9480_v13, %v1938_v25  ;;  %v4597_v48 = vld [vmem:[#allocation2 + $0xb4] sm:$0xf]  ;;  %v4600_v15 = vld [vmem:[#allocation2 + $0xc0] sm:$0xf] }
 0x1a2   : > { %v1941_v14 = vadd.f32 %v1940_v12, %v10488_v19  ;;  %v6588_v40 = vcombine.low %v9650_v47, %v9654_v30  ;;  %v6558_v32 = vrot.slane %v5325_v38, 9  ;;  %v9724_v57 = vadd.f32 %v9490_v50, %v1949_v21  ;;  %v9734_v44 = vpop.f32.mrf.mxu0  ;;  %v9739_v50 = vld [vmem:[#allocation2 + $0xc4] sm:$0xf] }
 0x1a3   : > { %v7165_v22 = vpop.f32.mrf.mxu1  ;;  %v10489_v23 = vcombine.low %v9568_v33, %v9576_v60  ;;  %v9730_v13 = vcombine.low %v4859_v29, %v4869_v52  ;;  %v9732_v20 = vcombine.low %v4883_v2, %v4893_v17  ;;  %v6589_v47 = vcombine.low %v9685_v54, %v9693_v7  ;;  %v5326_v33 = vld [vmem:[#allocation2 + $0xc0] sm:$0xe] }
 0x1a4   : > { %v5469_v30 = vrot.slane %v9707_v56, 5  ;;  %v1962_v63 = vadd.f32 %v7165_v22, %v10490_v51  ;;  %v9746_v60 = vrot.slane %v4914_v36, 5  ;;  %v5476_v29 = vrot.slane %v9739_v50, 5  ;;  %v9752_v53 = vpop.f32.mrf.mxu0 }
 0x1a5   : > { %7508 = vmatmul.mubr.bf16.gmra.mxu0 %v10489_v23  ;;  %v9750_v5 = vadd.f32 %v9514_v4, %v1941_v14  ;;  %v1953_v1 = vpop.f32.mrf.mxu1  ;;  %v9754_v9 = vrot.slane %v4901_v62, 4  ;;  %v4911_v25 = vor.u32 %v4910_v26, %v9695_v27  ;;  %v4919_v52 = vshrl.u32 %v4597_v48, 16 }
 0x1a6   : > { %7452 = vmatmul.mubr.bf16.gmra.mxu1 %v9454_v8  ;;  %v10491_v8 = vcombine.low %v9616_v42, %v9623_v58  ;;  %v9758_v42 = vld [vmem:[#allocation2 + $0xc8] sm:$0x1]  ;;  %v10492_v58 = vld [vmem:[#allocation20_spill] sm:$0xff]  ;;  %v9763_v54 = vsel %vm8234_vm13, %v6558_v32, %v5469_v30  ;;  %v4922_v4 = vshll.u32 %v4597_v48, 16  ;;  %v9766_v17 = vadd.f32 %v9523_v10, %v1962_v63  ;;  %v9768_v36 = vpop.f32.mrf.mxu0  ;;  %v10499_v48 = vld [vmem:[#allocation27_spill] sm:$0xff] }
 0x1a7   : > { %7455 = vmatprep.mubr.bf16.mxu1 %v9525_v0  ;;  %v5472_v0 = vrot.slane %v9721_v16, 5  ;;  %v1954_v2 = vadd.f32 %v1953_v1, %v10492_v58  ;;  %v7166_v7 = vpop.f32.mrf.mxu1  ;;  %v5471_v38 = vrot.slane %v5469_v30, 4  ;;  %v4928_v3 = vshll.u32 %v9707_v56, 16  ;;  %v9802_v58 = vld [vmem:[#allocation2 + $0xd0] sm:$0xf] }
 0x1a8   : > { %7511 = vmatprep.mubr.bf16.mxu0 %v10491_v8  ;;  %v4932_v21 = vshrl.u32 %v9707_v56, 16  ;;  %v6559_v62 = vrot.slane %v5326_v33, 9  ;;  %v1965_v12 = vadd.f32 %v7166_v7, %v9285_v41  ;;  %v5478_v26 = vrot.slane %v5476_v29, 4  ;;  %v10494_v8 = vld [vmem:[#allocation6_spill] sm:$0xff] }
 0x1a9   : > { %v5479_v19 = vrot.slane %v9758_v42, 5  ;;  %v9775_v14 = vadd.f32 %v9544_v35, %v1954_v2  ;;  %v1956_v32 = vpop.f32.mrf.mxu1  ;;  %v9777_v10 = vpop.f32.mrf.mxu0  ;;  %v9783_v22 = vrot.slane %v4911_v25, 4  ;;  %v4943_v56 = vshrl.u32 %v4600_v15, 16 }
 0x1aa   : > { %v4946_v23 = vshll.u32 %v4600_v15, 16  ;;  %v1957_v41 = vadd.f32 %v1956_v32, %v9311_v59  ;;  %v9786_v30 = vrot.slane %v4919_v52, 4  ;;  %v9788_v51 = vrot.slane %v4922_v4, 5  ;;  %v10496_v15 = vld [vmem:[#allocation33_spill] sm:$0xff] }
 0x1ab   : > { %v9791_v35 = vadd.f32 %v9560_v39, %v1965_v12  ;;  %v7169_v63 = vpop.f32.mrf.mxu1  ;;  %v5473_v33 = vsel %vm8234_vm13, %v5471_v38, %v5472_v0  ;;  %v9796_v1 = vpop.f32.mrf.mxu0  ;;  %v5477_v25 = vsel %vm8234_vm13, %v6559_v62, %v5476_v29  ;;  %v4952_v59 = vshll.u32 %v9739_v50, 16  ;;  %v10495_v39 = vld [vmem:[#allocation24_spill] sm:$0xff]  ;;  %v5327_v0 = vld [vmem:[#allocation2 + $0xcc] sm:$0xe] }
 0x1ac   : > { %v4956_v52 = vshrl.u32 %v9739_v50, 16  ;;  %v1978_v2 = vadd.f32 %v7169_v63, %v10495_v39  ;;  %v5483_v4 = vrot.slane %v9802_v58, 5  ;;  %v9810_v7 = vadd.f32 %v10496_v15, %v1957_v41  ;;  %v9816_v63 = vld [vmem:[#allocation2 + $0xd4] sm:$0x1] }
 0x1ad   : > { %10493 = vst [vmem:[#allocation8_spill] sm:$0xff] %v9791_v35  ;;  %7512 = vmatmul.mubr.bf16.gmra.mxu0 %v6588_v40  ;;  %v5480_v40 = vsel %vm8234_vm13, %v5478_v26, %v5479_v19  ;;  %v1969_v29 = vpop.f32.mrf.mxu1  ;;  %v9812_v38 = vrot.slane %v4928_v3, 5  ;;  %v4934_v50 = vrot.slane %v4932_v21, 4  ;;  %v9814_v62 = vpop.f32.mrf.mxu0  ;;  %v4945_v12 = vrot.slane %v4943_v56, 4 }
 0x1ae   : > { %7456 = vmatmul.mubr.bf16.gmra.mxu1 %v10494_v8  ;;  %7515 = vmatprep.mubr.bf16.mxu0 %v6589_v47  ;;  %10497 = vst [vmem:[#allocation9_spill] sm:$0xff] %v9810_v7  ;;  %v4948_v32 = vrot.slane %v4946_v23, 5  ;;  %v6590_v26 = vcombine.low %v9763_v54, %v5473_v33  ;;  %v4938_v19 = vshll.u32 %v9721_v16, 16  ;;  %v9822_v8 = vadd.f32 %v9583_v37, %v1978_v2  ;;  %v4603_v23 = vld [vmem:[#allocation2 + $0xcc] sm:$0xf] }
 0x1af   : > { %7459 = vmatprep.mubr.bf16.mxu1 %v9630_v24  ;;  %v10498_v24 = vld [vmem:[#allocation26_spill] sm:$0xff]  ;;  %v7170_v41 = vpop.f32.mrf.mxu1  ;;  %v9824_v39 = vpop.f32.mrf.mxu0  ;;  %v6591_v3 = vcombine.low %v5477_v25, %v5480_v40  ;;  %v9826_v21 = vrot.slane %v4952_v59, 5  ;;  %v4958_v15 = vrot.slane %v4956_v52, 4  ;;  %v6560_v56 = vrot.slane %v5327_v0, 9  ;;  %v10500_v52 = vld [vmem:[#allocation29_spill] sm:$0xff]  ;;  %v10501_v0 = vld [vmem:[#allocation35_spill] sm:$0xff] }
 0x1b0   : > { %v1970_v47 = vadd.f32 %v1969_v29, %v10498_v24  ;;  %v1981_v7 = vadd.f32 %v7170_v41, %v10499_v48  ;;  %v5485_v35 = vrot.slane %v5483_v4, 4  ;;  %v5486_v29 = vrot.slane %v9816_v63, 5  ;;  %v10503_v41 = vld [vmem:[#allocation37_spill] sm:$0xff] }
 0x1b1   : > { %v1972_v16 = vpop.f32.mrf.mxu1  ;;  %v4917_v37 = vsel %vm7798_vm3, %v9783_v22, %v9746_v60  ;;  %v4925_v33 = vor.u32 %v9788_v51, %v9786_v30  ;;  %v4935_v25 = vor.u32 %v4934_v50, %v9812_v38  ;;  %v4949_v48 = vor.u32 %v4948_v32, %v4945_v12  ;;  %v10504_v12 = vld [vmem:[#allocation14_spill] sm:$0xff] }
 0x1b2   : > { %v9831_v54 = vadd.f32 %v9596_v61, %v1970_v47  ;;  %v9840_v59 = vpop.f32.mrf.mxu0  ;;  %v1973_v2 = vadd.f32 %v1972_v16, %v10500_v52  ;;  %v4962_v40 = vshll.u32 %v9758_v42, 16  ;;  %v4967_v61 = vshrl.u32 %v4603_v23, 16 }
 0x1b3   : > { %v9845_v24 = vadd.f32 %v10501_v0, %v1981_v7  ;;  %v4959_v60 = vor.u32 %v4958_v15, %v9826_v21  ;;  %v5484_v22 = vsel %vm8234_vm13, %v6560_v56, %v5483_v4  ;;  %v4970_v30 = vshll.u32 %v4603_v23, 16 }
 0x1b4   : > { %v7173_v47 = vpop.f32.mrf.mxu1  ;;  %v4976_v51 = vshll.u32 %v9802_v58, 16  ;;  %v9852_v50 = vpop.f32.mrf.mxu0  ;;  %v5487_v7 = vsel %vm8234_vm13, %v5485_v35, %v5486_v29  ;;  %v4980_v32 = vshrl.u32 %v9802_v58, 16  ;;  %v10507_v4 = vsel %vm7798_vm3, %v9754_v9, %v9695_v27  ;;  %v10509_v58 = vld [vmem:[#allocation3_spill] sm:$0xff] }
 0x1b5   : > { %10502 = vst [vmem:[#allocation10_spill] sm:$0xff] %v9845_v24  ;;  %7516 = vmatmul.mubr.bf16.gmra.mxu0 %v6590_v26  ;;  %v1994_v42 = vadd.f32 %v7173_v47, %v10504_v12  ;;  %v10505_v26 = vld [vmem:[#allocation36_spill] sm:$0xff]  ;;  %v6533_v56 = vcombine.low %v10507_v4, %v4917_v37  ;;  %v4926_v23 = vrot.slane %v4925_v33, 4  ;;  %v4936_v52 = vrot.slane %v4935_v25, 4  ;;  %v10510_v27 = vld [vmem:[#allocation19_spill] sm:$0xff]  ;;  %v10511_v33 = vld [vmem:[#allocation38_spill] sm:$0xff] }
 0x1b6   : > { %7460 = vmatmul.mubr.bf16.gmra.mxu1 %v10503_v41  ;;  %7519 = vmatprep.mubr.bf16.mxu0 %v6591_v3  ;;  %v9860_v15 = vadd.f32 %v10505_v26, %v1973_v2  ;;  %v1985_v16 = vpop.f32.mrf.mxu1  ;;  %v4940_v0 = vrot.slane %v4938_v19, 5  ;;  %v10508_v3 = vld [vmem:[#allocation17_spill] sm:$0xff]  ;;  %v4950_v35 = vrot.slane %v4949_v48, 4  ;;  %v4964_v29 = vrot.slane %v4962_v40, 5 }
 0x1b7   : > { %7463 = vmatprep.mubr.bf16.mxu1 %v9730_v13  ;;  %v9867_v13 = vpop.f32.mrf.mxu0  ;;  %v1986_v55 = vadd.f32 %v1985_v16, %v10508_v3  ;;  %v9871_v47 = vadd.f32 %v10509_v58, %v1994_v42  ;;  %v4960_v41 = vrot.slane %v4959_v60, 4  ;;  %v6592_v12 = vcombine.low %v5484_v22, %v5487_v7  ;;  %v10512_v40 = vld [vmem:[#allocation21_spill] sm:$0xff] }
 0x1b8   : > { %10506 = vst [vmem:[#allocation11_spill] sm:$0xff] %v9860_v15  ;;  %v7174_v2 = vpop.f32.mrf.mxu1  ;;  %v4969_v26 = vrot.slane %v4967_v61, 4  ;;  %v4972_v15 = vrot.slane %v4970_v30, 5  ;;  %v4978_v37 = vrot.slane %v4976_v51, 5  ;;  %v4982_v19 = vrot.slane %v4980_v32, 4 }
 0x1b9   : > { %v9873_v24 = vpop.f32.mrf.mxu0  ;;  %v1997_v9 = vadd.f32 %v7174_v2, %v10510_v27  ;;  %v9877_v25 = vadd.f32 %v10511_v33, %v1986_v55  ;;  %v4931_v60 = vsel %vm7798_vm3, %v4926_v23, %v9812_v38  ;;  %v4941_v30 = vsel %vm7798_vm3, %v4936_v52, %v4940_v0 }
 0x1ba   : > { %v1988_v16 = vpop.f32.mrf.mxu1  ;;  %v4955_v51 = vsel %vm7798_vm3, %v4950_v35, %v9826_v21  ;;  %v4965_v7 = vsel %vm7798_vm3, %v4960_v41, %v4964_v29  ;;  %v4986_v32 = vshll.u32 %v9816_v63, 16  ;;  %v4973_v23 = vor.u32 %v4972_v15, %v4969_v26  ;;  %v10514_v21 = vld [vmem:[#allocation23_spill] sm:$0xff] }
 0x1bb   : > { %v9879_v48 = vpop.f32.mrf.mxu0  ;;  %v1989_v42 = vadd.f32 %v1988_v16, %v10512_v40  ;;  %v9886_v61 = vadd.f32 %v9671_v45, %v1997_v9  ;;  %v10513_v45 = vld [vmem:[#allocation22_spill] sm:$0xff]  ;;  %v6534_v63 = vcombine.low %v4931_v60, %v4941_v30  ;;  %v6535_v58 = vcombine.low %v4955_v51, %v4965_v7 }
 0x1bc   : > { %v4988_v2 = vrot.slane %v4986_v32, 5 }
 0x1bd   : > { %v7177_v22 = vpop.f32.mrf.mxu1  ;;  %7520 = vmatmul.mubr.bf16.gmra.mxu0 %v6592_v12  ;;  %v9897_v38 = vpop.f32.mrf.mxu0  ;;  %v9901_v3 = vadd.f32 %v9687_v34, %v1989_v42  ;;  %v4974_v12 = vrot.slane %v4973_v23, 4  ;;  %v10517_v42 = vld [vmem:[#allocation30_spill] sm:$0xff] }
 0x1be   : > { %7464 = vmatmul.mubr.bf16.gmra.mxu1 %v9732_v20  ;;  %v2010_v4 = vadd.f32 %v7177_v22, %v10513_v45  ;;  %v4983_v20 = vor.u32 %v4982_v19, %v4978_v37  ;;  %v10516_v19 = vld [vmem:[#allocation28_spill] sm:$0xff] }
 0x1bf   : > { %7467 = vmatprep.mubr.bf16.mxu1 %v6533_v56  ;;  %v2001_v52 = vpop.f32.mrf.mxu1  ;;  %v9903_v0 = vpop.f32.mrf.mxu0  ;;  %v10515_v56 = vld [vmem:[#allocation25_spill] sm:$0xff]  ;;  %v4979_v22 = vsel %vm7798_vm3, %v4974_v12, %v4978_v37 }
 0x1c0   : > { %v2002_v55 = vadd.f32 %v2001_v52, %v10514_v21  ;;  %v9907_v35 = vadd.f32 %v9705_v6, %v2010_v4  ;;  %v4984_v26 = vrot.slane %v4983_v20, 4  ;;  %v10519_v52 = vld [vmem:[#allocation32_spill] sm:$0xff] }
 0x1c1   : > { %v7178_v29 = vpop.f32.mrf.mxu1  ;;  %v9909_v41 = vpop.f32.mrf.mxu0 }
 0x1c2   : > { %v2013_v15 = vadd.f32 %v7178_v29, %v10515_v56  ;;  %v9913_v34 = vadd.f32 %v9734_v44, %v2002_v55  ;;  %v4989_v44 = vsel %vm7798_vm3, %v4984_v26, %v4988_v2  ;;  %v10520_v29 = vld [vmem:[#allocation15_spill] sm:$0xff] }
 0x1c3   : > { %v2004_v27 = vpop.f32.mrf.mxu1  ;;  %v9915_v9 = vpop.f32.mrf.mxu0  ;;  %v6536_v23 = vcombine.low %v4979_v22, %v4989_v44 }
 0x1c4   : > { %v2005_v33 = vadd.f32 %v2004_v27, %v10516_v19  ;;  %v9919_v6 = vadd.f32 %v9752_v53, %v2013_v15  ;;  %v10518_v53 = vld [vmem:[#allocation31_spill] sm:$0xff] }
 0x1c5   : > { %v7181_v16 = vpop.f32.mrf.mxu1  ;;  %v9921_v40 = vpop.f32.mrf.mxu0  ;;  %v10522_v27 = vld [vmem:[#allocation7_spill] sm:$0xff] }
 0x1c6   : > { %7468 = vmatmul.mubr.bf16.gmra.mxu1 %v6534_v63  ;;  %v2026_v60 = vadd.f32 %v7181_v16, %v10517_v42  ;;  %v9929_v30 = vadd.f32 %v9768_v36, %v2005_v33  ;;  %v10523_v42 = vld [vmem:[#allocation4_spill] sm:$0xff] }
 0x1c7   : > { %7471 = vmatprep.mubr.bf16.mxu1 %v6535_v58  ;;  %v2017_v51 = vpop.f32.mrf.mxu1  ;;  %v7306_v7 = vpop.f32.mrf.mxu0 }
 0x1c8   : > { %v2018_v32 = vadd.f32 %v2017_v51, %v10518_v53  ;;  %v9933_v45 = vadd.f32 %v9777_v10, %v2026_v60  ;;  %v10521_v10 = vld [vmem:[#allocation5_spill] sm:$0xff]  ;;  %v10524_v51 = vld [vmem:[#allocation34_spill] sm:$0xff] }
 0x1c9   : > { %v7182_v4 = vpop.f32.mrf.mxu1  ;;  %v3533_v20 = vpop.f32.mrf.mxu0 }
 0x1ca   : > { %v2029_v21 = vadd.f32 %v7182_v4, %v10519_v52  ;;  %v9937_v37 = vadd.f32 %v9796_v1, %v2018_v32 }
 0x1cb   : > { %v2020_v28 = vpop.f32.mrf.mxu1  ;;  %v7309_v55 = vpop.f32.mrf.mxu0 }
 0x1cc   : > { %v2021_v36 = vadd.f32 %v2020_v28, %v10520_v29  ;;  %v9941_v63 = vadd.f32 %v9814_v62, %v2029_v21 }
 0x1cd   : > { %v3546_v2 = vpop.f32.mrf.mxu0 }
 0x1ce   : > { %v7185_v58 = vpop.f32.mrf.mxu1  ;;  %7472 = vmatmul.mubr.bf16.gmra.mxu1 %v6536_v23  ;;  %v9945_v15 = vadd.f32 %v9824_v39, %v2021_v36 }
 0x1cf   : > { %v2042_v56 = vadd.f32 %v7185_v58, %v10521_v10  ;;  %v7310_v26 = vpop.f32.mrf.mxu0 }
 0x1d0   : > { %v2033_v12 = vpop.f32.mrf.mxu1 }
 0x1d1   : > { %v2034_v1 = vadd.f32 %v2033_v12, %v10522_v27  ;;  %v9949_v19 = vadd.f32 %v9840_v59, %v2042_v56  ;;  %v3549_v16 = vpop.f32.mrf.mxu0 }
 0x1d2   : > { %v7186_v33 = vpop.f32.mrf.mxu1 }
 0x1d3   : > { %v2045_v62 = vadd.f32 %v7186_v33, %v10523_v42  ;;  %v9953_v60 = vadd.f32 %v9852_v50, %v2034_v1  ;;  %v7313_v44 = vpop.f32.mrf.mxu0 }
 0x1d4   : > { %v2036_v22 = vpop.f32.mrf.mxu1 }
 0x1d5   : > { %v2037_v53 = vadd.f32 %v2036_v22, %v10524_v51  ;;  %v9957_v39 = vadd.f32 %v9867_v13, %v2045_v62  ;;  %v3562_v4 = vpop.f32.mrf.mxu0 }
 0x1d6   : > { %v7253_v32 = vpop.f32.mrf.mxu1 }
 0x1d7   : > { %v2889_v23 = vadd.f32 %v7253_v32, %v9674_v11  ;;  %v9961_v59 = vadd.f32 %v9873_v24, %v2037_v53  ;;  %v7314_v21 = vpop.f32.mrf.mxu0 }
 0x1d8   : > { %v2760_v52 = vpop.f32.mrf.mxu1 }
 0x1d9   : > { %v2887_v28 = vadd.f32 %v2760_v52, %v9700_v43  ;;  %v9965_v50 = vadd.f32 %v9879_v48, %v2889_v23  ;;  %v3565_v36 = vpop.f32.mrf.mxu0 }
 0x1da   : > { %v7254_v29 = vpop.f32.mrf.mxu1 }
 0x1db   : > { %v2890_v58 = vadd.f32 %v7254_v29, %v9703_v31  ;;  %v9969_v13 = vadd.f32 %v9897_v38, %v2887_v28  ;;  %v7317_v56 = vpop.f32.mrf.mxu0 }
 0x1dc   : > { %v2763_v10 = vpop.f32.mrf.mxu1 }
 0x1dd   : > { %v2888_v11 = vadd.f32 %v2763_v10, %v9710_v46  ;;  %v9973_v24 = vadd.f32 %v9903_v0, %v2890_v58  ;;  %v3578_v27 = vpop.f32.mrf.mxu0  ;;  %v10525_v58 = vld [vmem:[#allocation8_spill] sm:$0xff] }
 0x1de   : > { %v7257_v12 = vpop.f32.mrf.mxu1 }
 0x1df   : > { %v2893_v43 = vadd.f32 %v7257_v12, %v9713_v49  ;;  %v9977_v48 = vadd.f32 %v9909_v41, %v2888_v11  ;;  %v7318_v33 = vpop.f32.mrf.mxu0 }
 0x1e0   : > { %v2776_v1 = vpop.f32.mrf.mxu1 }
 0x1e1   : > { %v2891_v31 = vadd.f32 %v2776_v1, %v9716_v18  ;;  %v9981_v38 = vadd.f32 %v9915_v9, %v2893_v43  ;;  %v3581_v62 = vpop.f32.mrf.mxu0 }
 0x1e2   : > { %v7258_v42 = vpop.f32.mrf.mxu1 }
 0x1e3   : > { %v2894_v46 = vadd.f32 %v7258_v42, %v9724_v57  ;;  %v9985_v0 = vadd.f32 %v9921_v40, %v2891_v31  ;;  %v7321_v51 = vpop.f32.mrf.mxu0 }
 0x1e4   : > { %v2779_v22 = vpop.f32.mrf.mxu1 }
 0x1e5   : > { %v2892_v49 = vadd.f32 %v2779_v22, %v9750_v5  ;;  %v9988_v41 = vadd.f32 %v7306_v7, %v2894_v46  ;;  %v3594_v32 = vpop.f32.mrf.mxu0  ;;  %v10526_v7 = vld [vmem:[#allocation9_spill] sm:$0xff] }
 0x1e6   : > { %v7261_v53 = vpop.f32.mrf.mxu1 }
 0x1e7   : > { %v2897_v18 = vadd.f32 %v7261_v53, %v9766_v17  ;;  %v9991_v23 = vadd.f32 %v3533_v20, %v2892_v49  ;;  %v7322_v52 = vpop.f32.mrf.mxu0 }
 0x1e8   : > { %v2792_v9 = vpop.f32.mrf.mxu1 }
 0x1e9   : > { %v2895_v28 = vadd.f32 %v2792_v9, %v9775_v14  ;;  %v9994_v57 = vadd.f32 %v7309_v55, %v2897_v18  ;;  %v3597_v29 = vpop.f32.mrf.mxu0 }
 0x1ea   : > { %v7262_v40 = vpop.f32.mrf.mxu1 }
 0x1eb   : > { %v2898_v10 = vadd.f32 %v7262_v40, %v10525_v58  ;;  %v9997_v11 = vadd.f32 %v3546_v2, %v2895_v28  ;;  %v7325_v20 = vpop.f32.mrf.mxu0  ;;  %v10527_v2 = vld [vmem:[#allocation10_spill] sm:$0xff] }
 0x1ec   : > { %v2795_v5 = vpop.f32.mrf.mxu1 }
 0x1ed   : > { %v2896_v12 = vadd.f32 %v2795_v5, %v10526_v7  ;;  %v10000_v43 = vadd.f32 %v7310_v26, %v2898_v10  ;;  %v3610_v22 = vpop.f32.mrf.mxu0  ;;  %v10528_v26 = vld [vmem:[#allocation11_spill] sm:$0xff] }
 0x1ee   : > { %v7265_v17 = vpop.f32.mrf.mxu1 }
 0x1ef   : > { %v2901_v1 = vadd.f32 %v7265_v17, %v9822_v8  ;;  %v10003_v31 = vadd.f32 %v3549_v16, %v2896_v12  ;;  %v7326_v8 = vpop.f32.mrf.mxu0 }
 0x1f0   : > { %v2808_v14 = vpop.f32.mrf.mxu1 }
 0x1f1   : > { %v2899_v55 = vadd.f32 %v2808_v14, %v9831_v54  ;;  %v10006_v42 = vadd.f32 %v7313_v44, %v2901_v1  ;;  %v3613_v7 = vpop.f32.mrf.mxu0 }
 0x1f2   : > { %v7266_v46 = vpop.f32.mrf.mxu1 }
 0x1f3   : > { %v2902_v49 = vadd.f32 %v7266_v46, %v10527_v2  ;;  %v10009_v53 = vadd.f32 %v3562_v4, %v2899_v55 }
 0x1f4   : > { %v2811_v18 = vpop.f32.mrf.mxu1 }
 0x1f5   : > { %v2900_v9 = vadd.f32 %v2811_v18, %v10528_v26  ;;  %v10012_v28 = vadd.f32 %v7314_v21, %v2902_v49 }
 0x1f6   : > { %v7269_v40 = vpop.f32.mrf.mxu1 }
 0x1f7   : > { %v2905_v16 = vadd.f32 %v7269_v40, %v9871_v47  ;;  %v10015_v58 = vadd.f32 %v3565_v36, %v2900_v9 }
 0x1f8   : > { %v2824_v54 = vpop.f32.mrf.mxu1 }
 0x1f9   : > { %v2903_v44 = vadd.f32 %v2824_v54, %v9877_v25  ;;  %v10018_v10 = vadd.f32 %v7317_v56, %v2905_v16 }
 0x1fa   : > { %v7270_v5 = vpop.f32.mrf.mxu1 }
 0x1fb   : > { %v2906_v4 = vadd.f32 %v7270_v5, %v9886_v61  ;;  %v10021_v12 = vadd.f32 %v3578_v27, %v2903_v44 }
 0x1fc   : > { %v2827_v17 = vpop.f32.mrf.mxu1  ;;  %v7329_v47 = vpop.f32.mrf.mxu0 }
 0x1fd   : > { %v2904_v21 = vadd.f32 %v2827_v17, %v9901_v3  ;;  %v10024_v1 = vadd.f32 %v7318_v33, %v2906_v4 }
 0x1fe   : > { %v7273_v14 = vpop.f32.mrf.mxu1  ;;  %v3626_v56 = vpop.f32.mrf.mxu0 }
 0x1ff   : > { %v2909_v36 = vadd.f32 %v7273_v14, %v9907_v35  ;;  %v10027_v55 = vadd.f32 %v3581_v62, %v2904_v21 }
 0x200   : > { %v2840_v25 = vpop.f32.mrf.mxu1  ;;  %v7330_v27 = vpop.f32.mrf.mxu0 }
 0x201   : > { %v2907_v46 = vadd.f32 %v2840_v25, %v9913_v34  ;;  %v10030_v2 = vadd.f32 %v7321_v51, %v2909_v36 }
 0x202   : > { %v7274_v61 = vpop.f32.mrf.mxu1  ;;  %v3629_v33 = vpop.f32.mrf.mxu0 }
 0x203   : > { %v2910_v49 = vadd.f32 %v7274_v61, %v9919_v6  ;;  %v10033_v18 = vadd.f32 %v3594_v32, %v2907_v46 }
 0x204   : > { %v2843_v3 = vpop.f32.mrf.mxu1  ;;  %v7397_v62 = vpop.f32.mrf.mxu0 }
 0x205   : > { %10529 = vst [vmem:[#allocation12_spill] sm:$0xff] %v10033_v18  ;;  %v2908_v26 = vadd.f32 %v2843_v3, %v9929_v30  ;;  %v10036_v9 = vadd.f32 %v7322_v52, %v2910_v49 }
 0x206   : > { %v7277_v35 = vpop.f32.mrf.mxu1  ;;  %v4399_v51 = vpop.f32.mrf.mxu0 }
 0x207   : > { %10530 = vst [vmem:[#allocation13_spill] sm:$0xff] %v10036_v9  ;;  %v2913_v40 = vadd.f32 %v7277_v35, %v9933_v45  ;;  %v10039_v16 = vadd.f32 %v3597_v29, %v2908_v26 }
 0x208   : > { %v2856_v34 = vpop.f32.mrf.mxu1  ;;  %v10044_v32 = vpop.f32.mrf.mxu0 }
 0x209   : > { %10531 = vst [vmem:[#allocation16_spill] sm:$0xff] %v10039_v16  ;;  %v2911_v54 = vadd.f32 %v2856_v34, %v9937_v37  ;;  %v10042_v44 = vadd.f32 %v7325_v20, %v2913_v40 }
 0x20a   : > { %v7278_v6 = vpop.f32.mrf.mxu1  ;;  %v10049_v4 = vpop.f32.mrf.mxu0 }
 0x20b   : > { %v2914_v5 = vadd.f32 %v7278_v6, %v9941_v63  ;;  %v10047_v30 = vadd.f32 %v3610_v22, %v2911_v54 }
 0x20c   : > { %v2859_v52 = vpop.f32.mrf.mxu1  ;;  %v7401_v21 = vpop.f32.mrf.mxu0 }
 0x20d   : > { %10532 = vst [vmem:[#allocation18_spill] sm:$0xff] %v10047_v30  ;;  %v2912_v45 = vadd.f32 %v2859_v52, %v9945_v15  ;;  %v10052_v29 = vadd.f32 %v7326_v8, %v2914_v5 }
 0x20e   : > { %v7281_v17 = vpop.f32.mrf.mxu1  ;;  %v10057_v36 = vpop.f32.mrf.mxu0 }
 0x20f   : > { %10533 = vst [vmem:[#allocation20_spill] sm:$0xff] %v10052_v29  ;;  %v2917_v37 = vadd.f32 %v7281_v17, %v9949_v19  ;;  %v10055_v20 = vadd.f32 %v3613_v7, %v2912_v45 }
 0x210   : > { %v2872_v14 = vpop.f32.mrf.mxu1  ;;  %v10062_v46 = vpop.f32.mrf.mxu0 }
 0x211   : > { %10534 = vst [vmem:[#allocation6_spill] sm:$0xff] %v10055_v20  ;;  %v2915_v63 = vadd.f32 %v2872_v14, %v9953_v60  ;;  %v10060_v22 = vadd.f32 %v7329_v47, %v2917_v37 }
 0x212   : > { %v7282_v25 = vpop.f32.mrf.mxu1  ;;  %v10067_v49 = vpop.f32.mrf.mxu0 }
 0x213   : > { %v2918_v15 = vadd.f32 %v7282_v25, %v9957_v39  ;;  %v10065_v8 = vadd.f32 %v3626_v56, %v2915_v63 }
 0x214   : > { %v2875_v61 = vpop.f32.mrf.mxu1  ;;  %v7405_v26 = vpop.f32.mrf.mxu0 }
 0x215   : > { %10535 = vst [vmem:[#allocation24_spill] sm:$0xff] %v10065_v8  ;;  %v2916_v19 = vadd.f32 %v2875_v61, %v9961_v59  ;;  %v10070_v7 = vadd.f32 %v7330_v27, %v2918_v15 }
 0x216   : > { %v7349_v3 = vpop.f32.mrf.mxu1  ;;  %v10075_v40 = vpop.f32.mrf.mxu0 }
 0x217   : > { %10536 = vst [vmem:[#allocation33_spill] sm:$0xff] %v10070_v7  ;;  %v4141_v60 = vadd.f32 %v7349_v3, %v9965_v50  ;;  %v10073_v47 = vadd.f32 %v3629_v33, %v2916_v19 }
 0x218   : > { %v4012_v35 = vpop.f32.mrf.mxu1  ;;  %v10082_v54 = vpop.f32.mrf.mxu0 }
 0x219   : > { %10537 = vst [vmem:[#allocation26_spill] sm:$0xff] %v10073_v47  ;;  %v4139_v39 = vadd.f32 %v4012_v35, %v9969_v13  ;;  %v10078_v56 = vadd.f32 %v7397_v62, %v4141_v60 }
 0x21a   : > { %v10080_v34 = vpop.f32.mrf.mxu1  ;;  %v10088_v6 = vpop.f32.mrf.mxu0 }
 0x21b   : > { %v10084_v59 = vadd.f32 %v4399_v51, %v4139_v39 }
 0x21c   : > { %v10086_v27 = vpop.f32.mrf.mxu1  ;;  %v7409_v33 = vpop.f32.mrf.mxu0 }
 0x21e   : > { %v7353_v50 = vpop.f32.mrf.mxu1  ;;  %v10093_v45 = vpop.f32.mrf.mxu0 }
 0x21f   : > { %v4145_v5 = vadd.f32 %v7353_v50, %v9981_v38 }
 0x220   : > { %v10091_v52 = vpop.f32.mrf.mxu1  ;;  %v10099_v17 = vpop.f32.mrf.mxu0 }
 0x221   : > { %v10095_v13 = vadd.f32 %v7401_v21, %v4145_v5 }
 0x222   : > { %v10097_v62 = vpop.f32.mrf.mxu1  ;;  %v10103_v37 = vpop.f32.mrf.mxu0 }
 0x224   : > { %v10101_v51 = vpop.f32.mrf.mxu1  ;;  %v7413_v63 = vpop.f32.mrf.mxu0 }
 0x226   : > { %v7357_v14 = vpop.f32.mrf.mxu1  ;;  %v10108_v38 = vpop.f32.mrf.mxu0 }
 0x227   : > { %v4149_v25 = vadd.f32 %v7357_v14, %v9994_v57  ;;  %10538 = vst [vmem:[#allocation27_spill] sm:$0xff] %v10108_v38 }
 0x228   : > { %v10106_v15 = vpop.f32.mrf.mxu1  ;;  %v10114_v19 = vpop.f32.mrf.mxu0 }
 0x229   : > { %v10110_v61 = vadd.f32 %v7405_v26, %v4149_v25  ;;  %10539 = vst [vmem:[#allocation29_spill] sm:$0xff] %v10114_v19 }
 0x22a   : > { %v10112_v21 = vpop.f32.mrf.mxu1  ;;  %v10118_v60 = vpop.f32.mrf.mxu0 }
 0x22b   : > { %10540 = vst [vmem:[#allocation35_spill] sm:$0xff] %v10118_v60 }
 0x22c   : > { %v10116_v3 = vpop.f32.mrf.mxu1  ;;  %v7417_v39 = vpop.f32.mrf.mxu0 }
 0x22e   : > { %v7361_v35 = vpop.f32.mrf.mxu1  ;;  %v10123_v57 = vpop.f32.mrf.mxu0 }
 0x22f   : > { %v4153_v50 = vadd.f32 %v7361_v35, %v10006_v42  ;;  %10541 = vst [vmem:[#allocation37_spill] sm:$0xff] %v10123_v57 }
 0x230   : > { %v10121_v5 = vpop.f32.mrf.mxu1  ;;  %v10129_v25 = vpop.f32.mrf.mxu0 }
 0x231   : > { %v10125_v14 = vadd.f32 %v7409_v33, %v4153_v50  ;;  %10542 = vst [vmem:[#allocation14_spill] sm:$0xff] %v10129_v25 }
 0x232   : > { %v10127_v26 = vpop.f32.mrf.mxu1  ;;  %v10133_v7 = vpop.f32.mrf.mxu0 }
 0x233   : > { %10543 = vst [vmem:[#allocation36_spill] sm:$0xff] %v10133_v7 }
 0x234   : > { %v10131_v47 = vpop.f32.mrf.mxu1  ;;  %v7421_v20 = vpop.f32.mrf.mxu0 }
 0x236   : > { %v7365_v8 = vpop.f32.mrf.mxu1  ;;  %v10138_v42 = vpop.f32.mrf.mxu0 }
 0x237   : > { %v4157_v29 = vadd.f32 %v7365_v8, %v10018_v10  ;;  %10544 = vst [vmem:[#allocation17_spill] sm:$0xff] %v10138_v42 }
 0x238   : > { %v10136_v30 = vpop.f32.mrf.mxu1  ;;  %v10144_v50 = vpop.f32.mrf.mxu0 }
 0x239   : > { %v10140_v35 = vadd.f32 %v7413_v63, %v4157_v29  ;;  %10546 = vst [vmem:[#allocation19_spill] sm:$0xff] %v10144_v50 }
 0x23a   : > { %v10142_v33 = vpop.f32.mrf.mxu1  ;;  %v10148_v25 = vpop.f32.mrf.mxu0 }
 0x23b   : > { %10545 = vst [vmem:[#allocation3_spill] sm:$0xff] %v10140_v35  ;;  %10548 = vst [vmem:[#allocation21_spill] sm:$0xff] %v10148_v25 }
 0x23c   : > { %v10146_v57 = vpop.f32.mrf.mxu1  ;;  %v7425_v7 = vpop.f32.mrf.mxu0 }
 0x23d   : > { %10547 = vst [vmem:[#allocation38_spill] sm:$0xff] %v10146_v57 }
 0x23e   : > { %v7369_v16 = vpop.f32.mrf.mxu1  ;;  %v10153_v10 = vpop.f32.mrf.mxu0 }
 0x23f   : > { %v4161_v60 = vadd.f32 %v7369_v16, %v10030_v2  ;;  %10550 = vst [vmem:[#allocation23_spill] sm:$0xff] %v10153_v10 }
 0x240   : > { %v10151_v9 = vpop.f32.mrf.mxu1  ;;  %v10159_v63 = vpop.f32.mrf.mxu0 }
 0x241   : > { %10549 = vst [vmem:[#allocation22_spill] sm:$0xff] %v10151_v9  ;;  %v10155_v8 = vadd.f32 %v7417_v39, %v4161_v60  ;;  %10553 = vst [vmem:[#allocation30_spill] sm:$0xff] %v10159_v63 }
 0x242   : > { %v10157_v29 = vpop.f32.mrf.mxu1  ;;  %v10163_v50 = vpop.f32.mrf.mxu0 }
 0x243   : > { %10551 = vst [vmem:[#allocation25_spill] sm:$0xff] %v10155_v8  ;;  %10552 = vst [vmem:[#allocation28_spill] sm:$0xff] %v10157_v29 }
 0x244   : > { %v10161_v42 = vpop.f32.mrf.mxu1  ;;  %10555 = vst [vmem:[#allocation32_spill] sm:$0xff] %v10163_v50  ;;  %v7493_v25 = vpop.f32.mrf.mxu0 }
 0x245   : > { %10554 = vst [vmem:[#allocation31_spill] sm:$0xff] %v10161_v42 }
 0x246   : > { %v7373_v18 = vpop.f32.mrf.mxu1  ;;  %v5651_v2 = vpop.f32.mrf.mxu0 }
 0x247   : > { %v4165_v35 = vadd.f32 %v7373_v18, %v10042_v44 }
 0x248   : > { %v10166_v19 = vpop.f32.mrf.mxu1  ;;  %v7494_v60 = vpop.f32.mrf.mxu0 }
 0x249   : > { %10556 = vst [vmem:[#allocation15_spill] sm:$0xff] %v10166_v19  ;;  %v10168_v16 = vadd.f32 %v7421_v20, %v4165_v35  ;;  %v4143_v19 = vadd.f32 %v10091_v52, %v9985_v0 }
 0x24a   : > { %v10170_v10 = vpop.f32.mrf.mxu1  ;;  %v5654_v8 = vpop.f32.mrf.mxu0 }
 0x24b   : > { %10557 = vst [vmem:[#allocation5_spill] sm:$0xff] %v10168_v16  ;;  %10558 = vst [vmem:[#allocation7_spill] sm:$0xff] %v10170_v10  ;;  %v4142_v16 = vadd.f32 %v10080_v34, %v9973_v24 }
 0x24c   : > { %v10172_v39 = vpop.f32.mrf.mxu1  ;;  %v7497_v29 = vpop.f32.mrf.mxu0 }
 0x24d   : > { %10559 = vst [vmem:[#allocation4_spill] sm:$0xff] %v10172_v39 }
 0x24e   : > { %v7377_v63 = vpop.f32.mrf.mxu1  ;;  %v5667_v9 = vpop.f32.mrf.mxu0 }
 0x24f   : > { %v4169_v42 = vadd.f32 %v7377_v63, %v10060_v22  ;;  %v4140_v22 = vadd.f32 %v10086_v27, %v9977_v48  ;;  %v4146_v48 = vadd.f32 %v10097_v62, %v9988_v41 }
 0x250   : > { %v10175_v50 = vpop.f32.mrf.mxu1  ;;  %v7498_v44 = vpop.f32.mrf.mxu0 }
 0x251   : > { %10560 = vst [vmem:[#allocation34_spill] sm:$0xff] %v10175_v50  ;;  %v10177_v38 = vadd.f32 %v7425_v7, %v4169_v42  ;;  %v4527_v34 = vadd.f32 %v10049_v4, %v4140_v22  ;;  %v4147_v22 = vadd.f32 %v10106_v15, %v9997_v11 }
 0x252   : > { %v10179_v18 = vpop.f32.mrf.mxu1  ;;  %v10183_v35 = vpop.f32.mrf.mxu0 }
 0x253   : > { %10561 = vst [vmem:[#allocation8_spill] sm:$0xff] %v10177_v38  ;;  %10562 = vst [vmem:[#allocation9_spill] sm:$0xff] %v10179_v18  ;;  %v4529_v38 = vadd.f32 %v10044_v32, %v4142_v16  ;;  %v4144_v32 = vadd.f32 %v10101_v51, %v9991_v23  ;;  %v4533_v23 = vadd.f32 %v10062_v46, %v4146_v48 }
 0x254   : > { %v10181_v20 = vpop.f32.mrf.mxu1  ;;  %v10187_v10 = vpop.f32.mrf.mxu0 }
 0x255   : > { %10563 = vst [vmem:[#allocation10_spill] sm:$0xff] %v10181_v20 }
 0x256   : > { %v7445_v39 = vpop.f32.mrf.mxu1  ;;  %v10191_v50 = vpop.f32.mrf.mxu0 }
 0x257   : > { %v5282_v7 = vadd.f32 %v7445_v39, %v10078_v56 }
 0x258   : > { %v5153_v63 = vpop.f32.mrf.mxu1  ;;  %v10196_v18 = vpop.f32.mrf.mxu0 }
 0x259   : > { %v5280_v42 = vadd.f32 %v5153_v63, %v10084_v59  ;;  %v5780_v56 = vadd.f32 %v7493_v25, %v5282_v7 }
 0x25a   : > { %v7446_v20 = vpop.f32.mrf.mxu1  ;;  %v10203_v57 = vpop.f32.mrf.mxu0 }
 0x25b   : > { %v5283_v24 = vadd.f32 %v7446_v20, %v4529_v38  ;;  %v5778_v39 = vadd.f32 %v5651_v2, %v5280_v42  ;;  %v4530_v38 = vadd.f32 %v10057_v36, %v4143_v19  ;;  %v6009_v36 = vmul.f32 %v5780_v56, %v5780_v56 }
 0x25c   : > { %v5156_v27 = vpop.f32.mrf.mxu1  ;;  %v10214_v4 = vpop.f32.mrf.mxu0 }
 0x25d   : > { %v5781_v59 = vadd.f32 %v7494_v60, %v5283_v24  ;;  %v5281_v63 = vadd.f32 %v5156_v27, %v4527_v34  ;;  %v6007_v2 = vmul.f32 %v5778_v39, %v5778_v39  ;;  %v4150_v34 = vadd.f32 %v10112_v21, %v10000_v43 }
 0x25e   : > { %v7449_v0 = vpop.f32.mrf.mxu1  ;;  %v10219_v51 = vpop.f32.mrf.mxu0 }
 0x25f   : > { %v6773_v41 = vpack.c.bf16 %v5781_v59, %v5780_v56  ;;  %v5779_v52 = vadd.f32 %v5654_v8, %v5281_v63  ;;  %v5286_v62 = vadd.f32 %v7449_v0, %v10095_v13  ;;  %v4531_v13 = vadd.f32 %v10067_v49, %v4144_v32 }
 0x260   : > { %v5169_v25 = vpop.f32.mrf.mxu1  ;;  %v10225_v42 = vpop.f32.mrf.mxu0  ;;  %v6010_v48 = vmul.f32 %v5781_v59, %v5781_v59 }
 0x261   : > { %6860 = vst [vmem:[%s10212_s11 + $0x8] sm:$0xff] %v6773_v41   ;;  %v6768_v16 = vpack.c.bf16 %v5779_v52, %v5778_v39  ;;  %v5970_v60 = vadd.f32 %v5779_v52, %v5778_v39  ;;  %v6008_v20 = vmul.f32 %v5779_v52, %v5779_v52  ;;  %v5284_v7 = vadd.f32 %v5169_v25, %v4530_v38 }
 0x262   : > { %v7450_v8 = vpop.f32.mrf.mxu1  ;;  %v5784_v27 = vadd.f32 %v7497_v29, %v5286_v62  ;;  %v10230_v0 = vpop.f32.mrf.mxu0  ;;  %v4148_v41 = vadd.f32 %v10116_v3, %v10003_v31  ;;  %v4534_v52 = vadd.f32 %v10075_v40, %v4147_v22  ;;  %v4537_v3 = vadd.f32 %v10082_v54, %v4150_v34 }
 0x263   : > { %6769 = vst [vmem:[%s10212_s11] sm:$0xff] %v6768_v16   ;;  %v5971_v19 = vadd.f32 %v5970_v60, %v5780_v56  ;;  %v6039_v46 = vadd.f32 %v6008_v20, %v6007_v2  ;;  %v5287_v24 = vadd.f32 %v7450_v8, %v4533_v23  ;;  %v5782_v39 = vadd.f32 %v5667_v9, %v5284_v7 }
 0x264   : > { %v5172_v63 = vpop.f32.mrf.mxu1  ;;  %v4154_v22 = vadd.f32 %v10127_v26, %v10012_v28  ;;  %v4535_v8 = vadd.f32 %v10088_v6, %v4148_v41 }
 0x265   : > { %v6040_v11 = vadd.f32 %v6039_v46, %v6009_v36  ;;  %v5972_v15 = vadd.f32 %v5971_v19, %v5781_v59  ;;  %v5785_v49 = vadd.f32 %v7498_v44, %v5287_v24  ;;  %v5285_v32 = vadd.f32 %v5172_v63, %v4531_v13  ;;  %v10235_v38 = vpop.f32.mrf.mxu0 }
 0x266   : > { %v7453_v56 = vpop.f32.mrf.mxu1  ;;  %v6011_v21 = vmul.f32 %v5782_v39, %v5782_v39  ;;  %v6013_v13 = vmul.f32 %v5784_v27, %v5784_v27 }
 0x267   : > { %v5973_v43 = vadd.f32 %v5972_v15, %v5782_v39  ;;  %v6041_v29 = vadd.f32 %v6040_v11, %v6010_v48  ;;  %v6783_v9 = vpack.c.bf16 %v5785_v49, %v5784_v27  ;;  %v5783_v62 = vadd.f32 %v10183_v35, %v5285_v32  ;;  %v10238_v23 = vpop.f32.mrf.mxu0 }
 0x268   : > { %v5185_v25 = vpop.f32.mrf.mxu1  ;;  %v5290_v59 = vadd.f32 %v7453_v56, %v10110_v61  ;;  %v4151_v35 = vadd.f32 %v10121_v5, %v10009_v53  ;;  %v6014_v5 = vmul.f32 %v5785_v49, %v5785_v49  ;;  %v4541_v32 = vadd.f32 %v10099_v17, %v4154_v22 }
 0x269   : > { %v6042_v44 = vadd.f32 %v6041_v29, %v6011_v21  ;;  %6862 = vst [vmem:[%s10212_s11 + $0x18] sm:$0xff] %v6783_v9   ;;  %v5288_v31 = vadd.f32 %v5185_v25, %v4534_v52  ;;  %v6778_v40 = vpack.c.bf16 %v5783_v62, %v5782_v39  ;;  %v5974_v2 = vadd.f32 %v5973_v43, %v5783_v62  ;;  %v10243_v20 = vpop.f32.mrf.mxu0 }
 0x26a   : > { %v6012_v16 = vmul.f32 %v5783_v62, %v5783_v62  ;;  %v7454_v60 = vpop.f32.mrf.mxu1  ;;  %v5788_v24 = vadd.f32 %v10187_v10, %v5290_v59  ;;  %v4538_v63 = vadd.f32 %v10093_v45, %v4151_v35  ;;  %v4155_v45 = vadd.f32 %v10136_v30, %v10021_v12 }
 0x26b   : > { %v5291_v7 = vadd.f32 %v7454_v60, %v4537_v3  ;;  %6861 = vst [vmem:[%s10212_s11 + $0x10] sm:$0xff] %v6778_v40   ;;  %v5975_v61 = vadd.f32 %v5974_v2, %v5784_v27  ;;  %v5786_v54 = vadd.f32 %v10191_v50, %v5288_v31  ;;  %v10252_v46 = vpop.f32.mrf.mxu0  ;;  %v4152_v27 = vadd.f32 %v10131_v47, %v10015_v58 }
 0x26c   : > { %v6043_v36 = vadd.f32 %v6042_v44, %v6012_v16  ;;  %v5188_v19 = vpop.f32.mrf.mxu1  ;;  %v4158_v29 = vadd.f32 %v10142_v33, %v10024_v1  ;;  %v6017_v62 = vmul.f32 %v5788_v24, %v5788_v24 }
 0x26d   : > { %v5789_v34 = vadd.f32 %v10196_v18, %v5291_v7  ;;  %v5289_v53 = vadd.f32 %v5188_v19, %v4535_v8  ;;  %v5976_v26 = vadd.f32 %v5975_v61, %v5785_v49  ;;  %v10256_v6 = vpop.f32.mrf.mxu0  ;;  %v6015_v10 = vmul.f32 %v5786_v54, %v5786_v54  ;;  %v10567_v19 = vld [vmem:[#allocation3_spill] sm:$0xff] }
 0x26e   : > { %v6044_v28 = vadd.f32 %v6043_v36, %v6013_v13  ;;  %v7457_v48 = vpop.f32.mrf.mxu1  ;;  %v4539_v9 = vadd.f32 %v10103_v37, %v4152_v27  ;;  %v10564_v37 = vld [vmem:[#allocation38_spill] sm:$0xff]  ;;  %v10566_v13 = vld [vmem:[#allocation29_spill] sm:$0xff] }
 0x26f   : > { %v6793_v39 = vpack.c.bf16 %v5789_v34, %v5788_v24  ;;  %v5787_v50 = vadd.f32 %v10203_v57, %v5289_v53  ;;  %v5977_v11 = vadd.f32 %v5976_v26, %v5786_v54  ;;  %v10263_v41 = vpop.f32.mrf.mxu0  ;;  %v5294_v52 = vadd.f32 %v7457_v48, %v10125_v14  ;;  %v10569_v26 = vld [vmem:[#allocation22_spill] sm:$0xff]  ;;  %v10570_v27 = vld [vmem:[#allocation13_spill] sm:$0xff] }
 0x270   : > { %v6045_v18 = vadd.f32 %v6044_v28, %v6014_v5  ;;  %v5201_v15 = vpop.f32.mrf.mxu1  ;;  %v6018_v12 = vmul.f32 %v5789_v34, %v5789_v34  ;;  %v4156_v16 = vadd.f32 %v10564_v37, %v10027_v55  ;;  %v4545_v61 = vadd.f32 %v10566_v13, %v4158_v29 }
 0x271   : > { %6864 = vst [vmem:[%s10212_s11 + $0x28] sm:$0xff] %v6793_v39   ;;  %v6788_v49 = vpack.c.bf16 %v5787_v50, %v5786_v54  ;;  %v6016_v56 = vmul.f32 %v5787_v50, %v5787_v50  ;;  %v5292_v58 = vadd.f32 %v5201_v15, %v4538_v63  ;;  %v5978_v43 = vadd.f32 %v5977_v11, %v5787_v50  ;;  %v10267_v21 = vpop.f32.mrf.mxu0  ;;  %v10571_v39 = vld [vmem:[#allocation28_spill] sm:$0xff]  ;;  %v10572_v11 = vld [vmem:[#allocation35_spill] sm:$0xff] }
 0x272   : > { %v6046_v47 = vadd.f32 %v6045_v18, %v6015_v10  ;;  %v7458_v57 = vpop.f32.mrf.mxu1  ;;  %v5792_v31 = vadd.f32 %v10214_v4, %v5294_v52  ;;  %v4162_v50 = vadd.f32 %v10571_v39, %v10570_v27  ;;  %v4543_v10 = vadd.f32 %v10572_v11, %v4156_v16  ;;  %v10583_v11 = vld [vmem:[#allocation6_spill] sm:$0xff] }
 0x273   : > { %6863 = vst [vmem:[%s10212_s11 + $0x20] sm:$0xff] %v6788_v49   ;;  %v5295_v17 = vadd.f32 %v7458_v57, %v4541_v32  ;;  %v5979_v25 = vadd.f32 %v5978_v43, %v5788_v24  ;;  %v5790_v14 = vadd.f32 %v10219_v51, %v5292_v58  ;;  %v10278_v33 = vpop.f32.mrf.mxu0  ;;  %v10565_v51 = vld [vmem:[#allocation27_spill] sm:$0xff] }
 0x274   : > { %v6047_v44 = vadd.f32 %v6046_v47, %v6016_v56  ;;  %v5204_v59 = vpop.f32.mrf.mxu1  ;;  %v4542_v22 = vadd.f32 %v10565_v51, %v4155_v45  ;;  %v6021_v18 = vmul.f32 %v5792_v31, %v5792_v31 }
 0x275   : > { %v5793_v3 = vadd.f32 %v10225_v42, %v5295_v17  ;;  %v5293_v40 = vadd.f32 %v5204_v59, %v4539_v9  ;;  %v5980_v2 = vadd.f32 %v5979_v25, %v5789_v34  ;;  %v6019_v4 = vmul.f32 %v5790_v14, %v5790_v14  ;;  %v10287_v28 = vpop.f32.mrf.mxu0  ;;  %v10573_v9 = vld [vmem:[#allocation16_spill] sm:$0xff] }
 0x276   : > { %v6048_v30 = vadd.f32 %v6047_v44, %v6017_v62  ;;  %v7461_v1 = vpop.f32.mrf.mxu1  ;;  %v10574_v62 = vld [vmem:[#allocation31_spill] sm:$0xff] }
 0x277   : > { %v6803_v60 = vpack.c.bf16 %v5793_v3, %v5792_v31  ;;  %v5791_v35 = vadd.f32 %v10230_v0, %v5293_v40  ;;  %v5981_v7 = vadd.f32 %v5980_v2, %v5790_v14  ;;  %v5298_v24 = vadd.f32 %v7461_v1, %v10567_v19  ;;  %v10568_v0 = vld [vmem:[#allocation12_spill] sm:$0xff]  ;;  %v10298_v17 = vpop.f32.mrf.mxu0  ;;  %v10577_v1 = vld [vmem:[#allocation25_spill] sm:$0xff] }
 0x278   : > { %v6049_v42 = vadd.f32 %v6048_v30, %v6018_v12  ;;  %v5217_v8 = vpop.f32.mrf.mxu1  ;;  %v4159_v48 = vadd.f32 %v10569_v26, %v10568_v0  ;;  %v6022_v43 = vmul.f32 %v5793_v3, %v5793_v3  ;;  %v4160_v25 = vadd.f32 %v10574_v62, %v10573_v9  ;;  %v10576_v12 = vld [vmem:[#allocation14_spill] sm:$0xff] }
 0x279   : > { %6866 = vst [vmem:[%s10212_s11 + $0x38] sm:$0xff] %v6803_v60   ;;  %v6798_v36 = vpack.c.bf16 %v5791_v35, %v5790_v14  ;;  %v6020_v54 = vmul.f32 %v5791_v35, %v5791_v35  ;;  %v5296_v34 = vadd.f32 %v5217_v8, %v4542_v22  ;;  %v5982_v55 = vadd.f32 %v5981_v7, %v5791_v35  ;;  %v7518_v22 = vpop.f32.mrf.mxu0  ;;  %v10579_v7 = vld [vmem:[#allocation15_spill] sm:$0xff] }
 0x27a   : > { %v6050_v53 = vadd.f32 %v6049_v42, %v6019_v4  ;;  %v7462_v5 = vpop.f32.mrf.mxu1  ;;  %v5796_v52 = vadd.f32 %v10235_v38, %v5298_v24  ;;  %v4549_v30 = vadd.f32 %v10576_v12, %v4162_v50  ;;  %v10580_v42 = vld [vmem:[#allocation20_spill] sm:$0xff]  ;;  %v10581_v8 = vld [vmem:[#allocation7_spill] sm:$0xff]  ;;  %v10592_v12 = vld [vmem:[#allocation21_spill] sm:$0xff] }
 0x27b   : > { %6865 = vst [vmem:[%s10212_s11 + $0x30] sm:$0xff] %v6798_v36   ;;  %v5299_v63 = vadd.f32 %v7462_v5, %v4545_v61  ;;  %v5983_v15 = vadd.f32 %v5982_v55, %v5792_v31  ;;  %v5794_v49 = vadd.f32 %v10238_v23, %v5296_v34  ;;  %v10575_v23 = vld [vmem:[#allocation37_spill] sm:$0xff]  ;;  %v4166_v13 = vadd.f32 %v10581_v8, %v10580_v42  ;;  %v10582_v36 = vld [vmem:[#allocation36_spill] sm:$0xff] }
 0x27c   : > { %v6051_v32 = vadd.f32 %v6050_v53, %v6020_v54  ;;  %v5220_v56 = vpop.f32.mrf.mxu1  ;;  %v4546_v59 = vadd.f32 %v10575_v23, %v4159_v48  ;;  %v4547_v54 = vadd.f32 %v10582_v36, %v4160_v25  ;;  %v6025_v19 = vmul.f32 %v5796_v52, %v5796_v52  ;;  %v10589_v23 = vld [vmem:[#allocation34_spill] sm:$0xff] }
 0x27d   : > { %v5797_v58 = vadd.f32 %v10243_v20, %v5299_v63  ;;  %v5297_v47 = vadd.f32 %v5220_v56, %v4543_v10  ;;  %v5984_v45 = vadd.f32 %v5983_v15, %v5793_v3  ;;  %v6023_v38 = vmul.f32 %v5794_v49, %v5794_v49  ;;  %v5750_v63 = vpop.f32.mrf.mxu0  ;;  %v10584_v10 = vld [vmem:[#allocation4_spill] sm:$0xff] }
 0x27e   : > { %v6052_v57 = vadd.f32 %v6051_v32, %v6021_v18  ;;  %v7465_v29 = vpop.f32.mrf.mxu1  ;;  %v4164_v18 = vadd.f32 %v10584_v10, %v10583_v11 }
 0x27f   : > { %v6813_v44 = vpack.c.bf16 %v5797_v58, %v5796_v52  ;;  %v5795_v14 = vadd.f32 %v10252_v46, %v5297_v47  ;;  %v5985_v31 = vadd.f32 %v5984_v45, %v5794_v49  ;;  %v5302_v37 = vadd.f32 %v7465_v29, %v10577_v1  ;;  %v10578_v46 = vld [vmem:[#allocation18_spill] sm:$0xff]  ;;  %v10586_v47 = vld [vmem:[#allocation19_spill] sm:$0xff]  ;;  %v10587_v45 = vld [vmem:[#allocation5_spill] sm:$0xff] }
 0x280   : > { %v6053_v20 = vadd.f32 %v6052_v57, %v6022_v43  ;;  %v5233_v40 = vpop.f32.mrf.mxu1  ;;  %v4163_v4 = vadd.f32 %v10579_v7, %v10578_v46  ;;  %v6026_v48 = vmul.f32 %v5797_v58, %v5797_v58  ;;  %v4553_v43 = vadd.f32 %v10586_v47, %v4166_v13  ;;  %v10593_v13 = vld [vmem:[#allocation26_spill] sm:$0xff] }
 0x281   : > { %6868 = vst [vmem:[%s10212_s11 + $0x48] sm:$0xff] %v6813_v44   ;;  %v6808_v3 = vpack.c.bf16 %v5795_v14, %v5794_v49  ;;  %v6024_v2 = vmul.f32 %v5795_v14, %v5795_v14  ;;  %v5300_v16 = vadd.f32 %v5233_v40, %v4546_v59  ;;  %v5986_v35 = vadd.f32 %v5985_v31, %v5795_v14  ;;  %v10585_v49 = vld [vmem:[#allocation17_spill] sm:$0xff]  ;;  %v7521_v14 = vpop.f32.mrf.mxu0 }
 0x282   : > { %v6054_v60 = vadd.f32 %v6053_v20, %v6023_v38  ;;  %v7466_v51 = vpop.f32.mrf.mxu1  ;;  %v5800_v5 = vadd.f32 %v10256_v6, %v5302_v37  ;;  %v10590_v31 = vld [vmem:[#allocation33_spill] sm:$0xff] }
 0x283   : > { %6867 = vst [vmem:[%s10212_s11 + $0x40] sm:$0xff] %v6808_v3   ;;  %v5303_v61 = vadd.f32 %v7466_v51, %v4549_v30  ;;  %v5987_v24 = vadd.f32 %v5986_v35, %v5796_v52  ;;  %v5798_v53 = vadd.f32 %v10263_v41, %v5300_v16  ;;  %v4550_v41 = vadd.f32 %v10585_v49, %v4163_v4  ;;  %v10591_v38 = vld [vmem:[#allocation9_spill] sm:$0xff]  ;;  %v5763_v8 = vpop.f32.mrf.mxu0 }
 0x284   : > { %v6055_v34 = vadd.f32 %v6054_v60, %v6024_v2  ;;  %v5236_v55 = vpop.f32.mrf.mxu1  ;;  %v4170_v20 = vadd.f32 %v10591_v38, %v10590_v31  ;;  %v4551_v30 = vadd.f32 %v10592_v12, %v4164_v18  ;;  %v6029_v3 = vmul.f32 %v5800_v5, %v5800_v5 }
 0x285   : > { %v5801_v0 = vadd.f32 %v10267_v21, %v5303_v61  ;;  %v5301_v26 = vadd.f32 %v5236_v55, %v4547_v54  ;;  %v5988_v39 = vadd.f32 %v5987_v24, %v5797_v58  ;;  %v6027_v6 = vmul.f32 %v5798_v53, %v5798_v53  ;;  %v10594_v61 = vld [vmem:[#allocation10_spill] sm:$0xff]  ;;  %v10595_v24 = vld [vmem:[#allocation23_spill] sm:$0xff]  ;;  %v7522_v10 = vpop.f32.mrf.mxu0 }
 0x286   : > { %v6056_v27 = vadd.f32 %v6055_v34, %v6025_v19  ;;  %v7469_v50 = vpop.f32.mrf.mxu1  ;;  %v4168_v36 = vadd.f32 %v10594_v61, %v10593_v13 }
 0x287   : > { %v6823_v15 = vpack.c.bf16 %v5801_v0, %v5800_v5  ;;  %v5799_v32 = vadd.f32 %v10278_v33, %v5301_v26  ;;  %v5989_v56 = vadd.f32 %v5988_v39, %v5798_v53  ;;  %v5306_v29 = vadd.f32 %v7469_v50, %v10587_v45  ;;  %v10588_v33 = vld [vmem:[#allocation24_spill] sm:$0xff] }
 0x288   : > { %v6057_v52 = vadd.f32 %v6056_v27, %v6026_v48  ;;  %v5249_v21 = vpop.f32.mrf.mxu1  ;;  %v4167_v59 = vadd.f32 %v10589_v23, %v10588_v33  ;;  %v6030_v46 = vmul.f32 %v5801_v0, %v5801_v0 }
 0x289   : > { %6870 = vst [vmem:[%s10212_s11 + $0x58] sm:$0xff] %v6823_v15   ;;  %v6818_v57 = vpack.c.bf16 %v5799_v32, %v5798_v53  ;;  %v6028_v58 = vmul.f32 %v5799_v32, %v5799_v32  ;;  %v5304_v9 = vadd.f32 %v5249_v21, %v4550_v41  ;;  %v5990_v25 = vadd.f32 %v5989_v56, %v5799_v32  ;;  %v10598_v15 = vld [vmem:[#allocation32_spill] sm:$0xff] }
 0x28a   : > { %v6058_v62 = vadd.f32 %v6057_v52, %v6027_v6  ;;  %v7470_v44 = vpop.f32.mrf.mxu1  ;;  %v5804_v60 = vadd.f32 %v10287_v28, %v5306_v29  ;;  %v4554_v34 = vadd.f32 %v10595_v24, %v4167_v59  ;;  %v4555_v32 = vadd.f32 %v10598_v15, %v4168_v36  ;;  %v5766_v29 = vpop.f32.mrf.mxu0 }
 0x28b   : > { %6869 = vst [vmem:[%s10212_s11 + $0x50] sm:$0xff] %v6818_v57   ;;  %v5307_v40 = vadd.f32 %v7470_v44, %v4553_v43  ;;  %v5991_v2 = vadd.f32 %v5990_v25, %v5800_v5  ;;  %v5802_v37 = vadd.f32 %v10298_v17, %v5304_v9 }
 0x28c   : > { %v6059_v1 = vadd.f32 %v6058_v62, %v6028_v58  ;;  %v5252_v16 = vpop.f32.mrf.mxu1  ;;  %v6033_v49 = vmul.f32 %v5804_v60, %v5804_v60 }
 0x28d   : > { %v5805_v35 = vadd.f32 %v7518_v22, %v5307_v40  ;;  %v5305_v51 = vadd.f32 %v5252_v16, %v4551_v30  ;;  %v5992_v4 = vadd.f32 %v5991_v2, %v5801_v0  ;;  %v6031_v53 = vmul.f32 %v5802_v37, %v5802_v37  ;;  %v10596_v22 = vld [vmem:[#allocation30_spill] sm:$0xff]  ;;  %v10597_v0 = vld [vmem:[#allocation8_spill] sm:$0xff] }
 0x28e   : > { %v6060_v7 = vadd.f32 %v6059_v1, %v6029_v3  ;;  %v7473_v42 = vpop.f32.mrf.mxu1  ;;  %v4557_v5 = vadd.f32 %v10596_v22, %v4170_v20 }
 0x28f   : > { %v6833_v54 = vpack.c.bf16 %v5805_v35, %v5804_v60  ;;  %v5803_v19 = vadd.f32 %v5750_v63, %v5305_v51  ;;  %v5993_v17 = vadd.f32 %v5992_v4, %v5802_v37  ;;  %v5310_v27 = vadd.f32 %v7473_v42, %v10597_v0 }
 0x290   : > { %v6061_v55 = vadd.f32 %v6060_v7, %v6030_v46  ;;  %v5265_v28 = vpop.f32.mrf.mxu1  ;;  %v6034_v57 = vmul.f32 %v5805_v35, %v5805_v35 }
 0x291   : > { %6872 = vst [vmem:[%s10212_s11 + $0x68] sm:$0xff] %v6833_v54   ;;  %v6828_v26 = vpack.c.bf16 %v5803_v19, %v5802_v37  ;;  %v6032_v48 = vmul.f32 %v5803_v19, %v5803_v19  ;;  %v5308_v39 = vadd.f32 %v5265_v28, %v4554_v34  ;;  %v5994_v11 = vadd.f32 %v5993_v17, %v5803_v19 }
 0x292   : > { %v6062_v50 = vadd.f32 %v6061_v55, %v6031_v53  ;;  %v7474_v18 = vpop.f32.mrf.mxu1  ;;  %v5808_v21 = vadd.f32 %v7521_v14, %v5310_v27 }
 0x293   : > { %6871 = vst [vmem:[%s10212_s11 + $0x60] sm:$0xff] %v6828_v26   ;;  %v5311_v63 = vadd.f32 %v7474_v18, %v4557_v5  ;;  %v5995_v41 = vadd.f32 %v5994_v11, %v5804_v60  ;;  %v5806_v6 = vadd.f32 %v5763_v8, %v5308_v39 }
 0x294   : > { %v6063_v56 = vadd.f32 %v6062_v50, %v6032_v48  ;;  %v5268_v52 = vpop.f32.mrf.mxu1  ;;  %v6037_v20 = vmul.f32 %v5808_v21, %v5808_v21 }
 0x295   : > { %v5809_v47 = vadd.f32 %v7522_v10, %v5311_v63  ;;  %v5309_v43 = vadd.f32 %v5268_v52, %v4555_v32  ;;  %v5996_v45 = vadd.f32 %v5995_v41, %v5805_v35  ;;  %v6035_v44 = vmul.f32 %v5806_v6, %v5806_v6 }
 0x296   : > { %v6064_v58 = vadd.f32 %v6063_v56, %v6033_v49 }
 0x297   : > { %v6843_v9 = vpack.c.bf16 %v5809_v47, %v5808_v21  ;;  %v5807_v62 = vadd.f32 %v5766_v29, %v5309_v43  ;;  %v5997_v25 = vadd.f32 %v5996_v45, %v5806_v6  ;;  %v6038_v12 = vmul.f32 %v5809_v47, %v5809_v47 }
 0x298   : > { %v6065_v33 = vadd.f32 %v6064_v58, %v6034_v57 }
 0x299   : > { %6874 = vst [vmem:[%s10212_s11 + $0x78] sm:$0xff] %v6843_v9   ;;  %v6838_v23 = vpack.c.bf16 %v5807_v62, %v5806_v6  ;;  %v6036_v59 = vmul.f32 %v5807_v62, %v5807_v62  ;;  %v5998_v38 = vadd.f32 %v5997_v25, %v5807_v62 }
 0x29a   : > { %v6066_v31 = vadd.f32 %v6065_v33, %v6035_v44 }
 0x29b   : > { %6873 = vst [vmem:[%s10212_s11 + $0x70] sm:$0xff] %v6838_v23   ;;  %v5999_v14 = vadd.f32 %v5998_v38, %v5808_v21 }
 0x29c   : > { %v6067_v40 = vadd.f32 %v6066_v31, %v6036_v59 }
 0x29d   : > { %v6000_v30 = vadd.f32 %v5999_v14, %v5809_v47 }
 0x29e   : > { %v6068_v3 = vadd.f32 %v6067_v40, %v6037_v20 }
 0x29f   : > { %v6001_v2 = vrot.slane %v6000_v30, 4 }
 0x2a0   : > { %v6069_v1 = vadd.f32 %v6068_v3, %v6038_v12 }
 0x2a1   : > { %v6002_v37 = vadd.f32 %v6001_v2, %v6000_v30 }
 0x2a2   : > { %v6070_v16 = vrot.slane %v6069_v1, 4 }
 0x2a3   : > { %v6003_v60 = vrot.slane %v6002_v37, 2 }
 0x2a4   : > { %v6071_v35 = vadd.f32 %v6070_v16, %v6069_v1 }
 0x2a5   : > { %v6004_v51 = vadd.f32 %v6003_v60, %v6002_v37 }
 0x2a6   : > { %v6072_v46 = vrot.slane %v6071_v35, 2 }
 0x2a7   : > { %v6005_v7 = vrot.slane %v6004_v51, 1 }
 0x2a8   : > { %v6073_v4 = vadd.f32 %v6072_v46, %v6071_v35 }
 0x2a9   : > { %v6006_v8 = vadd.f32 %v6005_v7, %v6004_v51 }
 0x2aa   : > { %v6074_v42 = vrot.slane %v6073_v4, 1 }
 0x2ac   : > { %v6075_v13 = vadd.f32 %v6074_v42, %v6073_v4 }
 0x2ae   : > { %v6077_v61 = vsel %vm892_vm5, %v6006_v8, %v6075_v13 }
 0x2af   : > { %6078 = vst [vmem:[%s235_s14] sm:$0x3] %v6077_v61 }
 0x2b0 PF: > { %s16_s18 = sadd.s32 1, %s7703_s18  }
 0x2b1   : > { %p13_p4 = scmp.ge.s32.totalorder %s16_s18, 4  }
 0x2b3   :  { %15 = sbr.rel (!%p13_p4) target bundleno = 1 (0x1), region = 88 }

</bundles_post_ra>
